<compile_context>
chip_gen: v7x
topology: tpu7x:2x2x1
jax: 0.10.0
libtpu: 0.0.40
codegen_flags: <defaults>
</compile_context>

<pallas_src>
import functools

import jax
import jax.numpy as jnp
from jax import lax
from jax.experimental import pallas as pl
from jax.experimental.pallas import tpu as pltpu


# ----------------------------------------------------------------------------
# Fused conv (+bias+ReLU) + 2x2 max-pool kernel.
# One grid step = one image x one block of `rows_out` pooled output rows.
# ----------------------------------------------------------------------------
def _conv_pool_kernel(x_ref, w_ref, b_ref, o_ref, hbuf, *, groups, W, R, rows_out):
    """x_ref : [1, Hx, W, K]       bf16 lane-packed taps (K = taps*Cin), whole image
       w_ref : [groups, K, Cout]   bf16
       b_ref : [1, Cout]           f32
       o_ref : [1, rows_out*W2, Cout]
       hbuf  : VMEM [R*W, Cout]    f32 row-pooled strip (for the stride-2 w-pool)"""
    K = x_ref.shape[3]
    cout = o_ref.shape[2]
    W2 = W // 2
    n_strips = rows_out // R
    bias = b_ref[...]                                        # [1, Cout], hoisted

    # first conv row handled by this grid step (2 conv rows per pooled row)
    base = pl.multiple_of(pl.program_id(1) * (2 * rows_out), 8)

    for s in range(n_strips):
        r0 = 2 * R * s
        # ---- conv: `groups` row-shifted matmuls, f32 acc stays in vregs ----
        acc = None
        for di in range(groups):
            rows = x_ref[0, pl.ds(base + r0 + di, 2 * R)]    # [2R, W, K] bf16
            part = jnp.dot(rows.reshape(2 * R * W, K), w_ref[di],
                           preferred_element_type=jnp.float32)
            acc = part if acc is None else acc + part        # no zeros-init pass

        a = jnp.maximum(acc + bias, 0.0)                     # [2R*W, Cout]

        # ---- 2x2 max-pool, stride 2 ----
        a = a.reshape(R, 2, W, cout)                         # adjacent conv-row pairs
        hbuf[...] = jnp.maximum(a[:, 0], a[:, 1]).reshape(R * W, cout)
        y = jnp.maximum(hbuf[pl.ds(0, R * W2, 2)],           # adjacent columns
                        hbuf[pl.ds(1, R * W2, 2)])           # [R*W2, Cout]
        o_ref[0, s * R * W2:(s + 1) * R * W2] = y.astype(o_ref.dtype)


def conv_pool(xp, w, b, *, groups, R, G, out_dtype):
    """xp: [B, Hx, W, K] bf16 packed input (Hx = H + 4 when groups == 5)."""
    B, Hx, W, K = xp.shape
    H = Hx - (4 if groups > 1 else 0)
    H2, W2 = H // 2, W // 2
    cout = w.shape[2]
    rows_out = H2 // G
    kern = functools.partial(_conv_pool_kernel,
                             groups=groups, W=W, R=R, rows_out=rows_out)
    return pl.pallas_call(
        kern,
        out_shape=jax.ShapeDtypeStruct((B, H2 * W2, cout), out_dtype),
        grid=(B, G),
        in_specs=[
            pl.BlockSpec((1, Hx, W, K), lambda bb, g: (bb, 0, 0, 0)),   # image: resident
            pl.BlockSpec(w.shape, lambda bb, g: (0, 0, 0)),             # weights: resident
            pl.BlockSpec(b.shape, lambda bb, g: (0, 0)),
        ],
        out_specs=pl.BlockSpec((1, rows_out * W2, cout), lambda bb, g: (bb, g, 0)),
        scratch_shapes=[pltpu.VMEM((R * W, cout), jnp.float32)],
        compiler_params=pltpu.CompilerParams(
            dimension_semantics=("parallel", "arbitrary")),
    )(xp, w, b)


# ----------------------------------------------------------------------------
# Linear layer kernel: bf16 weight streamed in N tiles (ragged last tile, no
# N padding of the dominant HBM read).
# ----------------------------------------------------------------------------
def _linear_kernel(x_ref, w_ref, b_ref, o_ref):
    x = x_ref[...].astype(jnp.bfloat16)
    o_ref[...] = (jnp.dot(x, w_ref[...], preferred_element_type=jnp.float32)
                  + b_ref[...])


def linear(x, w, b, *, tn=128):
    M, K = x.shape
    N = w.shape[1]
    return pl.pallas_call(
        _linear_kernel,
        out_shape=jax.ShapeDtypeStruct((M, N), jnp.float32),
        grid=(pl.cdiv(N, tn),),
        in_specs=[
            pl.BlockSpec((M, K), lambda j: (0, 0)),
            pl.BlockSpec((K, tn), lambda j: (0, j)),
            pl.BlockSpec((1, tn), lambda j: (0, j)),
        ],
        out_specs=pl.BlockSpec((M, tn), lambda j: (0, j)),
        compiler_params=pltpu.CompilerParams(
            dimension_semantics=("parallel",)),
    )(x, w, b)


# ----------------------------------------------------------------------------
# Tiny XLA-side lane packing between layers (a few hundred KB of bf16).
# ----------------------------------------------------------------------------
def _pack_taps25(img):
    """[B, 64, 64] f32 image -> [B, 64, 64, 25] bf16 (all 25 taps in lanes)."""
    B, H, W = img.shape
    xp = jnp.pad(img, ((0, 0), (2, 2), (2, 2))).astype(jnp.bfloat16)
    taps = [xp[:, di:di + H, dj:dj + W] for di in range(5) for dj in range(5)]
    return jnp.stack(taps, axis=-1)


def _pack_dj(act):
    """[B, H, W, C] bf16 -> [B, H+4, W, 5*C] bf16: 2-row h border + 5 dj-shifted
       copies packed along lanes (the next conv's K dimension)."""
    B, H, W, C = act.shape
    ap = jnp.pad(act, ((0, 0), (2, 2), (2, 2), (0, 0)))
    return jnp.concatenate([ap[:, :, dj:dj + W, :] for dj in range(5)], axis=-1)


# ----------------------------------------------------------------------------
# Forward pass
# ----------------------------------------------------------------------------
def cnn_forward(x_nchw, kp):
    B = x_nchw.shape[0]
    # layer 1: single matmul group, K = 25 taps (Cin == 1)
    x1 = _pack_taps25(x_nchw[:, 0])                                  # [B,64,64,25]
    h1 = conv_pool(x1, kp["w1"], kp["b1"], groups=1, R=2, G=2,
                   out_dtype=jnp.bfloat16)                           # [B,1024,16]
    # layer 2: 5 matmuls, K = 5*16 = 80
    h2 = conv_pool(_pack_dj(h1.reshape(B, 32, 32, 16)),
                   kp["w2"], kp["b2"], groups=5, R=4, G=2,
                   out_dtype=jnp.bfloat16)                           # [B,256,32]
    # layer 3: 5 matmuls, K = 5*32 = 160
    h3 = conv_pool(_pack_dj(h2.reshape(B, 16, 16, 32)),
                   kp["w3"], kp["b3"], groups=5, R=4, G=2,
                   out_dtype=jnp.float32)                            # [B,64,64] (hw, c)
    # torch flattens an NCHW tensor: feat[b, c*64 + h*8 + w]
    # TODO(synk): fuse this tiny (32 KB) relayout into the conv3 kernel output.
    feat = jnp.transpose(h3, (0, 2, 1)).reshape(B, 64 * 8 * 8)
    feat_m = jnp.pad(feat, ((0, (-B) % 8), (0, 0)))                  # M-align for MXU
    logits = linear(feat_m, kp["w_out"], kp["b_out"])[:B]
    return logits, feat


# ----------------------------------------------------------------------------
# Parameters: torch-layout init + one-time kernel-layout preparation
# ----------------------------------------------------------------------------
def init_params(key):
    ks = jax.random.split(key, 8)

    def conv_init(kw, kb, cout, cin, ksz=5):
        fan_in = cin * ksz * ksz
        w = jax.random.normal(kw, (cout, cin, ksz, ksz), jnp.float32) / jnp.sqrt(fan_in)
        b = 0.01 * jax.random.normal(kb, (cout,), jnp.float32)
        return w, b

    w1, b1 = conv_init(ks[0], ks[1], 16, 1)
    w2, b2 = conv_init(ks[2], ks[3], 32, 16)
    w3, b3 = conv_init(ks[4], ks[5], 64, 32)
    w_out = jax.random.normal(ks[6], (653, 64 * 8 * 8), jnp.float32) / jnp.sqrt(64 * 8 * 8)
    b_out = 0.01 * jax.random.normal(ks[7], (653,), jnp.float32)
    return dict(w1=w1, b1=b1, w2=w2, b2=b2, w3=w3, b3=b3, w_out=w_out, b_out=b_out)


def prepare_params(p):
    """One-time weight prep: tap-major (dj,Cin)->K packing, bf16 cast."""
    def pack_conv(w):                                 # [O, I, 5, 5] -> [5, 5*I, O]
        o, i = w.shape[0], w.shape[1]
        return jnp.transpose(w, (2, 3, 1, 0)).reshape(5, 5 * i, o).astype(jnp.bfloat16)

    def bias2d(b):
        return b.reshape(1, -1).astype(jnp.float32)

    # conv1: all 25 taps packed into K (Cin == 1), a single matmul group
    w1 = jnp.transpose(p["w1"], (2, 3, 1, 0)).reshape(1, 25, 16).astype(jnp.bfloat16)

    return dict(w1=w1, b1=bias2d(p["b1"]),
                w2=pack_conv(p["w2"]), b2=bias2d(p["b2"]),
                w3=pack_conv(p["w3"]), b3=bias2d(p["b3"]),
                w_out=p["w_out"].T.astype(jnp.bfloat16),      # [4096, 653], unpadded
                b_out=p["b_out"].reshape(1, -1).astype(jnp.float32))


# ----------------------------------------------------------------------------
# Pure-JAX reference (semantics check)
# ----------------------------------------------------------------------------
def ref_forward(x, p):
    def conv_block(h, w, b):
        y = lax.conv_general_dilated(
            h, w, (1, 1), ((2, 2), (2, 2)),
            dimension_numbers=("NCHW", "OIHW", "NCHW"),
            precision=lax.Precision.HIGHEST)
        y = jax.nn.relu(y + b[None, :, None, None])
        return lax.reduce_window(y, -jnp.inf, lax.max,
                                 (1, 1, 2, 2), (1, 1, 2, 2), "VALID")

    h = conv_block(x, p["w1"], p["b1"])
    h = conv_block(h, p["w2"], p["b2"])
    h = conv_block(h, p["w3"], p["b3"])
    feat = h.reshape(h.shape[0], -1)
    out = jnp.dot(feat, p["w_out"].T, precision=lax.Precision.HIGHEST) + p["b_out"]
    return out, feat


if __name__ == "__main__":
    key = jax.random.PRNGKey(0)
    k_param, k_x = jax.random.split(key)
    params = init_params(k_param)
    kparams = prepare_params(params)

    # The linear layer expects 64*8*8 features -> input spatial size is 64x64.
    x = jax.random.normal(k_x, (2, 1, 64, 64), jnp.float32)

    fwd = jax.jit(cnn_forward)
    out, feat = jax.block_until_ready(fwd(x, kparams))
    assert out.shape == (2, 653) and feat.shape == (2, 64 * 8 * 8)
    assert bool(jnp.isfinite(out).all()) and bool(jnp.isfinite(feat).all())

    out_ref, feat_ref = jax.block_until_ready(ref_forward(x, params))

    def close(a, b, name):
        err = float(jnp.max(jnp.abs(a - b)))
        scale = float(jnp.max(jnp.abs(b))) + 1e-6
        assert err <= 2e-2 * scale + 1e-3, f"{name} mismatch: {err} vs scale {scale}"

    close(feat, feat_ref, "features")
    close(out, out_ref, "logits")

    print("KERNEL_OK")
</pallas_src>

<mosaic_0001>
module attributes {stable_mosaic.version = 11 : i64} {
  func.func @_conv_pool_kernel(%arg0: i32, %arg1: i32, %arg2: memref<1x64x64x25xbf16, #tpu.memory_space<vmem>>, %arg3: memref<1x25x16xbf16, #tpu.memory_space<vmem>>, %arg4: memref<1x16xf32, #tpu.memory_space<vmem>>, %arg5: memref<1x512x16xbf16, #tpu.memory_space<vmem>>, %arg6: memref<128x16xf32, #tpu.memory_space<vmem>>) attributes {dimension_semantics = [#tpu.dimension_semantics<parallel>, #tpu.dimension_semantics<arbitrary>], iteration_bounds = array<i64: 2, 2>, scalar_prefetch = 0 : i64, scratch_operands = 1 : i64, tpu.core_type = #tpu.core_type<tc>, window_params = [{transform_indices = @transform_0, window_bounds = array<i64: 1, 64, 64, 25>}, {pipeline_mode = #tpu.pipeline_mode<synchronous>, transform_indices = @transform_1, window_bounds = array<i64: 1, 25, 16>}, {pipeline_mode = #tpu.pipeline_mode<synchronous>, transform_indices = @transform_2, window_bounds = array<i64: 1, 16>}, {transform_indices = @transform_3, window_bounds = array<i64: 1, 512, 16>}]} {
    %c0 = arith.constant 0 : index
    %c0_0 = arith.constant 0 : index
    %0 = vector.load %arg4[%c0, %c0_0] : memref<1x16xf32, #tpu.memory_space<vmem>>, vector<1x16xf32>
    %c32_i32 = arith.constant 32 : i32
    %1 = arith.muli %arg1, %c32_i32 : i32
    %2 = tpu.assume_multiple %1, 8 : i32
    %c0_i32 = arith.constant 0 : i32
    %3 = arith.addi %2, %c0_i32 : i32
    %c0_i32_1 = arith.constant 0 : i32
    %4 = arith.addi %3, %c0_i32_1 : i32
    %c0_2 = arith.constant 0 : index
    %5 = arith.index_cast %4 : i32 to index
    %c0_3 = arith.constant 0 : index
    %c0_4 = arith.constant 0 : index
    %6 = vector.load %arg2[%c0_2, %5, %c0_3, %c0_4] : memref<1x64x64x25xbf16, #tpu.memory_space<vmem>>, vector<1x4x64x25xbf16>
    %7 = vector.shape_cast %6 : vector<1x4x64x25xbf16> to vector<4x64x25xbf16>
    %8 = vector.shape_cast %7 : vector<4x64x25xbf16> to vector<256x25xbf16>
    %c0_5 = arith.constant 0 : index
    %c0_6 = arith.constant 0 : index
    %c0_7 = arith.constant 0 : index
    %9 = vector.load %arg3[%c0_5, %c0_6, %c0_7] : memref<1x25x16xbf16, #tpu.memory_space<vmem>>, vector<1x25x16xbf16>
    %10 = vector.shape_cast %9 : vector<1x25x16xbf16> to vector<25x16xbf16>
    %cst = arith.constant dense<0.000000e+00> : vector<256x16xf32>
    %11 = tpu.matmul %8, %10, %cst {dimension_numbers = #tpu.dot_dimension_numbers<[1], [0], [0], [1], [0, 0, 1, 1], [], []>} : vector<256x25xbf16>, vector<25x16xbf16>, vector<256x16xf32> -> vector<256x16xf32>
    %12 = vector.broadcast %0 : vector<1x16xf32> to vector<256x16xf32>
    %13 = arith.addf %11, %12 : vector<256x16xf32>
    %cst_8 = arith.constant 0.000000e+00 : f32
    %14 = vector.broadcast %cst_8 : f32 to vector<256x16xf32>
    %15 = arith.maximumf %13, %14 : vector<256x16xf32>
    %16 = vector.shape_cast %15 : vector<256x16xf32> to vector<2x2x64x16xf32>
    %17 = vector.extract_strided_slice %16 {offsets = [0, 0, 0, 0], sizes = [2, 1, 64, 16], strides = [1, 1, 1, 1]} : vector<2x2x64x16xf32> to vector<2x1x64x16xf32>
    %18 = vector.shape_cast %17 : vector<2x1x64x16xf32> to vector<2x64x16xf32>
    %19 = vector.extract_strided_slice %16 {offsets = [0, 1, 0, 0], sizes = [2, 1, 64, 16], strides = [1, 1, 1, 1]} : vector<2x2x64x16xf32> to vector<2x1x64x16xf32>
    %20 = vector.shape_cast %19 : vector<2x1x64x16xf32> to vector<2x64x16xf32>
    %21 = arith.maximumf %18, %20 : vector<2x64x16xf32>
    %22 = vector.shape_cast %21 : vector<2x64x16xf32> to vector<128x16xf32>
    %c0_9 = arith.constant 0 : index
    %c0_10 = arith.constant 0 : index
    %23 = vector.load %arg6[%c0_9, %c0_10] : memref<128x16xf32, #tpu.memory_space<vmem>>, vector<128x16xf32>
    tpu.vector_store %arg6[%c0_9, %c0_10], %22 {strides = array<i32>} : memref<128x16xf32, #tpu.memory_space<vmem>>, vector<128x16xf32>,
    %c0_11 = arith.constant 0 : index
    %c0_12 = arith.constant 0 : index
    %24 = tpu.strided_load %arg6[%c0_11, %c0_12] {strides = array<i32: 2, 1>} : memref<128x16xf32, #tpu.memory_space<vmem>>, vector<64x16xf32>
    %c1 = arith.constant 1 : index
    %c0_13 = arith.constant 0 : index
    %25 = tpu.strided_load %arg6[%c1, %c0_13] {strides = array<i32: 2, 1>} : memref<128x16xf32, #tpu.memory_space<vmem>>, vector<64x16xf32>
    %26 = arith.maximumf %24, %25 : vector<64x16xf32>
    %27 = arith.truncf %26 : vector<64x16xf32> to vector<64x16xbf16>
    %c0_14 = arith.constant 0 : index
    %c0_15 = arith.constant 0 : index
    %c0_16 = arith.constant 0 : index
    %28 = vector.load %arg5[%c0_14, %c0_15, %c0_16] : memref<1x512x16xbf16, #tpu.memory_space<vmem>>, vector<1x64x16xbf16>
    %29 = vector.shape_cast %28 : vector<1x64x16xbf16> to vector<64x16xbf16>
    %30 = vector.shape_cast %27 : vector<64x16xbf16> to vector<1x64x16xbf16>
    tpu.vector_store %arg5[%c0_14, %c0_15, %c0_16], %30 {strides = array<i32>} : memref<1x512x16xbf16, #tpu.memory_space<vmem>>, vector<1x64x16xbf16>,
    %c4_i32 = arith.constant 4 : i32
    %31 = arith.addi %2, %c4_i32 : i32
    %c0_i32_17 = arith.constant 0 : i32
    %32 = arith.addi %31, %c0_i32_17 : i32
    %c0_18 = arith.constant 0 : index
    %33 = arith.index_cast %32 : i32 to index
    %c0_19 = arith.constant 0 : index
    %c0_20 = arith.constant 0 : index
    %34 = vector.load %arg2[%c0_18, %33, %c0_19, %c0_20] : memref<1x64x64x25xbf16, #tpu.memory_space<vmem>>, vector<1x4x64x25xbf16>
    %35 = vector.shape_cast %34 : vector<1x4x64x25xbf16> to vector<4x64x25xbf16>
    %36 = vector.shape_cast %35 : vector<4x64x25xbf16> to vector<256x25xbf16>
    %c0_21 = arith.constant 0 : index
    %c0_22 = arith.constant 0 : index
    %c0_23 = arith.constant 0 : index
    %37 = vector.load %arg3[%c0_21, %c0_22, %c0_23] : memref<1x25x16xbf16, #tpu.memory_space<vmem>>, vector<1x25x16xbf16>
    %38 = vector.shape_cast %37 : vector<1x25x16xbf16> to vector<25x16xbf16>
    %cst_24 = arith.constant dense<0.000000e+00> : vector<256x16xf32>
    %39 = tpu.matmul %36, %38, %cst_24 {dimension_numbers = #tpu.dot_dimension_numbers<[1], [0], [0], [1], [0, 0, 1, 1], [], []>} : vector<256x25xbf16>, vector<25x16xbf16>, vector<256x16xf32> -> vector<256x16xf32>
    %40 = vector.broadcast %0 : vector<1x16xf32> to vector<256x16xf32>
    %41 = arith.addf %39, %40 : vector<256x16xf32>
    %cst_25 = arith.constant 0.000000e+00 : f32
    %42 = vector.broadcast %cst_25 : f32 to vector<256x16xf32>
    %43 = arith.maximumf %41, %42 : vector<256x16xf32>
    %44 = vector.shape_cast %43 : vector<256x16xf32> to vector<2x2x64x16xf32>
    %45 = vector.extract_strided_slice %44 {offsets = [0, 0, 0, 0], sizes = [2, 1, 64, 16], strides = [1, 1, 1, 1]} : vector<2x2x64x16xf32> to vector<2x1x64x16xf32>
    %46 = vector.shape_cast %45 : vector<2x1x64x16xf32> to vector<2x64x16xf32>
    %47 = vector.extract_strided_slice %44 {offsets = [0, 1, 0, 0], sizes = [2, 1, 64, 16], strides = [1, 1, 1, 1]} : vector<2x2x64x16xf32> to vector<2x1x64x16xf32>
    %48 = vector.shape_cast %47 : vector<2x1x64x16xf32> to vector<2x64x16xf32>
    %49 = arith.maximumf %46, %48 : vector<2x64x16xf32>
    %50 = vector.shape_cast %49 : vector<2x64x16xf32> to vector<128x16xf32>
    %c0_26 = arith.constant 0 : index
    %c0_27 = arith.constant 0 : index
    %51 = vector.load %arg6[%c0_26, %c0_27] : memref<128x16xf32, #tpu.memory_space<vmem>>, vector<128x16xf32>
    tpu.vector_store %arg6[%c0_26, %c0_27], %50 {strides = array<i32>} : memref<128x16xf32, #tpu.memory_space<vmem>>, vector<128x16xf32>,
    %c0_28 = arith.constant 0 : index
    %c0_29 = arith.constant 0 : index
    %52 = tpu.strided_load %arg6[%c0_28, %c0_29] {strides = array<i32: 2, 1>} : memref<128x16xf32, #tpu.memory_space<vmem>>, vector<64x16xf32>
    %c1_30 = arith.constant 1 : index
    %c0_31 = arith.constant 0 : index
    %53 = tpu.strided_load %arg6[%c1_30, %c0_31] {strides = array<i32: 2, 1>} : memref<128x16xf32, #tpu.memory_space<vmem>>, vector<64x16xf32>
    %54 = arith.maximumf %52, %53 : vector<64x16xf32>
    %55 = arith.truncf %54 : vector<64x16xf32> to vector<64x16xbf16>
    %c0_32 = arith.constant 0 : index
    %c64 = arith.constant 64 : index
    %c0_33 = arith.constant 0 : index
    %56 = vector.load %arg5[%c0_32, %c64, %c0_33] : memref<1x512x16xbf16, #tpu.memory_space<vmem>>, vector<1x64x16xbf16>
    %57 = vector.shape_cast %56 : vector<1x64x16xbf16> to vector<64x16xbf16>
    %58 = vector.shape_cast %55 : vector<64x16xbf16> to vector<1x64x16xbf16>
    tpu.vector_store %arg5[%c0_32, %c64, %c0_33], %58 {strides = array<i32>} : memref<1x512x16xbf16, #tpu.memory_space<vmem>>, vector<1x64x16xbf16>,
    %c8_i32 = arith.constant 8 : i32
    %59 = arith.addi %2, %c8_i32 : i32
    %c0_i32_34 = arith.constant 0 : i32
    %60 = arith.addi %59, %c0_i32_34 : i32
    %c0_35 = arith.constant 0 : index
    %61 = arith.index_cast %60 : i32 to index
    %c0_36 = arith.constant 0 : index
    %c0_37 = arith.constant 0 : index
    %62 = vector.load %arg2[%c0_35, %61, %c0_36, %c0_37] : memref<1x64x64x25xbf16, #tpu.memory_space<vmem>>, vector<1x4x64x25xbf16>
    %63 = vector.shape_cast %62 : vector<1x4x64x25xbf16> to vector<4x64x25xbf16>
    %64 = vector.shape_cast %63 : vector<4x64x25xbf16> to vector<256x25xbf16>
    %c0_38 = arith.constant 0 : index
    %c0_39 = arith.constant 0 : index
    %c0_40 = arith.constant 0 : index
    %65 = vector.load %arg3[%c0_38, %c0_39, %c0_40] : memref<1x25x16xbf16, #tpu.memory_space<vmem>>, vector<1x25x16xbf16>
    %66 = vector.shape_cast %65 : vector<1x25x16xbf16> to vector<25x16xbf16>
    %cst_41 = arith.constant dense<0.000000e+00> : vector<256x16xf32>
    %67 = tpu.matmul %64, %66, %cst_41 {dimension_numbers = #tpu.dot_dimension_numbers<[1], [0], [0], [1], [0, 0, 1, 1], [], []>} : vector<256x25xbf16>, vector<25x16xbf16>, vector<256x16xf32> -> vector<256x16xf32>
    %68 = vector.broadcast %0 : vector<1x16xf32> to vector<256x16xf32>
    %69 = arith.addf %67, %68 : vector<256x16xf32>
    %cst_42 = arith.constant 0.000000e+00 : f32
    %70 = vector.broadcast %cst_42 : f32 to vector<256x16xf32>
    %71 = arith.maximumf %69, %70 : vector<256x16xf32>
    %72 = vector.shape_cast %71 : vector<256x16xf32> to vector<2x2x64x16xf32>
    %73 = vector.extract_strided_slice %72 {offsets = [0, 0, 0, 0], sizes = [2, 1, 64, 16], strides = [1, 1, 1, 1]} : vector<2x2x64x16xf32> to vector<2x1x64x16xf32>
    %74 = vector.shape_cast %73 : vector<2x1x64x16xf32> to vector<2x64x16xf32>
    %75 = vector.extract_strided_slice %72 {offsets = [0, 1, 0, 0], sizes = [2, 1, 64, 16], strides = [1, 1, 1, 1]} : vector<2x2x64x16xf32> to vector<2x1x64x16xf32>
    %76 = vector.shape_cast %75 : vector<2x1x64x16xf32> to vector<2x64x16xf32>
    %77 = arith.maximumf %74, %76 : vector<2x64x16xf32>
    %78 = vector.shape_cast %77 : vector<2x64x16xf32> to vector<128x16xf32>
    %c0_43 = arith.constant 0 : index
    %c0_44 = arith.constant 0 : index
    %79 = vector.load %arg6[%c0_43, %c0_44] : memref<128x16xf32, #tpu.memory_space<vmem>>, vector<128x16xf32>
    tpu.vector_store %arg6[%c0_43, %c0_44], %78 {strides = array<i32>} : memref<128x16xf32, #tpu.memory_space<vmem>>, vector<128x16xf32>,
    %c0_45 = arith.constant 0 : index
    %c0_46 = arith.constant 0 : index
    %80 = tpu.strided_load %arg6[%c0_45, %c0_46] {strides = array<i32: 2, 1>} : memref<128x16xf32, #tpu.memory_space<vmem>>, vector<64x16xf32>
    %c1_47 = arith.constant 1 : index
    %c0_48 = arith.constant 0 : index
    %81 = tpu.strided_load %arg6[%c1_47, %c0_48] {strides = array<i32: 2, 1>} : memref<128x16xf32, #tpu.memory_space<vmem>>, vector<64x16xf32>
    %82 = arith.maximumf %80, %81 : vector<64x16xf32>
    %83 = arith.truncf %82 : vector<64x16xf32> to vector<64x16xbf16>
    %c0_49 = arith.constant 0 : index
    %c128 = arith.constant 128 : index
    %c0_50 = arith.constant 0 : index
    %84 = vector.load %arg5[%c0_49, %c128, %c0_50] : memref<1x512x16xbf16, #tpu.memory_space<vmem>>, vector<1x64x16xbf16>
    %85 = vector.shape_cast %84 : vector<1x64x16xbf16> to vector<64x16xbf16>
    %86 = vector.shape_cast %83 : vector<64x16xbf16> to vector<1x64x16xbf16>
    tpu.vector_store %arg5[%c0_49, %c128, %c0_50], %86 {strides = array<i32>} : memref<1x512x16xbf16, #tpu.memory_space<vmem>>, vector<1x64x16xbf16>,
    %c12_i32 = arith.constant 12 : i32
    %87 = arith.addi %2, %c12_i32 : i32
    %c0_i32_51 = arith.constant 0 : i32
    %88 = arith.addi %87, %c0_i32_51 : i32
    %c0_52 = arith.constant 0 : index
    %89 = arith.index_cast %88 : i32 to index
    %c0_53 = arith.constant 0 : index
    %c0_54 = arith.constant 0 : index
    %90 = vector.load %arg2[%c0_52, %89, %c0_53, %c0_54] : memref<1x64x64x25xbf16, #tpu.memory_space<vmem>>, vector<1x4x64x25xbf16>
    %91 = vector.shape_cast %90 : vector<1x4x64x25xbf16> to vector<4x64x25xbf16>
    %92 = vector.shape_cast %91 : vector<4x64x25xbf16> to vector<256x25xbf16>
    %c0_55 = arith.constant 0 : index
    %c0_56 = arith.constant 0 : index
    %c0_57 = arith.constant 0 : index
    %93 = vector.load %arg3[%c0_55, %c0_56, %c0_57] : memref<1x25x16xbf16, #tpu.memory_space<vmem>>, vector<1x25x16xbf16>
    %94 = vector.shape_cast %93 : vector<1x25x16xbf16> to vector<25x16xbf16>
    %cst_58 = arith.constant dense<0.000000e+00> : vector<256x16xf32>
    %95 = tpu.matmul %92, %94, %cst_58 {dimension_numbers = #tpu.dot_dimension_numbers<[1], [0], [0], [1], [0, 0, 1, 1], [], []>} : vector<256x25xbf16>, vector<25x16xbf16>, vector<256x16xf32> -> vector<256x16xf32>
    %96 = vector.broadcast %0 : vector<1x16xf32> to vector<256x16xf32>
    %97 = arith.addf %95, %96 : vector<256x16xf32>
    %cst_59 = arith.constant 0.000000e+00 : f32
    %98 = vector.broadcast %cst_59 : f32 to vector<256x16xf32>
    %99 = arith.maximumf %97, %98 : vector<256x16xf32>
    %100 = vector.shape_cast %99 : vector<256x16xf32> to vector<2x2x64x16xf32>
    %101 = vector.extract_strided_slice %100 {offsets = [0, 0, 0, 0], sizes = [2, 1, 64, 16], strides = [1, 1, 1, 1]} : vector<2x2x64x16xf32> to vector<2x1x64x16xf32>
    %102 = vector.shape_cast %101 : vector<2x1x64x16xf32> to vector<2x64x16xf32>
    %103 = vector.extract_strided_slice %100 {offsets = [0, 1, 0, 0], sizes = [2, 1, 64, 16], strides = [1, 1, 1, 1]} : vector<2x2x64x16xf32> to vector<2x1x64x16xf32>
    %104 = vector.shape_cast %103 : vector<2x1x64x16xf32> to vector<2x64x16xf32>
    %105 = arith.maximumf %102, %104 : vector<2x64x16xf32>
    %106 = vector.shape_cast %105 : vector<2x64x16xf32> to vector<128x16xf32>
    %c0_60 = arith.constant 0 : index
    %c0_61 = arith.constant 0 : index
    %107 = vector.load %arg6[%c0_60, %c0_61] : memref<128x16xf32, #tpu.memory_space<vmem>>, vector<128x16xf32>
    tpu.vector_store %arg6[%c0_60, %c0_61], %106 {strides = array<i32>} : memref<128x16xf32, #tpu.memory_space<vmem>>, vector<128x16xf32>,
    %c0_62 = arith.constant 0 : index
    %c0_63 = arith.constant 0 : index
    %108 = tpu.strided_load %arg6[%c0_62, %c0_63] {strides = array<i32: 2, 1>} : memref<128x16xf32, #tpu.memory_space<vmem>>, vector<64x16xf32>
    %c1_64 = arith.constant 1 : index
    %c0_65 = arith.constant 0 : index
    %109 = tpu.strided_load %arg6[%c1_64, %c0_65] {strides = array<i32: 2, 1>} : memref<128x16xf32, #tpu.memory_space<vmem>>, vector<64x16xf32>
    %110 = arith.maximumf %108, %109 : vector<64x16xf32>
    %111 = arith.truncf %110 : vector<64x16xf32> to vector<64x16xbf16>
    %c0_66 = arith.constant 0 : index
    %c192 = arith.constant 192 : index
    %c0_67 = arith.constant 0 : index
    %112 = vector.load %arg5[%c0_66, %c192, %c0_67] : memref<1x512x16xbf16, #tpu.memory_space<vmem>>, vector<1x64x16xbf16>
    %113 = vector.shape_cast %112 : vector<1x64x16xbf16> to vector<64x16xbf16>
    %114 = vector.shape_cast %111 : vector<64x16xbf16> to vector<1x64x16xbf16>
    tpu.vector_store %arg5[%c0_66, %c192, %c0_67], %114 {strides = array<i32>} : memref<1x512x16xbf16, #tpu.memory_space<vmem>>, vector<1x64x16xbf16>,
    %c16_i32 = arith.constant 16 : i32
    %115 = arith.addi %2, %c16_i32 : i32
    %c0_i32_68 = arith.constant 0 : i32
    %116 = arith.addi %115, %c0_i32_68 : i32
    %c0_69 = arith.constant 0 : index
    %117 = arith.index_cast %116 : i32 to index
    %c0_70 = arith.constant 0 : index
    %c0_71 = arith.constant 0 : index
    %118 = vector.load %arg2[%c0_69, %117, %c0_70, %c0_71] : memref<1x64x64x25xbf16, #tpu.memory_space<vmem>>, vector<1x4x64x25xbf16>
    %119 = vector.shape_cast %118 : vector<1x4x64x25xbf16> to vector<4x64x25xbf16>
    %120 = vector.shape_cast %119 : vector<4x64x25xbf16> to vector<256x25xbf16>
    %c0_72 = arith.constant 0 : index
    %c0_73 = arith.constant 0 : index
    %c0_74 = arith.constant 0 : index
    %121 = vector.load %arg3[%c0_72, %c0_73, %c0_74] : memref<1x25x16xbf16, #tpu.memory_space<vmem>>, vector<1x25x16xbf16>
    %122 = vector.shape_cast %121 : vector<1x25x16xbf16> to vector<25x16xbf16>
    %cst_75 = arith.constant dense<0.000000e+00> : vector<256x16xf32>
    %123 = tpu.matmul %120, %122, %cst_75 {dimension_numbers = #tpu.dot_dimension_numbers<[1], [0], [0], [1], [0, 0, 1, 1], [], []>} : vector<256x25xbf16>, vector<25x16xbf16>, vector<256x16xf32> -> vector<256x16xf32>
    %124 = vector.broadcast %0 : vector<1x16xf32> to vector<256x16xf32>
    %125 = arith.addf %123, %124 : vector<256x16xf32>
    %cst_76 = arith.constant 0.000000e+00 : f32
    %126 = vector.broadcast %cst_76 : f32 to vector<256x16xf32>
    %127 = arith.maximumf %125, %126 : vector<256x16xf32>
    %128 = vector.shape_cast %127 : vector<256x16xf32> to vector<2x2x64x16xf32>
    %129 = vector.extract_strided_slice %128 {offsets = [0, 0, 0, 0], sizes = [2, 1, 64, 16], strides = [1, 1, 1, 1]} : vector<2x2x64x16xf32> to vector<2x1x64x16xf32>
    %130 = vector.shape_cast %129 : vector<2x1x64x16xf32> to vector<2x64x16xf32>
    %131 = vector.extract_strided_slice %128 {offsets = [0, 1, 0, 0], sizes = [2, 1, 64, 16], strides = [1, 1, 1, 1]} : vector<2x2x64x16xf32> to vector<2x1x64x16xf32>
    %132 = vector.shape_cast %131 : vector<2x1x64x16xf32> to vector<2x64x16xf32>
    %133 = arith.maximumf %130, %132 : vector<2x64x16xf32>
    %134 = vector.shape_cast %133 : vector<2x64x16xf32> to vector<128x16xf32>
    %c0_77 = arith.constant 0 : index
    %c0_78 = arith.constant 0 : index
    %135 = vector.load %arg6[%c0_77, %c0_78] : memref<128x16xf32, #tpu.memory_space<vmem>>, vector<128x16xf32>
    tpu.vector_store %arg6[%c0_77, %c0_78], %134 {strides = array<i32>} : memref<128x16xf32, #tpu.memory_space<vmem>>, vector<128x16xf32>,
    %c0_79 = arith.constant 0 : index
    %c0_80 = arith.constant 0 : index
    %136 = tpu.strided_load %arg6[%c0_79, %c0_80] {strides = array<i32: 2, 1>} : memref<128x16xf32, #tpu.memory_space<vmem>>, vector<64x16xf32>
    %c1_81 = arith.constant 1 : index
    %c0_82 = arith.constant 0 : index
    %137 = tpu.strided_load %arg6[%c1_81, %c0_82] {strides = array<i32: 2, 1>} : memref<128x16xf32, #tpu.memory_space<vmem>>, vector<64x16xf32>
    %138 = arith.maximumf %136, %137 : vector<64x16xf32>
    %139 = arith.truncf %138 : vector<64x16xf32> to vector<64x16xbf16>
    %c0_83 = arith.constant 0 : index
    %c256 = arith.constant 256 : index
    %c0_84 = arith.constant 0 : index
    %140 = vector.load %arg5[%c0_83, %c256, %c0_84] : memref<1x512x16xbf16, #tpu.memory_space<vmem>>, vector<1x64x16xbf16>
    %141 = vector.shape_cast %140 : vector<1x64x16xbf16> to vector<64x16xbf16>
    %142 = vector.shape_cast %139 : vector<64x16xbf16> to vector<1x64x16xbf16>
    tpu.vector_store %arg5[%c0_83, %c256, %c0_84], %142 {strides = array<i32>} : memref<1x512x16xbf16, #tpu.memory_space<vmem>>, vector<1x64x16xbf16>,
    %c20_i32 = arith.constant 20 : i32
    %143 = arith.addi %2, %c20_i32 : i32
    %c0_i32_85 = arith.constant 0 : i32
    %144 = arith.addi %143, %c0_i32_85 : i32
    %c0_86 = arith.constant 0 : index
    %145 = arith.index_cast %144 : i32 to index
    %c0_87 = arith.constant 0 : index
    %c0_88 = arith.constant 0 : index
    %146 = vector.load %arg2[%c0_86, %145, %c0_87, %c0_88] : memref<1x64x64x25xbf16, #tpu.memory_space<vmem>>, vector<1x4x64x25xbf16>
    %147 = vector.shape_cast %146 : vector<1x4x64x25xbf16> to vector<4x64x25xbf16>
    %148 = vector.shape_cast %147 : vector<4x64x25xbf16> to vector<256x25xbf16>
    %c0_89 = arith.constant 0 : index
    %c0_90 = arith.constant 0 : index
    %c0_91 = arith.constant 0 : index
    %149 = vector.load %arg3[%c0_89, %c0_90, %c0_91] : memref<1x25x16xbf16, #tpu.memory_space<vmem>>, vector<1x25x16xbf16>
    %150 = vector.shape_cast %149 : vector<1x25x16xbf16> to vector<25x16xbf16>
    %cst_92 = arith.constant dense<0.000000e+00> : vector<256x16xf32>
    %151 = tpu.matmul %148, %150, %cst_92 {dimension_numbers = #tpu.dot_dimension_numbers<[1], [0], [0], [1], [0, 0, 1, 1], [], []>} : vector<256x25xbf16>, vector<25x16xbf16>, vector<256x16xf32> -> vector<256x16xf32>
    %152 = vector.broadcast %0 : vector<1x16xf32> to vector<256x16xf32>
    %153 = arith.addf %151, %152 : vector<256x16xf32>
    %cst_93 = arith.constant 0.000000e+00 : f32
    %154 = vector.broadcast %cst_93 : f32 to vector<256x16xf32>
    %155 = arith.maximumf %153, %154 : vector<256x16xf32>
    %156 = vector.shape_cast %155 : vector<256x16xf32> to vector<2x2x64x16xf32>
    %157 = vector.extract_strided_slice %156 {offsets = [0, 0, 0, 0], sizes = [2, 1, 64, 16], strides = [1, 1, 1, 1]} : vector<2x2x64x16xf32> to vector<2x1x64x16xf32>
    %158 = vector.shape_cast %157 : vector<2x1x64x16xf32> to vector<2x64x16xf32>
    %159 = vector.extract_strided_slice %156 {offsets = [0, 1, 0, 0], sizes = [2, 1, 64, 16], strides = [1, 1, 1, 1]} : vector<2x2x64x16xf32> to vector<2x1x64x16xf32>
    %160 = vector.shape_cast %159 : vector<2x1x64x16xf32> to vector<2x64x16xf32>
    %161 = arith.maximumf %158, %160 : vector<2x64x16xf32>
    %162 = vector.shape_cast %161 : vector<2x64x16xf32> to vector<128x16xf32>
    %c0_94 = arith.constant 0 : index
    %c0_95 = arith.constant 0 : index
    %163 = vector.load %arg6[%c0_94, %c0_95] : memref<128x16xf32, #tpu.memory_space<vmem>>, vector<128x16xf32>
    tpu.vector_store %arg6[%c0_94, %c0_95], %162 {strides = array<i32>} : memref<128x16xf32, #tpu.memory_space<vmem>>, vector<128x16xf32>,
    %c0_96 = arith.constant 0 : index
    %c0_97 = arith.constant 0 : index
    %164 = tpu.strided_load %arg6[%c0_96, %c0_97] {strides = array<i32: 2, 1>} : memref<128x16xf32, #tpu.memory_space<vmem>>, vector<64x16xf32>
    %c1_98 = arith.constant 1 : index
    %c0_99 = arith.constant 0 : index
    %165 = tpu.strided_load %arg6[%c1_98, %c0_99] {strides = array<i32: 2, 1>} : memref<128x16xf32, #tpu.memory_space<vmem>>, vector<64x16xf32>
    %166 = arith.maximumf %164, %165 : vector<64x16xf32>
    %167 = arith.truncf %166 : vector<64x16xf32> to vector<64x16xbf16>
    %c0_100 = arith.constant 0 : index
    %c320 = arith.constant 320 : index
    %c0_101 = arith.constant 0 : index
    %168 = vector.load %arg5[%c0_100, %c320, %c0_101] : memref<1x512x16xbf16, #tpu.memory_space<vmem>>, vector<1x64x16xbf16>
    %169 = vector.shape_cast %168 : vector<1x64x16xbf16> to vector<64x16xbf16>
    %170 = vector.shape_cast %167 : vector<64x16xbf16> to vector<1x64x16xbf16>
    tpu.vector_store %arg5[%c0_100, %c320, %c0_101], %170 {strides = array<i32>} : memref<1x512x16xbf16, #tpu.memory_space<vmem>>, vector<1x64x16xbf16>,
    %c24_i32 = arith.constant 24 : i32
    %171 = arith.addi %2, %c24_i32 : i32
    %c0_i32_102 = arith.constant 0 : i32
    %172 = arith.addi %171, %c0_i32_102 : i32
    %c0_103 = arith.constant 0 : index
    %173 = arith.index_cast %172 : i32 to index
    %c0_104 = arith.constant 0 : index
    %c0_105 = arith.constant 0 : index
    %174 = vector.load %arg2[%c0_103, %173, %c0_104, %c0_105] : memref<1x64x64x25xbf16, #tpu.memory_space<vmem>>, vector<1x4x64x25xbf16>
    %175 = vector.shape_cast %174 : vector<1x4x64x25xbf16> to vector<4x64x25xbf16>
    %176 = vector.shape_cast %175 : vector<4x64x25xbf16> to vector<256x25xbf16>
    %c0_106 = arith.constant 0 : index
    %c0_107 = arith.constant 0 : index
    %c0_108 = arith.constant 0 : index
    %177 = vector.load %arg3[%c0_106, %c0_107, %c0_108] : memref<1x25x16xbf16, #tpu.memory_space<vmem>>, vector<1x25x16xbf16>
    %178 = vector.shape_cast %177 : vector<1x25x16xbf16> to vector<25x16xbf16>
    %cst_109 = arith.constant dense<0.000000e+00> : vector<256x16xf32>
    %179 = tpu.matmul %176, %178, %cst_109 {dimension_numbers = #tpu.dot_dimension_numbers<[1], [0], [0], [1], [0, 0, 1, 1], [], []>} : vector<256x25xbf16>, vector<25x16xbf16>, vector<256x16xf32> -> vector<256x16xf32>
    %180 = vector.broadcast %0 : vector<1x16xf32> to vector<256x16xf32>
    %181 = arith.addf %179, %180 : vector<256x16xf32>
    %cst_110 = arith.constant 0.000000e+00 : f32
    %182 = vector.broadcast %cst_110 : f32 to vector<256x16xf32>
    %183 = arith.maximumf %181, %182 : vector<256x16xf32>
    %184 = vector.shape_cast %183 : vector<256x16xf32> to vector<2x2x64x16xf32>
    %185 = vector.extract_strided_slice %184 {offsets = [0, 0, 0, 0], sizes = [2, 1, 64, 16], strides = [1, 1, 1, 1]} : vector<2x2x64x16xf32> to vector<2x1x64x16xf32>
    %186 = vector.shape_cast %185 : vector<2x1x64x16xf32> to vector<2x64x16xf32>
    %187 = vector.extract_strided_slice %184 {offsets = [0, 1, 0, 0], sizes = [2, 1, 64, 16], strides = [1, 1, 1, 1]} : vector<2x2x64x16xf32> to vector<2x1x64x16xf32>
    %188 = vector.shape_cast %187 : vector<2x1x64x16xf32> to vector<2x64x16xf32>
    %189 = arith.maximumf %186, %188 : vector<2x64x16xf32>
    %190 = vector.shape_cast %189 : vector<2x64x16xf32> to vector<128x16xf32>
    %c0_111 = arith.constant 0 : index
    %c0_112 = arith.constant 0 : index
    %191 = vector.load %arg6[%c0_111, %c0_112] : memref<128x16xf32, #tpu.memory_space<vmem>>, vector<128x16xf32>
    tpu.vector_store %arg6[%c0_111, %c0_112], %190 {strides = array<i32>} : memref<128x16xf32, #tpu.memory_space<vmem>>, vector<128x16xf32>,
    %c0_113 = arith.constant 0 : index
    %c0_114 = arith.constant 0 : index
    %192 = tpu.strided_load %arg6[%c0_113, %c0_114] {strides = array<i32: 2, 1>} : memref<128x16xf32, #tpu.memory_space<vmem>>, vector<64x16xf32>
    %c1_115 = arith.constant 1 : index
    %c0_116 = arith.constant 0 : index
    %193 = tpu.strided_load %arg6[%c1_115, %c0_116] {strides = array<i32: 2, 1>} : memref<128x16xf32, #tpu.memory_space<vmem>>, vector<64x16xf32>
    %194 = arith.maximumf %192, %193 : vector<64x16xf32>
    %195 = arith.truncf %194 : vector<64x16xf32> to vector<64x16xbf16>
    %c0_117 = arith.constant 0 : index
    %c384 = arith.constant 384 : index
    %c0_118 = arith.constant 0 : index
    %196 = vector.load %arg5[%c0_117, %c384, %c0_118] : memref<1x512x16xbf16, #tpu.memory_space<vmem>>, vector<1x64x16xbf16>
    %197 = vector.shape_cast %196 : vector<1x64x16xbf16> to vector<64x16xbf16>
    %198 = vector.shape_cast %195 : vector<64x16xbf16> to vector<1x64x16xbf16>
    tpu.vector_store %arg5[%c0_117, %c384, %c0_118], %198 {strides = array<i32>} : memref<1x512x16xbf16, #tpu.memory_space<vmem>>, vector<1x64x16xbf16>,
    %c28_i32 = arith.constant 28 : i32
    %199 = arith.addi %2, %c28_i32 : i32
    %c0_i32_119 = arith.constant 0 : i32
    %200 = arith.addi %199, %c0_i32_119 : i32
    %c0_120 = arith.constant 0 : index
    %201 = arith.index_cast %200 : i32 to index
    %c0_121 = arith.constant 0 : index
    %c0_122 = arith.constant 0 : index
    %202 = vector.load %arg2[%c0_120, %201, %c0_121, %c0_122] : memref<1x64x64x25xbf16, #tpu.memory_space<vmem>>, vector<1x4x64x25xbf16>
    %203 = vector.shape_cast %202 : vector<1x4x64x25xbf16> to vector<4x64x25xbf16>
    %204 = vector.shape_cast %203 : vector<4x64x25xbf16> to vector<256x25xbf16>
    %c0_123 = arith.constant 0 : index
    %c0_124 = arith.constant 0 : index
    %c0_125 = arith.constant 0 : index
    %205 = vector.load %arg3[%c0_123, %c0_124, %c0_125] : memref<1x25x16xbf16, #tpu.memory_space<vmem>>, vector<1x25x16xbf16>
    %206 = vector.shape_cast %205 : vector<1x25x16xbf16> to vector<25x16xbf16>
    %cst_126 = arith.constant dense<0.000000e+00> : vector<256x16xf32>
    %207 = tpu.matmul %204, %206, %cst_126 {dimension_numbers = #tpu.dot_dimension_numbers<[1], [0], [0], [1], [0, 0, 1, 1], [], []>} : vector<256x25xbf16>, vector<25x16xbf16>, vector<256x16xf32> -> vector<256x16xf32>
    %208 = vector.broadcast %0 : vector<1x16xf32> to vector<256x16xf32>
    %209 = arith.addf %207, %208 : vector<256x16xf32>
    %cst_127 = arith.constant 0.000000e+00 : f32
    %210 = vector.broadcast %cst_127 : f32 to vector<256x16xf32>
    %211 = arith.maximumf %209, %210 : vector<256x16xf32>
    %212 = vector.shape_cast %211 : vector<256x16xf32> to vector<2x2x64x16xf32>
    %213 = vector.extract_strided_slice %212 {offsets = [0, 0, 0, 0], sizes = [2, 1, 64, 16], strides = [1, 1, 1, 1]} : vector<2x2x64x16xf32> to vector<2x1x64x16xf32>
    %214 = vector.shape_cast %213 : vector<2x1x64x16xf32> to vector<2x64x16xf32>
    %215 = vector.extract_strided_slice %212 {offsets = [0, 1, 0, 0], sizes = [2, 1, 64, 16], strides = [1, 1, 1, 1]} : vector<2x2x64x16xf32> to vector<2x1x64x16xf32>
    %216 = vector.shape_cast %215 : vector<2x1x64x16xf32> to vector<2x64x16xf32>
    %217 = arith.maximumf %214, %216 : vector<2x64x16xf32>
    %218 = vector.shape_cast %217 : vector<2x64x16xf32> to vector<128x16xf32>
    %c0_128 = arith.constant 0 : index
    %c0_129 = arith.constant 0 : index
    %219 = vector.load %arg6[%c0_128, %c0_129] : memref<128x16xf32, #tpu.memory_space<vmem>>, vector<128x16xf32>
    tpu.vector_store %arg6[%c0_128, %c0_129], %218 {strides = array<i32>} : memref<128x16xf32, #tpu.memory_space<vmem>>, vector<128x16xf32>,
    %c0_130 = arith.constant 0 : index
    %c0_131 = arith.constant 0 : index
    %220 = tpu.strided_load %arg6[%c0_130, %c0_131] {strides = array<i32: 2, 1>} : memref<128x16xf32, #tpu.memory_space<vmem>>, vector<64x16xf32>
    %c1_132 = arith.constant 1 : index
    %c0_133 = arith.constant 0 : index
    %221 = tpu.strided_load %arg6[%c1_132, %c0_133] {strides = array<i32: 2, 1>} : memref<128x16xf32, #tpu.memory_space<vmem>>, vector<64x16xf32>
    %222 = arith.maximumf %220, %221 : vector<64x16xf32>
    %223 = arith.truncf %222 : vector<64x16xf32> to vector<64x16xbf16>
    %c0_134 = arith.constant 0 : index
    %c448 = arith.constant 448 : index
    %c0_135 = arith.constant 0 : index
    %224 = vector.load %arg5[%c0_134, %c448, %c0_135] : memref<1x512x16xbf16, #tpu.memory_space<vmem>>, vector<1x64x16xbf16>
    %225 = vector.shape_cast %224 : vector<1x64x16xbf16> to vector<64x16xbf16>
    %226 = vector.shape_cast %223 : vector<64x16xbf16> to vector<1x64x16xbf16>
    tpu.vector_store %arg5[%c0_134, %c448, %c0_135], %226 {strides = array<i32>} : memref<1x512x16xbf16, #tpu.memory_space<vmem>>, vector<1x64x16xbf16>,
    return
  }
  func.func @transform_0(%arg0: i32, %arg1: i32) -> (i32, i32, i32, i32) {
    %c0_i32 = arith.constant 0 : i32
    %c0_i32_0 = arith.constant 0 : i32
    %c0_i32_1 = arith.constant 0 : i32
    %c0_i32_2 = arith.constant 0 : i32
    return %arg0, %c0_i32, %c0_i32_0, %c0_i32_1 : i32, i32, i32, i32
  }
  func.func @transform_1(%arg0: i32, %arg1: i32) -> (i32, i32, i32) {
    %c0_i32 = arith.constant 0 : i32
    %c0_i32_0 = arith.constant 0 : i32
    %c0_i32_1 = arith.constant 0 : i32
    %c0_i32_2 = arith.constant 0 : i32
    return %c0_i32, %c0_i32_0, %c0_i32_1 : i32, i32, i32
  }
  func.func @transform_2(%arg0: i32, %arg1: i32) -> (i32, i32) {
    %c0_i32 = arith.constant 0 : i32
    %c0_i32_0 = arith.constant 0 : i32
    %c0_i32_1 = arith.constant 0 : i32
    return %c0_i32, %c0_i32_0 : i32, i32
  }
  func.func @transform_3(%arg0: i32, %arg1: i32) -> (i32, i32, i32) {
    %c0_i32 = arith.constant 0 : i32
    %c0_i32_0 = arith.constant 0 : i32
    return %arg0, %arg1, %c0_i32 : i32, i32, i32
  }
}

module attributes {stable_mosaic.version = 11 : i64} {
  func.func @_conv_pool_kernel(%arg0: i32, %arg1: i32, %arg2: memref<1x36x32x80xbf16, #tpu.memory_space<vmem>>, %arg3: memref<5x80x32xbf16, #tpu.memory_space<vmem>>, %arg4: memref<1x32xf32, #tpu.memory_space<vmem>>, %arg5: memref<1x128x32xbf16, #tpu.memory_space<vmem>>, %arg6: memref<128x32xf32, #tpu.memory_space<vmem>>) attributes {dimension_semantics = [#tpu.dimension_semantics<parallel>, #tpu.dimension_semantics<arbitrary>], iteration_bounds = array<i64: 2, 2>, scalar_prefetch = 0 : i64, scratch_operands = 1 : i64, tpu.core_type = #tpu.core_type<tc>, window_params = [{transform_indices = @transform_0, window_bounds = array<i64: 1, 36, 32, 80>}, {pipeline_mode = #tpu.pipeline_mode<synchronous>, transform_indices = @transform_1, window_bounds = array<i64: 5, 80, 32>}, {pipeline_mode = #tpu.pipeline_mode<synchronous>, transform_indices = @transform_2, window_bounds = array<i64: 1, 32>}, {transform_indices = @transform_3, window_bounds = array<i64: 1, 128, 32>}]} {
    %c0 = arith.constant 0 : index
    %c0_0 = arith.constant 0 : index
    %0 = vector.load %arg4[%c0, %c0_0] : memref<1x32xf32, #tpu.memory_space<vmem>>, vector<1x32xf32>
    %c16_i32 = arith.constant 16 : i32
    %1 = arith.muli %arg1, %c16_i32 : i32
    %2 = tpu.assume_multiple %1, 8 : i32
    %c0_i32 = arith.constant 0 : i32
    %3 = arith.addi %2, %c0_i32 : i32
    %c0_i32_1 = arith.constant 0 : i32
    %4 = arith.addi %3, %c0_i32_1 : i32
    %c0_2 = arith.constant 0 : index
    %5 = arith.index_cast %4 : i32 to index
    %c0_3 = arith.constant 0 : index
    %c0_4 = arith.constant 0 : index
    %6 = vector.load %arg2[%c0_2, %5, %c0_3, %c0_4] : memref<1x36x32x80xbf16, #tpu.memory_space<vmem>>, vector<1x8x32x80xbf16>
    %7 = vector.shape_cast %6 : vector<1x8x32x80xbf16> to vector<8x32x80xbf16>
    %8 = vector.shape_cast %7 : vector<8x32x80xbf16> to vector<256x80xbf16>
    %c0_5 = arith.constant 0 : index
    %c0_6 = arith.constant 0 : index
    %c0_7 = arith.constant 0 : index
    %9 = vector.load %arg3[%c0_5, %c0_6, %c0_7] : memref<5x80x32xbf16, #tpu.memory_space<vmem>>, vector<1x80x32xbf16>
    %10 = vector.shape_cast %9 : vector<1x80x32xbf16> to vector<80x32xbf16>
    %cst = arith.constant dense<0.000000e+00> : vector<256x32xf32>
    %11 = tpu.matmul %8, %10, %cst {dimension_numbers = #tpu.dot_dimension_numbers<[1], [0], [0], [1], [0, 0, 1, 1], [], []>} : vector<256x80xbf16>, vector<80x32xbf16>, vector<256x32xf32> -> vector<256x32xf32>
    %c0_i32_8 = arith.constant 0 : i32
    %12 = arith.addi %2, %c0_i32_8 : i32
    %c1_i32 = arith.constant 1 : i32
    %13 = arith.addi %12, %c1_i32 : i32
    %c0_9 = arith.constant 0 : index
    %14 = arith.index_cast %13 : i32 to index
    %c0_10 = arith.constant 0 : index
    %c0_11 = arith.constant 0 : index
    %15 = vector.load %arg2[%c0_9, %14, %c0_10, %c0_11] : memref<1x36x32x80xbf16, #tpu.memory_space<vmem>>, vector<1x8x32x80xbf16>
    %16 = vector.shape_cast %15 : vector<1x8x32x80xbf16> to vector<8x32x80xbf16>
    %17 = vector.shape_cast %16 : vector<8x32x80xbf16> to vector<256x80xbf16>
    %c1 = arith.constant 1 : index
    %c0_12 = arith.constant 0 : index
    %c0_13 = arith.constant 0 : index
    %18 = vector.load %arg3[%c1, %c0_12, %c0_13] : memref<5x80x32xbf16, #tpu.memory_space<vmem>>, vector<1x80x32xbf16>
    %19 = vector.shape_cast %18 : vector<1x80x32xbf16> to vector<80x32xbf16>
    %cst_14 = arith.constant dense<0.000000e+00> : vector<256x32xf32>
    %20 = tpu.matmul %17, %19, %cst_14 {dimension_numbers = #tpu.dot_dimension_numbers<[1], [0], [0], [1], [0, 0, 1, 1], [], []>} : vector<256x80xbf16>, vector<80x32xbf16>, vector<256x32xf32> -> vector<256x32xf32>
    %21 = arith.addf %11, %20 : vector<256x32xf32>
    %c0_i32_15 = arith.constant 0 : i32
    %22 = arith.addi %2, %c0_i32_15 : i32
    %c2_i32 = arith.constant 2 : i32
    %23 = arith.addi %22, %c2_i32 : i32
    %c0_16 = arith.constant 0 : index
    %24 = arith.index_cast %23 : i32 to index
    %c0_17 = arith.constant 0 : index
    %c0_18 = arith.constant 0 : index
    %25 = vector.load %arg2[%c0_16, %24, %c0_17, %c0_18] : memref<1x36x32x80xbf16, #tpu.memory_space<vmem>>, vector<1x8x32x80xbf16>
    %26 = vector.shape_cast %25 : vector<1x8x32x80xbf16> to vector<8x32x80xbf16>
    %27 = vector.shape_cast %26 : vector<8x32x80xbf16> to vector<256x80xbf16>
    %c2 = arith.constant 2 : index
    %c0_19 = arith.constant 0 : index
    %c0_20 = arith.constant 0 : index
    %28 = vector.load %arg3[%c2, %c0_19, %c0_20] : memref<5x80x32xbf16, #tpu.memory_space<vmem>>, vector<1x80x32xbf16>
    %29 = vector.shape_cast %28 : vector<1x80x32xbf16> to vector<80x32xbf16>
    %cst_21 = arith.constant dense<0.000000e+00> : vector<256x32xf32>
    %30 = tpu.matmul %27, %29, %cst_21 {dimension_numbers = #tpu.dot_dimension_numbers<[1], [0], [0], [1], [0, 0, 1, 1], [], []>} : vector<256x80xbf16>, vector<80x32xbf16>, vector<256x32xf32> -> vector<256x32xf32>
    %31 = arith.addf %21, %30 : vector<256x32xf32>
    %c0_i32_22 = arith.constant 0 : i32
    %32 = arith.addi %2, %c0_i32_22 : i32
    %c3_i32 = arith.constant 3 : i32
    %33 = arith.addi %32, %c3_i32 : i32
    %c0_23 = arith.constant 0 : index
    %34 = arith.index_cast %33 : i32 to index
    %c0_24 = arith.constant 0 : index
    %c0_25 = arith.constant 0 : index
    %35 = vector.load %arg2[%c0_23, %34, %c0_24, %c0_25] : memref<1x36x32x80xbf16, #tpu.memory_space<vmem>>, vector<1x8x32x80xbf16>
    %36 = vector.shape_cast %35 : vector<1x8x32x80xbf16> to vector<8x32x80xbf16>
    %37 = vector.shape_cast %36 : vector<8x32x80xbf16> to vector<256x80xbf16>
    %c3 = arith.constant 3 : index
    %c0_26 = arith.constant 0 : index
    %c0_27 = arith.constant 0 : index
    %38 = vector.load %arg3[%c3, %c0_26, %c0_27] : memref<5x80x32xbf16, #tpu.memory_space<vmem>>, vector<1x80x32xbf16>
    %39 = vector.shape_cast %38 : vector<1x80x32xbf16> to vector<80x32xbf16>
    %cst_28 = arith.constant dense<0.000000e+00> : vector<256x32xf32>
    %40 = tpu.matmul %37, %39, %cst_28 {dimension_numbers = #tpu.dot_dimension_numbers<[1], [0], [0], [1], [0, 0, 1, 1], [], []>} : vector<256x80xbf16>, vector<80x32xbf16>, vector<256x32xf32> -> vector<256x32xf32>
    %41 = arith.addf %31, %40 : vector<256x32xf32>
    %c0_i32_29 = arith.constant 0 : i32
    %42 = arith.addi %2, %c0_i32_29 : i32
    %c4_i32 = arith.constant 4 : i32
    %43 = arith.addi %42, %c4_i32 : i32
    %c0_30 = arith.constant 0 : index
    %44 = arith.index_cast %43 : i32 to index
    %c0_31 = arith.constant 0 : index
    %c0_32 = arith.constant 0 : index
    %45 = vector.load %arg2[%c0_30, %44, %c0_31, %c0_32] : memref<1x36x32x80xbf16, #tpu.memory_space<vmem>>, vector<1x8x32x80xbf16>
    %46 = vector.shape_cast %45 : vector<1x8x32x80xbf16> to vector<8x32x80xbf16>
    %47 = vector.shape_cast %46 : vector<8x32x80xbf16> to vector<256x80xbf16>
    %c4 = arith.constant 4 : index
    %c0_33 = arith.constant 0 : index
    %c0_34 = arith.constant 0 : index
    %48 = vector.load %arg3[%c4, %c0_33, %c0_34] : memref<5x80x32xbf16, #tpu.memory_space<vmem>>, vector<1x80x32xbf16>
    %49 = vector.shape_cast %48 : vector<1x80x32xbf16> to vector<80x32xbf16>
    %cst_35 = arith.constant dense<0.000000e+00> : vector<256x32xf32>
    %50 = tpu.matmul %47, %49, %cst_35 {dimension_numbers = #tpu.dot_dimension_numbers<[1], [0], [0], [1], [0, 0, 1, 1], [], []>} : vector<256x80xbf16>, vector<80x32xbf16>, vector<256x32xf32> -> vector<256x32xf32>
    %51 = arith.addf %41, %50 : vector<256x32xf32>
    %52 = vector.broadcast %0 : vector<1x32xf32> to vector<256x32xf32>
    %53 = arith.addf %51, %52 : vector<256x32xf32>
    %cst_36 = arith.constant 0.000000e+00 : f32
    %54 = vector.broadcast %cst_36 : f32 to vector<256x32xf32>
    %55 = arith.maximumf %53, %54 : vector<256x32xf32>
    %56 = vector.shape_cast %55 : vector<256x32xf32> to vector<4x2x32x32xf32>
    %57 = vector.extract_strided_slice %56 {offsets = [0, 0, 0, 0], sizes = [4, 1, 32, 32], strides = [1, 1, 1, 1]} : vector<4x2x32x32xf32> to vector<4x1x32x32xf32>
    %58 = vector.shape_cast %57 : vector<4x1x32x32xf32> to vector<4x32x32xf32>
    %59 = vector.extract_strided_slice %56 {offsets = [0, 1, 0, 0], sizes = [4, 1, 32, 32], strides = [1, 1, 1, 1]} : vector<4x2x32x32xf32> to vector<4x1x32x32xf32>
    %60 = vector.shape_cast %59 : vector<4x1x32x32xf32> to vector<4x32x32xf32>
    %61 = arith.maximumf %58, %60 : vector<4x32x32xf32>
    %62 = vector.shape_cast %61 : vector<4x32x32xf32> to vector<128x32xf32>
    %c0_37 = arith.constant 0 : index
    %c0_38 = arith.constant 0 : index
    %63 = vector.load %arg6[%c0_37, %c0_38] : memref<128x32xf32, #tpu.memory_space<vmem>>, vector<128x32xf32>
    tpu.vector_store %arg6[%c0_37, %c0_38], %62 {strides = array<i32>} : memref<128x32xf32, #tpu.memory_space<vmem>>, vector<128x32xf32>,
    %c0_39 = arith.constant 0 : index
    %c0_40 = arith.constant 0 : index
    %64 = tpu.strided_load %arg6[%c0_39, %c0_40] {strides = array<i32: 2, 1>} : memref<128x32xf32, #tpu.memory_space<vmem>>, vector<64x32xf32>
    %c1_41 = arith.constant 1 : index
    %c0_42 = arith.constant 0 : index
    %65 = tpu.strided_load %arg6[%c1_41, %c0_42] {strides = array<i32: 2, 1>} : memref<128x32xf32, #tpu.memory_space<vmem>>, vector<64x32xf32>
    %66 = arith.maximumf %64, %65 : vector<64x32xf32>
    %67 = arith.truncf %66 : vector<64x32xf32> to vector<64x32xbf16>
    %c0_43 = arith.constant 0 : index
    %c0_44 = arith.constant 0 : index
    %c0_45 = arith.constant 0 : index
    %68 = vector.load %arg5[%c0_43, %c0_44, %c0_45] : memref<1x128x32xbf16, #tpu.memory_space<vmem>>, vector<1x64x32xbf16>
    %69 = vector.shape_cast %68 : vector<1x64x32xbf16> to vector<64x32xbf16>
    %70 = vector.shape_cast %67 : vector<64x32xbf16> to vector<1x64x32xbf16>
    tpu.vector_store %arg5[%c0_43, %c0_44, %c0_45], %70 {strides = array<i32>} : memref<1x128x32xbf16, #tpu.memory_space<vmem>>, vector<1x64x32xbf16>,
    %c8_i32 = arith.constant 8 : i32
    %71 = arith.addi %2, %c8_i32 : i32
    %c0_i32_46 = arith.constant 0 : i32
    %72 = arith.addi %71, %c0_i32_46 : i32
    %c0_47 = arith.constant 0 : index
    %73 = arith.index_cast %72 : i32 to index
    %c0_48 = arith.constant 0 : index
    %c0_49 = arith.constant 0 : index
    %74 = vector.load %arg2[%c0_47, %73, %c0_48, %c0_49] : memref<1x36x32x80xbf16, #tpu.memory_space<vmem>>, vector<1x8x32x80xbf16>
    %75 = vector.shape_cast %74 : vector<1x8x32x80xbf16> to vector<8x32x80xbf16>
    %76 = vector.shape_cast %75 : vector<8x32x80xbf16> to vector<256x80xbf16>
    %c0_50 = arith.constant 0 : index
    %c0_51 = arith.constant 0 : index
    %c0_52 = arith.constant 0 : index
    %77 = vector.load %arg3[%c0_50, %c0_51, %c0_52] : memref<5x80x32xbf16, #tpu.memory_space<vmem>>, vector<1x80x32xbf16>
    %78 = vector.shape_cast %77 : vector<1x80x32xbf16> to vector<80x32xbf16>
    %cst_53 = arith.constant dense<0.000000e+00> : vector<256x32xf32>
    %79 = tpu.matmul %76, %78, %cst_53 {dimension_numbers = #tpu.dot_dimension_numbers<[1], [0], [0], [1], [0, 0, 1, 1], [], []>} : vector<256x80xbf16>, vector<80x32xbf16>, vector<256x32xf32> -> vector<256x32xf32>
    %c8_i32_54 = arith.constant 8 : i32
    %80 = arith.addi %2, %c8_i32_54 : i32
    %c1_i32_55 = arith.constant 1 : i32
    %81 = arith.addi %80, %c1_i32_55 : i32
    %c0_56 = arith.constant 0 : index
    %82 = arith.index_cast %81 : i32 to index
    %c0_57 = arith.constant 0 : index
    %c0_58 = arith.constant 0 : index
    %83 = vector.load %arg2[%c0_56, %82, %c0_57, %c0_58] : memref<1x36x32x80xbf16, #tpu.memory_space<vmem>>, vector<1x8x32x80xbf16>
    %84 = vector.shape_cast %83 : vector<1x8x32x80xbf16> to vector<8x32x80xbf16>
    %85 = vector.shape_cast %84 : vector<8x32x80xbf16> to vector<256x80xbf16>
    %c1_59 = arith.constant 1 : index
    %c0_60 = arith.constant 0 : index
    %c0_61 = arith.constant 0 : index
    %86 = vector.load %arg3[%c1_59, %c0_60, %c0_61] : memref<5x80x32xbf16, #tpu.memory_space<vmem>>, vector<1x80x32xbf16>
    %87 = vector.shape_cast %86 : vector<1x80x32xbf16> to vector<80x32xbf16>
    %cst_62 = arith.constant dense<0.000000e+00> : vector<256x32xf32>
    %88 = tpu.matmul %85, %87, %cst_62 {dimension_numbers = #tpu.dot_dimension_numbers<[1], [0], [0], [1], [0, 0, 1, 1], [], []>} : vector<256x80xbf16>, vector<80x32xbf16>, vector<256x32xf32> -> vector<256x32xf32>
    %89 = arith.addf %79, %88 : vector<256x32xf32>
    %c8_i32_63 = arith.constant 8 : i32
    %90 = arith.addi %2, %c8_i32_63 : i32
    %c2_i32_64 = arith.constant 2 : i32
    %91 = arith.addi %90, %c2_i32_64 : i32
    %c0_65 = arith.constant 0 : index
    %92 = arith.index_cast %91 : i32 to index
    %c0_66 = arith.constant 0 : index
    %c0_67 = arith.constant 0 : index
    %93 = vector.load %arg2[%c0_65, %92, %c0_66, %c0_67] : memref<1x36x32x80xbf16, #tpu.memory_space<vmem>>, vector<1x8x32x80xbf16>
    %94 = vector.shape_cast %93 : vector<1x8x32x80xbf16> to vector<8x32x80xbf16>
    %95 = vector.shape_cast %94 : vector<8x32x80xbf16> to vector<256x80xbf16>
    %c2_68 = arith.constant 2 : index
    %c0_69 = arith.constant 0 : index
    %c0_70 = arith.constant 0 : index
    %96 = vector.load %arg3[%c2_68, %c0_69, %c0_70] : memref<5x80x32xbf16, #tpu.memory_space<vmem>>, vector<1x80x32xbf16>
    %97 = vector.shape_cast %96 : vector<1x80x32xbf16> to vector<80x32xbf16>
    %cst_71 = arith.constant dense<0.000000e+00> : vector<256x32xf32>
    %98 = tpu.matmul %95, %97, %cst_71 {dimension_numbers = #tpu.dot_dimension_numbers<[1], [0], [0], [1], [0, 0, 1, 1], [], []>} : vector<256x80xbf16>, vector<80x32xbf16>, vector<256x32xf32> -> vector<256x32xf32>
    %99 = arith.addf %89, %98 : vector<256x32xf32>
    %c8_i32_72 = arith.constant 8 : i32
    %100 = arith.addi %2, %c8_i32_72 : i32
    %c3_i32_73 = arith.constant 3 : i32
    %101 = arith.addi %100, %c3_i32_73 : i32
    %c0_74 = arith.constant 0 : index
    %102 = arith.index_cast %101 : i32 to index
    %c0_75 = arith.constant 0 : index
    %c0_76 = arith.constant 0 : index
    %103 = vector.load %arg2[%c0_74, %102, %c0_75, %c0_76] : memref<1x36x32x80xbf16, #tpu.memory_space<vmem>>, vector<1x8x32x80xbf16>
    %104 = vector.shape_cast %103 : vector<1x8x32x80xbf16> to vector<8x32x80xbf16>
    %105 = vector.shape_cast %104 : vector<8x32x80xbf16> to vector<256x80xbf16>
    %c3_77 = arith.constant 3 : index
    %c0_78 = arith.constant 0 : index
    %c0_79 = arith.constant 0 : index
    %106 = vector.load %arg3[%c3_77, %c0_78, %c0_79] : memref<5x80x32xbf16, #tpu.memory_space<vmem>>, vector<1x80x32xbf16>
    %107 = vector.shape_cast %106 : vector<1x80x32xbf16> to vector<80x32xbf16>
    %cst_80 = arith.constant dense<0.000000e+00> : vector<256x32xf32>
    %108 = tpu.matmul %105, %107, %cst_80 {dimension_numbers = #tpu.dot_dimension_numbers<[1], [0], [0], [1], [0, 0, 1, 1], [], []>} : vector<256x80xbf16>, vector<80x32xbf16>, vector<256x32xf32> -> vector<256x32xf32>
    %109 = arith.addf %99, %108 : vector<256x32xf32>
    %c8_i32_81 = arith.constant 8 : i32
    %110 = arith.addi %2, %c8_i32_81 : i32
    %c4_i32_82 = arith.constant 4 : i32
    %111 = arith.addi %110, %c4_i32_82 : i32
    %c0_83 = arith.constant 0 : index
    %112 = arith.index_cast %111 : i32 to index
    %c0_84 = arith.constant 0 : index
    %c0_85 = arith.constant 0 : index
    %113 = vector.load %arg2[%c0_83, %112, %c0_84, %c0_85] : memref<1x36x32x80xbf16, #tpu.memory_space<vmem>>, vector<1x8x32x80xbf16>
    %114 = vector.shape_cast %113 : vector<1x8x32x80xbf16> to vector<8x32x80xbf16>
    %115 = vector.shape_cast %114 : vector<8x32x80xbf16> to vector<256x80xbf16>
    %c4_86 = arith.constant 4 : index
    %c0_87 = arith.constant 0 : index
    %c0_88 = arith.constant 0 : index
    %116 = vector.load %arg3[%c4_86, %c0_87, %c0_88] : memref<5x80x32xbf16, #tpu.memory_space<vmem>>, vector<1x80x32xbf16>
    %117 = vector.shape_cast %116 : vector<1x80x32xbf16> to vector<80x32xbf16>
    %cst_89 = arith.constant dense<0.000000e+00> : vector<256x32xf32>
    %118 = tpu.matmul %115, %117, %cst_89 {dimension_numbers = #tpu.dot_dimension_numbers<[1], [0], [0], [1], [0, 0, 1, 1], [], []>} : vector<256x80xbf16>, vector<80x32xbf16>, vector<256x32xf32> -> vector<256x32xf32>
    %119 = arith.addf %109, %118 : vector<256x32xf32>
    %120 = vector.broadcast %0 : vector<1x32xf32> to vector<256x32xf32>
    %121 = arith.addf %119, %120 : vector<256x32xf32>
    %cst_90 = arith.constant 0.000000e+00 : f32
    %122 = vector.broadcast %cst_90 : f32 to vector<256x32xf32>
    %123 = arith.maximumf %121, %122 : vector<256x32xf32>
    %124 = vector.shape_cast %123 : vector<256x32xf32> to vector<4x2x32x32xf32>
    %125 = vector.extract_strided_slice %124 {offsets = [0, 0, 0, 0], sizes = [4, 1, 32, 32], strides = [1, 1, 1, 1]} : vector<4x2x32x32xf32> to vector<4x1x32x32xf32>
    %126 = vector.shape_cast %125 : vector<4x1x32x32xf32> to vector<4x32x32xf32>
    %127 = vector.extract_strided_slice %124 {offsets = [0, 1, 0, 0], sizes = [4, 1, 32, 32], strides = [1, 1, 1, 1]} : vector<4x2x32x32xf32> to vector<4x1x32x32xf32>
    %128 = vector.shape_cast %127 : vector<4x1x32x32xf32> to vector<4x32x32xf32>
    %129 = arith.maximumf %126, %128 : vector<4x32x32xf32>
    %130 = vector.shape_cast %129 : vector<4x32x32xf32> to vector<128x32xf32>
    %c0_91 = arith.constant 0 : index
    %c0_92 = arith.constant 0 : index
    %131 = vector.load %arg6[%c0_91, %c0_92] : memref<128x32xf32, #tpu.memory_space<vmem>>, vector<128x32xf32>
    tpu.vector_store %arg6[%c0_91, %c0_92], %130 {strides = array<i32>} : memref<128x32xf32, #tpu.memory_space<vmem>>, vector<128x32xf32>,
    %c0_93 = arith.constant 0 : index
    %c0_94 = arith.constant 0 : index
    %132 = tpu.strided_load %arg6[%c0_93, %c0_94] {strides = array<i32: 2, 1>} : memref<128x32xf32, #tpu.memory_space<vmem>>, vector<64x32xf32>
    %c1_95 = arith.constant 1 : index
    %c0_96 = arith.constant 0 : index
    %133 = tpu.strided_load %arg6[%c1_95, %c0_96] {strides = array<i32: 2, 1>} : memref<128x32xf32, #tpu.memory_space<vmem>>, vector<64x32xf32>
    %134 = arith.maximumf %132, %133 : vector<64x32xf32>
    %135 = arith.truncf %134 : vector<64x32xf32> to vector<64x32xbf16>
    %c0_97 = arith.constant 0 : index
    %c64 = arith.constant 64 : index
    %c0_98 = arith.constant 0 : index
    %136 = vector.load %arg5[%c0_97, %c64, %c0_98] : memref<1x128x32xbf16, #tpu.memory_space<vmem>>, vector<1x64x32xbf16>
    %137 = vector.shape_cast %136 : vector<1x64x32xbf16> to vector<64x32xbf16>
    %138 = vector.shape_cast %135 : vector<64x32xbf16> to vector<1x64x32xbf16>
    tpu.vector_store %arg5[%c0_97, %c64, %c0_98], %138 {strides = array<i32>} : memref<1x128x32xbf16, #tpu.memory_space<vmem>>, vector<1x64x32xbf16>,
    return
  }
  func.func @transform_0(%arg0: i32, %arg1: i32) -> (i32, i32, i32, i32) {
    %c0_i32 = arith.constant 0 : i32
    %c0_i32_0 = arith.constant 0 : i32
    %c0_i32_1 = arith.constant 0 : i32
    %c0_i32_2 = arith.constant 0 : i32
    return %arg0, %c0_i32, %c0_i32_0, %c0_i32_1 : i32, i32, i32, i32
  }
  func.func @transform_1(%arg0: i32, %arg1: i32) -> (i32, i32, i32) {
    %c0_i32 = arith.constant 0 : i32
    %c0_i32_0 = arith.constant 0 : i32
    %c0_i32_1 = arith.constant 0 : i32
    %c0_i32_2 = arith.constant 0 : i32
    return %c0_i32, %c0_i32_0, %c0_i32_1 : i32, i32, i32
  }
  func.func @transform_2(%arg0: i32, %arg1: i32) -> (i32, i32) {
    %c0_i32 = arith.constant 0 : i32
    %c0_i32_0 = arith.constant 0 : i32
    %c0_i32_1 = arith.constant 0 : i32
    return %c0_i32, %c0_i32_0 : i32, i32
  }
  func.func @transform_3(%arg0: i32, %arg1: i32) -> (i32, i32, i32) {
    %c0_i32 = arith.constant 0 : i32
    %c0_i32_0 = arith.constant 0 : i32
    return %arg0, %arg1, %c0_i32 : i32, i32, i32
  }
}

module attributes {stable_mosaic.version = 11 : i64} {
  func.func @_conv_pool_kernel(%arg0: i32, %arg1: i32, %arg2: memref<1x20x16x160xbf16, #tpu.memory_space<vmem>>, %arg3: memref<5x160x64xbf16, #tpu.memory_space<vmem>>, %arg4: memref<1x64xf32, #tpu.memory_space<vmem>>, %arg5: memref<1x32x64xf32, #tpu.memory_space<vmem>>, %arg6: memref<64x64xf32, #tpu.memory_space<vmem>>) attributes {dimension_semantics = [#tpu.dimension_semantics<parallel>, #tpu.dimension_semantics<arbitrary>], iteration_bounds = array<i64: 2, 2>, scalar_prefetch = 0 : i64, scratch_operands = 1 : i64, tpu.core_type = #tpu.core_type<tc>, window_params = [{transform_indices = @transform_0, window_bounds = array<i64: 1, 20, 16, 160>}, {pipeline_mode = #tpu.pipeline_mode<synchronous>, transform_indices = @transform_1, window_bounds = array<i64: 5, 160, 64>}, {pipeline_mode = #tpu.pipeline_mode<synchronous>, transform_indices = @transform_2, window_bounds = array<i64: 1, 64>}, {transform_indices = @transform_3, window_bounds = array<i64: 1, 32, 64>}]} {
    %c0 = arith.constant 0 : index
    %c0_0 = arith.constant 0 : index
    %0 = vector.load %arg4[%c0, %c0_0] : memref<1x64xf32, #tpu.memory_space<vmem>>, vector<1x64xf32>
    %c8_i32 = arith.constant 8 : i32
    %1 = arith.muli %arg1, %c8_i32 : i32
    %2 = tpu.assume_multiple %1, 8 : i32
    %c0_i32 = arith.constant 0 : i32
    %3 = arith.addi %2, %c0_i32 : i32
    %c0_i32_1 = arith.constant 0 : i32
    %4 = arith.addi %3, %c0_i32_1 : i32
    %c0_2 = arith.constant 0 : index
    %5 = arith.index_cast %4 : i32 to index
    %c0_3 = arith.constant 0 : index
    %c0_4 = arith.constant 0 : index
    %6 = vector.load %arg2[%c0_2, %5, %c0_3, %c0_4] : memref<1x20x16x160xbf16, #tpu.memory_space<vmem>>, vector<1x8x16x160xbf16>
    %7 = vector.shape_cast %6 : vector<1x8x16x160xbf16> to vector<8x16x160xbf16>
    %8 = vector.shape_cast %7 : vector<8x16x160xbf16> to vector<128x160xbf16>
    %c0_5 = arith.constant 0 : index
    %c0_6 = arith.constant 0 : index
    %c0_7 = arith.constant 0 : index
    %9 = vector.load %arg3[%c0_5, %c0_6, %c0_7] : memref<5x160x64xbf16, #tpu.memory_space<vmem>>, vector<1x160x64xbf16>
    %10 = vector.shape_cast %9 : vector<1x160x64xbf16> to vector<160x64xbf16>
    %cst = arith.constant dense<0.000000e+00> : vector<128x64xf32>
    %11 = tpu.matmul %8, %10, %cst {dimension_numbers = #tpu.dot_dimension_numbers<[1], [0], [0], [1], [0, 0, 1, 1], [], []>} : vector<128x160xbf16>, vector<160x64xbf16>, vector<128x64xf32> -> vector<128x64xf32>
    %c0_i32_8 = arith.constant 0 : i32
    %12 = arith.addi %2, %c0_i32_8 : i32
    %c1_i32 = arith.constant 1 : i32
    %13 = arith.addi %12, %c1_i32 : i32
    %c0_9 = arith.constant 0 : index
    %14 = arith.index_cast %13 : i32 to index
    %c0_10 = arith.constant 0 : index
    %c0_11 = arith.constant 0 : index
    %15 = vector.load %arg2[%c0_9, %14, %c0_10, %c0_11] : memref<1x20x16x160xbf16, #tpu.memory_space<vmem>>, vector<1x8x16x160xbf16>
    %16 = vector.shape_cast %15 : vector<1x8x16x160xbf16> to vector<8x16x160xbf16>
    %17 = vector.shape_cast %16 : vector<8x16x160xbf16> to vector<128x160xbf16>
    %c1 = arith.constant 1 : index
    %c0_12 = arith.constant 0 : index
    %c0_13 = arith.constant 0 : index
    %18 = vector.load %arg3[%c1, %c0_12, %c0_13] : memref<5x160x64xbf16, #tpu.memory_space<vmem>>, vector<1x160x64xbf16>
    %19 = vector.shape_cast %18 : vector<1x160x64xbf16> to vector<160x64xbf16>
    %cst_14 = arith.constant dense<0.000000e+00> : vector<128x64xf32>
    %20 = tpu.matmul %17, %19, %cst_14 {dimension_numbers = #tpu.dot_dimension_numbers<[1], [0], [0], [1], [0, 0, 1, 1], [], []>} : vector<128x160xbf16>, vector<160x64xbf16>, vector<128x64xf32> -> vector<128x64xf32>
    %21 = arith.addf %11, %20 : vector<128x64xf32>
    %c0_i32_15 = arith.constant 0 : i32
    %22 = arith.addi %2, %c0_i32_15 : i32
    %c2_i32 = arith.constant 2 : i32
    %23 = arith.addi %22, %c2_i32 : i32
    %c0_16 = arith.constant 0 : index
    %24 = arith.index_cast %23 : i32 to index
    %c0_17 = arith.constant 0 : index
    %c0_18 = arith.constant 0 : index
    %25 = vector.load %arg2[%c0_16, %24, %c0_17, %c0_18] : memref<1x20x16x160xbf16, #tpu.memory_space<vmem>>, vector<1x8x16x160xbf16>
    %26 = vector.shape_cast %25 : vector<1x8x16x160xbf16> to vector<8x16x160xbf16>
    %27 = vector.shape_cast %26 : vector<8x16x160xbf16> to vector<128x160xbf16>
    %c2 = arith.constant 2 : index
    %c0_19 = arith.constant 0 : index
    %c0_20 = arith.constant 0 : index
    %28 = vector.load %arg3[%c2, %c0_19, %c0_20] : memref<5x160x64xbf16, #tpu.memory_space<vmem>>, vector<1x160x64xbf16>
    %29 = vector.shape_cast %28 : vector<1x160x64xbf16> to vector<160x64xbf16>
    %cst_21 = arith.constant dense<0.000000e+00> : vector<128x64xf32>
    %30 = tpu.matmul %27, %29, %cst_21 {dimension_numbers = #tpu.dot_dimension_numbers<[1], [0], [0], [1], [0, 0, 1, 1], [], []>} : vector<128x160xbf16>, vector<160x64xbf16>, vector<128x64xf32> -> vector<128x64xf32>
    %31 = arith.addf %21, %30 : vector<128x64xf32>
    %c0_i32_22 = arith.constant 0 : i32
    %32 = arith.addi %2, %c0_i32_22 : i32
    %c3_i32 = arith.constant 3 : i32
    %33 = arith.addi %32, %c3_i32 : i32
    %c0_23 = arith.constant 0 : index
    %34 = arith.index_cast %33 : i32 to index
    %c0_24 = arith.constant 0 : index
    %c0_25 = arith.constant 0 : index
    %35 = vector.load %arg2[%c0_23, %34, %c0_24, %c0_25] : memref<1x20x16x160xbf16, #tpu.memory_space<vmem>>, vector<1x8x16x160xbf16>
    %36 = vector.shape_cast %35 : vector<1x8x16x160xbf16> to vector<8x16x160xbf16>
    %37 = vector.shape_cast %36 : vector<8x16x160xbf16> to vector<128x160xbf16>
    %c3 = arith.constant 3 : index
    %c0_26 = arith.constant 0 : index
    %c0_27 = arith.constant 0 : index
    %38 = vector.load %arg3[%c3, %c0_26, %c0_27] : memref<5x160x64xbf16, #tpu.memory_space<vmem>>, vector<1x160x64xbf16>
    %39 = vector.shape_cast %38 : vector<1x160x64xbf16> to vector<160x64xbf16>
    %cst_28 = arith.constant dense<0.000000e+00> : vector<128x64xf32>
    %40 = tpu.matmul %37, %39, %cst_28 {dimension_numbers = #tpu.dot_dimension_numbers<[1], [0], [0], [1], [0, 0, 1, 1], [], []>} : vector<128x160xbf16>, vector<160x64xbf16>, vector<128x64xf32> -> vector<128x64xf32>
    %41 = arith.addf %31, %40 : vector<128x64xf32>
    %c0_i32_29 = arith.constant 0 : i32
    %42 = arith.addi %2, %c0_i32_29 : i32
    %c4_i32 = arith.constant 4 : i32
    %43 = arith.addi %42, %c4_i32 : i32
    %c0_30 = arith.constant 0 : index
    %44 = arith.index_cast %43 : i32 to index
    %c0_31 = arith.constant 0 : index
    %c0_32 = arith.constant 0 : index
    %45 = vector.load %arg2[%c0_30, %44, %c0_31, %c0_32] : memref<1x20x16x160xbf16, #tpu.memory_space<vmem>>, vector<1x8x16x160xbf16>
    %46 = vector.shape_cast %45 : vector<1x8x16x160xbf16> to vector<8x16x160xbf16>
    %47 = vector.shape_cast %46 : vector<8x16x160xbf16> to vector<128x160xbf16>
    %c4 = arith.constant 4 : index
    %c0_33 = arith.constant 0 : index
    %c0_34 = arith.constant 0 : index
    %48 = vector.load %arg3[%c4, %c0_33, %c0_34] : memref<5x160x64xbf16, #tpu.memory_space<vmem>>, vector<1x160x64xbf16>
    %49 = vector.shape_cast %48 : vector<1x160x64xbf16> to vector<160x64xbf16>
    %cst_35 = arith.constant dense<0.000000e+00> : vector<128x64xf32>
    %50 = tpu.matmul %47, %49, %cst_35 {dimension_numbers = #tpu.dot_dimension_numbers<[1], [0], [0], [1], [0, 0, 1, 1], [], []>} : vector<128x160xbf16>, vector<160x64xbf16>, vector<128x64xf32> -> vector<128x64xf32>
    %51 = arith.addf %41, %50 : vector<128x64xf32>
    %52 = vector.broadcast %0 : vector<1x64xf32> to vector<128x64xf32>
    %53 = arith.addf %51, %52 : vector<128x64xf32>
    %cst_36 = arith.constant 0.000000e+00 : f32
    %54 = vector.broadcast %cst_36 : f32 to vector<128x64xf32>
    %55 = arith.maximumf %53, %54 : vector<128x64xf32>
    %56 = vector.shape_cast %55 : vector<128x64xf32> to vector<4x2x16x64xf32>
    %57 = vector.extract_strided_slice %56 {offsets = [0, 0, 0, 0], sizes = [4, 1, 16, 64], strides = [1, 1, 1, 1]} : vector<4x2x16x64xf32> to vector<4x1x16x64xf32>
    %58 = vector.shape_cast %57 : vector<4x1x16x64xf32> to vector<4x16x64xf32>
    %59 = vector.extract_strided_slice %56 {offsets = [0, 1, 0, 0], sizes = [4, 1, 16, 64], strides = [1, 1, 1, 1]} : vector<4x2x16x64xf32> to vector<4x1x16x64xf32>
    %60 = vector.shape_cast %59 : vector<4x1x16x64xf32> to vector<4x16x64xf32>
    %61 = arith.maximumf %58, %60 : vector<4x16x64xf32>
    %62 = vector.shape_cast %61 : vector<4x16x64xf32> to vector<64x64xf32>
    %c0_37 = arith.constant 0 : index
    %c0_38 = arith.constant 0 : index
    %63 = vector.load %arg6[%c0_37, %c0_38] : memref<64x64xf32, #tpu.memory_space<vmem>>, vector<64x64xf32>
    tpu.vector_store %arg6[%c0_37, %c0_38], %62 {strides = array<i32>} : memref<64x64xf32, #tpu.memory_space<vmem>>, vector<64x64xf32>,
    %c0_39 = arith.constant 0 : index
    %c0_40 = arith.constant 0 : index
    %64 = tpu.strided_load %arg6[%c0_39, %c0_40] {strides = array<i32: 2, 1>} : memref<64x64xf32, #tpu.memory_space<vmem>>, vector<32x64xf32>
    %c1_41 = arith.constant 1 : index
    %c0_42 = arith.constant 0 : index
    %65 = tpu.strided_load %arg6[%c1_41, %c0_42] {strides = array<i32: 2, 1>} : memref<64x64xf32, #tpu.memory_space<vmem>>, vector<32x64xf32>
    %66 = arith.maximumf %64, %65 : vector<32x64xf32>
    %c0_43 = arith.constant 0 : index
    %c0_44 = arith.constant 0 : index
    %c0_45 = arith.constant 0 : index
    %67 = vector.load %arg5[%c0_43, %c0_44, %c0_45] : memref<1x32x64xf32, #tpu.memory_space<vmem>>, vector<1x32x64xf32>
    %68 = vector.shape_cast %67 : vector<1x32x64xf32> to vector<32x64xf32>
    %69 = vector.shape_cast %66 : vector<32x64xf32> to vector<1x32x64xf32>
    tpu.vector_store %arg5[%c0_43, %c0_44, %c0_45], %69 {strides = array<i32>} : memref<1x32x64xf32, #tpu.memory_space<vmem>>, vector<1x32x64xf32>,
    return
  }
  func.func @transform_0(%arg0: i32, %arg1: i32) -> (i32, i32, i32, i32) {
    %c0_i32 = arith.constant 0 : i32
    %c0_i32_0 = arith.constant 0 : i32
    %c0_i32_1 = arith.constant 0 : i32
    %c0_i32_2 = arith.constant 0 : i32
    return %arg0, %c0_i32, %c0_i32_0, %c0_i32_1 : i32, i32, i32, i32
  }
  func.func @transform_1(%arg0: i32, %arg1: i32) -> (i32, i32, i32) {
    %c0_i32 = arith.constant 0 : i32
    %c0_i32_0 = arith.constant 0 : i32
    %c0_i32_1 = arith.constant 0 : i32
    %c0_i32_2 = arith.constant 0 : i32
    return %c0_i32, %c0_i32_0, %c0_i32_1 : i32, i32, i32
  }
  func.func @transform_2(%arg0: i32, %arg1: i32) -> (i32, i32) {
    %c0_i32 = arith.constant 0 : i32
    %c0_i32_0 = arith.constant 0 : i32
    %c0_i32_1 = arith.constant 0 : i32
    return %c0_i32, %c0_i32_0 : i32, i32
  }
  func.func @transform_3(%arg0: i32, %arg1: i32) -> (i32, i32, i32) {
    %c0_i32 = arith.constant 0 : i32
    %c0_i32_0 = arith.constant 0 : i32
    return %arg0, %arg1, %c0_i32 : i32, i32, i32
  }
}

module attributes {stable_mosaic.version = 11 : i64} {
  func.func @_linear_kernel(%arg0: i32, %arg1: memref<8x4096xf32, #tpu.memory_space<vmem>>, %arg2: memref<4096x128xbf16, #tpu.memory_space<vmem>>, %arg3: memref<1x128xf32, #tpu.memory_space<vmem>>, %arg4: memref<8x128xf32, #tpu.memory_space<vmem>>) attributes {dimension_semantics = [#tpu.dimension_semantics<parallel>], iteration_bounds = array<i64: 6>, scalar_prefetch = 0 : i64, scratch_operands = 0 : i64, tpu.core_type = #tpu.core_type<tc>, window_params = [{pipeline_mode = #tpu.pipeline_mode<synchronous>, transform_indices = @transform_0, window_bounds = array<i64: 8, 4096>}, {transform_indices = @transform_1, window_bounds = array<i64: 4096, 128>}, {transform_indices = @transform_2, window_bounds = array<i64: 1, 128>}, {transform_indices = @transform_3, window_bounds = array<i64: 8, 128>}]} {
    %c0 = arith.constant 0 : index
    %c0_0 = arith.constant 0 : index
    %0 = vector.load %arg1[%c0, %c0_0] : memref<8x4096xf32, #tpu.memory_space<vmem>>, vector<8x4096xf32>
    %1 = arith.truncf %0 : vector<8x4096xf32> to vector<8x4096xbf16>
    %c0_1 = arith.constant 0 : index
    %c0_2 = arith.constant 0 : index
    %2 = vector.load %arg2[%c0_1, %c0_2] : memref<4096x128xbf16, #tpu.memory_space<vmem>>, vector<4096x128xbf16>
    %cst = arith.constant dense<0.000000e+00> : vector<8x128xf32>
    %3 = tpu.matmul %1, %2, %cst {dimension_numbers = #tpu.dot_dimension_numbers<[1], [0], [0], [1], [0, 0, 1, 1], [], []>} : vector<8x4096xbf16>, vector<4096x128xbf16>, vector<8x128xf32> -> vector<8x128xf32>
    %c0_3 = arith.constant 0 : index
    %c0_4 = arith.constant 0 : index
    %4 = vector.load %arg3[%c0_3, %c0_4] : memref<1x128xf32, #tpu.memory_space<vmem>>, vector<1x128xf32>
    %5 = vector.broadcast %4 : vector<1x128xf32> to vector<8x128xf32>
    %6 = arith.addf %3, %5 : vector<8x128xf32>
    %c0_5 = arith.constant 0 : index
    %c0_6 = arith.constant 0 : index
    %7 = vector.load %arg4[%c0_5, %c0_6] : memref<8x128xf32, #tpu.memory_space<vmem>>, vector<8x128xf32>
    tpu.vector_store %arg4[%c0_5, %c0_6], %6 {strides = array<i32>} : memref<8x128xf32, #tpu.memory_space<vmem>>, vector<8x128xf32>,
    return
  }
  func.func @transform_0(%arg0: i32) -> (i32, i32) {
    %c0_i32 = arith.constant 0 : i32
    %c0_i32_0 = arith.constant 0 : i32
    %c0_i32_1 = arith.constant 0 : i32
    return %c0_i32, %c0_i32_0 : i32, i32
  }
  func.func @transform_1(%arg0: i32) -> (i32, i32) {
    %c0_i32 = arith.constant 0 : i32
    %c0_i32_0 = arith.constant 0 : i32
    return %c0_i32, %arg0 : i32, i32
  }
  func.func @transform_2(%arg0: i32) -> (i32, i32) {
    %c0_i32 = arith.constant 0 : i32
    %c0_i32_0 = arith.constant 0 : i32
    return %c0_i32, %arg0 : i32, i32
  }
  func.func @transform_3(%arg0: i32) -> (i32, i32) {
    %c0_i32 = arith.constant 0 : i32
    %c0_i32_0 = arith.constant 0 : i32
    return %c0_i32, %arg0 : i32, i32
  }
}

</mosaic_0001>

<bundles_post_ra>
// kernel: cnn_forward.4
= control target key start
LH: loop header
LB: loop body
LE: loop exit
PB: predicated region body
PF: predicated region fallthrough
CT: control target
= control target key end

     0   :  { %8 = vsyncpa [#allocation4], 0  ;;  %s7152_s0 = inlined_call_operand.hbm [shape: bf16[2,64,64,25], index: 0, kind: input, shape index: {}]   ;;  %s7153_s1 = inlined_call_operand.vmem [shape: bf16[1,25,16], index: 1, kind: input, shape index: {}]   ;;  %s7154_s2 = inlined_call_operand.hbm [shape: f32[1,16], index: 2, kind: input, shape index: {}]   ;;  %s7155_s3 = inlined_call_operand.vmem [shape: bf16[2,1024,16], index: 3, kind: output, shape index: {}]  }
   0x1   :  { %10 = vsyncpa [#allocation4 + $0x1], 0 }
   0x2   :  { %11 = vsyncpa [#allocation6], 0  ;;  %s5646_s12 = smov 0   ;;  %s5648_s13 = smov 0  }
   0x3   :  { %s5650_s14 = smov 0   ;;  %s5652_s15 = smov 0  }
   0x4   :  { %s5654_s16 = smov 0   ;;  %s5656_s17 = smov 0  }
   0x5   :  { %s5658_s18 = smov 0   ;;  %s5660_s19 = smov 0  }
   0x6 LB: > { %s4160_s20 = sadd.s32 4294967295, %s5619_s19   ;;  %p43_p0 = scmp.ne.s32.totalorder %s5599_s14, %s5595_s13  ;;  %s5619_s19 = sphi %s5660_s19, %s17_s19   ;;  %s5615_s18 = sphi %s5658_s18, %s7179_s18   ;;  %s5611_s17 = sphi %s5656_s17, %s7178_s17   ;;  %s5607_s16 = sphi %s5654_s16, %s7177_s16   ;;  %s5603_s15 = sphi %s5652_s15, %s7176_s15   ;;  %s5599_s14 = sphi %s5650_s14, %s7175_s14   ;;  %s5595_s13 = sphi %s5648_s13, %s7174_s13   ;;  %s5591_s12 = sphi %s5646_s12, %s7173_s12  }
   0x7   : > { %p44_p1 = scmp.eq.s32.totalorder %s5619_s19, 0  ;;  %p49_p2 = scmp.ne.s32.totalorder %s5595_s13, %s5591_s12 }
   0x8   : > { %p5689_p3 = scmp.eq.s32.totalorder %s4160_s20, 0  ;;  %p4162_p5 = scmp.ge.s32.totalorder %s5619_s19, 1 }
   0x9   : > { %p45_p4 = por %p44_p1, %p43_p0  ;;  %p130_p7 = scmp.lt.s32.totalorder %s5619_s19, 5 }
   0xa   : > { %s7161_s21 = scalar_select %p5689_p3, 1, 0 }
   0xb   : > { %p5696_p6 = por %p5689_p3, %p49_p2  ;;  %p5701_p8 = pnand %p4162_p5, %p130_p7 }
   0xc   : > { %s5621_s24 = smov [#allocation5]   ;;  %p5275_p10 = scmp.lt.s32.totalorder %s5619_s19, 4 }
   0xd   : > { %s7162_s22 = scalar_select %p5696_p6, 1, 0 }
   0xe   : > { %s7163_s23 = scalar_select %p5701_p8, 1, 0 }
   0xf   : > { %s146_s25 = sshll.u32 %s5621_s24, 4  ;;  %p5266_p9 = pneg %p5701_p8  ;;  %s147_s25 = int_to_ptr.vmem [resolvable:$true] %s146_s25 }
  0x10   : > { %p5714_p12 = pnand %p5275_p10, %p45_p4  ;;  %s5491_s30 = scalar_lea.hbm %s7154_s2, 16 }
  0x11   : > { %p5710_p11 = pnand %p5266_p9, %p5689_p3  ;;  %p5492_p13 = scmp.ne.s32.totalorder %s7154_s2, %s5491_s30 }
  0x12   : > { %s7165_s27 = scalar_select %p5714_p12, 1, 0 }
  0x13   : > { %p5493_p0 = pneg %p5710_p11  ;;  %p5498_p5 = scmp.lt.u32.totalorder %s5491_s30, %s7154_s2 }
  0x15   : > { %p5494_p1 = pnand %p5493_p0, %p5492_p13 }
  0x17   : > { %p5495_p2 = pneg %p5494_p1 }
  0x19   : > { %p5500_p4 = pnand %p5498_p5, %p5495_p2 }
  0x1b   : > { %5503 = shalt.err (!%p5500_p4)
}
  0x1c   : > { %s5504_s8 = scalar_lea.vmem %s147_s25, 16  ;;  %s5511_s9 = scalar_lea.vmem %s147_s25, 32 }
  0x1d   : > { %p5505_p7 = scmp.ne.s32.totalorder %s147_s25, %s5504_s8  ;;  %p5512_p3 = scmp.lt.s32.totalorder %s147_s25, %s147_s25 }
  0x1e   : > { %p5513_p6 = scmp.lt.s32.totalorder %s5511_s9, %s5504_s8 }
  0x1f   : > { %p5507_p9 = pnand %p5505_p7, %p5493_p0 }
  0x20   : > { %p5514_p8 = por %p5513_p6, %p5512_p3 }
  0x21   : > { %p5508_p10 = pneg %p5507_p9 }
  0x23   : > { %p5515_p12 = pnand %p5514_p8, %p5508_p10 }
  0x25   : > { %5518 = shalt.err (!%p5515_p12)
}
  0x26   : > { %5269 = dma.hbm_to_vmem [thread:$0]  (!%p5710_p11), %s7154_s2, 16, %s147_s25, [#allocation6]  }
  0x27   : > { %s26_s12 = sadd.s32 1, %s5611_s17  ;;  %s29_s20 = sadd.s32 1, %s5615_s18 }
  0x28   : > { %p27_p13 = scmp.ge.s32.totalorder %s26_s12, 2  ;;  %s157_s24 = sand.u32 1, %s5599_s14  }
  0x29   : > { %s4165_s28 = sshll.u32 %s157_s24, 11  ;;  %s4754_s26 = sshll.u32 %s5615_s18, 15 }
  0x2a   : > { %s7181_s12 = smov (%p27_p13, %s26_s12), 0  ;;  %s7183_s20 = smov (!%p27_p13, %s29_s20), %s5615_s18 }
  0x2b   : > { %p31_p3 = scmp.ge.s32.totalorder %s7183_s20, 2  ;;  %s5744_s4 = scalar_lea.hbm %s7152_s0, %s4754_s26 }
  0x2c   : > { %s161_s25 = scalar_lea.vmem [#allocation3], %s4165_s28  ;;  %s36_s6 = sadd.s32 1, %s5599_s14 }
  0x2d   : > { %s168_s5 = sshll.u32 %s161_s25, 4  ;;  %s7185_s20 = smov (%p31_p3, %s7183_s20), 0  ;;  %s5748_s5 = int_to_ptr.vmem [resolvable:$true] %s168_s5 }
  0x2e   : > { %s33_s7 = ssub.s32 %s5615_s18, %s7185_s20  ;;  %s5757_s9 = scalar_lea.sflag [#allocation4], %s157_s24 }
  0x2f   : > { %p5753_p6 = scmp.eq.s32.totalorder %s33_s7, 0  ;;  %s5519_s10 = scalar_lea.hbm %s5744_s4, 32768 }
  0x30   : > { %p5520_p8 = scmp.ne.s32.totalorder %s5744_s4, %s5519_s10  ;;  %p7167_p11 = scmp.ne.s32.totalorder %s7165_s27, 0 }
  0x31   : > { %s5524_s26 = scalar_lea.hbm %s7152_s0, 65536  ;;  %p5525_p2 = scmp.lt.u32.totalorder %s5744_s4, %s7152_s0 }
  0x32   : > { %p5521_p12 = pneg %p7167_p11  ;;  %p5526_p5 = scmp.lt.u32.totalorder %s5524_s26, %s5519_s10 }
  0x33   : > { %p5528_p7 = scmp.lt.u32.totalorder %s5519_s10, %s5744_s4 }
  0x34   : > { %p5522_p0 = pnand %p5521_p12, %p5520_p8  ;;  %p5527_p4 = por %p5526_p5, %p5525_p2 }
  0x36   : > { %p5523_p1 = pneg %p5522_p0  ;;  %p5529_p9 = por %p5528_p7, %p5527_p4 }
  0x38   : > { %p5530_p10 = pnand %p5529_p9, %p5523_p1 }
  0x3a   : > { %5533 = shalt.err (!%p5530_p10)
}
  0x3b   : > { %s5534_s24 = scalar_lea.vmem %s5748_s5, 32768  ;;  %s5622_s25 = smov [#allocation3]  }
  0x3c   : > { %p5535_p13 = scmp.ne.s32.totalorder %s5748_s5, %s5534_s24  ;;  %s5539_s7 = sshll.u32 %s5622_s25, 4  ;;  %s5540_s7 = int_to_ptr.vmem [resolvable:$false] %s5539_s7 }
  0x3d   : > { %s5541_s11 = scalar_lea.vmem %s5540_s7, 65536  ;;  %p5542_p0 = scmp.lt.s32.totalorder %s5748_s5, %s5540_s7 }
  0x3e   : > { %p5537_p3 = pnand %p5535_p13, %p5521_p12  ;;  %p5543_p2 = scmp.lt.s32.totalorder %s5541_s11, %s5534_s24 }
  0x40   : > { %p5538_p8 = pneg %p5537_p3  ;;  %p5544_p5 = por %p5543_p2, %p5542_p0 }
  0x42   : > { %p5545_p4 = pnand %p5544_p5, %p5538_p8 }
  0x44   : > { %5548 = shalt.err (!%p5545_p4)
}
  0x45   : > { %s5623_s10 = smov 64   ;;  %s5624_s28 = smov 4  }
  0x46   : > { %5273 = dma.hbm_to_vmem [thread:$0]  (!%p7167_p11), %s5744_s4, 32768, %s5748_s5, %s5757_s9, %s5623_s10, %s5623_s10, %s5624_s28  }
  0x47   : > { %s5790_s26 = scalar_select %p5753_p6, %s5599_s14, %s36_s6  }
  0x48   : > { %p7168_p12 = scmp.ne.s32.totalorder %s7163_s23, 0 }
  0x49   : > { %s182_s29 = sand.u32 (!%p7168_p12), 1, %s5595_s13   ;;  %p7169_p1 = scmp.ne.s32.totalorder (!%p7168_p12), %s7162_s22, 0 }
  0x4a   : > { %180 = sbr.rel (%p7168_p12) target bundleno = 586 (0x24a), region = 32  ;;  %s4169_s30 = sshll.u32 (!%p7168_p12), %s182_s29, 11 }
  0x4b   : > { %s183_s24 = scalar_lea.sflag (!%p7168_p12), [#allocation4], %s182_s29  ;;  %s186_s25 = scalar_lea.vmem (!%p7168_p12), [#allocation3], %s4169_s30 }
  0x51   : > { %5582 = dma.done.wait (%p7169_p1), %s183_s24, 32768  }
  0x52   : > { %5584 = vsyncadd (%p7169_p1), %s183_s24, 4294934528  ;;  %p7170_p11 = scmp.ne.s32.totalorder %s7161_s21, 0 }
  0x54   : > { %5586 = dma.done.wait (%p7170_p11), [#allocation6], 16  }
  0x55   : > { %5588 = vsyncadd (%p7170_p11), [#allocation6], 4294967280  ;;  %vm415_vm0 = vcmask 1043456   ;;  %vm416_vm1 = vcmask 1044480   ;;  %v5625_v0 = vmov 65535   ;;  %s4756_s23 = sshll.u32 %s5603_s15, 10 }
  0x56   : > { %v417_v1 = vsel %vm415_vm0, 4294967295, %v5625_v0  ;;  %v5345_v2 = vld [vmem:[%s7153_s1] sm:$0xff]   ;;  %vm366_vm2 = vcmask 203776   ;;  %s5812_s6 = scalar_lea.vmem %s186_s25, %s4756_s23 [#allocation3]  ;;  %v5347_v5 = vld [vmem:[%s7153_s1 + $0x8] sm:$0x1f]   ;;  %vm631_vm3 = vcmask 130048  }
  0x57   : > { %v5346_v3 = vld [vmem:[%s7153_s1] sm:$0xff]   ;;  %v5810_v4 = vsel %vm416_vm1, %v417_v1, 0  ;;  %4972 = vmatprep.subr.bf16.mxu0 %v5345_v2  ;;  %v5348_v6 = vld [vmem:[%s7153_s1 + $0x8] sm:$0x1f]   ;;  %v5354_v14 = vld [vmem:[%s5812_s6 + $0x10] sm:$0xff]   ;;  %s4171_s27 = sshll.u32 %s5603_s15, 6 }
  0x58   : > { %5008 = vmatprep.subr.bf16.mxu1 %v5346_v3  ;;  %4973 = vmatpush3.bf16.msra.mxu0 %v5345_v2  ;;  %v420_v7 = vand.u32 %v5347_v5, %v5810_v4  ;;  %v5349_v8 = vld [vmem:[%s5812_s6] sm:$0xff]   ;;  %v908_v9 = vand.u32 %v5348_v6, %v5810_v4  ;;  %v5351_v11 = vld [vmem:[%s5812_s6 + $0x8] sm:$0xff]   ;;  %v5355_v15 = vld [vmem:[%s5812_s6 + $0x90] sm:$0xff]   ;;  %p218_p6 = scmp.lt.s32.totalorder %s5607_s16, 1  ;;  %p6168_p7 = scmp.lt.s32.totalorder %s4171_s27, 127  ;;  %vm719_vm4 = vcmask 125952  }
  0x59   : > { %5009 = vmatpush3.bf16.msra.mxu1 %v5346_v3  ;;  %v5350_v10 = vld [vmem:[%s5812_s6 + $0x80] sm:$0xff]   ;;  %4976 = vmatprep.mubr.msk.bf16.mxu0 %vm366_vm2, %v5349_v8  ;;  %v5352_v12 = vld [vmem:[%s5812_s6 + $0x88] sm:$0xff]   ;;  %v5356_v16 = vld [vmem:[%s5812_s6 + $0x18] sm:$0xff]  }
  0x5a   : > { %4974 = vmatprep.subr.bf16.mxu0 %v420_v7  ;;  %5010 = vmatprep.subr.bf16.mxu1 %v908_v9  ;;  %v5353_v13 = vld [vmem:[%s7153_s1] sm:$0xff]   ;;  %v5357_v18 = vld [vmem:[%s5812_s6 + $0x98] sm:$0xff]   ;;  %v5361_v21 = vld [vmem:[%s5812_s6 + $0x28] sm:$0xff]   ;;  %s7187_s16 = smov (!%p218_p6, %s5607_s16), 1  ;;  %s7189_s27 = smov (!%p6168_p7, %s4171_s27), 127 }
  0x5b   : > { %5012 = vmatprep.mubr.msk.bf16.mxu1 %vm366_vm2, %v5350_v10  ;;  %v5358_v17 = vld [vmem:[%s7153_s1] sm:$0xff]   ;;  %v5362_v22 = vld [vmem:[%s5812_s6 + $0xa8] sm:$0xff]   ;;  %v5363_v23 = vld [vmem:[%s5812_s6 + $0x30] sm:$0xff]   ;;  %s4172_s5 = sshll.u32 %s7187_s16, 7 }
  0x5c   : > { %4975 = vmatpush3.bf16.msra.mxu0 %v420_v7  ;;  %v5359_v19 = vld [vmem:[%s5812_s6 + $0x20] sm:$0xff]   ;;  %v5364_v24 = vld [vmem:[%s5812_s6 + $0xb0] sm:$0xff]   ;;  %v5371_v25 = vld [vmem:[%s7153_s1 + $0x8] sm:$0x1f]   ;;  %s6223_s15 = sadd.s32 %s4172_s5, %s7189_s27 }
  0x5d   : > { %5011 = vmatpush3.bf16.msra.mxu1 %v908_v9  ;;  %5044 = vmatprep.subr.bf16.mxu0 %v5353_v13  ;;  %v5360_v20 = vld [vmem:[%s5812_s6 + $0xa0] sm:$0xff]   ;;  %v5365_v26 = vld [vmem:[%s5812_s6 + $0x38] sm:$0xff]   ;;  %v1379_v27 = vand.u32 %v5371_v25, %v5810_v4  ;;  %v5376_v30 = vld [vmem:[%s7153_s1 + $0x8] sm:$0x1f]   ;;  %s4173_s16 = sshll.u32 %s6223_s15, 2 }
  0x5e   : > { %5080 = vmatprep.subr.bf16.mxu1 %v5358_v17  ;;  %v5366_v28 = vld [vmem:[%s5812_s6 + $0xb8] sm:$0xff]   ;;  %v5367_v29 = vld [vmem:[%s5812_s6 + $0x40] sm:$0xff]   ;;  %v1850_v32 = vand.u32 %v5376_v30, %v5810_v4  ;;  %v5369_v33 = vld [vmem:[%s5812_s6 + $0x48] sm:$0xff]   ;;  %s6245_s8 = scalar_lea.vmem %s7155_s3, %s4173_s16 }
  0x5f   : > { %4977 = vmatmul.mubr.msk.bf16.vlgmr.msra.gmra.mrb[0].mxu0 %vm366_vm2, %v5351_v11  ;;  %v5368_v31 = vld [vmem:[%s5812_s6 + $0xc0] sm:$0xff]   ;;  %v5370_v34 = vld [vmem:[%s5812_s6 + $0xc8] sm:$0xff]   ;;  %v5372_v35 = vld [vmem:[%s5812_s6 + $0x50] sm:$0xff]  }
  0x60   : > { %5013 = vmatmul.mubr.msk.bf16.vlgmr.msra.gmra.mrb[0].mxu1 %vm366_vm2, %v5352_v12  ;;  %5045 = vmatpush3.bf16.msra.mxu0 %v5353_v13  ;;  %v5373_v36 = vld [vmem:[%s5812_s6 + $0xd0] sm:$0xff]   ;;  %v5389_v37 = vld [vmem:[%s7153_s1] sm:$0xff]   ;;  %v5374_v38 = vld [vmem:[%s5812_s6 + $0x58] sm:$0xff]  }
  0x61   : > { %4980 = vmatprep.mubr.msk.bf16.mxu0 %vm366_vm2, %v5354_v14  ;;  %5016 = vmatprep.mubr.msk.bf16.mxu1 %vm366_vm2, %v5355_v15  ;;  %v5375_v39 = vld [vmem:[%s5812_s6 + $0xd8] sm:$0xff]   ;;  %v5377_v40 = vld [vmem:[%s5812_s6 + $0x60] sm:$0xff]   ;;  %v5379_v43 = vld [vmem:[%s5812_s6 + $0x68] sm:$0xff]  }
  0x62   : > { %5081 = vmatpush3.bf16.msra.mxu1 %v5358_v17  ;;  %5046 = vmatprep.subr.bf16.mxu0 %v1379_v27  ;;  %v5378_v41 = vld [vmem:[%s5812_s6 + $0xe0] sm:$0xff]   ;;  %v5380_v44 = vld [vmem:[%s5812_s6 + $0xe8] sm:$0xff]   ;;  %v5381_v45 = vld [vmem:[%s5812_s6 + $0x70] sm:$0xff]  }
  0x63   : > { %5082 = vmatprep.subr.bf16.mxu1 %v1850_v32  ;;  %v5394_v42 = vld [vmem:[%s7153_s1] sm:$0xff]   ;;  %v5382_v46 = vld [vmem:[%s5812_s6 + $0xf0] sm:$0xff]   ;;  %v5383_v47 = vld [vmem:[%s5812_s6 + $0x78] sm:$0xff]  }
  0x64   : > { %5047 = vmatpush3.bf16.msra.mxu0 %v1379_v27  ;;  %v5384_v48 = vld [vmem:[%s5812_s6 + $0xf8] sm:$0xff]   ;;  %v5385_v49 = vld [vmem:[%s5812_s6 + $0x100] sm:$0xff]   ;;  %v5387_v51 = vld [vmem:[%s5812_s6 + $0x108] sm:$0xff]  }
  0x65   : > { %5116 = vmatprep.subr.bf16.mxu0 %v5389_v37  ;;  %v5386_v50 = vld [vmem:[%s5812_s6 + $0x180] sm:$0xff]   ;;  %v5388_v52 = vld [vmem:[%s5812_s6 + $0x188] sm:$0xff]   ;;  %v5390_v55 = vld [vmem:[%s5812_s6 + $0x110] sm:$0xff]  }
  0x66   : > { %5083 = vmatpush3.bf16.msra.mxu1 %v1850_v32  ;;  %v5407_v53 = vld [vmem:[%s7153_s1 + $0x8] sm:$0x1f]   ;;  %v5391_v56 = vld [vmem:[%s5812_s6 + $0x190] sm:$0xff]   ;;  %v5392_v59 = vld [vmem:[%s5812_s6 + $0x118] sm:$0xff]  }
  0x67   : > { %4981 = vmatmul.mubr.msk.bf16.gmra.mrb[4].mxu0 %vm366_vm2, %v5356_v16  ;;  %5152 = vmatprep.subr.bf16.mxu1 %v5394_v42  ;;  %v5412_v54 = vld [vmem:[%s7153_s1 + $0x8] sm:$0x1f]   ;;  %v2321_v57 = vand.u32 %v5407_v53, %v5810_v4  ;;  %v5393_v60 = vld [vmem:[%s5812_s6 + $0x198] sm:$0xff]   ;;  %v5395_v61 = vld [vmem:[%s5812_s6 + $0x120] sm:$0xff]  }
  0x68   : > { %5017 = vmatmul.mubr.msk.bf16.gmra.mrb[4].mxu1 %vm366_vm2, %v5357_v18  ;;  %4984 = vmatprep.mubr.msk.bf16.mxu0 %vm366_vm2, %v5359_v19  ;;  %v2792_v58 = vand.u32 %v5412_v54, %v5810_v4  ;;  %v5396_v62 = vld [vmem:[%s5812_s6 + $0x1a0] sm:$0xff]   ;;  %v5397_v0 = vld [vmem:[%s5812_s6 + $0x128] sm:$0xff]   ;;  %v5399_v3 = vld [vmem:[%s5812_s6 + $0x130] sm:$0xff]  }
  0x69   : > { %5020 = vmatprep.mubr.msk.bf16.mxu1 %vm366_vm2, %v5360_v20  ;;  %v5933_v63 = vld [vmem:[%s7153_s1] sm:$0xff]   ;;  %v5398_v2 = vld [vmem:[%s5812_s6 + $0x1a8] sm:$0xff]   ;;  %v5400_v5 = vld [vmem:[%s5812_s6 + $0x1b0] sm:$0xff]  }
  0x6a   : > { %v5430_v1 = vld [vmem:[%s7153_s1] sm:$0xff]   ;;  %v5401_v6 = vld [vmem:[%s5812_s6 + $0x138] sm:$0xff]   ;;  %v5405_v10 = vld [vmem:[%s5812_s6 + $0x148] sm:$0xff]  }
  0x6b   : > { %v5402_v7 = vld [vmem:[%s5812_s6 + $0x1b8] sm:$0xff]   ;;  %v5403_v8 = vld [vmem:[%s5812_s6 + $0x140] sm:$0xff]   ;;  %v5406_v11 = vld [vmem:[%s5812_s6 + $0x1c8] sm:$0xff]  }
  0x6c   : > { %v5404_v9 = vld [vmem:[%s5812_s6 + $0x1c0] sm:$0xff]   ;;  %v5408_v12 = vld [vmem:[%s5812_s6 + $0x150] sm:$0xff]   ;;  %v5410_v14 = vld [vmem:[%s5812_s6 + $0x158] sm:$0xff]  }
  0x6d   : > { %v5409_v13 = vld [vmem:[%s5812_s6 + $0x1d0] sm:$0xff]   ;;  %v5411_v15 = vld [vmem:[%s5812_s6 + $0x1d8] sm:$0xff]   ;;  %v5413_v16 = vld [vmem:[%s5812_s6 + $0x160] sm:$0xff]  }
  0x6e   : > { %v5414_v17 = vld [vmem:[%s5812_s6 + $0x1e0] sm:$0xff]   ;;  %v5415_v18 = vld [vmem:[%s5812_s6 + $0x168] sm:$0xff]   ;;  %v5417_v20 = vld [vmem:[%s5812_s6 + $0x170] sm:$0xff]  }
  0x6f   : > { %4985 = vmatmul.mubr.msk.bf16.gmra.mrb[8].mxu0 %vm366_vm2, %v5361_v21  ;;  %v5416_v19 = vld [vmem:[%s5812_s6 + $0x1e8] sm:$0xff]   ;;  %v5418_v21 = vld [vmem:[%s5812_s6 + $0x1f0] sm:$0xff]   ;;  %v5422_v25 = vld [vmem:[%s5812_s6 + $0x280] sm:$0xff]  }
  0x70   : > { %5021 = vmatmul.mubr.msk.bf16.gmra.mrb[8].mxu1 %vm366_vm2, %v5362_v22  ;;  %4988 = vmatprep.mubr.msk.bf16.mxu0 %vm366_vm2, %v5363_v23  ;;  %v5419_v22 = vld [vmem:[%s5812_s6 + $0x178] sm:$0xff]   ;;  %v5424_v27 = vld [vmem:[%s5812_s6 + $0x288] sm:$0xff]   ;;  %v5426_v30 = vld [vmem:[%s5812_s6 + $0x210] sm:$0xff]  }
  0x71   : > { %5024 = vmatprep.mubr.msk.bf16.mxu1 %vm366_vm2, %v5364_v24  ;;  %v5420_v23 = vld [vmem:[%s5812_s6 + $0x1f8] sm:$0xff]   ;;  %v5421_v24 = vld [vmem:[%s5812_s6 + $0x200] sm:$0xff]   ;;  %v5451_v53 = vld [vmem:[%s5812_s6 + $0x268] sm:$0xff]  }
  0x72   : > { %v5452_v54 = vld [vmem:[%s5812_s6 + $0x2e8] sm:$0xff]  }
  0x77   : > { %4989 = vmatmul.mubr.msk.bf16.gmra.mrb[12].mxu0 %vm366_vm2, %v5365_v26  ;;  %v5423_v26 = vld [vmem:[%s5812_s6 + $0x208] sm:$0xff]  }
  0x78   : > { %5025 = vmatmul.mubr.msk.bf16.gmra.mrb[12].mxu1 %vm366_vm2, %v5366_v28  ;;  %4992 = vmatprep.mubr.msk.bf16.mxu0 %vm366_vm2, %v5367_v29  ;;  %v5443_v28 = vld [vmem:[%s7153_s1 + $0x8] sm:$0x1f]  }
  0x79   : > { %5028 = vmatprep.mubr.msk.bf16.mxu1 %vm366_vm2, %v5368_v31  ;;  %v5448_v29 = vld [vmem:[%s7153_s1 + $0x8] sm:$0x1f]   ;;  %v5427_v31 = vld [vmem:[%s5812_s6 + $0x290] sm:$0xff]   ;;  %v3263_v32 = vand.u32 %v5443_v28, %v5810_v4 }
  0x7f   : > { %4993 = vmatmul.mubr.msk.bf16.gmra.mrb[16].mxu0 %vm366_vm2, %v5369_v33  ;;  %v3734_v33 = vand.u32 %v5448_v29, %v5810_v4  ;;  %v5432_v4 = vld [vmem:[%s5812_s6 + $0x2a0] sm:$0xff]   ;;  %v5476_v29 = vld [vmem:[%s5812_s6 + $0x3c8] sm:$0xff]  }
  0x80   : > { %5029 = vmatmul.mubr.msk.bf16.gmra.mrb[16].mxu1 %vm366_vm2, %v5370_v34  ;;  %4996 = vmatprep.mubr.msk.bf16.mxu0 %vm366_vm2, %v5372_v35  ;;  %v5428_v34 = vld [vmem:[%s5812_s6 + $0x218] sm:$0xff]  }
  0x81   : > { %5032 = vmatprep.mubr.msk.bf16.mxu1 %vm366_vm2, %v5373_v36  ;;  %v5429_v35 = vld [vmem:[%s5812_s6 + $0x298] sm:$0xff]   ;;  %v5431_v36 = vld [vmem:[%s5812_s6 + $0x220] sm:$0xff]  }
  0x87   : > { %4997 = vmatmul.mubr.msk.bf16.gmra.mrb[20].mxu0 %vm366_vm2, %v5374_v38  ;;  %v5434_v38 = vld [vmem:[%s5812_s6 + $0x2a8] sm:$0xff]  }
  0x88   : > { %5033 = vmatmul.mubr.msk.bf16.gmra.mrb[20].mxu1 %vm366_vm2, %v5375_v39  ;;  %5000 = vmatprep.mubr.msk.bf16.mxu0 %vm366_vm2, %v5377_v40  ;;  %v5435_v39 = vld [vmem:[%s5812_s6 + $0x230] sm:$0xff]  }
  0x89   : > { %5036 = vmatprep.mubr.msk.bf16.mxu1 %vm366_vm2, %v5378_v41  ;;  %v5436_v40 = vld [vmem:[%s5812_s6 + $0x2b0] sm:$0xff]   ;;  %v5437_v41 = vld [vmem:[%s5812_s6 + $0x238] sm:$0xff]  }
  0x8f   : > { %5001 = vmatmul.mubr.msk.bf16.gmra.mrb[24].mxu0 %vm366_vm2, %v5379_v43  ;;  %v5439_v43 = vld [vmem:[%s5812_s6 + $0x240] sm:$0xff]  }
  0x90   : > { %5037 = vmatmul.mubr.msk.bf16.gmra.mrb[24].mxu1 %vm366_vm2, %v5380_v44  ;;  %5004 = vmatprep.mubr.msk.bf16.mxu0 %vm366_vm2, %v5381_v45  ;;  %v5440_v44 = vld [vmem:[%s5812_s6 + $0x2c0] sm:$0xff]   ;;  %v5441_v45 = vld [vmem:[%s5812_s6 + $0x248] sm:$0xff]  }
  0x91   : > { %5040 = vmatprep.mubr.msk.bf16.mxu1 %vm366_vm2, %v5382_v46  ;;  %v5442_v46 = vld [vmem:[%s5812_s6 + $0x2c8] sm:$0xff]  }
  0x97   : > { %5005 = vmatmul.mubr.msk.bf16.gmra.mrb[28].mxu0 %vm366_vm2, %v5383_v47  ;;  %v5444_v47 = vld [vmem:[%s5812_s6 + $0x250] sm:$0xff]  }
  0x98   : > { %5041 = vmatmul.mubr.msk.bf16.gmra.mrb[28].mxu1 %vm366_vm2, %v5384_v48  ;;  %5048 = vmatprep.mubr.msk.bf16.mxu0 %vm366_vm2, %v5385_v49  ;;  %v5445_v48 = vld [vmem:[%s5812_s6 + $0x2d0] sm:$0xff]   ;;  %v5446_v49 = vld [vmem:[%s5812_s6 + $0x258] sm:$0xff]  }
  0x99   : > { %5084 = vmatprep.mubr.msk.bf16.mxu1 %vm366_vm2, %v5386_v50  ;;  %v5447_v50 = vld [vmem:[%s5812_s6 + $0x2d8] sm:$0xff]  }
  0x9f   : > { %5049 = vmatmul.mubr.msk.bf16.vlgmr.msra.gmra.mrb[32].mxu0 %vm366_vm2, %v5387_v51  ;;  %v5449_v51 = vld [vmem:[%s5812_s6 + $0x260] sm:$0xff]  }
  0xa0   : > { %5085 = vmatmul.mubr.msk.bf16.vlgmr.msra.gmra.mrb[32].mxu1 %vm366_vm2, %v5388_v52  ;;  %5117 = vmatpush3.bf16.msra.mxu0 %v5389_v37  ;;  %v5433_v37 = vld [vmem:[%s5812_s6 + $0x228] sm:$0xff]   ;;  %v5450_v52 = vld [vmem:[%s5812_s6 + $0x2e0] sm:$0xff]  }
  0xa1   : > { %5052 = vmatprep.mubr.msk.bf16.mxu0 %vm366_vm2, %v5390_v55  ;;  %5088 = vmatprep.mubr.msk.bf16.mxu1 %vm366_vm2, %v5391_v56  ;;  %v5453_v55 = vld [vmem:[%s5812_s6 + $0x270] sm:$0xff]  }
  0xa2   : > { %5153 = vmatpush3.bf16.msra.mxu1 %v5394_v42  ;;  %5118 = vmatprep.subr.bf16.mxu0 %v2321_v57  ;;  %v5438_v42 = vld [vmem:[%s5812_s6 + $0x2b8] sm:$0xff]   ;;  %v5454_v56 = vld [vmem:[%s5812_s6 + $0x2f0] sm:$0xff]  }
  0xa3   : > { %5154 = vmatprep.subr.bf16.mxu1 %v2792_v58 }
  0xa4   : > { %5119 = vmatpush3.bf16.msra.mxu0 %v2321_v57  ;;  %v5455_v57 = vld [vmem:[%s5812_s6 + $0x278] sm:$0xff]  }
  0xa5   : > { %5188 = vmatprep.subr.bf16.mxu0 %v5933_v63 }
  0xa6   : > { %5155 = vmatpush3.bf16.msra.mxu1 %v2792_v58  ;;  %v5456_v58 = vld [vmem:[%s5812_s6 + $0x2f8] sm:$0xff]  }
  0xa7   : > { %5053 = vmatmul.mubr.msk.bf16.gmra.mrb[36].mxu0 %vm366_vm2, %v5392_v59  ;;  %5224 = vmatprep.subr.bf16.mxu1 %v5430_v1  ;;  %v5457_v59 = vld [vmem:[%s5812_s6 + $0x300] sm:$0xff]  }
  0xa8   : > { %5089 = vmatmul.mubr.msk.bf16.gmra.mrb[36].mxu1 %vm366_vm2, %v5393_v60  ;;  %5056 = vmatprep.mubr.msk.bf16.mxu0 %vm366_vm2, %v5395_v61  ;;  %v5458_v60 = vld [vmem:[%s5812_s6 + $0x380] sm:$0xff]   ;;  %v5459_v61 = vld [vmem:[%s5812_s6 + $0x308] sm:$0xff]  }
  0xa9   : > { %5092 = vmatprep.mubr.msk.bf16.mxu1 %vm366_vm2, %v5396_v62  ;;  %v5460_v62 = vld [vmem:[%s5812_s6 + $0x388] sm:$0xff]  }
  0xaf   : > { %5057 = vmatmul.mubr.msk.bf16.gmra.mrb[40].mxu0 %vm366_vm2, %v5397_v0  ;;  %v5462_v0 = vld [vmem:[%s5812_s6 + $0x390] sm:$0xff]  }
  0xb0   : > { %5093 = vmatmul.mubr.msk.bf16.gmra.mrb[40].mxu1 %vm366_vm2, %v5398_v2  ;;  %5060 = vmatprep.mubr.msk.bf16.mxu0 %vm366_vm2, %v5399_v3  ;;  %v5464_v2 = vld [vmem:[%s5812_s6 + $0x398] sm:$0xff]   ;;  %v5465_v3 = vld [vmem:[%s5812_s6 + $0x320] sm:$0xff]  }
  0xb1   : > { %5096 = vmatprep.mubr.msk.bf16.mxu1 %vm366_vm2, %v5400_v5  ;;  %v5466_v5 = vld [vmem:[%s5812_s6 + $0x3a0] sm:$0xff]  }
  0xb7   : > { %5061 = vmatmul.mubr.msk.bf16.gmra.mrb[44].mxu0 %vm366_vm2, %v5401_v6  ;;  %v5467_v6 = vld [vmem:[%s5812_s6 + $0x328] sm:$0xff]  }
  0xb8   : > { %5097 = vmatmul.mubr.msk.bf16.gmra.mrb[44].mxu1 %vm366_vm2, %v5402_v7  ;;  %5064 = vmatprep.mubr.msk.bf16.mxu0 %vm366_vm2, %v5403_v8  ;;  %v5468_v7 = vld [vmem:[%s5812_s6 + $0x3a8] sm:$0xff]   ;;  %v5469_v8 = vld [vmem:[%s5812_s6 + $0x330] sm:$0xff]  }
  0xb9   : > { %5100 = vmatprep.mubr.msk.bf16.mxu1 %vm366_vm2, %v5404_v9  ;;  %v5470_v9 = vld [vmem:[%s5812_s6 + $0x3b0] sm:$0xff]  }
  0xbf   : > { %5065 = vmatmul.mubr.msk.bf16.gmra.mrb[48].mxu0 %vm366_vm2, %v5405_v10 }
  0xc0   : > { %5101 = vmatmul.mubr.msk.bf16.gmra.mrb[48].mxu1 %vm366_vm2, %v5406_v11  ;;  %5068 = vmatprep.mubr.msk.bf16.mxu0 %vm366_vm2, %v5408_v12  ;;  %v5471_v12 = vld [vmem:[%s5812_s6 + $0x338] sm:$0xff]  }
  0xc1   : > { %5104 = vmatprep.mubr.msk.bf16.mxu1 %vm366_vm2, %v5409_v13 }
  0xc7   : > { %5069 = vmatmul.mubr.msk.bf16.gmra.mrb[52].mxu0 %vm366_vm2, %v5410_v14 }
  0xc8   : > { %5105 = vmatmul.mubr.msk.bf16.gmra.mrb[52].mxu1 %vm366_vm2, %v5411_v15  ;;  %5072 = vmatprep.mubr.msk.bf16.mxu0 %vm366_vm2, %v5413_v16  ;;  %v5472_v15 = vld [vmem:[%s5812_s6 + $0x3b8] sm:$0xff]  }
  0xc9   : > { %5108 = vmatprep.mubr.msk.bf16.mxu1 %vm366_vm2, %v5414_v17  ;;  %v5473_v17 = vld [vmem:[%s5812_s6 + $0x340] sm:$0xff]  }
  0xcf   : > { %5073 = vmatmul.mubr.msk.bf16.gmra.mrb[56].mxu0 %vm366_vm2, %v5415_v18 }
  0xd0   : > { %5109 = vmatmul.mubr.msk.bf16.gmra.mrb[56].mxu1 %vm366_vm2, %v5416_v19  ;;  %5076 = vmatprep.mubr.msk.bf16.mxu0 %vm366_vm2, %v5417_v20  ;;  %v5474_v20 = vld [vmem:[%s5812_s6 + $0x3c0] sm:$0xff]  }
  0xd1   : > { %5112 = vmatprep.mubr.msk.bf16.mxu1 %vm366_vm2, %v5418_v21 }
  0xd7   : > { %5077 = vmatmul.mubr.msk.bf16.gmra.mrb[60].mxu0 %vm366_vm2, %v5419_v22  ;;  %v6096_v22 = vld [vmem:[#allocation5] ss:$0 sm:$0xff] }
  0xd8   : > { %5113 = vmatmul.mubr.msk.bf16.gmra.mrb[60].mxu1 %vm366_vm2, %v5420_v23  ;;  %5120 = vmatprep.mubr.msk.bf16.mxu0 %vm366_vm2, %v5421_v24 }
  0xd9   : > { %5156 = vmatprep.mubr.msk.bf16.mxu1 %vm366_vm2, %v5422_v25 }
  0xdf   : > { %5121 = vmatmul.mubr.msk.bf16.vlgmr.msra.gmra.mrb[64].mxu0 %vm366_vm2, %v5423_v26  ;;  %v5475_v26 = vld [vmem:[%s5812_s6 + $0x348] sm:$0xff]  }
  0xe0   : > { %5157 = vmatmul.mubr.msk.bf16.vlgmr.msra.gmra.mrb[64].mxu1 %vm366_vm2, %v5424_v27  ;;  %5189 = vmatpush3.bf16.msra.mxu0 %v5933_v63  ;;  %v5461_v63 = vld [vmem:[%s5812_s6 + $0x310] sm:$0xff]  }
  0xe1   : > { %5124 = vmatprep.mubr.msk.bf16.mxu0 %vm366_vm2, %v5426_v30  ;;  %5160 = vmatprep.mubr.msk.bf16.mxu1 %vm366_vm2, %v5427_v31  ;;  %v5477_v30 = vld [vmem:[%s5812_s6 + $0x350] sm:$0xff]  }
  0xe2   : > { %5225 = vmatpush3.bf16.msra.mxu1 %v5430_v1  ;;  %5190 = vmatprep.subr.bf16.mxu0 %v3263_v32  ;;  %v5463_v1 = vld [vmem:[%s5812_s6 + $0x318] sm:$0xff]  }
  0xe3   : > { %5226 = vmatprep.subr.bf16.mxu1 %v3734_v33 }
  0xe4   : > { %5191 = vmatpush3.bf16.msra.mxu0 %v3263_v32 }
  0xe6   : > { %5227 = vmatpush3.bf16.msra.mxu1 %v3734_v33 }
  0xe7   : > { %5125 = vmatmul.mubr.msk.bf16.gmra.mrb[68].mxu0 %vm366_vm2, %v5428_v34 }
  0xe8   : > { %5161 = vmatmul.mubr.msk.bf16.gmra.mrb[68].mxu1 %vm366_vm2, %v5429_v35  ;;  %5128 = vmatprep.mubr.msk.bf16.mxu0 %vm366_vm2, %v5431_v36 }
  0xe9   : > { %5164 = vmatprep.mubr.msk.bf16.mxu1 %vm366_vm2, %v5432_v4  ;;  %v5478_v4 = vld [vmem:[%s5812_s6 + $0x3d0] sm:$0xff]  }
  0xef   : > { %5129 = vmatmul.mubr.msk.bf16.gmra.mrb[72].mxu0 %vm366_vm2, %v5433_v37 }
  0xf0   : > { %5165 = vmatmul.mubr.msk.bf16.gmra.mrb[72].mxu1 %vm366_vm2, %v5434_v38  ;;  %5132 = vmatprep.mubr.msk.bf16.mxu0 %vm366_vm2, %v5435_v39 }
  0xf1   : > { %5168 = vmatprep.mubr.msk.bf16.mxu1 %vm366_vm2, %v5436_v40 }
  0xf7   : > { %5133 = vmatmul.mubr.msk.bf16.gmra.mrb[76].mxu0 %vm366_vm2, %v5437_v41 }
  0xf8   : > { %5169 = vmatmul.mubr.msk.bf16.gmra.mrb[76].mxu1 %vm366_vm2, %v5438_v42  ;;  %5136 = vmatprep.mubr.msk.bf16.mxu0 %vm366_vm2, %v5439_v43 }
  0xf9   : > { %5172 = vmatprep.mubr.msk.bf16.mxu1 %vm366_vm2, %v5440_v44 }
  0xff   : > { %5137 = vmatmul.mubr.msk.bf16.gmra.mrb[80].mxu0 %vm366_vm2, %v5441_v45 }
 0x100   : > { %5173 = vmatmul.mubr.msk.bf16.gmra.mrb[80].mxu1 %vm366_vm2, %v5442_v46  ;;  %5140 = vmatprep.mubr.msk.bf16.mxu0 %vm366_vm2, %v5444_v47 }
 0x101   : > { %5176 = vmatprep.mubr.msk.bf16.mxu1 %vm366_vm2, %v5445_v48 }
 0x107   : > { %5141 = vmatmul.mubr.msk.bf16.gmra.mrb[84].mxu0 %vm366_vm2, %v5446_v49 }
 0x108   : > { %5177 = vmatmul.mubr.msk.bf16.gmra.mrb[84].mxu1 %vm366_vm2, %v5447_v50  ;;  %5144 = vmatprep.mubr.msk.bf16.mxu0 %vm366_vm2, %v5449_v51 }
 0x109   : > { %5180 = vmatprep.mubr.msk.bf16.mxu1 %vm366_vm2, %v5450_v52 }
 0x10f   : > { %5145 = vmatmul.mubr.msk.bf16.gmra.mrb[88].mxu0 %vm366_vm2, %v5451_v53 }
 0x110   : > { %5181 = vmatmul.mubr.msk.bf16.gmra.mrb[88].mxu1 %vm366_vm2, %v5452_v54  ;;  %5148 = vmatprep.mubr.msk.bf16.mxu0 %vm366_vm2, %v5453_v55 }
 0x111   : > { %5184 = vmatprep.mubr.msk.bf16.mxu1 %vm366_vm2, %v5454_v56 }
 0x117   : > { %5149 = vmatmul.mubr.msk.bf16.gmra.mrb[92].mxu0 %vm366_vm2, %v5455_v57 }
 0x118   : > { %5185 = vmatmul.mubr.msk.bf16.gmra.mrb[92].mxu1 %vm366_vm2, %v5456_v58  ;;  %5192 = vmatprep.mubr.msk.bf16.mxu0 %vm366_vm2, %v5457_v59  ;;  %v5479_v58 = vld [vmem:[%s5812_s6 + $0x358] sm:$0xff]  }
 0x119   : > { %5228 = vmatprep.mubr.msk.bf16.mxu1 %vm366_vm2, %v5458_v60 }
 0x11f   : > { %5193 = vmatmul.mubr.msk.bf16.vlgmr.msra.gmra.mrb[96].mxu0 %vm366_vm2, %v5459_v61 }
 0x120   : > { %5229 = vmatmul.mubr.msk.bf16.vlgmr.msra.gmra.mrb[96].mxu1 %vm366_vm2, %v5460_v62  ;;  %5196 = vmatprep.mubr.msk.bf16.mxu0 %vm366_vm2, %v5461_v63 }
 0x121   : > { %5232 = vmatprep.mubr.msk.bf16.mxu1 %vm366_vm2, %v5462_v0 }
 0x127   : > { %5197 = vmatmul.mubr.msk.bf16.gmra.mrb[100].mxu0 %vm366_vm2, %v5463_v1  ;;  %v5480_v1 = vld [vmem:[%s5812_s6 + $0x3d8] sm:$0xff]  }
 0x128   : > { %5233 = vmatmul.mubr.msk.bf16.gmra.mrb[100].mxu1 %vm366_vm2, %v5464_v2  ;;  %5200 = vmatprep.mubr.msk.bf16.mxu0 %vm366_vm2, %v5465_v3  ;;  %v5481_v2 = vld [vmem:[%s5812_s6 + $0x360] sm:$0xff]  }
 0x129   : > { %5236 = vmatprep.mubr.msk.bf16.mxu1 %vm366_vm2, %v5466_v5 }
 0x12f   : > { %5201 = vmatmul.mubr.msk.bf16.gmra.mrb[104].mxu0 %vm366_vm2, %v5467_v6 }
 0x130   : > { %5237 = vmatmul.mubr.msk.bf16.gmra.mrb[104].mxu1 %vm366_vm2, %v5468_v7  ;;  %5204 = vmatprep.mubr.msk.bf16.mxu0 %vm366_vm2, %v5469_v8 }
 0x131   : > { %5240 = vmatprep.mubr.msk.bf16.mxu1 %vm366_vm2, %v5470_v9 }
 0x132   : > { %v4978_v10 = vpop.f32.mrb[0].mxu0 }
 0x133   : > { %v456_v11 = vpop.f32.mrb[1].mxu0  ;;  %v5014_v13 = vpop.f32.mrb[0].mxu1  ;;  %v465_v31 = vadd.f32 %v4978_v10, %v6096_v22  ;;  %v5482_v10 = vld [vmem:[%s5812_s6 + $0x3e0] sm:$0xff]  }
 0x134   : > { %v4979_v14 = vpop.f32.mrb[2].mxu0  ;;  %v944_v16 = vpop.f32.mrb[1].mxu1  ;;  %v6103_v32 = vadd.f32 %v6096_v22, %v456_v11  ;;  %v953_v34 = vadd.f32 %v5014_v13, %v6096_v22 }
 0x135   : > { %v459_v18 = vpop.f32.mrb[3].mxu0  ;;  %v5015_v19 = vpop.f32.mrb[2].mxu1  ;;  %v6106_v33 = vadd.f32 %v4979_v14, %v6096_v22  ;;  %v6116_v38 = vadd.f32 %v6096_v22, %v944_v16  ;;  %v585_v43 = vmax.f32 %v465_v31, 0.0 }
 0x136   : > { %v947_v21 = vpop.f32.mrb[3].mxu1  ;;  %v6113_v37 = vadd.f32 %v6096_v22, %v459_v18  ;;  %v6119_v39 = vadd.f32 %v5015_v19, %v6096_v22  ;;  %v583_v44 = vmax.f32 %v6103_v32, 0.0  ;;  %v1073_v46 = vmax.f32 %v953_v34, 0.0 }
 0x137   : > { %5205 = vmatmul.mubr.msk.bf16.gmra.mrb[108].mxu0 %vm366_vm2, %v5471_v12  ;;  %v6122_v40 = vadd.f32 %v6096_v22, %v947_v21  ;;  %v586_v45 = vmax.f32 %v6106_v33, 0.0  ;;  %v1071_v48 = vmax.f32 %v6116_v38, 0.0 }
 0x138   : > { %5241 = vmatmul.mubr.msk.bf16.gmra.mrb[108].mxu1 %vm366_vm2, %v5472_v15  ;;  %5208 = vmatprep.mubr.msk.bf16.mxu0 %vm366_vm2, %v5473_v17  ;;  %v584_v47 = vmax.f32 %v6113_v37, 0.0  ;;  %v1074_v49 = vmax.f32 %v6119_v39, 0.0  ;;  %v5483_v39 = vld [vmem:[%s5812_s6 + $0x368] sm:$0xff]  }
 0x139   : > { %5244 = vmatprep.mubr.msk.bf16.mxu1 %vm366_vm2, %v5474_v20  ;;  %v1072_v50 = vmax.f32 %v6122_v40, 0.0 }
 0x13a   : > { %v4982_v23 = vpop.f32.mrb[4].mxu0 }
 0x13b   : > { %v472_v24 = vpop.f32.mrb[5].mxu0  ;;  %v5018_v25 = vpop.f32.mrb[4].mxu1  ;;  %v6127_v42 = vadd.f32 %v4982_v23, %v6096_v22 }
 0x13c   : > { %v4983_v27 = vpop.f32.mrb[6].mxu0  ;;  %v960_v28 = vpop.f32.mrb[5].mxu1  ;;  %v6141_v53 = vadd.f32 %v6096_v22, %v472_v24  ;;  %v6144_v54 = vadd.f32 %v5018_v25, %v6096_v22 }
 0x13d   : > { %v475_v35 = vpop.f32.mrb[7].mxu0  ;;  %v6109_v36 = vpop.f32.mrb[6].mxu1  ;;  %v589_v52 = vmax.f32 %v6127_v42, 0.0  ;;  %v6151_v59 = vadd.f32 %v4983_v27, %v6096_v22  ;;  %v6154_v60 = vadd.f32 %v6096_v22, %v960_v28 }
 0x13e   : > { %v6124_v41 = vpop.f32.mrb[7].mxu1  ;;  %v6161_v3 = vadd.f32 %v6096_v22, %v475_v35  ;;  %v6187_v25 = vadd.f32 %v6109_v36, %v6096_v22 }
 0x13f   : > { %5209 = vmatmul.mubr.msk.bf16.gmra.mrb[112].mxu0 %vm366_vm2, %v5475_v26  ;;  %v590_v34 = vmax.f32 %v6151_v59, 0.0  ;;  %v1075_v35 = vmax.f32 %v6154_v60, 0.0 }
 0x140   : > { %5245 = vmatmul.mubr.msk.bf16.gmra.mrb[112].mxu1 %vm366_vm2, %v5476_v29  ;;  %5212 = vmatprep.mubr.msk.bf16.mxu0 %vm366_vm2, %v5477_v30  ;;  %v587_v29 = vmax.f32 %v6141_v53, 0.0  ;;  %v1077_v30 = vmax.f32 %v6144_v54, 0.0  ;;  %v588_v40 = vmax.f32 %v6161_v3, 0.0 }
 0x141   : > { %5248 = vmatprep.mubr.msk.bf16.mxu1 %vm366_vm2, %v5478_v4 }
 0x142   : > { %v4986_v51 = vpop.f32.mrb[8].mxu0 }
 0x143   : > { %v497_v55 = vadd.f32 %v4986_v51, %v6096_v22  ;;  %v5022_v56 = vpop.f32.mrb[8].mxu1  ;;  %v488_v57 = vpop.f32.mrb[9].mxu0 }
 0x144   : > { %v985_v61 = vadd.f32 %v5022_v56, %v6096_v22  ;;  %v489_v62 = vadd.f32 %v6096_v22, %v488_v57  ;;  %v976_v63 = vpop.f32.mrb[9].mxu1  ;;  %v4987_v0 = vpop.f32.mrb[10].mxu0 }
 0x145   : > { %v593_v5 = vmax.f32 %v497_v55, 0.0  ;;  %v977_v6 = vadd.f32 %v6096_v22, %v976_v63  ;;  %v500_v7 = vadd.f32 %v4987_v0, %v6096_v22  ;;  %v5023_v8 = vpop.f32.mrb[10].mxu1  ;;  %v491_v9 = vpop.f32.mrb[11].mxu0 }
 0x146   : > { %v1081_v11 = vmax.f32 %v985_v61, 0.0  ;;  %v591_v12 = vmax.f32 %v489_v62, 0.0  ;;  %v988_v13 = vadd.f32 %v5023_v8, %v6096_v22  ;;  %v492_v14 = vadd.f32 %v6096_v22, %v491_v9  ;;  %v979_v15 = vpop.f32.mrb[11].mxu1 }
 0x147   : > { %v617_v16 = vmax.f32 %v585_v43, %v593_v5  ;;  %v1079_v17 = vmax.f32 %v977_v6, 0.0  ;;  %v594_v18 = vmax.f32 %v500_v7, 0.0  ;;  %v980_v19 = vadd.f32 %v6096_v22, %v979_v15  ;;  %5213 = vmatmul.mubr.msk.bf16.gmra.mrb[116].mxu0 %vm366_vm2, %v5479_v58 }
 0x148   : > { %v6181_v20 = vmax.f32 %v1073_v46, %v1081_v11  ;;  %v615_v21 = vmax.f32 %v583_v44, %v591_v12  ;;  %v1082_v23 = vmax.f32 %v988_v13, 0.0  ;;  %v592_v24 = vmax.f32 %v492_v14, 0.0  ;;  %5249 = vmatmul.mubr.msk.bf16.gmra.mrb[116].mxu1 %vm366_vm2, %v5480_v1  ;;  %5216 = vmatprep.mubr.msk.bf16.mxu0 %vm366_vm2, %v5481_v2  ;;  %v5487_v14 = vld [vmem:[%s5812_s6 + $0x378] sm:$0xff]  }
 0x149   : > { %634 = vst.msk [vmem:[#allocation2 + $0x10] sm:$0xff] %vm631_vm3, %v617_v16  ;;  %v6190_v26 = vmax.f32 %v1071_v48, %v1079_v17  ;;  %v618_v27 = vmax.f32 %v586_v45, %v594_v18  ;;  %v1080_v28 = vmax.f32 %v980_v19, 0.0  ;;  %5252 = vmatprep.mubr.msk.bf16.mxu1 %vm366_vm2, %v5482_v10  ;;  %v964_v43 = vadd.f32 %v6096_v22, %v6124_v41  ;;  %v5484_v48 = vld [vmem:[%s5812_s6 + $0x3e8] sm:$0xff]   ;;  %v5486_v41 = vld [vmem:[%s5812_s6 + $0x3f0] sm:$0xff]  }
 0x14a   : > { %632 = vst.msk [vmem:[#allocation2] sm:$0xff] %vm631_vm3, %v615_v21  ;;  %v1106_v31 = vmax.f32 %v1074_v49, %v1082_v23  ;;  %v616_v32 = vmax.f32 %v584_v47, %v592_v24  ;;  %v4990_v33 = vpop.f32.mrb[12].mxu0  ;;  %v5485_v49 = vld [vmem:[%s5812_s6 + $0x370] sm:$0xff]   ;;  %v5488_v24 = vld [vmem:[%s5812_s6 + $0x3f8] sm:$0xff]  }
 0x14b   : > { %635 = vst.msk [vmem:[#allocation2 + $0x18] sm:$0xff] %vm631_vm3, %v618_v27  ;;  %v6206_v36 = vmax.f32 %v1072_v50, %v1080_v28  ;;  %v513_v4 = vadd.f32 %v4990_v33, %v6096_v22  ;;  %v5026_v37 = vpop.f32.mrb[12].mxu1  ;;  %v504_v38 = vpop.f32.mrb[13].mxu0  ;;  %v1078_v50 = vmax.f32 %v6187_v25, 0.0  ;;  %v1076_v7 = vmax.f32 %v964_v43, 0.0 }
 0x14c   : > { %633 = vst.msk [vmem:[#allocation2 + $0x8] sm:$0xff] %vm631_vm3, %v616_v32  ;;  %v1001_v44 = vadd.f32 %v5026_v37, %v6096_v22  ;;  %v505_v45 = vadd.f32 %v6096_v22, %v504_v38  ;;  %v992_v46 = vpop.f32.mrb[13].mxu1  ;;  %v4991_v47 = vpop.f32.mrb[14].mxu0 }
 0x14d   : > { %v597_v51 = vmax.f32 %v513_v4, 0.0  ;;  %v993_v53 = vadd.f32 %v6096_v22, %v992_v46  ;;  %v516_v54 = vadd.f32 %v4991_v47, %v6096_v22  ;;  %v5027_v55 = vpop.f32.mrb[14].mxu1  ;;  %v507_v56 = vpop.f32.mrb[15].mxu0 }
 0x14e   : > { %v1085_v57 = vmax.f32 %v1001_v44, 0.0  ;;  %v595_v58 = vmax.f32 %v505_v45, 0.0  ;;  %v1004_v59 = vadd.f32 %v5027_v55, %v6096_v22  ;;  %v508_v60 = vadd.f32 %v6096_v22, %v507_v56  ;;  %v995_v61 = vpop.f32.mrb[15].mxu1 }
 0x14f   : > { %v621_v62 = vmax.f32 %v589_v52, %v597_v51  ;;  %v1083_v63 = vmax.f32 %v993_v53, 0.0  ;;  %v598_v0 = vmax.f32 %v516_v54, 0.0  ;;  %v996_v1 = vadd.f32 %v6096_v22, %v995_v61  ;;  %5217 = vmatmul.mubr.msk.bf16.gmra.mrb[120].mxu0 %vm366_vm2, %v5483_v39 }
 0x150   : > { %v1109_v2 = vmax.f32 %v1077_v30, %v1085_v57  ;;  %v619_v3 = vmax.f32 %v587_v29, %v595_v58  ;;  %v1086_v5 = vmax.f32 %v1004_v59, 0.0  ;;  %v596_v6 = vmax.f32 %v508_v60, 0.0  ;;  %5253 = vmatmul.mubr.msk.bf16.gmra.mrb[120].mxu1 %vm366_vm2, %v5484_v48  ;;  %5220 = vmatprep.mubr.msk.bf16.mxu0 %vm366_vm2, %v5485_v49 }
 0x151   : > { %638 = vst.msk [vmem:[#allocation2 + $0x30] sm:$0xff] %vm631_vm3, %v621_v62  ;;  %v1107_v42 = vmax.f32 %v1075_v35, %v1083_v63  ;;  %v622_v52 = vmax.f32 %v590_v34, %v598_v0  ;;  %v1084_v8 = vmax.f32 %v996_v1, 0.0  ;;  %5256 = vmatprep.mubr.msk.bf16.mxu1 %vm366_vm2, %v5486_v41 }
 0x152   : > { %v650_v9 = vld [vmem:[#allocation2 + $0x10] ss:$2 sm:$0xff]  ;;  %v666_v10 = vld [vmem:[#allocation2 + $0x11] ss:$2 sm:$0xff]  ;;  %636 = vst.msk [vmem:[#allocation2 + $0x20] sm:$0xff] %vm631_vm3, %v619_v3  ;;  %v1110_v11 = vmax.f32 %v1078_v50, %v1086_v5  ;;  %v620_v12 = vmax.f32 %v588_v40, %v596_v6  ;;  %v4994_v13 = vpop.f32.mrb[16].mxu0 }
 0x153   : > { %v680_v15 = vmax.f32 %v650_v9, %v666_v10  ;;  %1121 = vst.msk [vmem:[#allocation2 + $0x10] sm:$0xff] %vm631_vm3, %v6181_v20  ;;  %1122 = vst.msk [vmem:[#allocation2 + $0x18] sm:$0xff] %vm631_vm3, %v1106_v31  ;;  %v648_v16 = vld [vmem:[#allocation2] ss:$2 sm:$0xff]  ;;  %v664_v17 = vld [vmem:[#allocation2 + $0x1] ss:$2 sm:$0xff]  ;;  %v1108_v18 = vmax.f32 %v1076_v7, %v1084_v8  ;;  %v6260_v33 = vadd.f32 %v4994_v13, %v6096_v22 }
 0x154   : > { %639 = vst.msk [vmem:[#allocation2 + $0x38] sm:$0xff] %vm631_vm3, %v622_v52  ;;  %v520_v19 = vpop.f32.mrb[17].mxu0  ;;  %v5030_v21 = vpop.f32.mrb[16].mxu1  ;;  %v679_v23 = vmax.f32 %v648_v16, %v664_v17  ;;  %1119 = vst.msk [vmem:[#allocation2] sm:$0xff] %vm631_vm3, %v6190_v26 }
 0x155   : > { %1120 = vst.msk [vmem:[#allocation2 + $0x8] sm:$0xff] %vm631_vm3, %v6206_v36  ;;  %637 = vst.msk [vmem:[#allocation2 + $0x28] sm:$0xff] %vm631_vm3, %v620_v12  ;;  %v4995_v20 = vpop.f32.mrb[18].mxu0  ;;  %v1008_v25 = vpop.f32.mrb[17].mxu1  ;;  %v4758_v27 = vpack.c.bf16 %v680_v15, %v680_v15  ;;  %v6265_v37 = vadd.f32 %v6096_v22, %v520_v19  ;;  %v6271_v39 = vadd.f32 %v5030_v21, %v6096_v22  ;;  %v601_v61 = vmax.f32 %v6260_v33, 0.0 }
 0x156   : > { %v523_v28 = vpop.f32.mrb[19].mxu0  ;;  %v5031_v29 = vpop.f32.mrb[18].mxu1  ;;  %v4757_v30 = vpack.c.bf16 %v679_v23, %v679_v23  ;;  %v6268_v38 = vadd.f32 %v4995_v20, %v6096_v22  ;;  %v6279_v46 = vadd.f32 %v6096_v22, %v1008_v25 }
 0x157   : > { %v1011_v31 = vpop.f32.mrb[19].mxu1  ;;  %721 = vst.msk [vmem:[%s6245_s8 + $0x4] sm:$0xf] %vm719_vm4, %v4758_v27  ;;  %5221 = vmatmul.mubr.msk.bf16.gmra.mrb[124].mxu0 %vm366_vm2, %v5487_v14  ;;  %v6276_v45 = vadd.f32 %v6096_v22, %v523_v28  ;;  %v6282_v51 = vadd.f32 %v5031_v29, %v6096_v22  ;;  %v599_v62 = vmax.f32 %v6265_v37, 0.0  ;;  %v1089_v0 = vmax.f32 %v6271_v39, 0.0 }
 0x158   : > { %720 = vst.msk [vmem:[%s6245_s8] sm:$0xf] %vm719_vm4, %v4757_v30  ;;  %5257 = vmatmul.mubr.msk.bf16.gmra.mrb[124].mxu1 %vm366_vm2, %v5488_v24  ;;  %v6285_v53 = vadd.f32 %v6096_v22, %v1011_v31  ;;  %v602_v63 = vmax.f32 %v6268_v38, 0.0 }
 0x159   : > { %v600_v1 = vmax.f32 %v6276_v45, 0.0  ;;  %v1090_v6 = vmax.f32 %v6282_v51, 0.0 }
 0x15a   : > { %v4998_v34 = vpop.f32.mrb[20].mxu0  ;;  %v1136_v49 = vld [vmem:[#allocation2 + $0x10] ss:$2 sm:$0xff]  ;;  %v1144_v56 = vld [vmem:[#allocation2 + $0x11] ss:$2 sm:$0xff] }
 0x15b   : > { %v654_v26 = vld [vmem:[#allocation2 + $0x30] ss:$2 sm:$0xff]  ;;  %v670_v32 = vld [vmem:[#allocation2 + $0x31] ss:$2 sm:$0xff]  ;;  %v536_v40 = vpop.f32.mrb[21].mxu0  ;;  %v5034_v43 = vpop.f32.mrb[20].mxu1  ;;  %v6288_v58 = vadd.f32 %v4998_v34, %v6096_v22  ;;  %v1152_v3 = vmax.f32 %v1136_v49, %v1144_v56 }
 0x15c   : > { %v682_v35 = vmax.f32 %v654_v26, %v670_v32  ;;  %1125 = vst.msk [vmem:[#allocation2 + $0x30] sm:$0xff] %vm631_vm3, %v1109_v2  ;;  %1126 = vst.msk [vmem:[#allocation2 + $0x38] sm:$0xff] %vm631_vm3, %v1110_v11  ;;  %v652_v36 = vld [vmem:[#allocation2 + $0x20] ss:$2 sm:$0xff]  ;;  %v668_v4 = vld [vmem:[#allocation2 + $0x21] ss:$2 sm:$0xff]  ;;  %v6304_v7 = vadd.f32 %v6096_v22, %v536_v40  ;;  %v6308_v52 = vadd.f32 %v5034_v43, %v6096_v22 }
 0x15d   : > { %v681_v44 = vmax.f32 %v652_v36, %v668_v4  ;;  %1123 = vst.msk [vmem:[#allocation2 + $0x20] sm:$0xff] %vm631_vm3, %v1107_v42  ;;  %1124 = vst.msk [vmem:[#allocation2 + $0x28] sm:$0xff] %vm631_vm3, %v1108_v18  ;;  %v4999_v47 = vpop.f32.mrb[22].mxu0  ;;  %v1024_v48 = vpop.f32.mrb[21].mxu1  ;;  %v1135_v41 = vld [vmem:[#allocation2] ss:$2 sm:$0xff]  ;;  %v4767_v11 = vpack.c.bf16 %v1152_v3, %v1152_v3 }
 0x15e   : > { %v4760_v50 = vpack.c.bf16 %v682_v35, %v682_v35  ;;  %v539_v54 = vpop.f32.mrb[23].mxu0  ;;  %v5035_v55 = vpop.f32.mrb[22].mxu1  ;;  %v1143_v60 = vld [vmem:[#allocation2 + $0x1] ss:$2 sm:$0xff]  ;;  %v1087_v2 = vmax.f32 %v6279_v46, 0.0  ;;  %v1088_v42 = vmax.f32 %v6285_v53, 0.0  ;;  %v6312_v9 = vadd.f32 %v4999_v47, %v6096_v22 }
 0x15f   : > { %v4759_v57 = vpack.c.bf16 %v681_v44, %v681_v44  ;;  %v6290_v59 = vpop.f32.mrb[23].mxu1  ;;  %v1151_v5 = vmax.f32 %v1135_v41, %v1143_v60  ;;  %v605_v8 = vmax.f32 %v6288_v58, 0.0  ;;  %v6315_v15 = vadd.f32 %v6096_v22, %v539_v54  ;;  %1192 = vst.msk [vmem:[%s6245_s8 + $0x24] sm:$0xf] %vm719_vm4, %v4767_v11 }
 0x160   : > { %723 = vst.msk [vmem:[%s6245_s8 + $0xc] sm:$0xf] %vm719_vm4, %v4760_v50  ;;  %v6318_v16 = vadd.f32 %v6096_v22, %v1024_v48  ;;  %v6322_v24 = vadd.f32 %v5035_v55, %v6096_v22  ;;  %v603_v55 = vmax.f32 %v6304_v7, 0.0  ;;  %v1093_v56 = vmax.f32 %v6308_v52, 0.0 }
 0x161   : > { %722 = vst.msk [vmem:[%s6245_s8 + $0x8] sm:$0xf] %vm719_vm4, %v4759_v57  ;;  %v4766_v12 = vpack.c.bf16 %v1151_v5, %v1151_v5  ;;  %v604_v5 = vmax.f32 %v6315_v15, 0.0 }
 0x162   : > { %v5002_v10 = vpop.f32.mrb[24].mxu0 }
 0x163   : > { %v1138_v13 = vld [vmem:[#allocation2 + $0x30] ss:$2 sm:$0xff]  ;;  %v1146_v14 = vld [vmem:[#allocation2 + $0x31] ss:$2 sm:$0xff]  ;;  %v561_v17 = vadd.f32 %v5002_v10, %v6096_v22  ;;  %v5038_v18 = vpop.f32.mrb[24].mxu1  ;;  %v552_v19 = vpop.f32.mrb[25].mxu0 }
 0x164   : > { %v1154_v21 = vmax.f32 %v1138_v13, %v1146_v14  ;;  %v1137_v23 = vld [vmem:[#allocation2 + $0x20] ss:$2 sm:$0xff]  ;;  %v1145_v20 = vld [vmem:[#allocation2 + $0x21] ss:$2 sm:$0xff]  ;;  %v1049_v25 = vadd.f32 %v5038_v18, %v6096_v22  ;;  %v553_v27 = vadd.f32 %v6096_v22, %v552_v19  ;;  %v1040_v28 = vpop.f32.mrb[25].mxu1  ;;  %v5003_v29 = vpop.f32.mrb[26].mxu0 }
 0x165   : > { %1191 = vst.msk [vmem:[%s6245_s8 + $0x20] sm:$0xf] %vm719_vm4, %v4766_v12  ;;  %v1153_v30 = vmax.f32 %v1137_v23, %v1145_v20  ;;  %v609_v31 = vmax.f32 %v561_v17, 0.0  ;;  %v1041_v26 = vadd.f32 %v6096_v22, %v1040_v28  ;;  %v564_v32 = vadd.f32 %v5003_v29, %v6096_v22  ;;  %v5039_v33 = vpop.f32.mrb[26].mxu1  ;;  %v555_v34 = vpop.f32.mrb[27].mxu0 }
 0x166   : > { %v4769_v35 = vpack.c.bf16 %v1154_v21, %v1154_v21  ;;  %v1097_v36 = vmax.f32 %v1049_v25, 0.0  ;;  %v607_v4 = vmax.f32 %v553_v27, 0.0  ;;  %v1052_v37 = vadd.f32 %v5039_v33, %v6096_v22  ;;  %v1043_v39 = vpop.f32.mrb[27].mxu1 }
 0x167   : > { %v556_v38 = vadd.f32 %v6096_v22, %v555_v34  ;;  %v625_v40 = vmax.f32 %v601_v61, %v609_v31  ;;  %v1095_v43 = vmax.f32 %v1041_v26, 0.0  ;;  %v610_v44 = vmax.f32 %v564_v32, 0.0 }
 0x168   : > { %v1044_v45 = vadd.f32 %v6096_v22, %v1043_v39  ;;  %1194 = vst.msk [vmem:[%s6245_s8 + $0x2c] sm:$0xf] %vm719_vm4, %v4769_v35  ;;  %v1113_v46 = vmax.f32 %v1089_v0, %v1097_v36  ;;  %v623_v47 = vmax.f32 %v599_v62, %v607_v4  ;;  %v1098_v48 = vmax.f32 %v1052_v37, 0.0 }
 0x169   : > { %v608_v49 = vmax.f32 %v556_v38, 0.0  ;;  %642 = vst.msk [vmem:[#allocation2 + $0x50] sm:$0xff] %vm631_vm3, %v625_v40  ;;  %v6338_v50 = vmax.f32 %v1087_v2, %v1095_v43  ;;  %v626_v51 = vmax.f32 %v602_v63, %v610_v44  ;;  %v4768_v54 = vpack.c.bf16 %v1153_v30, %v1153_v30 }
 0x16a   : > { %v1096_v53 = vmax.f32 %v1044_v45, 0.0  ;;  %640 = vst.msk [vmem:[#allocation2 + $0x40] sm:$0xff] %vm631_vm3, %v623_v47  ;;  %v1114_v41 = vmax.f32 %v1090_v6, %v1098_v48  ;;  %v5006_v60 = vpop.f32.mrb[28].mxu0  ;;  %v606_v61 = vmax.f32 %v6312_v9, 0.0  ;;  %v1091_v62 = vmax.f32 %v6318_v16, 0.0 }
 0x16b   : > { %v624_v57 = vmax.f32 %v600_v1, %v608_v49  ;;  %643 = vst.msk [vmem:[#allocation2 + $0x58] sm:$0xff] %vm631_vm3, %v626_v51  ;;  %v577_v63 = vadd.f32 %v5006_v60, %v6096_v22  ;;  %v5042_v2 = vpop.f32.mrb[28].mxu1  ;;  %v568_v3 = vpop.f32.mrb[29].mxu0  ;;  %v1028_v6 = vadd.f32 %v6096_v22, %v6290_v59 }
 0x16c   : > { %v1112_v0 = vmax.f32 %v1088_v42, %v1096_v53  ;;  %1193 = vst.msk [vmem:[%s6245_s8 + $0x28] sm:$0xf] %vm719_vm4, %v4768_v54  ;;  %v1065_v1 = vadd.f32 %v5042_v2, %v6096_v22  ;;  %v569_v7 = vadd.f32 %v6096_v22, %v568_v3  ;;  %v1056_v52 = vpop.f32.mrb[29].mxu1  ;;  %v5007_v9 = vpop.f32.mrb[30].mxu0  ;;  %v1094_v42 = vmax.f32 %v6322_v24, 0.0 }
 0x16d   : > { %641 = vst.msk [vmem:[#allocation2 + $0x48] sm:$0xff] %vm631_vm3, %v624_v57  ;;  %v613_v10 = vmax.f32 %v577_v63, 0.0  ;;  %v1057_v11 = vadd.f32 %v6096_v22, %v1056_v52  ;;  %v580_v12 = vadd.f32 %v5007_v9, %v6096_v22  ;;  %v5043_v13 = vpop.f32.mrb[30].mxu1  ;;  %v571_v14 = vpop.f32.mrb[31].mxu0  ;;  %v1092_v29 = vmax.f32 %v1028_v6, 0.0 }
 0x16e   : > { %v1101_v15 = vmax.f32 %v1065_v1, 0.0  ;;  %v611_v16 = vmax.f32 %v569_v7, 0.0  ;;  %v1068_v59 = vadd.f32 %v5043_v13, %v6096_v22  ;;  %v572_v17 = vadd.f32 %v6096_v22, %v571_v14  ;;  %v1059_v18 = vpop.f32.mrb[31].mxu1 }
 0x16f   : > { %v629_v19 = vmax.f32 %v605_v8, %v613_v10  ;;  %v1099_v21 = vmax.f32 %v1057_v11, 0.0  ;;  %v614_v23 = vmax.f32 %v580_v12, 0.0  ;;  %v1060_v20 = vadd.f32 %v6096_v22, %v1059_v18 }
 0x170   : > { %v1117_v24 = vmax.f32 %v1093_v56, %v1101_v15  ;;  %v627_v25 = vmax.f32 %v603_v55, %v611_v16  ;;  %v1102_v27 = vmax.f32 %v1068_v59, 0.0  ;;  %v612_v28 = vmax.f32 %v572_v17, 0.0 }
 0x171   : > { %646 = vst.msk [vmem:[#allocation2 + $0x70] sm:$0xff] %vm631_vm3, %v629_v19  ;;  %v1115_v30 = vmax.f32 %v1091_v62, %v1099_v21  ;;  %v630_v31 = vmax.f32 %v606_v61, %v614_v23  ;;  %v1100_v26 = vmax.f32 %v1060_v20, 0.0 }
 0x172   : > { %v658_v32 = vld [vmem:[#allocation2 + $0x50] ss:$2 sm:$0xff]  ;;  %v674_v33 = vld [vmem:[#allocation2 + $0x51] ss:$2 sm:$0xff]  ;;  %644 = vst.msk [vmem:[#allocation2 + $0x60] sm:$0xff] %vm631_vm3, %v627_v25  ;;  %v1118_v58 = vmax.f32 %v1094_v42, %v1102_v27  ;;  %v628_v8 = vmax.f32 %v604_v5, %v612_v28  ;;  %v5050_v34 = vpop.f32.mrb[32].mxu0 }
 0x173   : > { %v684_v35 = vmax.f32 %v658_v32, %v674_v33  ;;  %1129 = vst.msk [vmem:[#allocation2 + $0x50] sm:$0xff] %vm631_vm3, %v1113_v46  ;;  %1130 = vst.msk [vmem:[#allocation2 + $0x58] sm:$0xff] %vm631_vm3, %v1114_v41  ;;  %v1116_v37 = vmax.f32 %v1092_v29, %v1100_v26  ;;  %v1415_v38 = vpop.f32.mrb[33].mxu0  ;;  %v5086_v39 = vpop.f32.mrb[32].mxu1  ;;  %v6377_v54 = vadd.f32 %v5050_v34, %v6096_v22 }
 0x174   : > { %v656_v36 = vld [vmem:[#allocation2 + $0x40] ss:$2 sm:$0xff]  ;;  %v672_v4 = vld [vmem:[#allocation2 + $0x41] ss:$2 sm:$0xff]  ;;  %647 = vst.msk [vmem:[#allocation2 + $0x78] sm:$0xff] %vm631_vm3, %v630_v31  ;;  %645 = vst.msk [vmem:[#allocation2 + $0x68] sm:$0xff] %vm631_vm3, %v628_v8  ;;  %v6382_v57 = vadd.f32 %v6096_v22, %v1415_v38  ;;  %v6388_v61 = vadd.f32 %v5086_v39, %v6096_v22 }
 0x175   : > { %v683_v40 = vmax.f32 %v656_v36, %v672_v4  ;;  %1127 = vst.msk [vmem:[#allocation2 + $0x40] sm:$0xff] %vm631_vm3, %v6338_v50  ;;  %1128 = vst.msk [vmem:[#allocation2 + $0x48] sm:$0xff] %vm631_vm3, %v1112_v0  ;;  %v5051_v43 = vpop.f32.mrb[34].mxu0  ;;  %v1886_v44 = vpop.f32.mrb[33].mxu1  ;;  %v4762_v45 = vpack.c.bf16 %v684_v35, %v684_v35  ;;  %v1544_v59 = vmax.f32 %v6377_v54, 0.0 }
 0x176   : > { %v1418_v46 = vpop.f32.mrb[35].mxu0  ;;  %v5087_v47 = vpop.f32.mrb[34].mxu1  ;;  %v6385_v60 = vadd.f32 %v5051_v43, %v6096_v22  ;;  %v6396_v3 = vadd.f32 %v6096_v22, %v1886_v44  ;;  %v1542_v17 = vmax.f32 %v6382_v57, 0.0  ;;  %v2015_v19 = vmax.f32 %v6388_v61, 0.0 }
 0x177   : > { %v4761_v48 = vpack.c.bf16 %v683_v40, %v683_v40  ;;  %v1889_v49 = vpop.f32.mrb[35].mxu1  ;;  %725 = vst.msk [vmem:[%s6245_s8 + $0x14] sm:$0xf] %vm719_vm4, %v4762_v45  ;;  %v6393_v2 = vadd.f32 %v6096_v22, %v1418_v46  ;;  %v6399_v52 = vadd.f32 %v5087_v47, %v6096_v22 }
 0x178   : > { %v6402_v9 = vadd.f32 %v6096_v22, %v1889_v49  ;;  %v1545_v18 = vmax.f32 %v6385_v60, 0.0  ;;  %v2013_v23 = vmax.f32 %v6396_v3, 0.0 }
 0x179   : > { %724 = vst.msk [vmem:[%s6245_s8 + $0x10] sm:$0xf] %vm719_vm4, %v4761_v48  ;;  %v1543_v21 = vmax.f32 %v6393_v2, 0.0  ;;  %v2016_v25 = vmax.f32 %v6399_v52, 0.0 }
 0x17a   : > { %v5054_v50 = vpop.f32.mrb[36].mxu0  ;;  %v1140_v1 = vld [vmem:[#allocation2 + $0x50] ss:$2 sm:$0xff]  ;;  %v1148_v11 = vld [vmem:[#allocation2 + $0x51] ss:$2 sm:$0xff]  ;;  %v2014_v28 = vmax.f32 %v6402_v9, 0.0 }
 0x17b   : > { %v662_v51 = vld [vmem:[#allocation2 + $0x70] ss:$2 sm:$0xff]  ;;  %v678_v53 = vld [vmem:[#allocation2 + $0x71] ss:$2 sm:$0xff]  ;;  %v660_v56 = vld [vmem:[#allocation2 + $0x60] ss:$2 sm:$0xff]  ;;  %v6405_v14 = vadd.f32 %v5054_v50, %v6096_v22  ;;  %v1156_v20 = vmax.f32 %v1140_v1, %v1148_v11 }
 0x17c   : > { %v686_v55 = vmax.f32 %v662_v51, %v678_v53  ;;  %1133 = vst.msk [vmem:[#allocation2 + $0x70] sm:$0xff] %vm631_vm3, %v1117_v24  ;;  %1134 = vst.msk [vmem:[#allocation2 + $0x78] sm:$0xff] %vm631_vm3, %v1118_v58  ;;  %v676_v41 = vld [vmem:[#allocation2 + $0x61] ss:$2 sm:$0xff]  ;;  %v1431_v62 = vpop.f32.mrb[37].mxu0  ;;  %v5090_v0 = vpop.f32.mrb[36].mxu1 }
 0x17d   : > { %v685_v63 = vmax.f32 %v660_v56, %v676_v41  ;;  %1131 = vst.msk [vmem:[#allocation2 + $0x60] sm:$0xff] %vm631_vm3, %v1115_v30  ;;  %1132 = vst.msk [vmem:[#allocation2 + $0x68] sm:$0xff] %vm631_vm3, %v1116_v37  ;;  %v5055_v5 = vpop.f32.mrb[38].mxu0  ;;  %v1902_v6 = vpop.f32.mrb[37].mxu1  ;;  %v1139_v12 = vld [vmem:[#allocation2 + $0x40] ss:$2 sm:$0xff]  ;;  %v6421_v27 = vadd.f32 %v6096_v22, %v1431_v62  ;;  %v6425_v29 = vadd.f32 %v5090_v0, %v6096_v22 }
 0x17e   : > { %v4764_v7 = vpack.c.bf16 %v686_v55, %v686_v55  ;;  %v1434_v42 = vpop.f32.mrb[39].mxu0  ;;  %v5091_v10 = vpop.f32.mrb[38].mxu1  ;;  %v1147_v16 = vld [vmem:[#allocation2 + $0x41] ss:$2 sm:$0xff]  ;;  %v1548_v30 = vmax.f32 %v6405_v14, 0.0  ;;  %v6429_v31 = vadd.f32 %v5055_v5, %v6096_v22  ;;  %v4771_v32 = vpack.c.bf16 %v1156_v20, %v1156_v20 }
 0x17f   : > { %v4763_v13 = vpack.c.bf16 %v685_v63, %v685_v63  ;;  %v6407_v15 = vpop.f32.mrb[39].mxu1  ;;  %v1155_v24 = vmax.f32 %v1139_v12, %v1147_v16  ;;  %v6432_v34 = vadd.f32 %v6096_v22, %v1434_v42  ;;  %v6435_v35 = vadd.f32 %v6096_v22, %v1902_v6 }
 0x180   : > { %727 = vst.msk [vmem:[%s6245_s8 + $0x1c] sm:$0xf] %vm719_vm4, %v4764_v7  ;;  %v6439_v43 = vadd.f32 %v5091_v10, %v6096_v22  ;;  %1196 = vst.msk [vmem:[%s6245_s8 + $0x34] sm:$0xf] %vm719_vm4, %v4771_v32  ;;  %v1546_v10 = vmax.f32 %v6421_v27, 0.0  ;;  %v2019_v11 = vmax.f32 %v6425_v29, 0.0 }
 0x181   : > { %726 = vst.msk [vmem:[%s6245_s8 + $0x18] sm:$0xf] %vm719_vm4, %v4763_v13  ;;  %v4770_v33 = vpack.c.bf16 %v1155_v24, %v1155_v24  ;;  %v1547_v24 = vmax.f32 %v6432_v34, 0.0 }
 0x182   : > { %v5058_v26 = vpop.f32.mrb[40].mxu0 }
 0x183   : > { %v1142_v58 = vld [vmem:[#allocation2 + $0x70] ss:$2 sm:$0xff]  ;;  %v1150_v8 = vld [vmem:[#allocation2 + $0x71] ss:$2 sm:$0xff]  ;;  %v1456_v36 = vadd.f32 %v5058_v26, %v6096_v22  ;;  %v5094_v4 = vpop.f32.mrb[40].mxu1  ;;  %v1447_v37 = vpop.f32.mrb[41].mxu0 }
 0x184   : > { %v1158_v38 = vmax.f32 %v1142_v58, %v1150_v8  ;;  %v1141_v39 = vld [vmem:[#allocation2 + $0x60] ss:$2 sm:$0xff]  ;;  %v1149_v40 = vld [vmem:[#allocation2 + $0x61] ss:$2 sm:$0xff]  ;;  %v1927_v44 = vadd.f32 %v5094_v4, %v6096_v22  ;;  %v1448_v45 = vadd.f32 %v6096_v22, %v1447_v37  ;;  %v1918_v46 = vpop.f32.mrb[41].mxu1  ;;  %v5059_v47 = vpop.f32.mrb[42].mxu0 }
 0x185   : > { %1195 = vst.msk [vmem:[%s6245_s8 + $0x30] sm:$0xf] %vm719_vm4, %v4770_v33  ;;  %v1157_v48 = vmax.f32 %v1141_v39, %v1149_v40  ;;  %v1552_v49 = vmax.f32 %v1456_v36, 0.0  ;;  %v1919_v51 = vadd.f32 %v6096_v22, %v1918_v46  ;;  %v1459_v53 = vadd.f32 %v5059_v47, %v6096_v22  ;;  %v5095_v54 = vpop.f32.mrb[42].mxu1  ;;  %v1450_v50 = vpop.f32.mrb[43].mxu0 }
 0x186   : > { %v4773_v55 = vpack.c.bf16 %v1158_v38, %v1158_v38  ;;  %v2023_v56 = vmax.f32 %v1927_v44, 0.0  ;;  %v1550_v41 = vmax.f32 %v1448_v45, 0.0  ;;  %v1930_v57 = vadd.f32 %v5095_v54, %v6096_v22  ;;  %v1921_v61 = vpop.f32.mrb[43].mxu1 }
 0x187   : > { %v1451_v60 = vadd.f32 %v6096_v22, %v1450_v50  ;;  %v1576_v62 = vmax.f32 %v1544_v59, %v1552_v49  ;;  %v2021_v0 = vmax.f32 %v1919_v51, 0.0  ;;  %v1553_v63 = vmax.f32 %v1459_v53, 0.0 }
 0x188   : > { %v1922_v2 = vadd.f32 %v6096_v22, %v1921_v61  ;;  %1198 = vst.msk [vmem:[%s6245_s8 + $0x3c] sm:$0xf] %vm719_vm4, %v4773_v55  ;;  %v2047_v3 = vmax.f32 %v2015_v19, %v2023_v56  ;;  %v1574_v5 = vmax.f32 %v1542_v17, %v1550_v41  ;;  %v2024_v6 = vmax.f32 %v1930_v57, 0.0 }
 0x189   : > { %v1551_v1 = vmax.f32 %v1451_v60, 0.0  ;;  %1592 = vst.msk [vmem:[#allocation2 + $0x10] sm:$0xff] %vm631_vm3, %v1576_v62  ;;  %v6455_v7 = vmax.f32 %v2013_v23, %v2021_v0  ;;  %v1577_v52 = vmax.f32 %v1545_v18, %v1553_v63  ;;  %v4772_v42 = vpack.c.bf16 %v1157_v48, %v1157_v48 }
 0x18a   : > { %v2022_v9 = vmax.f32 %v1922_v2, 0.0  ;;  %1590 = vst.msk [vmem:[#allocation2] sm:$0xff] %vm631_vm3, %v1574_v5  ;;  %v2048_v12 = vmax.f32 %v2016_v25, %v2024_v6  ;;  %v5062_v16 = vpop.f32.mrb[44].mxu0  ;;  %v1549_v59 = vmax.f32 %v6429_v31, 0.0  ;;  %v2017_v17 = vmax.f32 %v6435_v35, 0.0 }
 0x18b   : > { %v1575_v13 = vmax.f32 %v1543_v21, %v1551_v1  ;;  %1593 = vst.msk [vmem:[#allocation2 + $0x18] sm:$0xff] %vm631_vm3, %v1577_v52  ;;  %v1472_v18 = vadd.f32 %v5062_v16, %v6096_v22  ;;  %v5098_v23 = vpop.f32.mrb[44].mxu1  ;;  %v1463_v20 = vpop.f32.mrb[45].mxu0  ;;  %v1906_v25 = vadd.f32 %v6096_v22, %v6407_v15 }
 0x18c   : > { %v2046_v19 = vmax.f32 %v2014_v28, %v2022_v9  ;;  %1197 = vst.msk [vmem:[%s6245_s8 + $0x38] sm:$0xf] %vm719_vm4, %v4772_v42  ;;  %v1943_v21 = vadd.f32 %v5098_v23, %v6096_v22  ;;  %v1464_v27 = vadd.f32 %v6096_v22, %v1463_v20  ;;  %v1934_v29 = vpop.f32.mrb[45].mxu1  ;;  %v5063_v31 = vpop.f32.mrb[46].mxu0  ;;  %v2020_v28 = vmax.f32 %v6439_v43, 0.0 }
 0x18d   : > { %1591 = vst.msk [vmem:[#allocation2 + $0x8] sm:$0xff] %vm631_vm3, %v1575_v13  ;;  %v1556_v26 = vmax.f32 %v1472_v18, 0.0  ;;  %v1935_v32 = vadd.f32 %v6096_v22, %v1934_v29  ;;  %v1475_v33 = vadd.f32 %v5063_v31, %v6096_v22  ;;  %v5099_v58 = vpop.f32.mrb[46].mxu1  ;;  %v1466_v8 = vpop.f32.mrb[47].mxu0  ;;  %v2018_v47 = vmax.f32 %v1906_v25, 0.0 }
 0x18e   : > { %v2027_v34 = vmax.f32 %v1943_v21, 0.0  ;;  %v1554_v35 = vmax.f32 %v1464_v27, 0.0  ;;  %v1946_v15 = vadd.f32 %v5099_v58, %v6096_v22  ;;  %v1467_v36 = vadd.f32 %v6096_v22, %v1466_v8  ;;  %v1937_v4 = vpop.f32.mrb[47].mxu1  ;;  %v6493_v42 = vld [vmem:[#allocation5] ss:$0 sm:$0xff] }
 0x18f   : > { %v1580_v37 = vmax.f32 %v1548_v30, %v1556_v26  ;;  %v2025_v38 = vmax.f32 %v1935_v32, 0.0  ;;  %v1557_v39 = vmax.f32 %v1475_v33, 0.0  ;;  %v1938_v40 = vadd.f32 %v6096_v22, %v1937_v4 }
 0x190   : > { %v2051_v43 = vmax.f32 %v2019_v11, %v2027_v34  ;;  %v1578_v44 = vmax.f32 %v1546_v10, %v1554_v35  ;;  %v2028_v45 = vmax.f32 %v1946_v15, 0.0  ;;  %v1555_v46 = vmax.f32 %v1467_v36, 0.0 }
 0x191   : > { %1596 = vst.msk [vmem:[#allocation2 + $0x30] sm:$0xff] %vm631_vm3, %v1580_v37  ;;  %v2049_v48 = vmax.f32 %v2017_v17, %v2025_v38  ;;  %v1581_v49 = vmax.f32 %v1549_v59, %v1557_v39  ;;  %v2026_v51 = vmax.f32 %v1938_v40, 0.0 }
 0x192   : > { %v1607_v53 = vld [vmem:[#allocation2 + $0x10] ss:$2 sm:$0xff]  ;;  %v1615_v54 = vld [vmem:[#allocation2 + $0x11] ss:$2 sm:$0xff]  ;;  %1594 = vst.msk [vmem:[#allocation2 + $0x20] sm:$0xff] %vm631_vm3, %v1578_v44  ;;  %v2052_v14 = vmax.f32 %v2020_v28, %v2028_v45  ;;  %v1579_v30 = vmax.f32 %v1547_v24, %v1555_v46  ;;  %v5066_v50 = vpop.f32.mrb[48].mxu0 }
 0x193   : > { %v1623_v55 = vmax.f32 %v1607_v53, %v1615_v54  ;;  %2063 = vst.msk [vmem:[#allocation2 + $0x10] sm:$0xff] %vm631_vm3, %v2047_v3  ;;  %2064 = vst.msk [vmem:[#allocation2 + $0x18] sm:$0xff] %vm631_vm3, %v2048_v12  ;;  %v2050_v41 = vmax.f32 %v2018_v47, %v2026_v51  ;;  %v1479_v57 = vpop.f32.mrb[49].mxu0  ;;  %v5102_v60 = vpop.f32.mrb[48].mxu1 }
 0x194   : > { %v1606_v22 = vld [vmem:[#allocation2] ss:$2 sm:$0xff]  ;;  %v1614_v56 = vld [vmem:[#allocation2 + $0x1] ss:$2 sm:$0xff]  ;;  %1597 = vst.msk [vmem:[#allocation2 + $0x38] sm:$0xff] %vm631_vm3, %v1581_v49  ;;  %1595 = vst.msk [vmem:[#allocation2 + $0x28] sm:$0xff] %vm631_vm3, %v1579_v30  ;;  %v6499_v16 = vadd.f32 %v6493_v42, %v1479_v57  ;;  %v6505_v17 = vadd.f32 %v6493_v42, %v5102_v60 }
 0x195   : > { %v1622_v61 = vmax.f32 %v1606_v22, %v1614_v56  ;;  %2061 = vst.msk [vmem:[#allocation2] sm:$0xff] %vm631_vm3, %v6455_v7  ;;  %2062 = vst.msk [vmem:[#allocation2 + $0x8] sm:$0xff] %vm631_vm3, %v2046_v19  ;;  %v5067_v62 = vpop.f32.mrb[50].mxu0  ;;  %v1950_v0 = vpop.f32.mrb[49].mxu1  ;;  %v4776_v63 = vpack.c.bf16 %v1623_v55, %v1623_v55  ;;  %v6496_v7 = vadd.f32 %v6493_v42, %v5066_v50 }
 0x196   : > { %v1482_v2 = vpop.f32.mrb[51].mxu0  ;;  %v5103_v3 = vpop.f32.mrb[50].mxu1  ;;  %v6502_v59 = vadd.f32 %v6493_v42, %v5067_v62  ;;  %v6513_v25 = vadd.f32 %v6493_v42, %v1950_v0  ;;  %v2031_v46 = vmax.f32 %v6505_v17, 0.0 }
 0x197   : > { %v4775_v5 = vpack.c.bf16 %v1622_v61, %v1622_v61  ;;  %v1953_v6 = vpop.f32.mrb[51].mxu1  ;;  %1663 = vst.msk [vmem:[%s6245_s8 + $0x44] sm:$0xf] %vm719_vm4, %v4776_v63  ;;  %v6510_v24 = vadd.f32 %v6493_v42, %v1482_v2  ;;  %v6518_v28 = vadd.f32 %v6493_v42, %v5103_v3  ;;  %v1560_v40 = vmax.f32 %v6496_v7, 0.0 }
 0x198   : > { %v6521_v32 = vadd.f32 %v6493_v42, %v1953_v6  ;;  %v1561_v44 = vmax.f32 %v6502_v59, 0.0  ;;  %v2029_v47 = vmax.f32 %v6513_v25, 0.0 }
 0x199   : > { %1662 = vst.msk [vmem:[%s6245_s8 + $0x40] sm:$0xf] %vm719_vm4, %v4775_v5  ;;  %v1559_v45 = vmax.f32 %v6510_v24, 0.0  ;;  %v2032_v49 = vmax.f32 %v6518_v28, 0.0 }
 0x19a   : > { %v2078_v1 = vld [vmem:[#allocation2 + $0x10] ss:$2 sm:$0xff]  ;;  %v2086_v52 = vld [vmem:[#allocation2 + $0x11] ss:$2 sm:$0xff]  ;;  %v5070_v21 = vpop.f32.mrb[52].mxu0  ;;  %v2030_v51 = vmax.f32 %v6521_v32, 0.0 }
 0x19b   : > { %v1609_v9 = vld [vmem:[#allocation2 + $0x30] ss:$2 sm:$0xff]  ;;  %v2094_v10 = vmax.f32 %v2078_v1, %v2086_v52  ;;  %v1617_v13 = vld [vmem:[#allocation2 + $0x31] ss:$2 sm:$0xff]  ;;  %v1608_v23 = vld [vmem:[#allocation2 + $0x20] ss:$2 sm:$0xff]  ;;  %v6524_v34 = vadd.f32 %v6493_v42, %v5070_v21 }
 0x19c   : > { %v2077_v11 = vld [vmem:[#allocation2] ss:$2 sm:$0xff]  ;;  %v2085_v12 = vld [vmem:[#allocation2 + $0x1] ss:$2 sm:$0xff]  ;;  %v1625_v18 = vmax.f32 %v1609_v9, %v1617_v13  ;;  %2067 = vst.msk [vmem:[#allocation2 + $0x30] sm:$0xff] %vm631_vm3, %v2051_v43  ;;  %2068 = vst.msk [vmem:[#allocation2 + $0x38] sm:$0xff] %vm631_vm3, %v2052_v14 }
 0x19d   : > { %v2093_v19 = vmax.f32 %v2077_v11, %v2085_v12  ;;  %v1616_v20 = vld [vmem:[#allocation2 + $0x21] ss:$2 sm:$0xff]  ;;  %v5106_v27 = vpop.f32.mrb[52].mxu1  ;;  %v4785_v29 = vpack.c.bf16 %v2094_v10, %v2094_v10  ;;  %v1495_v26 = vpop.f32.mrb[53].mxu0  ;;  %v1558_v43 = vmax.f32 %v6499_v16, 0.0 }
 0x19e   : > { %v1624_v31 = vmax.f32 %v1608_v23, %v1616_v20  ;;  %2065 = vst.msk [vmem:[#allocation2 + $0x20] sm:$0xff] %vm631_vm3, %v2049_v48  ;;  %2066 = vst.msk [vmem:[#allocation2 + $0x28] sm:$0xff] %vm631_vm3, %v2050_v41  ;;  %v1966_v33 = vpop.f32.mrb[53].mxu1  ;;  %v4778_v8 = vpack.c.bf16 %v1625_v18, %v1625_v18  ;;  %v5071_v35 = vpop.f32.mrb[54].mxu0  ;;  %v6527_v15 = vadd.f32 %v6493_v42, %v5106_v27  ;;  %v1564_v48 = vmax.f32 %v6524_v34, 0.0 }
 0x19f   : > { %v4784_v58 = vpack.c.bf16 %v2093_v19, %v2093_v19  ;;  %v5107_v36 = vpop.f32.mrb[54].mxu1  ;;  %2134 = vst.msk [vmem:[%s6245_s8 + $0x64] sm:$0xf] %vm719_vm4, %v4785_v29  ;;  %v6532_v37 = vadd.f32 %v6493_v42, %v1495_v26  ;;  %v1498_v38 = vpop.f32.mrb[55].mxu0  ;;  %v6554_v55 = vadd.f32 %v6493_v42, %v5071_v35  ;;  %v6557_v22 = vadd.f32 %v6493_v42, %v1966_v33 }
 0x1a0   : > { %v4777_v4 = vpack.c.bf16 %v1624_v31, %v1624_v31  ;;  %v6534_v39 = vpop.f32.mrb[55].mxu1  ;;  %1665 = vst.msk [vmem:[%s6245_s8 + $0x4c] sm:$0xf] %vm719_vm4, %v4778_v8  ;;  %v2035_v53 = vmax.f32 %v6527_v15, 0.0  ;;  %v6561_v62 = vadd.f32 %v6493_v42, %v1498_v38  ;;  %v6564_v0 = vadd.f32 %v6493_v42, %v5107_v36 }
 0x1a1   : > { %2133 = vst.msk [vmem:[%s6245_s8 + $0x60] sm:$0xf] %vm719_vm4, %v4784_v58  ;;  %v1562_v50 = vmax.f32 %v6532_v37, 0.0  ;;  %v2033_v29 = vmax.f32 %v6557_v22, 0.0  ;;  %v1565_v33 = vmax.f32 %v6554_v55, 0.0  ;;  %v1970_v38 = vadd.f32 %v6493_v42, %v6534_v39 }
 0x1a2   : > { %1664 = vst.msk [vmem:[%s6245_s8 + $0x48] sm:$0xf] %vm719_vm4, %v4777_v4  ;;  %v5074_v54 = vpop.f32.mrb[56].mxu0  ;;  %v1563_v4 = vmax.f32 %v6561_v62, 0.0 }
 0x1a3   : > { %v2080_v14 = vld [vmem:[#allocation2 + $0x30] ss:$2 sm:$0xff]  ;;  %v2088_v30 = vld [vmem:[#allocation2 + $0x31] ss:$2 sm:$0xff]  ;;  %v1520_v56 = vadd.f32 %v6493_v42, %v5074_v54  ;;  %v5110_v41 = vpop.f32.mrb[56].mxu1  ;;  %v1511_v2 = vpop.f32.mrb[57].mxu0 }
 0x1a4   : > { %v2096_v57 = vmax.f32 %v2080_v14, %v2088_v30  ;;  %v1991_v63 = vadd.f32 %v6493_v42, %v5110_v41  ;;  %v1982_v3 = vpop.f32.mrb[57].mxu1  ;;  %v1512_v1 = vadd.f32 %v6493_v42, %v1511_v2  ;;  %v5075_v9 = vpop.f32.mrb[58].mxu0  ;;  %v2036_v54 = vmax.f32 %v6564_v0, 0.0 }
 0x1a5   : > { %v2079_v60 = vld [vmem:[#allocation2 + $0x20] ss:$2 sm:$0xff]  ;;  %v2087_v61 = vld [vmem:[#allocation2 + $0x21] ss:$2 sm:$0xff]  ;;  %v1568_v6 = vmax.f32 %v1520_v56, 0.0  ;;  %v1983_v52 = vadd.f32 %v6493_v42, %v1982_v3  ;;  %v5111_v7 = vpop.f32.mrb[58].mxu1  ;;  %v1523_v12 = vadd.f32 %v6493_v42, %v5075_v9 }
 0x1a6   : > { %v2095_v5 = vmax.f32 %v2079_v60, %v2087_v61  ;;  %v4787_v10 = vpack.c.bf16 %v2096_v57, %v2096_v57  ;;  %v2039_v11 = vmax.f32 %v1991_v63, 0.0  ;;  %v1994_v13 = vadd.f32 %v6493_v42, %v5111_v7  ;;  %v1514_v16 = vpop.f32.mrb[59].mxu0  ;;  %v1985_v59 = vpop.f32.mrb[59].mxu1 }
 0x1a7   : > { %v1584_v19 = vmax.f32 %v1560_v40, %v1568_v6  ;;  %v1566_v18 = vmax.f32 %v1512_v1, 0.0  ;;  %v2037_v23 = vmax.f32 %v1983_v52, 0.0  ;;  %v1569_v25 = vmax.f32 %v1523_v12, 0.0 }
 0x1a8   : > { %v4786_v17 = vpack.c.bf16 %v2095_v5, %v2095_v5  ;;  %2136 = vst.msk [vmem:[%s6245_s8 + $0x6c] sm:$0xf] %vm719_vm4, %v4787_v10  ;;  %v6573_v20 = vmax.f32 %v2031_v46, %v2039_v11  ;;  %v2040_v21 = vmax.f32 %v1994_v13, 0.0  ;;  %v1515_v27 = vadd.f32 %v6493_v42, %v1514_v16 }
 0x1a9   : > { %1600 = vst.msk [vmem:[#allocation2 + $0x50] sm:$0xff] %vm631_vm3, %v1584_v19  ;;  %v1582_v31 = vmax.f32 %v1558_v43, %v1566_v18  ;;  %v6580_v28 = vmax.f32 %v2029_v47, %v2037_v23  ;;  %v1986_v26 = vadd.f32 %v6493_v42, %v1985_v59  ;;  %v1585_v58 = vmax.f32 %v1561_v44, %v1569_v25 }
 0x1aa   : > { %2135 = vst.msk [vmem:[%s6245_s8 + $0x68] sm:$0xf] %vm719_vm4, %v4786_v17  ;;  %v2056_v8 = vmax.f32 %v2032_v49, %v2040_v21  ;;  %v1567_v35 = vmax.f32 %v1515_v27, 0.0  ;;  %v5078_v36 = vpop.f32.mrb[60].mxu0  ;;  %v2034_v52 = vmax.f32 %v1970_v38, 0.0 }
 0x1ab   : > { %1598 = vst.msk [vmem:[#allocation2 + $0x40] sm:$0xff] %vm631_vm3, %v1582_v31  ;;  %v2038_v40 = vmax.f32 %v1986_v26, 0.0  ;;  %v1536_v43 = vadd.f32 %v6493_v42, %v5078_v36  ;;  %v5114_v46 = vpop.f32.mrb[60].mxu1  ;;  %v1527_v47 = vpop.f32.mrb[61].mxu0  ;;  %1601 = vst.msk [vmem:[#allocation2 + $0x58] sm:$0xff] %vm631_vm3, %v1585_v58 }
 0x1ac   : > { %v1583_v44 = vmax.f32 %v1559_v45, %v1567_v35  ;;  %v2007_v49 = vadd.f32 %v6493_v42, %v5114_v46  ;;  %v1528_v14 = vadd.f32 %v6493_v42, %v1527_v47  ;;  %v1998_v30 = vpop.f32.mrb[61].mxu1  ;;  %v5079_v39 = vpop.f32.mrb[62].mxu0 }
 0x1ad   : > { %v2054_v55 = vmax.f32 %v2030_v51, %v2038_v40  ;;  %v1572_v22 = vmax.f32 %v1536_v43, 0.0  ;;  %v1999_v56 = vadd.f32 %v6493_v42, %v1998_v30  ;;  %v1539_v41 = vadd.f32 %v6493_v42, %v5079_v39  ;;  %v5115_v57 = vpop.f32.mrb[62].mxu1  ;;  %v1530_v60 = vpop.f32.mrb[63].mxu0 }
 0x1ae   : > { %1599 = vst.msk [vmem:[#allocation2 + $0x48] sm:$0xff] %vm631_vm3, %v1583_v44  ;;  %v2043_v24 = vmax.f32 %v2007_v49, 0.0  ;;  %v1570_v45 = vmax.f32 %v1528_v14, 0.0  ;;  %v2010_v61 = vadd.f32 %v6493_v42, %v5115_v57  ;;  %v1531_v62 = vadd.f32 %v6493_v42, %v1530_v60  ;;  %v2001_v0 = vpop.f32.mrb[63].mxu1 }
 0x1af   : > { %v1588_v32 = vmax.f32 %v1564_v48, %v1572_v22  ;;  %v2041_v51 = vmax.f32 %v1999_v56, 0.0  ;;  %v1573_v63 = vmax.f32 %v1539_v41, 0.0  ;;  %v2002_v2 = vadd.f32 %v6493_v42, %v2001_v0 }
 0x1b0   : > { %v2059_v3 = vmax.f32 %v2035_v53, %v2043_v24  ;;  %v1586_v5 = vmax.f32 %v1562_v50, %v1570_v45  ;;  %v2044_v6 = vmax.f32 %v2010_v61, 0.0  ;;  %v1571_v1 = vmax.f32 %v1531_v62, 0.0 }
 0x1b1   : > { %1604 = vst.msk [vmem:[#allocation2 + $0x70] sm:$0xff] %vm631_vm3, %v1588_v32  ;;  %v2057_v9 = vmax.f32 %v2033_v29, %v2041_v51  ;;  %v1589_v7 = vmax.f32 %v1565_v33, %v1573_v63  ;;  %v2042_v10 = vmax.f32 %v2002_v2, 0.0 }
 0x1b2   : > { %1602 = vst.msk [vmem:[#allocation2 + $0x60] sm:$0xff] %vm631_vm3, %v1586_v5  ;;  %v2060_v34 = vmax.f32 %v2036_v54, %v2044_v6  ;;  %v1587_v48 = vmax.f32 %v1563_v4, %v1571_v1  ;;  %v5122_v11 = vpop.f32.mrb[64].mxu0  ;;  %v1611_v12 = vld [vmem:[#allocation2 + $0x50] ss:$2 sm:$0xff]  ;;  %v1619_v13 = vld [vmem:[#allocation2 + $0x51] ss:$2 sm:$0xff] }
 0x1b3   : > { %1605 = vst.msk [vmem:[#allocation2 + $0x78] sm:$0xff] %vm631_vm3, %v1589_v7  ;;  %v2058_v15 = vmax.f32 %v2034_v52, %v2042_v10  ;;  %v2357_v37 = vpop.f32.mrb[65].mxu0  ;;  %v5158_v53 = vpop.f32.mrb[64].mxu1  ;;  %v1627_v50 = vmax.f32 %v1611_v12, %v1619_v13  ;;  %2071 = vst.msk [vmem:[#allocation2 + $0x50] sm:$0xff] %vm631_vm3, %v6573_v20  ;;  %v6626_v35 = vadd.f32 %v6493_v42, %v5122_v11 }
 0x1b4   : > { %2072 = vst.msk [vmem:[#allocation2 + $0x58] sm:$0xff] %vm631_vm3, %v2056_v8  ;;  %1603 = vst.msk [vmem:[#allocation2 + $0x68] sm:$0xff] %vm631_vm3, %v1587_v48  ;;  %v5123_v16 = vpop.f32.mrb[66].mxu0  ;;  %v2828_v59 = vpop.f32.mrb[65].mxu1  ;;  %v6629_v36 = vadd.f32 %v6493_v42, %v2357_v37  ;;  %v6632_v4 = vadd.f32 %v6493_v42, %v5158_v53 }
 0x1b5   : > { %v1610_v17 = vld [vmem:[#allocation2 + $0x40] ss:$2 sm:$0xff]  ;;  %v1618_v19 = vld [vmem:[#allocation2 + $0x41] ss:$2 sm:$0xff]  ;;  %v2360_v18 = vpop.f32.mrb[67].mxu0  ;;  %v4780_v23 = vpack.c.bf16 %v1627_v50, %v1627_v50  ;;  %v5159_v21 = vpop.f32.mrb[66].mxu1  ;;  %v6635_v43 = vadd.f32 %v6493_v42, %v5123_v16  ;;  %v6641_v47 = vadd.f32 %v6493_v42, %v2828_v59 }
 0x1b6   : > { %v1626_v25 = vmax.f32 %v1610_v17, %v1618_v19  ;;  %2069 = vst.msk [vmem:[#allocation2 + $0x40] sm:$0xff] %vm631_vm3, %v6580_v28  ;;  %2070 = vst.msk [vmem:[#allocation2 + $0x48] sm:$0xff] %vm631_vm3, %v2054_v55  ;;  %v2831_v27 = vpop.f32.mrb[67].mxu1  ;;  %v6638_v46 = vadd.f32 %v6493_v42, %v2360_v18  ;;  %v6646_v55 = vadd.f32 %v6493_v42, %v5159_v21  ;;  %v2486_v62 = vmax.f32 %v6626_v35, 0.0 }
 0x1b7   : > { %1667 = vst.msk [vmem:[%s6245_s8 + $0x54] sm:$0xf] %vm719_vm4, %v4780_v23  ;;  %v6649_v22 = vadd.f32 %v6493_v42, %v2831_v27  ;;  %v2484_v63 = vmax.f32 %v6629_v36, 0.0  ;;  %v2487_v2 = vmax.f32 %v6635_v43, 0.0  ;;  %v2955_v1 = vmax.f32 %v6641_v47, 0.0 }
 0x1b8   : > { %v4779_v20 = vpack.c.bf16 %v1626_v25, %v1626_v25  ;;  %v2485_v6 = vmax.f32 %v6638_v46, 0.0  ;;  %v2958_v52 = vmax.f32 %v6646_v55, 0.0 }
 0x1ba   : > { %1666 = vst.msk [vmem:[%s6245_s8 + $0x50] sm:$0xf] %vm719_vm4, %v4779_v20  ;;  %v1613_v29 = vld [vmem:[#allocation2 + $0x70] ss:$2 sm:$0xff]  ;;  %v1621_v31 = vld [vmem:[#allocation2 + $0x71] ss:$2 sm:$0xff] }
 0x1bb   : > { %v5126_v26 = vpop.f32.mrb[68].mxu0  ;;  %v2082_v33 = vld [vmem:[#allocation2 + $0x50] ss:$2 sm:$0xff]  ;;  %v2090_v58 = vld [vmem:[#allocation2 + $0x51] ss:$2 sm:$0xff]  ;;  %v1629_v8 = vmax.f32 %v1613_v29, %v1621_v31  ;;  %2075 = vst.msk [vmem:[#allocation2 + $0x70] sm:$0xff] %vm631_vm3, %v2059_v3 }
 0x1bc   : > { %2076 = vst.msk [vmem:[#allocation2 + $0x78] sm:$0xff] %vm631_vm3, %v2060_v34  ;;  %v1612_v28 = vld [vmem:[#allocation2 + $0x60] ss:$2 sm:$0xff]  ;;  %v2098_v38 = vmax.f32 %v2082_v33, %v2090_v58  ;;  %v1620_v40 = vld [vmem:[#allocation2 + $0x61] ss:$2 sm:$0xff]  ;;  %v2373_v54 = vpop.f32.mrb[69].mxu0  ;;  %v6652_v60 = vadd.f32 %v6493_v42, %v5126_v26 }
 0x1bd   : > { %v5162_v44 = vpop.f32.mrb[68].mxu1  ;;  %v2081_v49 = vld [vmem:[#allocation2 + $0x40] ss:$2 sm:$0xff]  ;;  %v2089_v14 = vld [vmem:[#allocation2 + $0x41] ss:$2 sm:$0xff]  ;;  %v4782_v30 = vpack.c.bf16 %v1629_v8, %v1629_v8  ;;  %v1628_v39 = vmax.f32 %v1612_v28, %v1620_v40  ;;  %2073 = vst.msk [vmem:[#allocation2 + $0x60] sm:$0xff] %vm631_vm3, %v2057_v9  ;;  %v6658_v0 = vadd.f32 %v6493_v42, %v2373_v54 }
 0x1be   : > { %2074 = vst.msk [vmem:[#allocation2 + $0x68] sm:$0xff] %vm631_vm3, %v2058_v15  ;;  %v5127_v56 = vpop.f32.mrb[70].mxu0  ;;  %v4789_v41 = vpack.c.bf16 %v2098_v38, %v2098_v38  ;;  %v2097_v57 = vmax.f32 %v2081_v49, %v2089_v14  ;;  %v2844_v45 = vpop.f32.mrb[69].mxu1  ;;  %v2957_v3 = vmax.f32 %v6632_v4, 0.0  ;;  %v2956_v9 = vmax.f32 %v6649_v22, 0.0 }
 0x1bf   : > { %v2376_v24 = vpop.f32.mrb[71].mxu0  ;;  %1669 = vst.msk [vmem:[%s6245_s8 + $0x5c] sm:$0xf] %vm719_vm4, %v4782_v30  ;;  %v4781_v61 = vpack.c.bf16 %v1628_v39, %v1628_v39  ;;  %v5163_v32 = vpop.f32.mrb[70].mxu1  ;;  %v2490_v34 = vmax.f32 %v6652_v60, 0.0  ;;  %v6677_v48 = vadd.f32 %v6493_v42, %v5127_v56  ;;  %v6680_v11 = vadd.f32 %v6493_v42, %v5162_v44 }
 0x1c0   : > { %2138 = vst.msk [vmem:[%s6245_s8 + $0x74] sm:$0xf] %vm719_vm4, %v4789_v41  ;;  %v4788_v51 = vpack.c.bf16 %v2097_v57, %v2097_v57  ;;  %v6665_v5 = vpop.f32.mrb[71].mxu1  ;;  %v2488_v15 = vmax.f32 %v6658_v0, 0.0  ;;  %v6684_v37 = vadd.f32 %v6493_v42, %v2376_v24  ;;  %v6688_v19 = vadd.f32 %v6493_v42, %v2844_v45 }
 0x1c1   : > { %1668 = vst.msk [vmem:[%s6245_s8 + $0x58] sm:$0xf] %vm719_vm4, %v4781_v61  ;;  %v6691_v18 = vadd.f32 %v6493_v42, %v5163_v32  ;;  %v2491_v14 = vmax.f32 %v6677_v48, 0.0  ;;  %v2961_v41 = vmax.f32 %v6680_v11, 0.0 }
 0x1c2   : > { %2137 = vst.msk [vmem:[%s6245_s8 + $0x70] sm:$0xf] %vm719_vm4, %v4788_v51  ;;  %v5130_v12 = vpop.f32.mrb[72].mxu0  ;;  %v2489_v56 = vmax.f32 %v6684_v37, 0.0  ;;  %v2959_v61 = vmax.f32 %v6688_v19, 0.0 }
 0x1c3   : > { %v2084_v7 = vld [vmem:[#allocation2 + $0x70] ss:$2 sm:$0xff]  ;;  %v2092_v10 = vld [vmem:[#allocation2 + $0x71] ss:$2 sm:$0xff]  ;;  %v2398_v53 = vadd.f32 %v6493_v42, %v5130_v12  ;;  %v5166_v50 = vpop.f32.mrb[72].mxu1  ;;  %v2389_v16 = vpop.f32.mrb[73].mxu0 }
 0x1c4   : > { %v2100_v13 = vmax.f32 %v2084_v7, %v2092_v10  ;;  %v2869_v23 = vadd.f32 %v6493_v42, %v5166_v50  ;;  %v2390_v25 = vadd.f32 %v6493_v42, %v2389_v16  ;;  %v2860_v21 = vpop.f32.mrb[73].mxu1  ;;  %v5131_v27 = vpop.f32.mrb[74].mxu0  ;;  %v2848_v7 = vadd.f32 %v6493_v42, %v6665_v5 }
 0x1c5   : > { %v2083_v59 = vld [vmem:[#allocation2 + $0x60] ss:$2 sm:$0xff]  ;;  %v2091_v17 = vld [vmem:[#allocation2 + $0x61] ss:$2 sm:$0xff]  ;;  %v2494_v31 = vmax.f32 %v2398_v53, 0.0  ;;  %v2861_v26 = vadd.f32 %v6493_v42, %v2860_v21  ;;  %v5167_v33 = vpop.f32.mrb[74].mxu1  ;;  %v2401_v35 = vadd.f32 %v6493_v42, %v5131_v27 }
 0x1c6   : > { %v4791_v20 = vpack.c.bf16 %v2100_v13, %v2100_v13  ;;  %v2099_v29 = vmax.f32 %v2083_v59, %v2091_v17  ;;  %v2392_v58 = vpop.f32.mrb[75].mxu0  ;;  %v2965_v8 = vmax.f32 %v2869_v23, 0.0  ;;  %v2492_v28 = vmax.f32 %v2390_v25, 0.0  ;;  %v2863_v4 = vpop.f32.mrb[75].mxu1 }
 0x1c7   : > { %v2872_v36 = vadd.f32 %v6493_v42, %v5167_v33  ;;  %v2518_v40 = vmax.f32 %v2486_v62, %v2494_v31  ;;  %v2963_v43 = vmax.f32 %v2861_v26, 0.0  ;;  %v2393_v46 = vadd.f32 %v6493_v42, %v2392_v58 }
 0x1c8   : > { %2140 = vst.msk [vmem:[%s6245_s8 + $0x7c] sm:$0xf] %vm719_vm4, %v4791_v20  ;;  %v4790_v38 = vpack.c.bf16 %v2099_v29, %v2099_v29  ;;  %v6701_v47 = vmax.f32 %v2957_v3, %v2965_v8  ;;  %v2516_v54 = vmax.f32 %v2484_v63, %v2492_v28  ;;  %v2495_v44 = vmax.f32 %v2401_v35, 0.0 }
 0x1c9   : > { %v2966_v49 = vmax.f32 %v2872_v36, 0.0  ;;  %2534 = vst.msk [vmem:[#allocation2 + $0x10] sm:$0xff] %vm631_vm3, %v2518_v40  ;;  %v6707_v30 = vmax.f32 %v2955_v1, %v2963_v43  ;;  %v2493_v39 = vmax.f32 %v2393_v46, 0.0  ;;  %v2864_v55 = vadd.f32 %v6493_v42, %v2863_v4 }
 0x1ca   : > { %2139 = vst.msk [vmem:[%s6245_s8 + $0x78] sm:$0xf] %vm719_vm4, %v4790_v38  ;;  %v2519_v57 = vmax.f32 %v2487_v2, %v2495_v44  ;;  %v5134_v45 = vpop.f32.mrb[76].mxu0  ;;  %v2962_v1 = vmax.f32 %v6691_v18, 0.0  ;;  %v2960_v20 = vmax.f32 %v2848_v7, 0.0 }
 0x1cb   : > { %2532 = vst.msk [vmem:[#allocation2] sm:$0xff] %vm631_vm3, %v2516_v54  ;;  %v2990_v24 = vmax.f32 %v2958_v52, %v2966_v49  ;;  %v2517_v62 = vmax.f32 %v2485_v6, %v2493_v39  ;;  %v2964_v32 = vmax.f32 %v2864_v55, 0.0  ;;  %v2414_v51 = vadd.f32 %v6493_v42, %v5134_v45  ;;  %v5170_v63 = vpop.f32.mrb[76].mxu1  ;;  %v2405_v3 = vpop.f32.mrb[77].mxu0 }
 0x1cc   : > { %2535 = vst.msk [vmem:[#allocation2 + $0x18] sm:$0xff] %vm631_vm3, %v2519_v57  ;;  %v2885_v10 = vadd.f32 %v6493_v42, %v5170_v63  ;;  %v2406_v2 = vadd.f32 %v6493_v42, %v2405_v3  ;;  %v2876_v52 = vpop.f32.mrb[77].mxu1  ;;  %v5135_v48 = vpop.f32.mrb[78].mxu0 }
 0x1cd   : > { %2533 = vst.msk [vmem:[#allocation2 + $0x8] sm:$0xff] %vm631_vm3, %v2517_v62  ;;  %v2988_v6 = vmax.f32 %v2956_v9, %v2964_v32  ;;  %v2498_v11 = vmax.f32 %v2414_v51, 0.0  ;;  %v2877_v12 = vadd.f32 %v6493_v42, %v2876_v52  ;;  %v2417_v13 = vadd.f32 %v6493_v42, %v5135_v48  ;;  %v5171_v37 = vpop.f32.mrb[78].mxu1  ;;  %v2408_v5 = vpop.f32.mrb[79].mxu0 }
 0x1ce   : > { %v2969_v53 = vmax.f32 %v2885_v10, 0.0  ;;  %v2496_v50 = vmax.f32 %v2406_v2, 0.0  ;;  %v2888_v16 = vadd.f32 %v6493_v42, %v5171_v37  ;;  %v2409_v59 = vadd.f32 %v6493_v42, %v2408_v5  ;;  %v2879_v17 = vpop.f32.mrb[79].mxu1 }
 0x1cf   : > { %v2522_v19 = vmax.f32 %v2490_v34, %v2498_v11  ;;  %v2967_v18 = vmax.f32 %v2877_v12, 0.0  ;;  %v2499_v22 = vmax.f32 %v2417_v13, 0.0  ;;  %v2880_v9 = vadd.f32 %v6493_v42, %v2879_v17 }
 0x1d0   : > { %v2993_v23 = vmax.f32 %v2961_v41, %v2969_v53  ;;  %v2520_v25 = vmax.f32 %v2488_v15, %v2496_v50  ;;  %v2970_v21 = vmax.f32 %v2888_v16, 0.0  ;;  %v2497_v27 = vmax.f32 %v2409_v59, 0.0 }
 0x1d1   : > { %2538 = vst.msk [vmem:[#allocation2 + $0x30] sm:$0xff] %vm631_vm3, %v2522_v19  ;;  %v2991_v29 = vmax.f32 %v2959_v61, %v2967_v18  ;;  %v2523_v31 = vmax.f32 %v2491_v14, %v2499_v22  ;;  %v2968_v26 = vmax.f32 %v2880_v9, 0.0 }
 0x1d2   : > { %2536 = vst.msk [vmem:[#allocation2 + $0x20] sm:$0xff] %vm631_vm3, %v2520_v25  ;;  %v2994_v60 = vmax.f32 %v2962_v1, %v2970_v21  ;;  %v2521_v34 = vmax.f32 %v2489_v56, %v2497_v27  ;;  %v5138_v33 = vpop.f32.mrb[80].mxu0 }
 0x1d3   : > { %v2549_v58 = vld [vmem:[#allocation2 + $0x10] ss:$2 sm:$0xff]  ;;  %v2557_v8 = vld [vmem:[#allocation2 + $0x11] ss:$2 sm:$0xff]  ;;  %2539 = vst.msk [vmem:[#allocation2 + $0x38] sm:$0xff] %vm631_vm3, %v2523_v31  ;;  %v2992_v28 = vmax.f32 %v2960_v20, %v2968_v26  ;;  %v2421_v0 = vpop.f32.mrb[81].mxu0 }
 0x1d4   : > { %v5174_v15 = vpop.f32.mrb[80].mxu1  ;;  %v2565_v35 = vmax.f32 %v2549_v58, %v2557_v8  ;;  %3005 = vst.msk [vmem:[#allocation2 + $0x10] sm:$0xff] %vm631_vm3, %v6701_v47  ;;  %3006 = vst.msk [vmem:[#allocation2 + $0x18] sm:$0xff] %vm631_vm3, %v2990_v24  ;;  %v2548_v36 = vld [vmem:[#allocation2] ss:$2 sm:$0xff]  ;;  %v5139_v38 = vpop.f32.mrb[82].mxu0  ;;  %v6750_v24 = vadd.f32 %v6493_v42, %v5138_v33  ;;  %v6753_v45 = vadd.f32 %v6493_v42, %v2421_v0 }
 0x1d5   : > { %v2556_v4 = vld [vmem:[#allocation2 + $0x1] ss:$2 sm:$0xff]  ;;  %2537 = vst.msk [vmem:[#allocation2 + $0x28] sm:$0xff] %vm631_vm3, %v2521_v34  ;;  %v2892_v40 = vpop.f32.mrb[81].mxu1  ;;  %v2424_v46 = vpop.f32.mrb[83].mxu0  ;;  %v6756_v61 = vadd.f32 %v6493_v42, %v5174_v15  ;;  %v6759_v3 = vadd.f32 %v6493_v42, %v5139_v38 }
 0x1d6   : > { %v2564_v43 = vmax.f32 %v2548_v36, %v2556_v4  ;;  %3003 = vst.msk [vmem:[#allocation2] sm:$0xff] %vm631_vm3, %v6707_v30  ;;  %3004 = vst.msk [vmem:[#allocation2 + $0x8] sm:$0xff] %vm631_vm3, %v2988_v6  ;;  %v5175_v54 = vpop.f32.mrb[82].mxu1  ;;  %v4794_v44 = vpack.c.bf16 %v2565_v35, %v2565_v35  ;;  %v6762_v1 = vadd.f32 %v6493_v42, %v2424_v46  ;;  %v2502_v22 = vmax.f32 %v6750_v24, 0.0 }
 0x1d7   : > { %v2895_v49 = vpop.f32.mrb[83].mxu1  ;;  %v6765_v7 = vadd.f32 %v6493_v42, %v2892_v40  ;;  %v6770_v48 = vadd.f32 %v6493_v42, %v5175_v54  ;;  %v2500_v9 = vmax.f32 %v6753_v45, 0.0  ;;  %v2503_v21 = vmax.f32 %v6759_v3, 0.0 }
 0x1d8   : > { %v4793_v47 = vpack.c.bf16 %v2564_v43, %v2564_v43  ;;  %2605 = vst.msk [vmem:[%s6245_s8 + $0x84] sm:$0xf] %vm719_vm4, %v4794_v44  ;;  %v6776_v37 = vadd.f32 %v6493_v42, %v2895_v49  ;;  %v2501_v27 = vmax.f32 %v6762_v1, 0.0 }
 0x1d9   : > { %v2971_v20 = vmax.f32 %v6765_v7, 0.0 }
 0x1da   : > { %2604 = vst.msk [vmem:[%s6245_s8 + $0x80] sm:$0xf] %vm719_vm4, %v4793_v47  ;;  %v2551_v14 = vld [vmem:[#allocation2 + $0x30] ss:$2 sm:$0xff]  ;;  %v2559_v39 = vld [vmem:[#allocation2 + $0x31] ss:$2 sm:$0xff] }
 0x1db   : > { %v5142_v55 = vpop.f32.mrb[84].mxu0  ;;  %v3020_v56 = vld [vmem:[#allocation2 + $0x10] ss:$2 sm:$0xff]  ;;  %v3028_v41 = vld [vmem:[#allocation2 + $0x11] ss:$2 sm:$0xff]  ;;  %v2567_v57 = vmax.f32 %v2551_v14, %v2559_v39  ;;  %3009 = vst.msk [vmem:[#allocation2 + $0x30] sm:$0xff] %vm631_vm3, %v2993_v23 }
 0x1dc   : > { %3010 = vst.msk [vmem:[#allocation2 + $0x38] sm:$0xff] %vm631_vm3, %v2994_v60  ;;  %v2550_v30 = vld [vmem:[#allocation2 + $0x20] ss:$2 sm:$0xff]  ;;  %v3036_v62 = vmax.f32 %v3020_v56, %v3028_v41  ;;  %v2558_v63 = vld [vmem:[#allocation2 + $0x21] ss:$2 sm:$0xff]  ;;  %v2437_v6 = vpop.f32.mrb[85].mxu0  ;;  %v6773_v13 = vadd.f32 %v6493_v42, %v5142_v55 }
 0x1dd   : > { %v3019_v32 = vld [vmem:[#allocation2] ss:$2 sm:$0xff]  ;;  %v3027_v51 = vld [vmem:[#allocation2 + $0x1] ss:$2 sm:$0xff]  ;;  %v4796_v2 = vpack.c.bf16 %v2567_v57, %v2567_v57  ;;  %v2566_v52 = vmax.f32 %v2550_v30, %v2558_v63  ;;  %3007 = vst.msk [vmem:[#allocation2 + $0x20] sm:$0xff] %vm631_vm3, %v2991_v29  ;;  %3008 = vst.msk [vmem:[#allocation2 + $0x28] sm:$0xff] %vm631_vm3, %v2992_v28  ;;  %v6781_v59 = vadd.f32 %v6493_v42, %v2437_v6 }
 0x1de   : > { %v3035_v10 = vmax.f32 %v3019_v32, %v3027_v51  ;;  %v5178_v11 = vpop.f32.mrb[84].mxu1  ;;  %v4803_v12 = vpack.c.bf16 %v3036_v62, %v3036_v62  ;;  %v5143_v5 = vpop.f32.mrb[86].mxu0  ;;  %v2973_v23 = vmax.f32 %v6756_v61, 0.0  ;;  %v2974_v29 = vmax.f32 %v6770_v48, 0.0 }
 0x1df   : > { %v2908_v53 = vpop.f32.mrb[85].mxu1  ;;  %2607 = vst.msk [vmem:[%s6245_s8 + $0x8c] sm:$0xf] %vm719_vm4, %v4796_v2  ;;  %v4795_v16 = vpack.c.bf16 %v2566_v52, %v2566_v52  ;;  %v2440_v17 = vpop.f32.mrb[87].mxu0  ;;  %v6784_v19 = vadd.f32 %v6493_v42, %v5178_v11  ;;  %v2506_v60 = vmax.f32 %v6773_v13, 0.0  ;;  %v2972_v34 = vmax.f32 %v6776_v37, 0.0 }
 0x1e0   : > { %v4802_v50 = vpack.c.bf16 %v3035_v10, %v3035_v10  ;;  %v5179_v18 = vpop.f32.mrb[86].mxu1  ;;  %3076 = vst.msk [vmem:[%s6245_s8 + $0xa4] sm:$0xf] %vm719_vm4, %v4803_v12  ;;  %v6802_v33 = vadd.f32 %v6493_v42, %v5143_v5  ;;  %v2504_v8 = vmax.f32 %v6781_v59, 0.0  ;;  %v6807_v0 = vadd.f32 %v6493_v42, %v2908_v53 }
 0x1e1   : > { %v2911_v25 = vpop.f32.mrb[87].mxu1  ;;  %2606 = vst.msk [vmem:[%s6245_s8 + $0x88] sm:$0xf] %vm719_vm4, %v4795_v16  ;;  %v2977_v28 = vmax.f32 %v6784_v19, 0.0  ;;  %v6810_v38 = vadd.f32 %v6493_v42, %v2440_v17  ;;  %v6813_v40 = vadd.f32 %v6493_v42, %v5179_v18 }
 0x1e2   : > { %3075 = vst.msk [vmem:[%s6245_s8 + $0xa0] sm:$0xf] %vm719_vm4, %v4802_v50  ;;  %v5146_v15 = vpop.f32.mrb[88].mxu0  ;;  %v2507_v11 = vmax.f32 %v6802_v33, 0.0  ;;  %v2975_v12 = vmax.f32 %v6807_v0, 0.0  ;;  %v2912_v16 = vadd.f32 %v6493_v42, %v2911_v25 }
 0x1e3   : > { %v3022_v31 = vld [vmem:[#allocation2 + $0x30] ss:$2 sm:$0xff]  ;;  %v3030_v26 = vld [vmem:[#allocation2 + $0x31] ss:$2 sm:$0xff]  ;;  %v5182_v35 = vpop.f32.mrb[88].mxu1  ;;  %v2462_v43 = vadd.f32 %v6493_v42, %v5146_v15  ;;  %v2453_v54 = vpop.f32.mrb[89].mxu0 }
 0x1e4   : > { %v3038_v58 = vmax.f32 %v3022_v31, %v3030_v26  ;;  %v3021_v36 = vld [vmem:[#allocation2 + $0x20] ss:$2 sm:$0xff]  ;;  %v3029_v4 = vld [vmem:[#allocation2 + $0x21] ss:$2 sm:$0xff]  ;;  %v2933_v46 = vadd.f32 %v6493_v42, %v5182_v35  ;;  %v2924_v44 = vpop.f32.mrb[89].mxu1  ;;  %v2454_v14 = vadd.f32 %v6493_v42, %v2453_v54  ;;  %v5147_v55 = vpop.f32.mrb[90].mxu0 }
 0x1e5   : > { %v3037_v47 = vmax.f32 %v3021_v36, %v3029_v4  ;;  %v2925_v39 = vadd.f32 %v6493_v42, %v2924_v44  ;;  %v5183_v56 = vpop.f32.mrb[90].mxu1  ;;  %v2510_v41 = vmax.f32 %v2462_v43, 0.0  ;;  %v2465_v30 = vadd.f32 %v6493_v42, %v5147_v55  ;;  %v2456_v45 = vpop.f32.mrb[91].mxu0 }
 0x1e6   : > { %v4805_v49 = vpack.c.bf16 %v3038_v58, %v3038_v58  ;;  %v2981_v57 = vmax.f32 %v2933_v46, 0.0  ;;  %v2936_v24 = vadd.f32 %v6493_v42, %v5183_v56  ;;  %v2927_v61 = vpop.f32.mrb[91].mxu1  ;;  %v2508_v32 = vmax.f32 %v2454_v14, 0.0 }
 0x1e7   : > { %v4804_v62 = vpack.c.bf16 %v3037_v47, %v3037_v47  ;;  %v2979_v51 = vmax.f32 %v2925_v39, 0.0  ;;  %v2457_v63 = vadd.f32 %v6493_v42, %v2456_v45  ;;  %v2526_v3 = vmax.f32 %v2502_v22, %v2510_v41 }
 0x1e8   : > { %3078 = vst.msk [vmem:[%s6245_s8 + $0xac] sm:$0xf] %vm719_vm4, %v4805_v49  ;;  %v6824_v1 = vmax.f32 %v2973_v23, %v2981_v57  ;;  %v2511_v7 = vmax.f32 %v2465_v30, 0.0  ;;  %v2982_v10 = vmax.f32 %v2936_v24, 0.0  ;;  %v2524_v2 = vmax.f32 %v2500_v9, %v2508_v32 }
 0x1e9   : > { %3077 = vst.msk [vmem:[%s6245_s8 + $0xa8] sm:$0xf] %vm719_vm4, %v4804_v62  ;;  %v6828_v52 = vmax.f32 %v2971_v20, %v2979_v51  ;;  %v2509_v48 = vmax.f32 %v2457_v63, 0.0  ;;  %v2928_v6 = vadd.f32 %v6493_v42, %v2927_v61  ;;  %v2505_v20 = vmax.f32 %v6810_v38, 0.0 }
 0x1ea   : > { %2542 = vst.msk [vmem:[#allocation2 + $0x50] sm:$0xff] %vm631_vm3, %v2526_v3  ;;  %v2527_v5 = vmax.f32 %v2503_v21, %v2511_v7  ;;  %v2998_v53 = vmax.f32 %v2974_v29, %v2982_v10  ;;  %v5150_v50 = vpop.f32.mrb[92].mxu0  ;;  %2540 = vst.msk [vmem:[#allocation2 + $0x40] sm:$0xff] %vm631_vm3, %v2524_v2  ;;  %v2978_v31 = vmax.f32 %v6813_v40, 0.0  ;;  %v2976_v39 = vmax.f32 %v2912_v16, 0.0 }
 0x1eb   : > { %v2525_v17 = vmax.f32 %v2501_v27, %v2509_v48  ;;  %v2980_v18 = vmax.f32 %v2928_v6, 0.0  ;;  %v2478_v22 = vadd.f32 %v6493_v42, %v5150_v50  ;;  %v5186_v9 = vpop.f32.mrb[92].mxu1  ;;  %v2469_v23 = vpop.f32.mrb[93].mxu0  ;;  %v6878_v16 = vld [vmem:[#allocation5] ss:$0 sm:$0xff] }
 0x1ec   : > { %2543 = vst.msk [vmem:[#allocation2 + $0x58] sm:$0xff] %vm631_vm3, %v2527_v5  ;;  %v2949_v21 = vadd.f32 %v6493_v42, %v5186_v9  ;;  %v2470_v29 = vadd.f32 %v6493_v42, %v2469_v23  ;;  %v2940_v26 = vpop.f32.mrb[93].mxu1  ;;  %v5151_v25 = vpop.f32.mrb[94].mxu0 }
 0x1ed   : > { %2541 = vst.msk [vmem:[#allocation2 + $0x48] sm:$0xff] %vm631_vm3, %v2525_v17  ;;  %v2996_v27 = vmax.f32 %v2972_v34, %v2980_v18  ;;  %v2514_v33 = vmax.f32 %v2478_v22, 0.0  ;;  %v2941_v58 = vadd.f32 %v6493_v42, %v2940_v26  ;;  %v2481_v0 = vadd.f32 %v6493_v42, %v5151_v25  ;;  %v5187_v15 = vpop.f32.mrb[94].mxu1  ;;  %v2472_v35 = vpop.f32.mrb[95].mxu0 }
 0x1ee   : > { %v2985_v36 = vmax.f32 %v2949_v21, 0.0  ;;  %v2512_v4 = vmax.f32 %v2470_v29, 0.0  ;;  %v2952_v38 = vadd.f32 %v6493_v42, %v5187_v15  ;;  %v2473_v40 = vadd.f32 %v6493_v42, %v2472_v35  ;;  %v2943_v43 = vpop.f32.mrb[95].mxu1 }
 0x1ef   : > { %v2530_v46 = vmax.f32 %v2506_v60, %v2514_v33  ;;  %v2983_v54 = vmax.f32 %v2941_v58, 0.0  ;;  %v2515_v37 = vmax.f32 %v2481_v0, 0.0  ;;  %v2944_v34 = vadd.f32 %v6493_v42, %v2943_v43 }
 0x1f0   : > { %v3001_v44 = vmax.f32 %v2977_v28, %v2985_v36  ;;  %v2528_v49 = vmax.f32 %v2504_v8, %v2512_v4  ;;  %v2986_v47 = vmax.f32 %v2952_v38, 0.0  ;;  %v2513_v14 = vmax.f32 %v2473_v40, 0.0 }
 0x1f1   : > { %2546 = vst.msk [vmem:[#allocation2 + $0x70] sm:$0xff] %vm631_vm3, %v2530_v46  ;;  %v2999_v55 = vmax.f32 %v2975_v12, %v2983_v54  ;;  %v2531_v56 = vmax.f32 %v2507_v11, %v2515_v37  ;;  %v2984_v41 = vmax.f32 %v2944_v34, 0.0 }
 0x1f2   : > { %2544 = vst.msk [vmem:[#allocation2 + $0x60] sm:$0xff] %vm631_vm3, %v2528_v49  ;;  %v3002_v13 = vmax.f32 %v2978_v31, %v2986_v47  ;;  %v2529_v60 = vmax.f32 %v2505_v20, %v2513_v14  ;;  %v5194_v57 = vpop.f32.mrb[96].mxu0 }
 0x1f3   : > { %v2553_v30 = vld [vmem:[#allocation2 + $0x50] ss:$2 sm:$0xff]  ;;  %v2561_v24 = vld [vmem:[#allocation2 + $0x51] ss:$2 sm:$0xff]  ;;  %2547 = vst.msk [vmem:[#allocation2 + $0x78] sm:$0xff] %vm631_vm3, %v2531_v56  ;;  %v3000_v19 = vmax.f32 %v2976_v39, %v2984_v41  ;;  %v3299_v59 = vpop.f32.mrb[97].mxu0 }
 0x1f4   : > { %v5230_v8 = vpop.f32.mrb[96].mxu1  ;;  %v2569_v28 = vmax.f32 %v2553_v30, %v2561_v24  ;;  %3013 = vst.msk [vmem:[#allocation2 + $0x50] sm:$0xff] %vm631_vm3, %v6824_v1  ;;  %3014 = vst.msk [vmem:[#allocation2 + $0x58] sm:$0xff] %vm631_vm3, %v2998_v53  ;;  %v2552_v45 = vld [vmem:[#allocation2 + $0x40] ss:$2 sm:$0xff]  ;;  %v5195_v62 = vpop.f32.mrb[98].mxu0  ;;  %v6873_v53 = vadd.f32 %v6493_v42, %v5194_v57  ;;  %v6876_v50 = vadd.f32 %v6493_v42, %v3299_v59 }
 0x1f5   : > { %v2560_v61 = vld [vmem:[#allocation2 + $0x41] ss:$2 sm:$0xff]  ;;  %2545 = vst.msk [vmem:[#allocation2 + $0x68] sm:$0xff] %vm631_vm3, %v2529_v60  ;;  %v3770_v32 = vpop.f32.mrb[97].mxu1  ;;  %v3302_v63 = vpop.f32.mrb[99].mxu0  ;;  %v6881_v17 = vadd.f32 %v6878_v16, %v5230_v8  ;;  %v6884_v20 = vadd.f32 %v6878_v16, %v5195_v62 }
 0x1f6   : > { %v2568_v51 = vmax.f32 %v2552_v45, %v2560_v61  ;;  %3011 = vst.msk [vmem:[#allocation2 + $0x40] sm:$0xff] %vm631_vm3, %v6828_v52  ;;  %3012 = vst.msk [vmem:[#allocation2 + $0x48] sm:$0xff] %vm631_vm3, %v2996_v27  ;;  %v5231_v3 = vpop.f32.mrb[98].mxu1  ;;  %v4798_v7 = vpack.c.bf16 %v2569_v28, %v2569_v28  ;;  %v6887_v31 = vadd.f32 %v6878_v16, %v3302_v63  ;;  %v3428_v37 = vmax.f32 %v6873_v53, 0.0 }
 0x1f7   : > { %v3773_v10 = vpop.f32.mrb[99].mxu1  ;;  %v6890_v21 = vadd.f32 %v6878_v16, %v3770_v32  ;;  %v6895_v25 = vadd.f32 %v6878_v16, %v5231_v3  ;;  %v3426_v34 = vmax.f32 %v6876_v50, 0.0  ;;  %v3429_v47 = vmax.f32 %v6884_v20, 0.0 }
 0x1f8   : > { %v4797_v1 = vpack.c.bf16 %v2568_v51, %v2568_v51  ;;  %2609 = vst.msk [vmem:[%s6245_s8 + $0x94] sm:$0xf] %vm719_vm4, %v4798_v7  ;;  %v6901_v15 = vadd.f32 %v6878_v16, %v3773_v10  ;;  %v3427_v14 = vmax.f32 %v6887_v31, 0.0 }
 0x1f9   : > { %v3897_v39 = vmax.f32 %v6890_v21, 0.0 }
 0x1fa   : > { %2608 = vst.msk [vmem:[%s6245_s8 + $0x90] sm:$0xf] %vm719_vm4, %v4797_v1  ;;  %v2555_v2 = vld [vmem:[#allocation2 + $0x70] ss:$2 sm:$0xff]  ;;  %v2563_v48 = vld [vmem:[#allocation2 + $0x71] ss:$2 sm:$0xff] }
 0x1fb   : > { %v5198_v6 = vpop.f32.mrb[100].mxu0  ;;  %v3024_v11 = vld [vmem:[#allocation2 + $0x50] ss:$2 sm:$0xff]  ;;  %v3032_v12 = vld [vmem:[#allocation2 + $0x51] ss:$2 sm:$0xff]  ;;  %v2571_v5 = vmax.f32 %v2555_v2, %v2563_v48  ;;  %3017 = vst.msk [vmem:[#allocation2 + $0x70] sm:$0xff] %vm631_vm3, %v3001_v44 }
 0x1fc   : > { %3018 = vst.msk [vmem:[#allocation2 + $0x78] sm:$0xff] %vm631_vm3, %v3002_v13  ;;  %v2554_v52 = vld [vmem:[#allocation2 + $0x60] ss:$2 sm:$0xff]  ;;  %v3040_v18 = vmax.f32 %v3024_v11, %v3032_v12  ;;  %v2562_v23 = vld [vmem:[#allocation2 + $0x61] ss:$2 sm:$0xff]  ;;  %v3315_v27 = vpop.f32.mrb[101].mxu0  ;;  %v6898_v0 = vadd.f32 %v6878_v16, %v5198_v6 }
 0x1fd   : > { %v3023_v22 = vld [vmem:[#allocation2 + $0x40] ss:$2 sm:$0xff]  ;;  %v3031_v9 = vld [vmem:[#allocation2 + $0x41] ss:$2 sm:$0xff]  ;;  %v4800_v29 = vpack.c.bf16 %v2571_v5, %v2571_v5  ;;  %v2570_v26 = vmax.f32 %v2554_v52, %v2562_v23  ;;  %3015 = vst.msk [vmem:[#allocation2 + $0x60] sm:$0xff] %vm631_vm3, %v2999_v55  ;;  %3016 = vst.msk [vmem:[#allocation2 + $0x68] sm:$0xff] %vm631_vm3, %v3000_v19  ;;  %v6906_v40 = vadd.f32 %v6878_v16, %v3315_v27 }
 0x1fe   : > { %v3039_v42 = vmax.f32 %v3023_v22, %v3031_v9  ;;  %v5234_v33 = vpop.f32.mrb[100].mxu1  ;;  %v4807_v58 = vpack.c.bf16 %v3040_v18, %v3040_v18  ;;  %v5199_v35 = vpop.f32.mrb[102].mxu0  ;;  %v3899_v44 = vmax.f32 %v6881_v17, 0.0  ;;  %v3900_v55 = vmax.f32 %v6895_v25, 0.0 }
 0x1ff   : > { %v3786_v36 = vpop.f32.mrb[101].mxu1  ;;  %2611 = vst.msk [vmem:[%s6245_s8 + $0x9c] sm:$0xf] %vm719_vm4, %v4800_v29  ;;  %v4799_v38 = vpack.c.bf16 %v2570_v26, %v2570_v26  ;;  %v3318_v43 = vpop.f32.mrb[103].mxu0  ;;  %v6909_v46 = vadd.f32 %v6878_v16, %v5234_v33  ;;  %v3432_v13 = vmax.f32 %v6898_v0, 0.0  ;;  %v3898_v60 = vmax.f32 %v6901_v15, 0.0 }
 0x200   : > { %v4806_v4 = vpack.c.bf16 %v3039_v42, %v3039_v42  ;;  %v5235_v54 = vpop.f32.mrb[102].mxu1  ;;  %3080 = vst.msk [vmem:[%s6245_s8 + $0xb4] sm:$0xf] %vm719_vm4, %v4807_v58  ;;  %v6927_v57 = vadd.f32 %v6878_v16, %v5199_v35  ;;  %v3430_v24 = vmax.f32 %v6906_v40, 0.0  ;;  %v6932_v59 = vadd.f32 %v6878_v16, %v3786_v36 }
 0x201   : > { %v3789_v49 = vpop.f32.mrb[103].mxu1  ;;  %2610 = vst.msk [vmem:[%s6245_s8 + $0x98] sm:$0xf] %vm719_vm4, %v4799_v38  ;;  %v3903_v19 = vmax.f32 %v6909_v46, 0.0  ;;  %v6935_v62 = vadd.f32 %v6878_v16, %v3318_v43  ;;  %v6938_v32 = vadd.f32 %v6878_v16, %v5235_v54 }
 0x202   : > { %3079 = vst.msk [vmem:[%s6245_s8 + $0xb0] sm:$0xf] %vm719_vm4, %v4806_v4  ;;  %v5202_v8 = vpop.f32.mrb[104].mxu0  ;;  %v3433_v33 = vmax.f32 %v6927_v57, 0.0  ;;  %v3901_v58 = vmax.f32 %v6932_v59, 0.0  ;;  %v3790_v38 = vadd.f32 %v6878_v16, %v3789_v49 }
 0x203   : > { %v3026_v56 = vld [vmem:[#allocation2 + $0x70] ss:$2 sm:$0xff]  ;;  %v3034_v41 = vld [vmem:[#allocation2 + $0x71] ss:$2 sm:$0xff]  ;;  %v5238_v28 = vpop.f32.mrb[104].mxu1  ;;  %v3340_v51 = vadd.f32 %v6878_v16, %v5202_v8  ;;  %v3331_v3 = vpop.f32.mrb[105].mxu0 }
 0x204   : > { %v3042_v30 = vmax.f32 %v3026_v56, %v3034_v41  ;;  %v3025_v45 = vld [vmem:[#allocation2 + $0x60] ss:$2 sm:$0xff]  ;;  %v3033_v61 = vld [vmem:[#allocation2 + $0x61] ss:$2 sm:$0xff]  ;;  %v3811_v63 = vadd.f32 %v6878_v16, %v5238_v28  ;;  %v3802_v7 = vpop.f32.mrb[105].mxu1  ;;  %v3332_v2 = vadd.f32 %v6878_v16, %v3331_v3  ;;  %v5203_v6 = vpop.f32.mrb[106].mxu0 }
 0x205   : > { %v3041_v1 = vmax.f32 %v3025_v45, %v3033_v61  ;;  %v3803_v48 = vadd.f32 %v6878_v16, %v3802_v7  ;;  %v5239_v11 = vpop.f32.mrb[106].mxu1  ;;  %v3436_v12 = vmax.f32 %v3340_v51, 0.0  ;;  %v3343_v52 = vadd.f32 %v6878_v16, %v5203_v6  ;;  %v3334_v50 = vpop.f32.mrb[107].mxu0 }
 0x206   : > { %v4809_v10 = vpack.c.bf16 %v3042_v30, %v3042_v30  ;;  %v3907_v5 = vmax.f32 %v3811_v63, 0.0  ;;  %v3814_v53 = vadd.f32 %v6878_v16, %v5239_v11  ;;  %v3805_v17 = vpop.f32.mrb[107].mxu1  ;;  %v3434_v22 = vmax.f32 %v3332_v2, 0.0 }
 0x207   : > { %v4808_v18 = vpack.c.bf16 %v3041_v1, %v3041_v1  ;;  %v3905_v9 = vmax.f32 %v3803_v48, 0.0  ;;  %v3335_v23 = vadd.f32 %v6878_v16, %v3334_v50  ;;  %v3460_v20 = vmax.f32 %v3428_v37, %v3436_v12 }
 0x208   : > { %3082 = vst.msk [vmem:[%s6245_s8 + $0xbc] sm:$0xf] %vm719_vm4, %v4809_v10  ;;  %v6949_v31 = vmax.f32 %v3899_v44, %v3907_v5  ;;  %v3437_v21 = vmax.f32 %v3343_v52, 0.0  ;;  %v3908_v42 = vmax.f32 %v3814_v53, 0.0  ;;  %v3458_v29 = vmax.f32 %v3426_v34, %v3434_v22 }
 0x209   : > { %3081 = vst.msk [vmem:[%s6245_s8 + $0xb8] sm:$0xf] %vm719_vm4, %v4808_v18  ;;  %v6953_v26 = vmax.f32 %v3897_v39, %v3905_v9  ;;  %v3435_v25 = vmax.f32 %v3335_v23, 0.0  ;;  %v3806_v27 = vadd.f32 %v6878_v16, %v3805_v17  ;;  %v3431_v39 = vmax.f32 %v6935_v62, 0.0 }
 0x20a   : > { %3476 = vst.msk [vmem:[#allocation2 + $0x10] sm:$0xff] %vm631_vm3, %v3460_v20  ;;  %v3461_v35 = vmax.f32 %v3429_v47, %v3437_v21  ;;  %v3932_v36 = vmax.f32 %v3900_v55, %v3908_v42  ;;  %v5206_v4 = vpop.f32.mrb[108].mxu0  ;;  %3474 = vst.msk [vmem:[#allocation2] sm:$0xff] %vm631_vm3, %v3458_v29  ;;  %v3904_v56 = vmax.f32 %v6938_v32, 0.0  ;;  %v3902_v48 = vmax.f32 %v3790_v38, 0.0 }
 0x20b   : > { %v3459_v43 = vmax.f32 %v3427_v14, %v3435_v25  ;;  %v3906_v54 = vmax.f32 %v3806_v27, 0.0  ;;  %v3356_v37 = vadd.f32 %v6878_v16, %v5206_v4  ;;  %v5242_v34 = vpop.f32.mrb[108].mxu1  ;;  %v3347_v44 = vpop.f32.mrb[109].mxu0 }
 0x20c   : > { %3477 = vst.msk [vmem:[#allocation2 + $0x18] sm:$0xff] %vm631_vm3, %v3461_v35  ;;  %v3827_v47 = vadd.f32 %v6878_v16, %v5242_v34  ;;  %v3348_v55 = vadd.f32 %v6878_v16, %v3347_v44  ;;  %v3818_v41 = vpop.f32.mrb[109].mxu1  ;;  %v5207_v49 = vpop.f32.mrb[110].mxu0 }
 0x20d   : > { %3475 = vst.msk [vmem:[#allocation2 + $0x8] sm:$0xff] %vm631_vm3, %v3459_v43  ;;  %v3930_v14 = vmax.f32 %v3898_v60, %v3906_v54  ;;  %v3440_v57 = vmax.f32 %v3356_v37, 0.0  ;;  %v3819_v30 = vadd.f32 %v6878_v16, %v3818_v41  ;;  %v3359_v59 = vadd.f32 %v6878_v16, %v5207_v49  ;;  %v5243_v8 = vpop.f32.mrb[110].mxu1  ;;  %v3350_v28 = vpop.f32.mrb[111].mxu0 }
 0x20e   : > { %v3911_v45 = vmax.f32 %v3827_v47, 0.0  ;;  %v3438_v61 = vmax.f32 %v3348_v55, 0.0  ;;  %v3830_v62 = vadd.f32 %v6878_v16, %v5243_v8  ;;  %v3351_v32 = vadd.f32 %v6878_v16, %v3350_v28  ;;  %v3821_v51 = vpop.f32.mrb[111].mxu1 }
 0x20f   : > { %v3464_v63 = vmax.f32 %v3432_v13, %v3440_v57  ;;  %v3909_v3 = vmax.f32 %v3819_v30, 0.0  ;;  %v3441_v15 = vmax.f32 %v3359_v59, 0.0  ;;  %v3822_v60 = vadd.f32 %v6878_v16, %v3821_v51 }
 0x210   : > { %v3935_v7 = vmax.f32 %v3903_v19, %v3911_v45  ;;  %v3462_v10 = vmax.f32 %v3430_v24, %v3438_v61  ;;  %v3912_v1 = vmax.f32 %v3830_v62, 0.0  ;;  %v3439_v2 = vmax.f32 %v3351_v32, 0.0 }
 0x211   : > { %3480 = vst.msk [vmem:[#allocation2 + $0x30] sm:$0xff] %vm631_vm3, %v3464_v63  ;;  %v3933_v6 = vmax.f32 %v3901_v58, %v3909_v3  ;;  %v3465_v11 = vmax.f32 %v3433_v33, %v3441_v15  ;;  %v3910_v12 = vmax.f32 %v3822_v60, 0.0 }
 0x212   : > { %3478 = vst.msk [vmem:[#allocation2 + $0x20] sm:$0xff] %vm631_vm3, %v3462_v10  ;;  %v3936_v0 = vmax.f32 %v3904_v56, %v3912_v1  ;;  %v3463_v13 = vmax.f32 %v3431_v39, %v3439_v2  ;;  %v5210_v5 = vpop.f32.mrb[112].mxu0 }
 0x213   : > { %v3491_v52 = vld [vmem:[#allocation2 + $0x10] ss:$2 sm:$0xff]  ;;  %v3499_v53 = vld [vmem:[#allocation2 + $0x11] ss:$2 sm:$0xff]  ;;  %3481 = vst.msk [vmem:[#allocation2 + $0x38] sm:$0xff] %vm631_vm3, %v3465_v11  ;;  %v3934_v46 = vmax.f32 %v3902_v48, %v3910_v12  ;;  %v3363_v40 = vpop.f32.mrb[113].mxu0 }
 0x214   : > { %v5246_v24 = vpop.f32.mrb[112].mxu1  ;;  %v3507_v19 = vmax.f32 %v3491_v52, %v3499_v53  ;;  %3947 = vst.msk [vmem:[#allocation2 + $0x10] sm:$0xff] %vm631_vm3, %v6949_v31  ;;  %3948 = vst.msk [vmem:[#allocation2 + $0x18] sm:$0xff] %vm631_vm3, %v3932_v36  ;;  %v3490_v50 = vld [vmem:[#allocation2] ss:$2 sm:$0xff]  ;;  %v5211_v18 = vpop.f32.mrb[114].mxu0  ;;  %v6998_v36 = vadd.f32 %v6878_v16, %v5210_v5  ;;  %v7001_v4 = vadd.f32 %v6878_v16, %v3363_v40 }
 0x215   : > { %v3498_v17 = vld [vmem:[#allocation2 + $0x1] ss:$2 sm:$0xff]  ;;  %3479 = vst.msk [vmem:[#allocation2 + $0x28] sm:$0xff] %vm631_vm3, %v3463_v13  ;;  %v3834_v22 = vpop.f32.mrb[113].mxu1  ;;  %v3366_v23 = vpop.f32.mrb[115].mxu0  ;;  %v7004_v38 = vadd.f32 %v6878_v16, %v5246_v24  ;;  %v7007_v44 = vadd.f32 %v6878_v16, %v5211_v18 }
 0x216   : > { %v3506_v9 = vmax.f32 %v3490_v50, %v3498_v17  ;;  %3945 = vst.msk [vmem:[#allocation2] sm:$0xff] %vm631_vm3, %v6953_v26  ;;  %3946 = vst.msk [vmem:[#allocation2 + $0x8] sm:$0xff] %vm631_vm3, %v3930_v14  ;;  %v5247_v20 = vpop.f32.mrb[114].mxu1  ;;  %v4812_v21 = vpack.c.bf16 %v3507_v19, %v3507_v19  ;;  %v7010_v39 = vadd.f32 %v6878_v16, %v3366_v23  ;;  %v3444_v15 = vmax.f32 %v6998_v36, 0.0 }
 0x217   : > { %v3837_v42 = vpop.f32.mrb[115].mxu1  ;;  %v7013_v56 = vadd.f32 %v6878_v16, %v3834_v22  ;;  %v7018_v49 = vadd.f32 %v6878_v16, %v5247_v20  ;;  %v3442_v60 = vmax.f32 %v7001_v4, 0.0  ;;  %v3445_v1 = vmax.f32 %v7007_v44, 0.0 }
 0x218   : > { %v4811_v31 = vpack.c.bf16 %v3506_v9, %v3506_v9  ;;  %3547 = vst.msk [vmem:[%s6245_s8 + $0xc4] sm:$0xf] %vm719_vm4, %v4812_v21  ;;  %v7024_v8 = vadd.f32 %v6878_v16, %v3837_v42  ;;  %v3443_v2 = vmax.f32 %v7010_v39, 0.0 }
 0x219   : > { %v3913_v48 = vmax.f32 %v7013_v56, 0.0 }
 0x21a   : > { %3546 = vst.msk [vmem:[%s6245_s8 + $0xc0] sm:$0xf] %vm719_vm4, %v4811_v31  ;;  %v3493_v29 = vld [vmem:[#allocation2 + $0x30] ss:$2 sm:$0xff]  ;;  %v3501_v25 = vld [vmem:[#allocation2 + $0x31] ss:$2 sm:$0xff] }
 0x21b   : > { %v5214_v27 = vpop.f32.mrb[116].mxu0  ;;  %v3962_v33 = vld [vmem:[#allocation2 + $0x10] ss:$2 sm:$0xff]  ;;  %v3970_v58 = vld [vmem:[#allocation2 + $0x11] ss:$2 sm:$0xff]  ;;  %v3509_v35 = vmax.f32 %v3493_v29, %v3501_v25  ;;  %3951 = vst.msk [vmem:[#allocation2 + $0x30] sm:$0xff] %vm631_vm3, %v3935_v7 }
 0x21c   : > { %3952 = vst.msk [vmem:[#allocation2 + $0x38] sm:$0xff] %vm631_vm3, %v3936_v0  ;;  %v3492_v26 = vld [vmem:[#allocation2 + $0x20] ss:$2 sm:$0xff]  ;;  %v3978_v43 = vmax.f32 %v3962_v33, %v3970_v58  ;;  %v3500_v34 = vld [vmem:[#allocation2 + $0x21] ss:$2 sm:$0xff]  ;;  %v3379_v14 = vpop.f32.mrb[117].mxu0  ;;  %v7021_v59 = vadd.f32 %v6878_v16, %v5214_v27 }
 0x21d   : > { %v3961_v54 = vld [vmem:[#allocation2] ss:$2 sm:$0xff]  ;;  %v3969_v37 = vld [vmem:[#allocation2 + $0x1] ss:$2 sm:$0xff]  ;;  %v4814_v55 = vpack.c.bf16 %v3509_v35, %v3509_v35  ;;  %v3508_v41 = vmax.f32 %v3492_v26, %v3500_v34  ;;  %3949 = vst.msk [vmem:[#allocation2 + $0x20] sm:$0xff] %vm631_vm3, %v3933_v6  ;;  %3950 = vst.msk [vmem:[#allocation2 + $0x28] sm:$0xff] %vm631_vm3, %v3934_v46  ;;  %v7029_v32 = vadd.f32 %v6878_v16, %v3379_v14 }
 0x21e   : > { %v3977_v47 = vmax.f32 %v3961_v54, %v3969_v37  ;;  %v5250_v57 = vpop.f32.mrb[116].mxu1  ;;  %v4821_v30 = vpack.c.bf16 %v3978_v43, %v3978_v43  ;;  %v5215_v28 = vpop.f32.mrb[118].mxu0  ;;  %v3915_v7 = vmax.f32 %v7004_v38, 0.0  ;;  %v3916_v6 = vmax.f32 %v7018_v49, 0.0 }
 0x21f   : > { %v3850_v45 = vpop.f32.mrb[117].mxu1  ;;  %3549 = vst.msk [vmem:[%s6245_s8 + $0xcc] sm:$0xf] %vm719_vm4, %v4814_v55  ;;  %v4813_v62 = vpack.c.bf16 %v3508_v41, %v3508_v41  ;;  %v3382_v51 = vpop.f32.mrb[119].mxu0  ;;  %v7032_v63 = vadd.f32 %v6878_v16, %v5250_v57  ;;  %v3448_v0 = vmax.f32 %v7021_v59, 0.0  ;;  %v3914_v13 = vmax.f32 %v7024_v8, 0.0 }
 0x220   : > { %v4820_v61 = vpack.c.bf16 %v3977_v47, %v3977_v47  ;;  %v5251_v3 = vpop.f32.mrb[118].mxu1  ;;  %4018 = vst.msk [vmem:[%s6245_s8 + $0xe4] sm:$0xf] %vm719_vm4, %v4821_v30  ;;  %v7050_v5 = vadd.f32 %v6878_v16, %v5215_v28  ;;  %v3446_v53 = vmax.f32 %v7029_v32, 0.0  ;;  %v7055_v40 = vadd.f32 %v6878_v16, %v3850_v45 }
 0x221   : > { %v3853_v10 = vpop.f32.mrb[119].mxu1  ;;  %3548 = vst.msk [vmem:[%s6245_s8 + $0xc8] sm:$0xf] %vm719_vm4, %v4813_v62  ;;  %v3919_v46 = vmax.f32 %v7032_v63, 0.0  ;;  %v7058_v18 = vadd.f32 %v6878_v16, %v3382_v51  ;;  %v7061_v22 = vadd.f32 %v6878_v16, %v5251_v3 }
 0x222   : > { %4017 = vst.msk [vmem:[%s6245_s8 + $0xe0] sm:$0xf] %vm719_vm4, %v4820_v61  ;;  %v5218_v24 = vpop.f32.mrb[120].mxu0  ;;  %v3449_v57 = vmax.f32 %v7050_v5, 0.0  ;;  %v3917_v30 = vmax.f32 %v7055_v40, 0.0  ;;  %v3854_v62 = vadd.f32 %v6878_v16, %v3853_v10 }
 0x223   : > { %v3964_v11 = vld [vmem:[#allocation2 + $0x30] ss:$2 sm:$0xff]  ;;  %v3972_v12 = vld [vmem:[#allocation2 + $0x31] ss:$2 sm:$0xff]  ;;  %v5254_v19 = vpop.f32.mrb[120].mxu1  ;;  %v3404_v9 = vadd.f32 %v6878_v16, %v5218_v24  ;;  %v3395_v20 = vpop.f32.mrb[121].mxu0 }
 0x224   : > { %v3980_v52 = vmax.f32 %v3964_v11, %v3972_v12  ;;  %v3963_v50 = vld [vmem:[#allocation2 + $0x20] ss:$2 sm:$0xff]  ;;  %v3971_v17 = vld [vmem:[#allocation2 + $0x21] ss:$2 sm:$0xff]  ;;  %v3875_v23 = vadd.f32 %v6878_v16, %v5254_v19  ;;  %v3866_v21 = vpop.f32.mrb[121].mxu1  ;;  %v3396_v29 = vadd.f32 %v6878_v16, %v3395_v20  ;;  %v5219_v27 = vpop.f32.mrb[122].mxu0 }
 0x225   : > { %v3979_v31 = vmax.f32 %v3963_v50, %v3971_v17  ;;  %v3867_v25 = vadd.f32 %v6878_v16, %v3866_v21  ;;  %v5255_v33 = vpop.f32.mrb[122].mxu1  ;;  %v3452_v58 = vmax.f32 %v3404_v9, 0.0  ;;  %v3407_v26 = vadd.f32 %v6878_v16, %v5219_v27  ;;  %v3398_v4 = vpop.f32.mrb[123].mxu0 }
 0x226   : > { %v4823_v42 = vpack.c.bf16 %v3980_v52, %v3980_v52  ;;  %v3923_v35 = vmax.f32 %v3875_v23, 0.0  ;;  %v3878_v36 = vadd.f32 %v6878_v16, %v5255_v33  ;;  %v3869_v38 = vpop.f32.mrb[123].mxu1  ;;  %v3450_v54 = vmax.f32 %v3396_v29, 0.0 }
 0x227   : > { %v4822_v43 = vpack.c.bf16 %v3979_v31, %v3979_v31  ;;  %v3921_v37 = vmax.f32 %v3867_v25, 0.0  ;;  %v3399_v34 = vadd.f32 %v6878_v16, %v3398_v4  ;;  %v3468_v44 = vmax.f32 %v3444_v15, %v3452_v58 }
 0x228   : > { %4020 = vst.msk [vmem:[%s6245_s8 + $0xec] sm:$0xf] %vm719_vm4, %v4823_v42  ;;  %v3939_v39 = vmax.f32 %v3915_v7, %v3923_v35  ;;  %v3453_v56 = vmax.f32 %v3407_v26, 0.0  ;;  %v3924_v47 = vmax.f32 %v3878_v36, 0.0  ;;  %v3466_v55 = vmax.f32 %v3442_v60, %v3450_v54 }
 0x229   : > { %4019 = vst.msk [vmem:[%s6245_s8 + $0xe8] sm:$0xf] %vm719_vm4, %v4822_v43  ;;  %v3937_v41 = vmax.f32 %v3913_v48, %v3921_v37  ;;  %v3451_v49 = vmax.f32 %v3399_v34, 0.0  ;;  %v3870_v14 = vadd.f32 %v6878_v16, %v3869_v38  ;;  %v3447_v48 = vmax.f32 %v7058_v18, 0.0 }
 0x22a   : > { %3484 = vst.msk [vmem:[#allocation2 + $0x50] sm:$0xff] %vm631_vm3, %v3468_v44  ;;  %v3469_v28 = vmax.f32 %v3445_v1, %v3453_v56  ;;  %v3940_v45 = vmax.f32 %v3916_v6, %v3924_v47  ;;  %v5222_v61 = vpop.f32.mrb[124].mxu0  ;;  %3482 = vst.msk [vmem:[#allocation2 + $0x40] sm:$0xff] %vm631_vm3, %v3466_v55  ;;  %v3920_v11 = vmax.f32 %v7061_v22, 0.0  ;;  %v3918_v25 = vmax.f32 %v3854_v62, 0.0 }
 0x22b   : > { %v3467_v51 = vmax.f32 %v3443_v2, %v3451_v49  ;;  %v3922_v3 = vmax.f32 %v3870_v14, 0.0  ;;  %v3420_v15 = vadd.f32 %v6878_v16, %v5222_v61  ;;  %v5258_v60 = vpop.f32.mrb[124].mxu1  ;;  %v3411_v7 = vpop.f32.mrb[125].mxu0 }
 0x22c   : > { %3485 = vst.msk [vmem:[#allocation2 + $0x58] sm:$0xff] %vm631_vm3, %v3469_v28  ;;  %v3891_v1 = vadd.f32 %v6878_v16, %v5258_v60  ;;  %v3412_v6 = vadd.f32 %v6878_v16, %v3411_v7  ;;  %v3882_v12 = vpop.f32.mrb[125].mxu1  ;;  %v5223_v10 = vpop.f32.mrb[126].mxu0 }
 0x22d   : > { %3483 = vst.msk [vmem:[#allocation2 + $0x48] sm:$0xff] %vm631_vm3, %v3467_v51  ;;  %v3938_v2 = vmax.f32 %v3914_v13, %v3922_v3  ;;  %v3456_v5 = vmax.f32 %v3420_v15, 0.0  ;;  %v3883_v52 = vadd.f32 %v6878_v16, %v3882_v12  ;;  %v3423_v40 = vadd.f32 %v6878_v16, %v5223_v10  ;;  %v5259_v24 = vpop.f32.mrb[126].mxu1  ;;  %v3414_v19 = vpop.f32.mrb[127].mxu0 }
 0x22e   : > { %v3927_v50 = vmax.f32 %v3891_v1, 0.0  ;;  %v3454_v17 = vmax.f32 %v3412_v6, 0.0  ;;  %v3894_v18 = vadd.f32 %v6878_v16, %v5259_v24  ;;  %v3415_v22 = vadd.f32 %v6878_v16, %v3414_v19  ;;  %v3885_v9 = vpop.f32.mrb[127].mxu1 }
 0x22f   : > { %v3472_v23 = vmax.f32 %v3448_v0, %v3456_v5  ;;  %v3925_v20 = vmax.f32 %v3883_v52, 0.0  ;;  %v3457_v8 = vmax.f32 %v3423_v40, 0.0  ;;  %v3886_v13 = vadd.f32 %v6878_v16, %v3885_v9 }
 0x230   : > { %v3943_v21 = vmax.f32 %v3919_v46, %v3927_v50  ;;  %v3470_v42 = vmax.f32 %v3446_v53, %v3454_v17  ;;  %v3928_v31 = vmax.f32 %v3894_v18, 0.0  ;;  %v3455_v29 = vmax.f32 %v3415_v22, 0.0 }
 0x231   : > { %3488 = vst.msk [vmem:[#allocation2 + $0x70] sm:$0xff] %vm631_vm3, %v3472_v23  ;;  %v3941_v27 = vmax.f32 %v3917_v30, %v3925_v20  ;;  %v3473_v33 = vmax.f32 %v3449_v57, %v3457_v8  ;;  %v3926_v58 = vmax.f32 %v3886_v13, 0.0 }
 0x232   : > { %3486 = vst.msk [vmem:[#allocation2 + $0x60] sm:$0xff] %vm631_vm3, %v3470_v42  ;;  %v3944_v59 = vmax.f32 %v3920_v11, %v3928_v31  ;;  %v3471_v0 = vmax.f32 %v3447_v48, %v3455_v29 }
 0x233   : > { %v3495_v16 = vld [vmem:[#allocation2 + $0x50] ss:$2 sm:$0xff]  ;;  %v3503_v63 = vld [vmem:[#allocation2 + $0x51] ss:$2 sm:$0xff]  ;;  %3489 = vst.msk [vmem:[#allocation2 + $0x78] sm:$0xff] %vm631_vm3, %v3473_v33  ;;  %v3942_v32 = vmax.f32 %v3918_v25, %v3926_v58 }
 0x234   : > { %v3511_v53 = vmax.f32 %v3495_v16, %v3503_v63  ;;  %3955 = vst.msk [vmem:[#allocation2 + $0x50] sm:$0xff] %vm631_vm3, %v3939_v39  ;;  %3956 = vst.msk [vmem:[#allocation2 + $0x58] sm:$0xff] %vm631_vm3, %v3940_v45  ;;  %v3494_v46 = vld [vmem:[#allocation2 + $0x40] ss:$2 sm:$0xff]  ;;  %v3502_v35 = vld [vmem:[#allocation2 + $0x41] ss:$2 sm:$0xff] }
 0x235   : > { %3487 = vst.msk [vmem:[#allocation2 + $0x68] sm:$0xff] %vm631_vm3, %v3471_v0  ;;  %v3510_v26 = vmax.f32 %v3494_v46, %v3502_v35  ;;  %3953 = vst.msk [vmem:[#allocation2 + $0x40] sm:$0xff] %vm631_vm3, %v3937_v41 }
 0x236   : > { %3954 = vst.msk [vmem:[#allocation2 + $0x48] sm:$0xff] %vm631_vm3, %v3938_v2  ;;  %v4816_v36 = vpack.c.bf16 %v3511_v53, %v3511_v53 }
 0x237   : > { %v4815_v4 = vpack.c.bf16 %v3510_v26, %v3510_v26 }
 0x238   : > { %3551 = vst.msk [vmem:[%s6245_s8 + $0xd4] sm:$0xf] %vm719_vm4, %v4816_v36 }
 0x239   : > { %3550 = vst.msk [vmem:[%s6245_s8 + $0xd0] sm:$0xf] %vm719_vm4, %v4815_v4 }
 0x23a   : > { %v3497_v38 = vld [vmem:[#allocation2 + $0x70] ss:$2 sm:$0xff]  ;;  %v3505_v43 = vld [vmem:[#allocation2 + $0x71] ss:$2 sm:$0xff] }
 0x23b   : > { %v3966_v54 = vld [vmem:[#allocation2 + $0x50] ss:$2 sm:$0xff]  ;;  %v3974_v37 = vld [vmem:[#allocation2 + $0x51] ss:$2 sm:$0xff]  ;;  %v3513_v34 = vmax.f32 %v3497_v38, %v3505_v43  ;;  %3959 = vst.msk [vmem:[#allocation2 + $0x70] sm:$0xff] %vm631_vm3, %v3943_v21  ;;  %3960 = vst.msk [vmem:[#allocation2 + $0x78] sm:$0xff] %vm631_vm3, %v3944_v59 }
 0x23c   : > { %v3496_v44 = vld [vmem:[#allocation2 + $0x60] ss:$2 sm:$0xff]  ;;  %v3982_v39 = vmax.f32 %v3966_v54, %v3974_v37  ;;  %v3504_v55 = vld [vmem:[#allocation2 + $0x61] ss:$2 sm:$0xff] }
 0x23d   : > { %v3965_v56 = vld [vmem:[#allocation2 + $0x40] ss:$2 sm:$0xff]  ;;  %v3973_v47 = vld [vmem:[#allocation2 + $0x41] ss:$2 sm:$0xff]  ;;  %v4818_v49 = vpack.c.bf16 %v3513_v34, %v3513_v34  ;;  %v3512_v14 = vmax.f32 %v3496_v44, %v3504_v55  ;;  %3957 = vst.msk [vmem:[#allocation2 + $0x60] sm:$0xff] %vm631_vm3, %v3941_v27  ;;  %3958 = vst.msk [vmem:[#allocation2 + $0x68] sm:$0xff] %vm631_vm3, %v3942_v32 }
 0x23e   : > { %v3981_v41 = vmax.f32 %v3965_v56, %v3973_v47  ;;  %v4825_v57 = vpack.c.bf16 %v3982_v39, %v3982_v39 }
 0x23f   : > { %3553 = vst.msk [vmem:[%s6245_s8 + $0xdc] sm:$0xf] %vm719_vm4, %v4818_v49  ;;  %v4817_v28 = vpack.c.bf16 %v3512_v14, %v3512_v14 }
 0x240   : > { %v4824_v30 = vpack.c.bf16 %v3981_v41, %v3981_v41  ;;  %4022 = vst.msk [vmem:[%s6245_s8 + $0xf4] sm:$0xf] %vm719_vm4, %v4825_v57 }
 0x241   : > { %3552 = vst.msk [vmem:[%s6245_s8 + $0xd8] sm:$0xf] %vm719_vm4, %v4817_v28 }
 0x242   : > { %4021 = vst.msk [vmem:[%s6245_s8 + $0xf0] sm:$0xf] %vm719_vm4, %v4824_v30  ;;  %v3968_v45 = vld [vmem:[#allocation2 + $0x70] ss:$2 sm:$0xff]  ;;  %v3976_v61 = vld [vmem:[#allocation2 + $0x71] ss:$2 sm:$0xff] }
 0x243   : > { %v3984_v62 = vmax.f32 %v3968_v45, %v3976_v61 }
 0x244   : > { %v3967_v51 = vld [vmem:[#allocation2 + $0x60] ss:$2 sm:$0xff]  ;;  %v3975_v3 = vld [vmem:[#allocation2 + $0x61] ss:$2 sm:$0xff] }
 0x245   : > { %v4827_v15 = vpack.c.bf16 %v3984_v62, %v3984_v62  ;;  %v3983_v60 = vmax.f32 %v3967_v51, %v3975_v3 }
 0x247   : > { %4024 = vst.msk [vmem:[%s6245_s8 + $0xfc] sm:$0xf] %vm719_vm4, %v4827_v15  ;;  %v4826_v7 = vpack.c.bf16 %v3983_v60, %v3983_v60 }
 0x249   : > { %4023 = vst.msk [vmem:[%s6245_s8 + $0xf8] sm:$0xf] %vm719_vm4, %v4826_v7 }
 0x24a PF: > { %s17_s19 = sadd.s32 1, %s5619_s19   ;;  %s7172_s6 = smov %s7181_s12 }
 0x24b   : > { %p14_p9 = scmp.ge.s32.totalorder %s17_s19, 6   ;;  %s7173_s12 = smov %s5595_s13 }
 0x24c   : > { %s7174_s13 = smov %s5599_s14  ;;  %s7175_s14 = smov %s5790_s26 }
 0x24d   : > { %s7176_s15 = smov %s5611_s17  ;;  %s7177_s16 = smov %s5615_s18 }
 0x24e   : > { %s7178_s17 = smov %s7172_s6  ;;  %s7179_s18 = smov %s7185_s20 }
 0x24f   :  { %16 = sbr.rel (!%p14_p9) target bundleno = 6 (0x6), region = 99 }
 0x256   :  { %4055 = vsyncpa [#allocation4], 1 }
 0x257   :  { %4057 = vsyncpa [#allocation4 + $0x1], 1 }
 0x258   :  { %4058 = vsyncpa [#allocation6], 1 }

// kernel: cnn_forward.5
= control target key start
LH: loop header
LB: loop body
LE: loop exit
PB: predicated region body
PF: predicated region fallthrough
CT: control target
= control target key end

     0   :  { %s6519_s12 = smov 0   ;;  %s6521_s13 = smov 0   ;;  %s7198_s0 = inlined_call_operand.vmem [shape: bf16[2,36,32,80], index: 0, kind: input, shape index: {}]   ;;  %s7199_s1 = inlined_call_operand.vmem [shape: bf16[5,80,32], index: 1, kind: input, shape index: {}]   ;;  %s7200_s2 = inlined_call_operand.vmem [shape: f32[1,32], index: 2, kind: input, shape index: {}]   ;;  %s7201_s3 = inlined_call_operand.vmem [shape: bf16[2,256,32], index: 3, kind: output, shape index: {}]  }
   0x1   :  { %s6523_s14 = smov 0   ;;  %s6525_s15 = smov 0  }
   0x2   :  { %s6527_s16 = smov 0  }
   0x3 LB: > { %s22_s17 = sadd.s32 1, %s6489_s14  ;;  %s25_s18 = sadd.s32 1, %s6493_s15  ;;  %s6497_s16 = sphi %s6527_s16, %s13_s16   ;;  %s6493_s15 = sphi %s6525_s15, %s7206_s15   ;;  %s6489_s14 = sphi %s6523_s14, %s7205_s14   ;;  %s6485_s13 = sphi %s6521_s13, %s7204_s13   ;;  %s6481_s12 = sphi %s6519_s12, %s7203_s12  }
   0x4   : > { %p23_p0 = scmp.ge.s32.totalorder %s22_s17, 2  ;;  %p4512_p1 = scmp.ge.s32.totalorder %s6497_s16, 1 }
   0x5   : > { %p151_p2 = scmp.lt.s32.totalorder %s6497_s16, 5 }
   0x6   : > { %s7208_s17 = smov (%p23_p0, %s22_s17), 0  ;;  %s7210_s18 = smov (!%p23_p0, %s25_s18), %s6493_s15 }
   0x7   : > { %p152_p3 = pnand %p4512_p1, %p151_p2  ;;  %p27_p4 = scmp.ge.s32.totalorder %s7210_s18, 2 }
   0x8   : > { %v6249_v0 = vld [vmem:[%s7199_s1 + $0x28] sm:$0xff] (!%p152_p3)   ;;  %p179_p5 = scmp.lt.s32.totalorder (!%p152_p3), %s6485_s13, 1  ;;  %v6251_v2 = vld [vmem:[%s7199_s1 + $0x30] sm:$0xff] (!%p152_p3)   ;;  %s5296_s27 = sshll.u32 (!%p152_p3), %s6481_s12, 8  ;;  %v6253_v4 = vld [vmem:[%s7199_s1 + $0x38] sm:$0xff] (!%p152_p3)   ;;  %vm399_vm0 = vcmask (!%p152_p3), 654336  }
   0x9   : > { %s7212_s18 = smov (%p27_p4, %s7210_s18), 0  ;;  %155 = sbr.rel (%p152_p3) target bundleno = 586 (0x24a), region = 32 }
   0xa   : > { %v6250_v1 = vld [vmem:[%s7199_s1 + $0x28] sm:$0xff] (!%p152_p3)   ;;  %5532 = vmatprep.subr.bf16.mxu0 (!%p152_p3), %v6249_v0  ;;  %v6252_v3 = vld [vmem:[%s7199_s1 + $0x30] sm:$0xff] (!%p152_p3)   ;;  %v6254_v5 = vld [vmem:[%s7199_s1 + $0x38] sm:$0xff] (!%p152_p3)   ;;  %vm2208_vm1 = vcmask (!%p152_p3), 261120   ;;  %vm2296_vm2 = vcmask (!%p152_p3), 257024  }
   0xb   : > { %5742 = vmatprep.subr.bf16.mxu1 (!%p152_p3), %v6250_v1  ;;  %5533 = vmatpush3.bf16.msra.mxu0 (!%p152_p3), %v6249_v0  ;;  %v6255_v6 = vld [vmem:[%s7199_s1 + $0x40] sm:$0xff] (!%p152_p3)   ;;  %v6257_v10 = vld [vmem:[%s7199_s1 + $0x48] sm:$0xff] (!%p152_p3)   ;;  %v6279_v24 = vld [vmem:[%s7199_s1 + $0x10] sm:$0xff] (!%p152_p3)  }
   0xc   : > { %5743 = vmatpush3.bf16.msra.mxu1 (!%p152_p3), %v6250_v1  ;;  %5534 = vmatprep.subr.bf16.mxu0 (!%p152_p3), %v6251_v2  ;;  %v6256_v7 = vld [vmem:[%s7199_s1 + $0x40] sm:$0xff] (!%p152_p3)   ;;  %v6258_v11 = vld [vmem:[%s7199_s1 + $0x48] sm:$0xff] (!%p152_p3)   ;;  %v6284_v28 = vld [vmem:[%s7199_s1 + $0x10] sm:$0xff] (!%p152_p3)  }
   0xd   : > { %5744 = vmatprep.subr.bf16.mxu1 (!%p152_p3), %v6252_v3  ;;  %v6262_v13 = vld [vmem:[%s7199_s1] sm:$0xff] (!%p152_p3)   ;;  %v6269_v18 = vld [vmem:[%s7199_s1 + $0x8] sm:$0xff] (!%p152_p3)   ;;  %v6286_v30 = vld [vmem:[%s7199_s1 + $0x18] sm:$0xff] (!%p152_p3)  }
   0xe   : > { %v6268_v16 = vld [vmem:[%s7199_s1] sm:$0xff] (!%p152_p3)   ;;  %v6274_v20 = vld [vmem:[%s7199_s1 + $0x8] sm:$0xff] (!%p152_p3)   ;;  %v6292_v34 = vld [vmem:[%s7199_s1 + $0x18] sm:$0xff] (!%p152_p3)  }
   0xf   : > { %5535 = vmatpush3.bf16.msra.mxu0 (!%p152_p3), %v6251_v2  ;;  %v6295_v36 = vld [vmem:[%s7199_s1 + $0x20] sm:$0xff] (!%p152_p3)   ;;  %v6304_v42 = vld [vmem:[%s7199_s1 + $0x50] sm:$0xff] (!%p152_p3)   ;;  %v6311_v60 = vld [vmem:[%s7199_s1 + $0x58] sm:$0xff] (!%p152_p3)  }
  0x10   : > { %s7214_s13 = smov (!%p179_p5, %s6485_s13), 1  ;;  %5745 = vmatpush3.bf16.msra.mxu1 %v6252_v3  ;;  %5536 = vmatprep.subr.bf16.mxu0 %v6253_v4  ;;  %v6300_v40 = vld [vmem:[%s7199_s1 + $0x20] sm:$0xff]   ;;  %v6310_v47 = vld [vmem:[%s7199_s1 + $0x50] sm:$0xff]   ;;  %v6316_v61 = vld [vmem:[%s7199_s1 + $0x58] sm:$0xff]  }
  0x11   : > { %s6208_s30 = smul.u32 576, %s7214_s13  ;;  %5746 = vmatprep.subr.bf16.mxu1 %v6254_v5  ;;  %v6321_v63 = vld [vmem:[%s7199_s1 + $0x60] sm:$0xff]   ;;  %s4515_s5 = sshll.u32 %s7214_s13, 5 }
  0x12   : > { %v6326_v1 = vld [vmem:[%s7199_s1 + $0x60] sm:$0xff]  }
  0x13   : > { %s183_s8 = scalar_lea.vmem %s7198_s0, %s6208_s30  ;;  %5537 = vmatpush3.bf16.msra.mxu0 %v6253_v4  ;;  %v6328_v4 = vld [vmem:[%s7199_s1 + $0x68] sm:$0xff]  }
  0x14   : > { %s6576_s9 = scalar_lea.vmem %s183_s8, %s5296_s27  ;;  %5747 = vmatpush3.bf16.msra.mxu1 %v6254_v5  ;;  %5538 = vmatprep.subr.bf16.mxu0 %v6255_v6  ;;  %v6334_v5 = vld [vmem:[%s7199_s1 + $0x68] sm:$0xff]  }
  0x15   : > { %v6259_v8 = vld [vmem:[%s6576_s9 + $0x10] sm:$0xff]   ;;  %5748 = vmatprep.subr.bf16.mxu1 %v6256_v7  ;;  %v6261_v12 = vld [vmem:[%s6576_s9 + $0x18] sm:$0xff]   ;;  %v6264_v15 = vld [vmem:[%s6576_s9 + $0x20] sm:$0xff]  }
  0x16   : > { %v6260_v9 = vld [vmem:[%s6576_s9 + $0x90] sm:$0xff]   ;;  %5542 = vmatprep.mubr.msk.bf16.mxu0 %vm399_vm0, %v6259_v8  ;;  %v6263_v14 = vld [vmem:[%s6576_s9 + $0x98] sm:$0xff]   ;;  %v6265_v17 = vld [vmem:[%s6576_s9 + $0xa0] sm:$0xff]  }
  0x17   : > { %5752 = vmatprep.mubr.msk.bf16.mxu1 %vm399_vm0, %v6260_v9  ;;  %5539 = vmatpush3.bf16.msra.mxu0 %v6255_v6  ;;  %v6266_v19 = vld [vmem:[%s6576_s9 + $0x28] sm:$0xff]   ;;  %v6270_v22 = vld [vmem:[%s6576_s9 + $0x30] sm:$0xff]   ;;  %v6272_v25 = vld [vmem:[%s6576_s9 + $0x38] sm:$0xff]  }
  0x18   : > { %5749 = vmatpush3.bf16.msra.mxu1 %v6256_v7  ;;  %5540 = vmatprep.subr.bf16.mxu0 %v6257_v10  ;;  %v6267_v21 = vld [vmem:[%s6576_s9 + $0xa8] sm:$0xff]   ;;  %v6271_v23 = vld [vmem:[%s6576_s9 + $0xb0] sm:$0xff]   ;;  %v6273_v26 = vld [vmem:[%s6576_s9 + $0xb8] sm:$0xff]  }
  0x19   : > { %5750 = vmatprep.subr.bf16.mxu1 %v6258_v11  ;;  %v6275_v27 = vld [vmem:[%s6576_s9 + $0x40] sm:$0xff]   ;;  %v6277_v31 = vld [vmem:[%s6576_s9 + $0x48] sm:$0xff]   ;;  %v6280_v33 = vld [vmem:[%s6576_s9 + $0x50] sm:$0xff]  }
  0x1a   : > { %v6276_v29 = vld [vmem:[%s6576_s9 + $0xc0] sm:$0xff]   ;;  %v6278_v32 = vld [vmem:[%s6576_s9 + $0xc8] sm:$0xff]   ;;  %v6281_v35 = vld [vmem:[%s6576_s9 + $0xd0] sm:$0xff]  }
  0x1b   : > { %5541 = vmatpush3.bf16.msra.mxu0 %v6257_v10  ;;  %v6282_v37 = vld [vmem:[%s6576_s9 + $0x58] sm:$0xff]   ;;  %v6285_v39 = vld [vmem:[%s6576_s9 + $0x60] sm:$0xff]   ;;  %v6288_v43 = vld [vmem:[%s6576_s9 + $0x68] sm:$0xff]  }
  0x1c   : > { %5751 = vmatpush3.bf16.msra.mxu1 %v6258_v11  ;;  %5574 = vmatprep.subr.bf16.mxu0 %v6262_v13  ;;  %v6283_v38 = vld [vmem:[%s6576_s9 + $0xd8] sm:$0xff]   ;;  %v6287_v41 = vld [vmem:[%s6576_s9 + $0xe0] sm:$0xff]   ;;  %v6289_v44 = vld [vmem:[%s6576_s9 + $0xe8] sm:$0xff]  }
  0x1d   : > { %5784 = vmatprep.subr.bf16.mxu1 %v6268_v16  ;;  %v6290_v45 = vld [vmem:[%s6576_s9 + $0x70] sm:$0xff]   ;;  %v6293_v48 = vld [vmem:[%s6576_s9 + $0x78] sm:$0xff]   ;;  %v6296_v50 = vld [vmem:[%s6576_s9 + $0x80] sm:$0xff]  }
  0x1e   : > { %5543 = vmatmul.mubr.msk.bf16.vlgmr.msra.gmra.mrb[0].mxu0 %vm399_vm0, %v6261_v12  ;;  %v6291_v46 = vld [vmem:[%s6576_s9 + $0xf0] sm:$0xff]   ;;  %v6294_v49 = vld [vmem:[%s6576_s9 + $0xf8] sm:$0xff]   ;;  %v6297_v51 = vld [vmem:[%s6576_s9 + $0x100] sm:$0xff]  }
  0x1f   : > { %5753 = vmatmul.mubr.msk.bf16.vlgmr.msra.gmra.mrb[0].mxu1 %vm399_vm0, %v6263_v14  ;;  %5575 = vmatpush3.bf16.msra.mxu0 %v6262_v13  ;;  %v6298_v52 = vld [vmem:[%s6576_s9 + $0x88] sm:$0xff]   ;;  %v6301_v54 = vld [vmem:[%s6576_s9] sm:$0xff]   ;;  %v6306_v58 = vld [vmem:[%s6576_s9 + $0x10] sm:$0xff]  }
  0x20   : > { %5546 = vmatprep.mubr.msk.bf16.mxu0 %vm399_vm0, %v6264_v15  ;;  %5756 = vmatprep.mubr.msk.bf16.mxu1 %vm399_vm0, %v6265_v17  ;;  %v6299_v53 = vld [vmem:[%s6576_s9 + $0x108] sm:$0xff]   ;;  %v6302_v55 = vld [vmem:[%s6576_s9 + $0x80] sm:$0xff]   ;;  %v6307_v59 = vld [vmem:[%s6576_s9 + $0x90] sm:$0xff]  }
  0x21   : > { %5785 = vmatpush3.bf16.msra.mxu1 %v6268_v16  ;;  %5576 = vmatprep.subr.bf16.mxu0 %v6269_v18  ;;  %v6303_v56 = vld [vmem:[%s6576_s9 + $0x8] sm:$0xff]   ;;  %v6308_v62 = vld [vmem:[%s6576_s9 + $0x18] sm:$0xff]   ;;  %v6312_v2 = vld [vmem:[%s6576_s9 + $0x20] sm:$0xff]  }
  0x22   : > { %5786 = vmatprep.subr.bf16.mxu1 %v6274_v20  ;;  %v6305_v57 = vld [vmem:[%s6576_s9 + $0x88] sm:$0xff]   ;;  %v6309_v0 = vld [vmem:[%s6576_s9 + $0x98] sm:$0xff]   ;;  %v6313_v3 = vld [vmem:[%s6576_s9 + $0xa0] sm:$0xff]  }
  0x23   : > { %5577 = vmatpush3.bf16.msra.mxu0 %v6269_v18  ;;  %v6314_v6 = vld [vmem:[%s6576_s9 + $0x28] sm:$0xff]   ;;  %v6337_v8 = vld [vmem:[%s7199_s1 + $0x70] sm:$0xff]   ;;  %v6346_v12 = vld [vmem:[%s7199_s1 + $0x78] sm:$0xff]  }
  0x24   : > { %5578 = vmatprep.subr.bf16.mxu0 %v6279_v24  ;;  %v6315_v7 = vld [vmem:[%s6576_s9 + $0xa8] sm:$0xff]   ;;  %v6342_v9 = vld [vmem:[%s7199_s1 + $0x70] sm:$0xff]   ;;  %v6352_v13 = vld [vmem:[%s7199_s1 + $0x78] sm:$0xff]  }
  0x25   : > { %5787 = vmatpush3.bf16.msra.mxu1 %v6274_v20  ;;  %v6317_v10 = vld [vmem:[%s6576_s9 + $0x30] sm:$0xff]   ;;  %v6319_v14 = vld [vmem:[%s6576_s9 + $0x38] sm:$0xff]   ;;  %v6322_v16 = vld [vmem:[%s6576_s9 + $0x40] sm:$0xff]  }
  0x26   : > { %5547 = vmatmul.mubr.msk.bf16.gmra.mrb[4].mxu0 %vm399_vm0, %v6266_v19  ;;  %5788 = vmatprep.subr.bf16.mxu1 %v6284_v28  ;;  %v6318_v11 = vld [vmem:[%s6576_s9 + $0xb0] sm:$0xff]   ;;  %v6320_v15 = vld [vmem:[%s6576_s9 + $0xb8] sm:$0xff]   ;;  %v6323_v17 = vld [vmem:[%s6576_s9 + $0xc0] sm:$0xff]  }
  0x27   : > { %5757 = vmatmul.mubr.msk.bf16.gmra.mrb[4].mxu1 %vm399_vm0, %v6267_v21  ;;  %5550 = vmatprep.mubr.msk.bf16.mxu0 %vm399_vm0, %v6270_v22  ;;  %v6324_v18 = vld [vmem:[%s6576_s9 + $0x48] sm:$0xff]   ;;  %v6327_v20 = vld [vmem:[%s6576_s9 + $0x50] sm:$0xff]   ;;  %v6330_v22 = vld [vmem:[%s6576_s9 + $0x58] sm:$0xff]  }
  0x28   : > { %5760 = vmatprep.mubr.msk.bf16.mxu1 %vm399_vm0, %v6271_v23  ;;  %5579 = vmatpush3.bf16.msra.mxu0 %v6279_v24  ;;  %v6325_v19 = vld [vmem:[%s6576_s9 + $0xc8] sm:$0xff]   ;;  %v6329_v21 = vld [vmem:[%s6576_s9 + $0xd0] sm:$0xff]   ;;  %v6331_v23 = vld [vmem:[%s6576_s9 + $0xd8] sm:$0xff]  }
  0x29   : > { %5789 = vmatpush3.bf16.msra.mxu1 %v6284_v28  ;;  %5580 = vmatprep.subr.bf16.mxu0 %v6286_v30  ;;  %v6332_v24 = vld [vmem:[%s6576_s9 + $0x60] sm:$0xff]   ;;  %v6338_v28 = vld [vmem:[%s6576_s9 + $0x70] sm:$0xff]  }
  0x2a   : > { %5790 = vmatprep.subr.bf16.mxu1 %v6292_v34 }
  0x2c   : > { %5581 = vmatpush3.bf16.msra.mxu0 %v6286_v30  ;;  %v6340_v30 = vld [vmem:[%s6576_s9 + $0x78] sm:$0xff]  }
  0x2d   : > { %5791 = vmatpush3.bf16.msra.mxu1 %v6292_v34  ;;  %5582 = vmatprep.subr.bf16.mxu0 %v6295_v36  ;;  %v6345_v34 = vld [vmem:[%s6576_s9 + $0x28] sm:$0xff]  }
  0x2e   : > { %5551 = vmatmul.mubr.msk.bf16.gmra.mrb[8].mxu0 %vm399_vm0, %v6272_v25  ;;  %5792 = vmatprep.subr.bf16.mxu1 %v6300_v40  ;;  %v6333_v25 = vld [vmem:[%s6576_s9 + $0xe0] sm:$0xff]  }
  0x2f   : > { %5761 = vmatmul.mubr.msk.bf16.gmra.mrb[8].mxu1 %vm399_vm0, %v6273_v26  ;;  %5554 = vmatprep.mubr.msk.bf16.mxu0 %vm399_vm0, %v6275_v27  ;;  %v6335_v26 = vld [vmem:[%s6576_s9 + $0x68] sm:$0xff]  }
  0x30   : > { %5764 = vmatprep.mubr.msk.bf16.mxu1 %vm399_vm0, %v6276_v29  ;;  %5583 = vmatpush3.bf16.msra.mxu0 %v6295_v36  ;;  %v6336_v27 = vld [vmem:[%s6576_s9 + $0xe8] sm:$0xff]   ;;  %v6339_v29 = vld [vmem:[%s6576_s9 + $0xf0] sm:$0xff]  }
  0x31   : > { %5793 = vmatpush3.bf16.msra.mxu1 %v6300_v40  ;;  %5616 = vmatprep.subr.bf16.mxu0 %v6304_v42  ;;  %v6348_v36 = vld [vmem:[%s6576_s9 + $0x30] sm:$0xff]   ;;  %v6350_v40 = vld [vmem:[%s6576_s9 + $0x38] sm:$0xff]  }
  0x32   : > { %5826 = vmatprep.subr.bf16.mxu1 %v6310_v47 }
  0x36   : > { %5555 = vmatmul.mubr.msk.bf16.gmra.mrb[12].mxu0 %vm399_vm0, %v6277_v31  ;;  %v6341_v31 = vld [vmem:[%s6576_s9 + $0xf8] sm:$0xff]  }
  0x37   : > { %5765 = vmatmul.mubr.msk.bf16.gmra.mrb[12].mxu1 %vm399_vm0, %v6278_v32  ;;  %5558 = vmatprep.mubr.msk.bf16.mxu0 %vm399_vm0, %v6280_v33  ;;  %v6343_v32 = vld [vmem:[%s6576_s9 + $0x20] sm:$0xff]  }
  0x38   : > { %5768 = vmatprep.mubr.msk.bf16.mxu1 %vm399_vm0, %v6281_v35  ;;  %v6344_v33 = vld [vmem:[%s6576_s9 + $0xa0] sm:$0xff]   ;;  %v6347_v35 = vld [vmem:[%s6576_s9 + $0xa8] sm:$0xff]  }
  0x3e   : > { %5559 = vmatmul.mubr.msk.bf16.gmra.mrb[16].mxu0 %vm399_vm0, %v6282_v37  ;;  %v6349_v37 = vld [vmem:[%s6576_s9 + $0xb0] sm:$0xff]  }
  0x3f   : > { %5769 = vmatmul.mubr.msk.bf16.gmra.mrb[16].mxu1 %vm399_vm0, %v6283_v38  ;;  %5562 = vmatprep.mubr.msk.bf16.mxu0 %vm399_vm0, %v6285_v39  ;;  %v6353_v38 = vld [vmem:[%s7199_s1 + $0x80] sm:$0xff]  }
  0x40   : > { %5772 = vmatprep.mubr.msk.bf16.mxu1 %vm399_vm0, %v6287_v41  ;;  %v6358_v39 = vld [vmem:[%s7199_s1 + $0x80] sm:$0xff]   ;;  %v6363_v41 = vld [vmem:[%s7199_s1 + $0x88] sm:$0xff]  }
  0x46   : > { %5563 = vmatmul.mubr.msk.bf16.gmra.mrb[20].mxu0 %vm399_vm0, %v6288_v43  ;;  %v6368_v43 = vld [vmem:[%s7199_s1 + $0x88] sm:$0xff]  }
  0x47   : > { %5773 = vmatmul.mubr.msk.bf16.gmra.mrb[20].mxu1 %vm399_vm0, %v6289_v44  ;;  %5566 = vmatprep.mubr.msk.bf16.mxu0 %vm399_vm0, %v6290_v45  ;;  %v6354_v44 = vld [vmem:[%s6576_s9 + $0x40] sm:$0xff]  }
  0x48   : > { %5776 = vmatprep.mubr.msk.bf16.mxu1 %vm399_vm0, %v6291_v46  ;;  %v6355_v45 = vld [vmem:[%s6576_s9 + $0xc0] sm:$0xff]   ;;  %v6370_v46 = vld [vmem:[%s7199_s1 + $0x90] sm:$0xff]  }
  0x4e   : > { %5567 = vmatmul.mubr.msk.bf16.gmra.mrb[24].mxu0 %vm399_vm0, %v6293_v48  ;;  %v6356_v48 = vld [vmem:[%s6576_s9 + $0x48] sm:$0xff]  }
  0x4f   : > { %5777 = vmatmul.mubr.msk.bf16.gmra.mrb[24].mxu1 %vm399_vm0, %v6294_v49  ;;  %5570 = vmatprep.mubr.msk.bf16.mxu0 %vm399_vm0, %v6296_v50  ;;  %v6357_v49 = vld [vmem:[%s6576_s9 + $0xc8] sm:$0xff]   ;;  %v6379_v50 = vld [vmem:[%s7199_s1 + $0x98] sm:$0xff]  }
  0x50   : > { %5780 = vmatprep.mubr.msk.bf16.mxu1 %vm399_vm0, %v6297_v51  ;;  %v6384_v51 = vld [vmem:[%s7199_s1 + $0x98] sm:$0xff]  }
  0x56   : > { %5571 = vmatmul.mubr.msk.bf16.gmra.mrb[28].mxu0 %vm399_vm0, %v6298_v52  ;;  %v6359_v52 = vld [vmem:[%s6576_s9 + $0x50] sm:$0xff]  }
  0x57   : > { %5781 = vmatmul.mubr.msk.bf16.gmra.mrb[28].mxu1 %vm399_vm0, %v6299_v53  ;;  %5584 = vmatprep.mubr.msk.bf16.mxu0 %vm399_vm0, %v6301_v54  ;;  %v6360_v53 = vld [vmem:[%s6576_s9 + $0xd0] sm:$0xff]   ;;  %v6388_v54 = vld [vmem:[%s7199_s1 + $0xa0] sm:$0xff]  }
  0x58   : > { %5794 = vmatprep.mubr.msk.bf16.mxu1 %vm399_vm0, %v6302_v55  ;;  %v6394_v55 = vld [vmem:[%s7199_s1 + $0xa0] sm:$0xff]  }
  0x5e   : > { %5585 = vmatmul.mubr.msk.bf16.vlgmr.msra.gmra.mrb[0].mxu0 %vm399_vm0, %v6303_v56  ;;  %v6361_v56 = vld [vmem:[%s6576_s9 + $0x58] sm:$0xff]  }
  0x5f   : > { %5795 = vmatmul.mubr.msk.bf16.vlgmr.msra.gmra.mrb[0].mxu1 %vm399_vm0, %v6305_v57  ;;  %5617 = vmatpush3.bf16.msra.mxu0 %v6304_v42  ;;  %v6351_v42 = vld [vmem:[%s6576_s9 + $0xb8] sm:$0xff]  }
  0x60   : > { %5588 = vmatprep.mubr.msk.bf16.mxu0 %vm399_vm0, %v6306_v58  ;;  %5798 = vmatprep.mubr.msk.bf16.mxu1 %vm399_vm0, %v6307_v59  ;;  %v6362_v57 = vld [vmem:[%s6576_s9 + $0xd8] sm:$0xff]   ;;  %v6364_v58 = vld [vmem:[%s6576_s9 + $0x60] sm:$0xff]  }
  0x61   : > { %5827 = vmatpush3.bf16.msra.mxu1 %v6310_v47  ;;  %5618 = vmatprep.subr.bf16.mxu0 %v6311_v60  ;;  %v6376_v47 = vld [vmem:[%s7199_s1 + $0x90] sm:$0xff]   ;;  %v6365_v59 = vld [vmem:[%s6576_s9 + $0xe0] sm:$0xff]  }
  0x62   : > { %5828 = vmatprep.subr.bf16.mxu1 %v6316_v61 }
  0x63   : > { %5619 = vmatpush3.bf16.msra.mxu0 %v6311_v60  ;;  %v6366_v60 = vld [vmem:[%s6576_s9 + $0x68] sm:$0xff]  }
  0x64   : > { %5620 = vmatprep.subr.bf16.mxu0 %v6321_v63 }
  0x65   : > { %5829 = vmatpush3.bf16.msra.mxu1 %v6316_v61  ;;  %v6367_v61 = vld [vmem:[%s6576_s9 + $0xe8] sm:$0xff]  }
  0x66   : > { %5589 = vmatmul.mubr.msk.bf16.gmra.mrb[4].mxu0 %vm399_vm0, %v6308_v62  ;;  %5830 = vmatprep.subr.bf16.mxu1 %v6326_v1  ;;  %v6369_v62 = vld [vmem:[%s6576_s9 + $0x70] sm:$0xff]  }
  0x67   : > { %5799 = vmatmul.mubr.msk.bf16.gmra.mrb[4].mxu1 %vm399_vm0, %v6309_v0  ;;  %5592 = vmatprep.mubr.msk.bf16.mxu0 %vm399_vm0, %v6312_v2  ;;  %v6372_v0 = vld [vmem:[%s6576_s9 + $0x78] sm:$0xff]   ;;  %v6374_v2 = vld [vmem:[%s6576_s9 + $0x80] sm:$0xff]  }
  0x68   : > { %5802 = vmatprep.mubr.msk.bf16.mxu1 %vm399_vm0, %v6313_v3  ;;  %5621 = vmatpush3.bf16.msra.mxu0 %v6321_v63  ;;  %v6371_v63 = vld [vmem:[%s6576_s9 + $0xf0] sm:$0xff]   ;;  %v6375_v3 = vld [vmem:[%s6576_s9 + $0x100] sm:$0xff]  }
  0x69   : > { %5831 = vmatpush3.bf16.msra.mxu1 %v6326_v1  ;;  %5622 = vmatprep.subr.bf16.mxu0 %v6328_v4  ;;  %v6373_v1 = vld [vmem:[%s6576_s9 + $0xf8] sm:$0xff]  }
  0x6a   : > { %5832 = vmatprep.subr.bf16.mxu1 %v6334_v5 }
  0x6c   : > { %5623 = vmatpush3.bf16.msra.mxu0 %v6328_v4  ;;  %v6377_v4 = vld [vmem:[%s6576_s9 + $0x88] sm:$0xff]  }
  0x6d   : > { %5833 = vmatpush3.bf16.msra.mxu1 %v6334_v5  ;;  %5624 = vmatprep.subr.bf16.mxu0 %v6337_v8  ;;  %v6378_v5 = vld [vmem:[%s6576_s9 + $0x108] sm:$0xff]  }
  0x6e   : > { %5593 = vmatmul.mubr.msk.bf16.gmra.mrb[8].mxu0 %vm399_vm0, %v6314_v6  ;;  %5834 = vmatprep.subr.bf16.mxu1 %v6342_v9  ;;  %v6380_v6 = vld [vmem:[%s6576_s9 + $0x90] sm:$0xff]  }
  0x6f   : > { %5803 = vmatmul.mubr.msk.bf16.gmra.mrb[8].mxu1 %vm399_vm0, %v6315_v7  ;;  %5596 = vmatprep.mubr.msk.bf16.mxu0 %vm399_vm0, %v6317_v10  ;;  %v6381_v7 = vld [vmem:[%s6576_s9 + $0x110] sm:$0xff]  }
  0x70   : > { %5806 = vmatprep.mubr.msk.bf16.mxu1 %vm399_vm0, %v6318_v11  ;;  %5625 = vmatpush3.bf16.msra.mxu0 %v6337_v8  ;;  %v6382_v8 = vld [vmem:[%s6576_s9 + $0x98] sm:$0xff]   ;;  %v6385_v10 = vld [vmem:[%s6576_s9 + $0x30] sm:$0xff]  }
  0x71   : > { %5835 = vmatpush3.bf16.msra.mxu1 %v6342_v9  ;;  %5658 = vmatprep.subr.bf16.mxu0 %v6346_v12  ;;  %v6383_v9 = vld [vmem:[%s6576_s9 + $0x118] sm:$0xff]   ;;  %v6386_v11 = vld [vmem:[%s6576_s9 + $0xb0] sm:$0xff]  }
  0x72   : > { %5868 = vmatprep.subr.bf16.mxu1 %v6352_v13 }
  0x76   : > { %5597 = vmatmul.mubr.msk.bf16.gmra.mrb[12].mxu0 %vm399_vm0, %v6319_v14  ;;  %v6390_v14 = vld [vmem:[%s6576_s9 + $0x40] sm:$0xff]  }
  0x77   : > { %5807 = vmatmul.mubr.msk.bf16.gmra.mrb[12].mxu1 %vm399_vm0, %v6320_v15  ;;  %5600 = vmatprep.mubr.msk.bf16.mxu0 %vm399_vm0, %v6322_v16  ;;  %v6391_v15 = vld [vmem:[%s6576_s9 + $0xc0] sm:$0xff]   ;;  %v6395_v16 = vld [vmem:[%s7199_s1 + $0xa8] sm:$0xff]  }
  0x78   : > { %5810 = vmatprep.mubr.msk.bf16.mxu1 %vm399_vm0, %v6323_v17  ;;  %v6400_v17 = vld [vmem:[%s7199_s1 + $0xa8] sm:$0xff]  }
  0x7e   : > { %5601 = vmatmul.mubr.msk.bf16.gmra.mrb[16].mxu0 %vm399_vm0, %v6324_v18  ;;  %v6405_v18 = vld [vmem:[%s7199_s1 + $0xb0] sm:$0xff]  }
  0x7f   : > { %5811 = vmatmul.mubr.msk.bf16.gmra.mrb[16].mxu1 %vm399_vm0, %v6325_v19  ;;  %5604 = vmatprep.mubr.msk.bf16.mxu0 %vm399_vm0, %v6327_v20  ;;  %v6392_v19 = vld [vmem:[%s6576_s9 + $0x48] sm:$0xff]   ;;  %v6410_v20 = vld [vmem:[%s7199_s1 + $0xb0] sm:$0xff]  }
  0x80   : > { %5814 = vmatprep.mubr.msk.bf16.mxu1 %vm399_vm0, %v6329_v21  ;;  %v6393_v21 = vld [vmem:[%s6576_s9 + $0xc8] sm:$0xff]  }
  0x86   : > { %5605 = vmatmul.mubr.msk.bf16.gmra.mrb[20].mxu0 %vm399_vm0, %v6330_v22  ;;  %v6396_v22 = vld [vmem:[%s6576_s9 + $0x50] sm:$0xff]  }
  0x87   : > { %5815 = vmatmul.mubr.msk.bf16.gmra.mrb[20].mxu1 %vm399_vm0, %v6331_v23  ;;  %5608 = vmatprep.mubr.msk.bf16.mxu0 %vm399_vm0, %v6332_v24  ;;  %v6397_v23 = vld [vmem:[%s6576_s9 + $0xd0] sm:$0xff]   ;;  %v6412_v24 = vld [vmem:[%s7199_s1 + $0xb8] sm:$0xff]  }
  0x88   : > { %5818 = vmatprep.mubr.msk.bf16.mxu1 %vm399_vm0, %v6333_v25  ;;  %v6418_v25 = vld [vmem:[%s7199_s1 + $0xb8] sm:$0xff]  }
  0x8e   : > { %5609 = vmatmul.mubr.msk.bf16.gmra.mrb[24].mxu0 %vm399_vm0, %v6335_v26  ;;  %v6421_v26 = vld [vmem:[%s7199_s1 + $0xc0] sm:$0xff]  }
  0x8f   : > { %5819 = vmatmul.mubr.msk.bf16.gmra.mrb[24].mxu1 %vm399_vm0, %v6336_v27  ;;  %5612 = vmatprep.mubr.msk.bf16.mxu0 %vm399_vm0, %v6338_v28  ;;  %v6398_v27 = vld [vmem:[%s6576_s9 + $0x58] sm:$0xff]   ;;  %v6426_v28 = vld [vmem:[%s7199_s1 + $0xc0] sm:$0xff]  }
  0x90   : > { %5822 = vmatprep.mubr.msk.bf16.mxu1 %vm399_vm0, %v6339_v29  ;;  %v6399_v29 = vld [vmem:[%s6576_s9 + $0xd8] sm:$0xff]  }
  0x96   : > { %5613 = vmatmul.mubr.msk.bf16.gmra.mrb[28].mxu0 %vm399_vm0, %v6340_v30  ;;  %v6401_v30 = vld [vmem:[%s6576_s9 + $0x60] sm:$0xff]  }
  0x97   : > { %5823 = vmatmul.mubr.msk.bf16.gmra.mrb[28].mxu1 %vm399_vm0, %v6341_v31  ;;  %5626 = vmatprep.mubr.msk.bf16.mxu0 %vm399_vm0, %v6343_v32  ;;  %v6402_v31 = vld [vmem:[%s6576_s9 + $0xe0] sm:$0xff]   ;;  %v6403_v32 = vld [vmem:[%s6576_s9 + $0x68] sm:$0xff]  }
  0x98   : > { %5836 = vmatprep.mubr.msk.bf16.mxu1 %vm399_vm0, %v6344_v33  ;;  %v6404_v33 = vld [vmem:[%s6576_s9 + $0xe8] sm:$0xff]  }
  0x9e   : > { %5627 = vmatmul.mubr.msk.bf16.vlgmr.msra.gmra.mrb[0].mxu0 %vm399_vm0, %v6345_v34  ;;  %v6406_v34 = vld [vmem:[%s6576_s9 + $0x70] sm:$0xff]  }
  0x9f   : > { %5837 = vmatmul.mubr.msk.bf16.vlgmr.msra.gmra.mrb[0].mxu1 %vm399_vm0, %v6347_v35  ;;  %5659 = vmatpush3.bf16.msra.mxu0 %v6346_v12  ;;  %v6387_v12 = vld [vmem:[%s6576_s9 + $0x38] sm:$0xff]   ;;  %v6407_v35 = vld [vmem:[%s6576_s9 + $0xf0] sm:$0xff]  }
  0xa0   : > { %5630 = vmatprep.mubr.msk.bf16.mxu0 %vm399_vm0, %v6348_v36  ;;  %5840 = vmatprep.mubr.msk.bf16.mxu1 %vm399_vm0, %v6349_v37  ;;  %v6408_v36 = vld [vmem:[%s6576_s9 + $0x78] sm:$0xff]  }
  0xa1   : > { %5869 = vmatpush3.bf16.msra.mxu1 %v6352_v13  ;;  %5660 = vmatprep.subr.bf16.mxu0 %v6353_v38  ;;  %v6389_v13 = vld [vmem:[%s6576_s9 + $0xb8] sm:$0xff]  }
  0xa2   : > { %5870 = vmatprep.subr.bf16.mxu1 %v6358_v39  ;;  %v6409_v37 = vld [vmem:[%s6576_s9 + $0xf8] sm:$0xff]  }
  0xa3   : > { %5661 = vmatpush3.bf16.msra.mxu0 %v6353_v38  ;;  %v6411_v38 = vld [vmem:[%s6576_s9 + $0x80] sm:$0xff]  }
  0xa4   : > { %5662 = vmatprep.subr.bf16.mxu0 %v6363_v41 }
  0xa5   : > { %5871 = vmatpush3.bf16.msra.mxu1 %v6358_v39  ;;  %v6413_v39 = vld [vmem:[%s6576_s9 + $0x100] sm:$0xff]  }
  0xa6   : > { %5631 = vmatmul.mubr.msk.bf16.gmra.mrb[4].mxu0 %vm399_vm0, %v6350_v40  ;;  %5872 = vmatprep.subr.bf16.mxu1 %v6368_v43  ;;  %v6414_v40 = vld [vmem:[%s6576_s9 + $0x88] sm:$0xff]  }
  0xa7   : > { %5841 = vmatmul.mubr.msk.bf16.gmra.mrb[4].mxu1 %vm399_vm0, %v6351_v42  ;;  %5634 = vmatprep.mubr.msk.bf16.mxu0 %vm399_vm0, %v6354_v44  ;;  %v6416_v42 = vld [vmem:[%s6576_s9 + $0x90] sm:$0xff]   ;;  %v6419_v44 = vld [vmem:[%s6576_s9 + $0x98] sm:$0xff]  }
  0xa8   : > { %5844 = vmatprep.mubr.msk.bf16.mxu1 %vm399_vm0, %v6355_v45  ;;  %5663 = vmatpush3.bf16.msra.mxu0 %v6363_v41  ;;  %v6415_v41 = vld [vmem:[%s6576_s9 + $0x108] sm:$0xff]   ;;  %v6420_v45 = vld [vmem:[%s6576_s9 + $0x118] sm:$0xff]  }
  0xa9   : > { %5873 = vmatpush3.bf16.msra.mxu1 %v6368_v43  ;;  %5664 = vmatprep.subr.bf16.mxu0 %v6370_v46  ;;  %v6417_v43 = vld [vmem:[%s6576_s9 + $0x110] sm:$0xff]  }
  0xaa   : > { %5874 = vmatprep.subr.bf16.mxu1 %v6376_v47 }
  0xac   : > { %5665 = vmatpush3.bf16.msra.mxu0 %v6370_v46  ;;  %v6422_v46 = vld [vmem:[%s6576_s9 + $0xa0] sm:$0xff]  }
  0xad   : > { %5875 = vmatpush3.bf16.msra.mxu1 %v6376_v47  ;;  %5666 = vmatprep.subr.bf16.mxu0 %v6379_v50  ;;  %v6423_v47 = vld [vmem:[%s6576_s9 + $0x120] sm:$0xff]  }
  0xae   : > { %5635 = vmatmul.mubr.msk.bf16.gmra.mrb[8].mxu0 %vm399_vm0, %v6356_v48  ;;  %5876 = vmatprep.subr.bf16.mxu1 %v6384_v51  ;;  %v6424_v48 = vld [vmem:[%s6576_s9 + $0xa8] sm:$0xff]  }
  0xaf   : > { %5845 = vmatmul.mubr.msk.bf16.gmra.mrb[8].mxu1 %vm399_vm0, %v6357_v49  ;;  %5638 = vmatprep.mubr.msk.bf16.mxu0 %vm399_vm0, %v6359_v52  ;;  %v6425_v49 = vld [vmem:[%s6576_s9 + $0x128] sm:$0xff]  }
  0xb0   : > { %5848 = vmatprep.mubr.msk.bf16.mxu1 %vm399_vm0, %v6360_v53  ;;  %5667 = vmatpush3.bf16.msra.mxu0 %v6379_v50  ;;  %v6427_v50 = vld [vmem:[%s6576_s9 + $0x40] sm:$0xff]   ;;  %v6429_v52 = vld [vmem:[%s6576_s9 + $0x48] sm:$0xff]  }
  0xb1   : > { %5877 = vmatpush3.bf16.msra.mxu1 %v6384_v51  ;;  %5700 = vmatprep.subr.bf16.mxu0 %v6388_v54  ;;  %v6428_v51 = vld [vmem:[%s6576_s9 + $0xc0] sm:$0xff]   ;;  %v6430_v53 = vld [vmem:[%s6576_s9 + $0xc8] sm:$0xff]  }
  0xb2   : > { %5910 = vmatprep.subr.bf16.mxu1 %v6394_v55 }
  0xb6   : > { %5639 = vmatmul.mubr.msk.bf16.gmra.mrb[12].mxu0 %vm399_vm0, %v6361_v56  ;;  %v6433_v56 = vld [vmem:[%s6576_s9 + $0x58] sm:$0xff]  }
  0xb7   : > { %5849 = vmatmul.mubr.msk.bf16.gmra.mrb[12].mxu1 %vm399_vm0, %v6362_v57  ;;  %5642 = vmatprep.mubr.msk.bf16.mxu0 %vm399_vm0, %v6364_v58  ;;  %v6434_v57 = vld [vmem:[%s6576_s9 + $0xd8] sm:$0xff]   ;;  %v6435_v58 = vld [vmem:[%s6576_s9 + $0x60] sm:$0xff]  }
  0xb8   : > { %5852 = vmatprep.mubr.msk.bf16.mxu1 %vm399_vm0, %v6365_v59  ;;  %v6436_v59 = vld [vmem:[%s6576_s9 + $0xe0] sm:$0xff]  }
  0xbe   : > { %5643 = vmatmul.mubr.msk.bf16.gmra.mrb[16].mxu0 %vm399_vm0, %v6366_v60  ;;  %v6437_v60 = vld [vmem:[%s6576_s9 + $0x68] sm:$0xff]  }
  0xbf   : > { %5853 = vmatmul.mubr.msk.bf16.gmra.mrb[16].mxu1 %vm399_vm0, %v6367_v61  ;;  %5646 = vmatprep.mubr.msk.bf16.mxu0 %vm399_vm0, %v6369_v62  ;;  %v6438_v61 = vld [vmem:[%s6576_s9 + $0xe8] sm:$0xff]   ;;  %v6439_v62 = vld [vmem:[%s6576_s9 + $0x70] sm:$0xff]  }
  0xc0   : > { %5856 = vmatprep.mubr.msk.bf16.mxu1 %vm399_vm0, %v6371_v63  ;;  %v6440_v63 = vld [vmem:[%s6576_s9 + $0xf0] sm:$0xff]  }
  0xc6   : > { %5647 = vmatmul.mubr.msk.bf16.gmra.mrb[20].mxu0 %vm399_vm0, %v6372_v0  ;;  %v6441_v0 = vld [vmem:[%s6576_s9 + $0x78] sm:$0xff]  }
  0xc7   : > { %5857 = vmatmul.mubr.msk.bf16.gmra.mrb[20].mxu1 %vm399_vm0, %v6373_v1  ;;  %5650 = vmatprep.mubr.msk.bf16.mxu0 %vm399_vm0, %v6374_v2  ;;  %v6442_v1 = vld [vmem:[%s6576_s9 + $0xf8] sm:$0xff]   ;;  %v6443_v2 = vld [vmem:[%s6576_s9 + $0x80] sm:$0xff]  }
  0xc8   : > { %5860 = vmatprep.mubr.msk.bf16.mxu1 %vm399_vm0, %v6375_v3  ;;  %v6444_v3 = vld [vmem:[%s6576_s9 + $0x100] sm:$0xff]  }
  0xce   : > { %5651 = vmatmul.mubr.msk.bf16.gmra.mrb[24].mxu0 %vm399_vm0, %v6377_v4  ;;  %v6445_v4 = vld [vmem:[%s6576_s9 + $0x88] sm:$0xff]  }
  0xcf   : > { %5861 = vmatmul.mubr.msk.bf16.gmra.mrb[24].mxu1 %vm399_vm0, %v6378_v5  ;;  %5654 = vmatprep.mubr.msk.bf16.mxu0 %vm399_vm0, %v6380_v6  ;;  %v6446_v5 = vld [vmem:[%s6576_s9 + $0x108] sm:$0xff]   ;;  %v6447_v6 = vld [vmem:[%s6576_s9 + $0x90] sm:$0xff]  }
  0xd0   : > { %5864 = vmatprep.mubr.msk.bf16.mxu1 %vm399_vm0, %v6381_v7  ;;  %v6448_v7 = vld [vmem:[%s6576_s9 + $0x110] sm:$0xff]  }
  0xd6   : > { %5655 = vmatmul.mubr.msk.bf16.gmra.mrb[28].mxu0 %vm399_vm0, %v6382_v8  ;;  %v6449_v8 = vld [vmem:[%s6576_s9 + $0x98] sm:$0xff]  }
  0xd7   : > { %5865 = vmatmul.mubr.msk.bf16.gmra.mrb[28].mxu1 %vm399_vm0, %v6383_v9  ;;  %5668 = vmatprep.mubr.msk.bf16.mxu0 %vm399_vm0, %v6385_v10  ;;  %v6450_v9 = vld [vmem:[%s6576_s9 + $0x118] sm:$0xff]   ;;  %v6451_v10 = vld [vmem:[%s6576_s9 + $0xa0] sm:$0xff]  }
  0xd8   : > { %5878 = vmatprep.mubr.msk.bf16.mxu1 %vm399_vm0, %v6386_v11  ;;  %v6452_v11 = vld [vmem:[%s6576_s9 + $0x120] sm:$0xff]  }
  0xde   : > { %5669 = vmatmul.mubr.msk.bf16.vlgmr.msra.gmra.mrb[0].mxu0 %vm399_vm0, %v6387_v12  ;;  %v6453_v12 = vld [vmem:[%s6576_s9 + $0xa8] sm:$0xff]  }
  0xdf   : > { %5879 = vmatmul.mubr.msk.bf16.vlgmr.msra.gmra.mrb[0].mxu1 %vm399_vm0, %v6389_v13  ;;  %5701 = vmatpush3.bf16.msra.mxu0 %v6388_v54  ;;  %v6431_v54 = vld [vmem:[%s6576_s9 + $0x50] sm:$0xff]   ;;  %v6454_v13 = vld [vmem:[%s6576_s9 + $0x128] sm:$0xff]  }
  0xe0   : > { %5672 = vmatprep.mubr.msk.bf16.mxu0 %vm399_vm0, %v6390_v14  ;;  %5882 = vmatprep.mubr.msk.bf16.mxu1 %vm399_vm0, %v6391_v15  ;;  %v6455_v14 = vld [vmem:[%s6576_s9 + $0xb0] sm:$0xff]  }
  0xe1   : > { %5911 = vmatpush3.bf16.msra.mxu1 %v6394_v55  ;;  %5702 = vmatprep.subr.bf16.mxu0 %v6395_v16  ;;  %v6432_v55 = vld [vmem:[%s6576_s9 + $0xd0] sm:$0xff]  }
  0xe2   : > { %5912 = vmatprep.subr.bf16.mxu1 %v6400_v17  ;;  %v6456_v15 = vld [vmem:[%s6576_s9 + $0x130] sm:$0xff]  }
  0xe3   : > { %5703 = vmatpush3.bf16.msra.mxu0 %v6395_v16  ;;  %v6457_v16 = vld [vmem:[%s6576_s9 + $0xb8] sm:$0xff]  }
  0xe4   : > { %5704 = vmatprep.subr.bf16.mxu0 %v6405_v18 }
  0xe5   : > { %5913 = vmatpush3.bf16.msra.mxu1 %v6400_v17  ;;  %v6458_v17 = vld [vmem:[%s6576_s9 + $0x138] sm:$0xff]   ;;  %s4514_s9 = sshll.u32 %s6481_s12, 4 }
  0xe6   : > { %5673 = vmatmul.mubr.msk.bf16.gmra.mrb[4].mxu0 %vm399_vm0, %v6392_v19  ;;  %5914 = vmatprep.subr.bf16.mxu1 %v6410_v20  ;;  %v7033_v19 = vld [vmem:[%s7200_s2] ss:$0 sm:$0xff]  ;;  %p7051_p6 = scmp.lt.s32.totalorder %s4514_s9, 31 }
  0xe7   : > { %5883 = vmatmul.mubr.msk.bf16.gmra.mrb[4].mxu1 %vm399_vm0, %v6393_v21  ;;  %5676 = vmatprep.mubr.msk.bf16.mxu0 %vm399_vm0, %v6396_v22 }
  0xe8   : > { %5886 = vmatprep.mubr.msk.bf16.mxu1 %vm399_vm0, %v6397_v23  ;;  %5705 = vmatpush3.bf16.msra.mxu0 %v6405_v18  ;;  %s7216_s9 = smov (!%p7051_p6, %s4514_s9), 31 }
  0xe9   : > { %5915 = vmatpush3.bf16.msra.mxu1 %v6410_v20  ;;  %5706 = vmatprep.subr.bf16.mxu0 %v6412_v24  ;;  %s190_s12 = sadd.s32 %s4515_s5, %s7216_s9 }
  0xea   : > { %5916 = vmatprep.subr.bf16.mxu1 %v6418_v25  ;;  %s4516_s13 = sshll.u32 %s190_s12, 2 }
  0xeb   : > { %s7083_s8 = scalar_lea.vmem %s7201_s3, %s4516_s13 }
  0xec   : > { %5707 = vmatpush3.bf16.msra.mxu0 %v6412_v24 }
  0xed   : > { %5917 = vmatpush3.bf16.msra.mxu1 %v6418_v25  ;;  %5708 = vmatprep.subr.bf16.mxu0 %v6421_v26 }
  0xee   : > { %5677 = vmatmul.mubr.msk.bf16.gmra.mrb[8].mxu0 %vm399_vm0, %v6398_v27  ;;  %5918 = vmatprep.subr.bf16.mxu1 %v6426_v28 }
  0xef   : > { %5887 = vmatmul.mubr.msk.bf16.gmra.mrb[8].mxu1 %vm399_vm0, %v6399_v29  ;;  %5680 = vmatprep.mubr.msk.bf16.mxu0 %vm399_vm0, %v6401_v30 }
  0xf0   : > { %5890 = vmatprep.mubr.msk.bf16.mxu1 %vm399_vm0, %v6402_v31  ;;  %5709 = vmatpush3.bf16.msra.mxu0 %v6421_v26 }
  0xf1   : > { %5919 = vmatpush3.bf16.msra.mxu1 %v6426_v28 }
  0xf6   : > { %5681 = vmatmul.mubr.msk.bf16.gmra.mrb[12].mxu0 %vm399_vm0, %v6403_v32 }
  0xf7   : > { %5891 = vmatmul.mubr.msk.bf16.gmra.mrb[12].mxu1 %vm399_vm0, %v6404_v33  ;;  %5684 = vmatprep.mubr.msk.bf16.mxu0 %vm399_vm0, %v6406_v34 }
  0xf8   : > { %5894 = vmatprep.mubr.msk.bf16.mxu1 %vm399_vm0, %v6407_v35 }
  0xfe   : > { %5685 = vmatmul.mubr.msk.bf16.gmra.mrb[16].mxu0 %vm399_vm0, %v6408_v36 }
  0xff   : > { %5895 = vmatmul.mubr.msk.bf16.gmra.mrb[16].mxu1 %vm399_vm0, %v6409_v37  ;;  %5688 = vmatprep.mubr.msk.bf16.mxu0 %vm399_vm0, %v6411_v38 }
 0x100   : > { %5898 = vmatprep.mubr.msk.bf16.mxu1 %vm399_vm0, %v6413_v39 }
 0x106   : > { %5689 = vmatmul.mubr.msk.bf16.gmra.mrb[20].mxu0 %vm399_vm0, %v6414_v40 }
 0x107   : > { %5899 = vmatmul.mubr.msk.bf16.gmra.mrb[20].mxu1 %vm399_vm0, %v6415_v41  ;;  %5692 = vmatprep.mubr.msk.bf16.mxu0 %vm399_vm0, %v6416_v42 }
 0x108   : > { %5902 = vmatprep.mubr.msk.bf16.mxu1 %vm399_vm0, %v6417_v43 }
 0x10e   : > { %5693 = vmatmul.mubr.msk.bf16.gmra.mrb[24].mxu0 %vm399_vm0, %v6419_v44 }
 0x10f   : > { %5903 = vmatmul.mubr.msk.bf16.gmra.mrb[24].mxu1 %vm399_vm0, %v6420_v45  ;;  %5696 = vmatprep.mubr.msk.bf16.mxu0 %vm399_vm0, %v6422_v46 }
 0x110   : > { %5906 = vmatprep.mubr.msk.bf16.mxu1 %vm399_vm0, %v6423_v47 }
 0x116   : > { %5697 = vmatmul.mubr.msk.bf16.gmra.mrb[28].mxu0 %vm399_vm0, %v6424_v48 }
 0x117   : > { %5907 = vmatmul.mubr.msk.bf16.gmra.mrb[28].mxu1 %vm399_vm0, %v6425_v49  ;;  %5710 = vmatprep.mubr.msk.bf16.mxu0 %vm399_vm0, %v6427_v50 }
 0x118   : > { %5920 = vmatprep.mubr.msk.bf16.mxu1 %vm399_vm0, %v6428_v51 }
 0x11e   : > { %5711 = vmatmul.mubr.msk.bf16.vlgmr.msra.gmra.mrb[0].mxu0 %vm399_vm0, %v6429_v52 }
 0x11f   : > { %5921 = vmatmul.mubr.msk.bf16.vlgmr.msra.gmra.mrb[0].mxu1 %vm399_vm0, %v6430_v53  ;;  %5714 = vmatprep.mubr.msk.bf16.mxu0 %vm399_vm0, %v6431_v54 }
 0x120   : > { %5924 = vmatprep.mubr.msk.bf16.mxu1 %vm399_vm0, %v6432_v55 }
 0x126   : > { %5715 = vmatmul.mubr.msk.bf16.gmra.mrb[4].mxu0 %vm399_vm0, %v6433_v56 }
 0x127   : > { %5925 = vmatmul.mubr.msk.bf16.gmra.mrb[4].mxu1 %vm399_vm0, %v6434_v57  ;;  %5718 = vmatprep.mubr.msk.bf16.mxu0 %vm399_vm0, %v6435_v58 }
 0x128   : > { %5928 = vmatprep.mubr.msk.bf16.mxu1 %vm399_vm0, %v6436_v59 }
 0x12e   : > { %5719 = vmatmul.mubr.msk.bf16.gmra.mrb[8].mxu0 %vm399_vm0, %v6437_v60 }
 0x12f   : > { %5929 = vmatmul.mubr.msk.bf16.gmra.mrb[8].mxu1 %vm399_vm0, %v6438_v61  ;;  %5722 = vmatprep.mubr.msk.bf16.mxu0 %vm399_vm0, %v6439_v62 }
 0x130   : > { %5932 = vmatprep.mubr.msk.bf16.mxu1 %vm399_vm0, %v6440_v63 }
 0x136   : > { %5723 = vmatmul.mubr.msk.bf16.gmra.mrb[12].mxu0 %vm399_vm0, %v6441_v0 }
 0x137   : > { %5933 = vmatmul.mubr.msk.bf16.gmra.mrb[12].mxu1 %vm399_vm0, %v6442_v1  ;;  %5726 = vmatprep.mubr.msk.bf16.mxu0 %vm399_vm0, %v6443_v2 }
 0x138   : > { %5936 = vmatprep.mubr.msk.bf16.mxu1 %vm399_vm0, %v6444_v3 }
 0x13e   : > { %5727 = vmatmul.mubr.msk.bf16.gmra.mrb[16].mxu0 %vm399_vm0, %v6445_v4 }
 0x13f   : > { %5937 = vmatmul.mubr.msk.bf16.gmra.mrb[16].mxu1 %vm399_vm0, %v6446_v5  ;;  %5730 = vmatprep.mubr.msk.bf16.mxu0 %vm399_vm0, %v6447_v6 }
 0x140   : > { %5940 = vmatprep.mubr.msk.bf16.mxu1 %vm399_vm0, %v6448_v7 }
 0x146   : > { %5731 = vmatmul.mubr.msk.bf16.gmra.mrb[20].mxu0 %vm399_vm0, %v6449_v8 }
 0x147   : > { %5941 = vmatmul.mubr.msk.bf16.gmra.mrb[20].mxu1 %vm399_vm0, %v6450_v9  ;;  %5734 = vmatprep.mubr.msk.bf16.mxu0 %vm399_vm0, %v6451_v10 }
 0x148   : > { %5944 = vmatprep.mubr.msk.bf16.mxu1 %vm399_vm0, %v6452_v11 }
 0x14e   : > { %5735 = vmatmul.mubr.msk.bf16.gmra.mrb[24].mxu0 %vm399_vm0, %v6453_v12 }
 0x14f   : > { %5945 = vmatmul.mubr.msk.bf16.gmra.mrb[24].mxu1 %vm399_vm0, %v6454_v13  ;;  %5738 = vmatprep.mubr.msk.bf16.mxu0 %vm399_vm0, %v6455_v14 }
 0x150   : > { %5948 = vmatprep.mubr.msk.bf16.mxu1 %vm399_vm0, %v6456_v15 }
 0x156   : > { %5739 = vmatmul.mubr.msk.bf16.gmra.mrb[28].mxu0 %vm399_vm0, %v6457_v16 }
 0x157   : > { %5949 = vmatmul.mubr.msk.bf16.gmra.mrb[28].mxu1 %vm399_vm0, %v6458_v17 }
 0x1f1   : > { %v5712_v18 = vpop.f32.mrb[0].mxu0 }
 0x1f2   : > { %v5922_v20 = vpop.f32.mrb[0].mxu1  ;;  %v1963_v21 = vpop.f32.mrb[1].mxu0  ;;  %v2130_v26 = vadd.f32 %v5712_v18, %v7033_v19 }
 0x1f3   : > { %v4067_v22 = vpop.f32.mrb[1].mxu1  ;;  %v5713_v23 = vpop.f32.mrb[2].mxu0  ;;  %v4228_v27 = vadd.f32 %v5922_v20, %v7033_v19  ;;  %v2128_v29 = vadd.f32 %v7033_v19, %v1963_v21 }
 0x1f4   : > { %v5923_v24 = vpop.f32.mrb[2].mxu1  ;;  %v1966_v25 = vpop.f32.mrb[3].mxu0  ;;  %v4226_v30 = vadd.f32 %v7033_v19, %v4067_v22  ;;  %v2131_v31 = vadd.f32 %v5713_v23, %v7033_v19  ;;  %v2162_v34 = vmax.f32 %v2130_v26, 0.0 }
 0x1f5   : > { %v4070_v28 = vpop.f32.mrb[3].mxu1  ;;  %v4229_v32 = vadd.f32 %v5923_v24, %v7033_v19  ;;  %v2129_v33 = vadd.f32 %v7033_v19, %v1966_v25  ;;  %v4260_v35 = vmax.f32 %v4228_v27, 0.0  ;;  %v2160_v37 = vmax.f32 %v2128_v29, 0.0 }
 0x1f6   : > { %v4258_v38 = vmax.f32 %v4226_v30, 0.0  ;;  %v2163_v39 = vmax.f32 %v2131_v31, 0.0  ;;  %v4227_v44 = vadd.f32 %v7033_v19, %v4070_v28 }
 0x1f7   : > { %v4261_v43 = vmax.f32 %v4229_v32, 0.0  ;;  %v2161_v49 = vmax.f32 %v2129_v33, 0.0 }
 0x1f8   : > { %v4259_v4 = vmax.f32 %v4227_v44, 0.0 }
 0x1f9   : > { %v5716_v36 = vpop.f32.mrb[4].mxu0 }
 0x1fa   : > { %v2134_v40 = vadd.f32 %v5716_v36, %v7033_v19  ;;  %v5926_v41 = vpop.f32.mrb[4].mxu1  ;;  %v1979_v42 = vpop.f32.mrb[5].mxu0 }
 0x1fb   : > { %v4232_v45 = vadd.f32 %v5926_v41, %v7033_v19  ;;  %v2132_v46 = vadd.f32 %v7033_v19, %v1979_v42  ;;  %v4083_v47 = vpop.f32.mrb[5].mxu1  ;;  %v5717_v48 = vpop.f32.mrb[6].mxu0 }
 0x1fc   : > { %v2166_v50 = vmax.f32 %v2134_v40, 0.0  ;;  %v4230_v51 = vadd.f32 %v7033_v19, %v4083_v47  ;;  %v2135_v52 = vadd.f32 %v5717_v48, %v7033_v19  ;;  %v5927_v53 = vpop.f32.mrb[6].mxu1  ;;  %v1982_v54 = vpop.f32.mrb[7].mxu0 }
 0x1fd   : > { %v4264_v55 = vmax.f32 %v4232_v45, 0.0  ;;  %v2164_v56 = vmax.f32 %v2132_v46, 0.0  ;;  %v4233_v57 = vadd.f32 %v5927_v53, %v7033_v19  ;;  %v2133_v58 = vadd.f32 %v7033_v19, %v1982_v54  ;;  %v4086_v59 = vpop.f32.mrb[7].mxu1 }
 0x1fe   : > { %v2194_v60 = vmax.f32 %v2162_v34, %v2166_v50  ;;  %v4262_v61 = vmax.f32 %v4230_v51, 0.0  ;;  %v2167_v62 = vmax.f32 %v2135_v52, 0.0  ;;  %v4231_v63 = vadd.f32 %v7033_v19, %v4086_v59 }
 0x1ff   : > { %v4292_v0 = vmax.f32 %v4260_v35, %v4264_v55  ;;  %v2192_v1 = vmax.f32 %v2160_v37, %v2164_v56  ;;  %v4265_v2 = vmax.f32 %v4233_v57, 0.0  ;;  %v2165_v3 = vmax.f32 %v2133_v58, 0.0 }
 0x200   : > { %2211 = vst.msk [vmem:[#allocation2 + $0x10] sm:$0xff] %vm2208_vm1, %v2194_v60  ;;  %v4290_v5 = vmax.f32 %v4258_v38, %v4262_v61  ;;  %v2195_v6 = vmax.f32 %v2163_v39, %v2167_v62  ;;  %v4263_v7 = vmax.f32 %v4231_v63, 0.0 }
 0x201   : > { %2209 = vst.msk [vmem:[#allocation2] sm:$0xff] %vm2208_vm1, %v2192_v1  ;;  %v4293_v8 = vmax.f32 %v4261_v43, %v4265_v2  ;;  %v2193_v9 = vmax.f32 %v2161_v49, %v2165_v3  ;;  %v5720_v10 = vpop.f32.mrb[8].mxu0 }
 0x202   : > { %2212 = vst.msk [vmem:[#allocation2 + $0x18] sm:$0xff] %vm2208_vm1, %v2195_v6  ;;  %v4291_v11 = vmax.f32 %v4259_v4, %v4263_v7  ;;  %v5930_v12 = vpop.f32.mrb[8].mxu1  ;;  %v1995_v13 = vpop.f32.mrb[9].mxu0  ;;  %v2138_v14 = vadd.f32 %v5720_v10, %v7033_v19 }
 0x203   : > { %2210 = vst.msk [vmem:[#allocation2 + $0x8] sm:$0xff] %vm2208_vm1, %v2193_v9  ;;  %v4099_v15 = vpop.f32.mrb[9].mxu1  ;;  %v5721_v16 = vpop.f32.mrb[10].mxu0  ;;  %v4236_v17 = vadd.f32 %v5930_v12, %v7033_v19  ;;  %v2136_v18 = vadd.f32 %v7033_v19, %v1995_v13 }
 0x204   : > { %v4234_v20 = vadd.f32 %v7033_v19, %v4099_v15  ;;  %v2139_v21 = vadd.f32 %v5721_v16, %v7033_v19  ;;  %v5931_v22 = vpop.f32.mrb[10].mxu1  ;;  %v1998_v23 = vpop.f32.mrb[11].mxu0  ;;  %v2170_v26 = vmax.f32 %v2138_v14, 0.0 }
 0x205   : > { %v4237_v24 = vadd.f32 %v5931_v22, %v7033_v19  ;;  %v4102_v25 = vpop.f32.mrb[11].mxu1  ;;  %v7074_v27 = vadd.f32 %v7033_v19, %v1998_v23  ;;  %v4268_v28 = vmax.f32 %v4236_v17, 0.0  ;;  %v2168_v29 = vmax.f32 %v2136_v18, 0.0 }
 0x206   : > { %v4266_v30 = vmax.f32 %v4234_v20, 0.0  ;;  %v2171_v31 = vmax.f32 %v2139_v21, 0.0  ;;  %v4235_v39 = vadd.f32 %v7033_v19, %v4102_v25 }
 0x207   : > { %v4269_v34 = vmax.f32 %v4237_v24, 0.0  ;;  %v2169_v44 = vmax.f32 %v7074_v27, 0.0 }
 0x208   : > { %v4267_v4 = vmax.f32 %v4235_v39, 0.0 }
 0x209   : > { %v2227_v32 = vld [vmem:[#allocation2 + $0x10] ss:$2 sm:$0xff]  ;;  %v2243_v33 = vld [vmem:[#allocation2 + $0x11] ss:$2 sm:$0xff]  ;;  %v5724_v35 = vpop.f32.mrb[12].mxu0 }
 0x20a   : > { %v2257_v36 = vmax.f32 %v2227_v32, %v2243_v33  ;;  %4308 = vst.msk [vmem:[#allocation2 + $0x10] sm:$0xff] %vm2208_vm1, %v4292_v0  ;;  %4309 = vst.msk [vmem:[#allocation2 + $0x18] sm:$0xff] %vm2208_vm1, %v4293_v8  ;;  %v2225_v37 = vld [vmem:[#allocation2] ss:$2 sm:$0xff]  ;;  %v2241_v38 = vld [vmem:[#allocation2 + $0x1] ss:$2 sm:$0xff]  ;;  %v2142_v40 = vadd.f32 %v5724_v35, %v7033_v19 }
 0x20b   : > { %v5934_v41 = vpop.f32.mrb[12].mxu1  ;;  %v2011_v42 = vpop.f32.mrb[13].mxu0  ;;  %v2256_v43 = vmax.f32 %v2225_v37, %v2241_v38  ;;  %4306 = vst.msk [vmem:[#allocation2] sm:$0xff] %vm2208_vm1, %v4290_v5  ;;  %4307 = vst.msk [vmem:[#allocation2 + $0x8] sm:$0xff] %vm2208_vm1, %v4291_v11 }
 0x20c   : > { %v4240_v45 = vadd.f32 %v5934_v41, %v7033_v19  ;;  %v2140_v46 = vadd.f32 %v7033_v19, %v2011_v42  ;;  %v4115_v47 = vpop.f32.mrb[13].mxu1  ;;  %v5725_v48 = vpop.f32.mrb[14].mxu0  ;;  %v5302_v49 = vpack.c.bf16 %v2257_v36, %v2257_v36  ;;  %v2174_v50 = vmax.f32 %v2142_v40, 0.0 }
 0x20d   : > { %v4238_v51 = vadd.f32 %v7033_v19, %v4115_v47  ;;  %v2143_v52 = vadd.f32 %v5725_v48, %v7033_v19  ;;  %v5935_v53 = vpop.f32.mrb[14].mxu1  ;;  %v2014_v54 = vpop.f32.mrb[15].mxu0  ;;  %v5301_v55 = vpack.c.bf16 %v2256_v43, %v2256_v43 }
 0x20e   : > { %v4272_v56 = vmax.f32 %v4240_v45, 0.0  ;;  %v2172_v57 = vmax.f32 %v2140_v46, 0.0  ;;  %v4241_v58 = vadd.f32 %v5935_v53, %v7033_v19  ;;  %v4118_v59 = vpop.f32.mrb[15].mxu1  ;;  %2298 = vst.msk [vmem:[%s7083_s8 + $0x4] sm:$0xf] %vm2296_vm2, %v5302_v49  ;;  %v2198_v60 = vmax.f32 %v2170_v26, %v2174_v50 }
 0x20f   : > { %v4270_v61 = vmax.f32 %v4238_v51, 0.0  ;;  %v2175_v62 = vmax.f32 %v2143_v52, 0.0  ;;  %v2141_v63 = vadd.f32 %v7033_v19, %v2014_v54  ;;  %2297 = vst.msk [vmem:[%s7083_s8] sm:$0xf] %vm2296_vm2, %v5301_v55  ;;  %v4239_v3 = vadd.f32 %v7033_v19, %v4118_v59 }
 0x210   : > { %v4296_v0 = vmax.f32 %v4268_v28, %v4272_v56  ;;  %v2196_v1 = vmax.f32 %v2168_v29, %v2172_v57  ;;  %v4273_v2 = vmax.f32 %v4241_v58, 0.0  ;;  %2215 = vst.msk [vmem:[#allocation2 + $0x30] sm:$0xff] %vm2208_vm1, %v2198_v60 }
 0x211   : > { %v4294_v5 = vmax.f32 %v4266_v30, %v4270_v61  ;;  %v2199_v6 = vmax.f32 %v2171_v31, %v2175_v62  ;;  %v2173_v7 = vmax.f32 %v2141_v63, 0.0  ;;  %v4323_v8 = vld [vmem:[#allocation2 + $0x10] ss:$2 sm:$0xff]  ;;  %v4331_v9 = vld [vmem:[#allocation2 + $0x11] ss:$2 sm:$0xff]  ;;  %v4271_v11 = vmax.f32 %v4239_v3, 0.0 }
 0x212   : > { %2213 = vst.msk [vmem:[#allocation2 + $0x20] sm:$0xff] %vm2208_vm1, %v2196_v1  ;;  %v4297_v10 = vmax.f32 %v4269_v34, %v4273_v2  ;;  %v5728_v12 = vpop.f32.mrb[16].mxu0  ;;  %v4339_v13 = vmax.f32 %v4323_v8, %v4331_v9  ;;  %v4322_v14 = vld [vmem:[#allocation2] ss:$2 sm:$0xff]  ;;  %v4330_v15 = vld [vmem:[#allocation2 + $0x1] ss:$2 sm:$0xff] }
 0x213   : > { %2216 = vst.msk [vmem:[#allocation2 + $0x38] sm:$0xff] %vm2208_vm1, %v2199_v6  ;;  %v2197_v16 = vmax.f32 %v2169_v44, %v2173_v7  ;;  %v5938_v17 = vpop.f32.mrb[16].mxu1  ;;  %v2027_v18 = vpop.f32.mrb[17].mxu0  ;;  %v4338_v20 = vmax.f32 %v4322_v14, %v4330_v15  ;;  %v4295_v21 = vmax.f32 %v4267_v4, %v4271_v11  ;;  %v2146_v25 = vadd.f32 %v5728_v12, %v7033_v19 }
 0x214   : > { %v4131_v22 = vpop.f32.mrb[17].mxu1  ;;  %v5729_v23 = vpop.f32.mrb[18].mxu0  ;;  %v5315_v24 = vpack.c.bf16 %v4339_v13, %v4339_v13  ;;  %v4244_v26 = vadd.f32 %v5938_v17, %v7033_v19  ;;  %v2144_v27 = vadd.f32 %v7033_v19, %v2027_v18 }
 0x215   : > { %2214 = vst.msk [vmem:[#allocation2 + $0x28] sm:$0xff] %vm2208_vm1, %v2197_v16  ;;  %v5939_v28 = vpop.f32.mrb[18].mxu1  ;;  %v2030_v29 = vpop.f32.mrb[19].mxu0  ;;  %v5314_v30 = vpack.c.bf16 %v4338_v20, %v4338_v20  ;;  %v4242_v31 = vadd.f32 %v7033_v19, %v4131_v22  ;;  %v2147_v33 = vadd.f32 %v5729_v23, %v7033_v19  ;;  %v2178_v35 = vmax.f32 %v2146_v25, 0.0 }
 0x216   : > { %v4134_v32 = vpop.f32.mrb[19].mxu1  ;;  %4379 = vst.msk [vmem:[%s7083_s8 + $0x24] sm:$0xf] %vm2296_vm2, %v5315_v24  ;;  %v4245_v34 = vadd.f32 %v5939_v28, %v7033_v19  ;;  %v4276_v36 = vmax.f32 %v4244_v26, 0.0  ;;  %v2176_v37 = vmax.f32 %v2144_v27, 0.0  ;;  %v2145_v50 = vadd.f32 %v7033_v19, %v2030_v29 }
 0x217   : > { %4378 = vst.msk [vmem:[%s7083_s8 + $0x20] sm:$0xf] %vm2296_vm2, %v5314_v30  ;;  %v4274_v40 = vmax.f32 %v4242_v31, 0.0  ;;  %v2179_v43 = vmax.f32 %v2147_v33, 0.0  ;;  %v4243_v51 = vadd.f32 %v7033_v19, %v4134_v32 }
 0x218   : > { %v4277_v44 = vmax.f32 %v4245_v34, 0.0  ;;  %v2177_v11 = vmax.f32 %v2145_v50, 0.0 }
 0x219   : > { %v5732_v41 = vpop.f32.mrb[20].mxu0  ;;  %v4275_v22 = vmax.f32 %v4243_v51, 0.0 }
 0x21a   : > { %v2231_v38 = vld [vmem:[#allocation2 + $0x30] ss:$2 sm:$0xff]  ;;  %v2247_v39 = vld [vmem:[#allocation2 + $0x31] ss:$2 sm:$0xff]  ;;  %v2150_v45 = vadd.f32 %v5732_v41, %v7033_v19  ;;  %v5942_v46 = vpop.f32.mrb[20].mxu1  ;;  %v2043_v47 = vpop.f32.mrb[21].mxu0 }
 0x21b   : > { %v2259_v42 = vmax.f32 %v2231_v38, %v2247_v39  ;;  %4312 = vst.msk [vmem:[#allocation2 + $0x30] sm:$0xff] %vm2208_vm1, %v4296_v0  ;;  %4313 = vst.msk [vmem:[#allocation2 + $0x38] sm:$0xff] %vm2208_vm1, %v4297_v10  ;;  %v4248_v52 = vadd.f32 %v5942_v46, %v7033_v19  ;;  %v2148_v53 = vadd.f32 %v7033_v19, %v2043_v47  ;;  %v4147_v54 = vpop.f32.mrb[21].mxu1  ;;  %v5733_v55 = vpop.f32.mrb[22].mxu0 }
 0x21c   : > { %v2229_v48 = vld [vmem:[#allocation2 + $0x20] ss:$2 sm:$0xff]  ;;  %v2245_v49 = vld [vmem:[#allocation2 + $0x21] ss:$2 sm:$0xff]  ;;  %v2182_v58 = vmax.f32 %v2150_v45, 0.0  ;;  %v4246_v59 = vadd.f32 %v7033_v19, %v4147_v54  ;;  %v5943_v60 = vpop.f32.mrb[22].mxu1  ;;  %v2151_v0 = vadd.f32 %v5733_v55, %v7033_v19 }
 0x21d   : > { %v5304_v56 = vpack.c.bf16 %v2259_v42, %v2259_v42  ;;  %v2258_v57 = vmax.f32 %v2229_v48, %v2245_v49  ;;  %4310 = vst.msk [vmem:[#allocation2 + $0x20] sm:$0xff] %vm2208_vm1, %v4294_v5  ;;  %4311 = vst.msk [vmem:[#allocation2 + $0x28] sm:$0xff] %vm2208_vm1, %v4295_v21  ;;  %v2046_v61 = vpop.f32.mrb[23].mxu0  ;;  %v4280_v62 = vmax.f32 %v4248_v52, 0.0  ;;  %v2180_v63 = vmax.f32 %v2148_v53, 0.0  ;;  %v4150_v2 = vpop.f32.mrb[23].mxu1 }
 0x21e   : > { %v4249_v1 = vadd.f32 %v5943_v60, %v7033_v19  ;;  %v2202_v4 = vmax.f32 %v2178_v35, %v2182_v58  ;;  %v4278_v5 = vmax.f32 %v4246_v59, 0.0  ;;  %v2149_v6 = vadd.f32 %v7033_v19, %v2046_v61 }
 0x21f   : > { %2300 = vst.msk [vmem:[%s7083_s8 + $0xc] sm:$0xf] %vm2296_vm2, %v5304_v56  ;;  %v5303_v3 = vpack.c.bf16 %v2258_v57, %v2258_v57  ;;  %v4300_v7 = vmax.f32 %v4276_v36, %v4280_v62  ;;  %v2200_v8 = vmax.f32 %v2176_v37, %v2180_v63  ;;  %v2183_v9 = vmax.f32 %v2151_v0, 0.0 }
 0x220   : > { %v4281_v10 = vmax.f32 %v4249_v1, 0.0  ;;  %2219 = vst.msk [vmem:[#allocation2 + $0x50] sm:$0xff] %vm2208_vm1, %v2202_v4  ;;  %v4298_v12 = vmax.f32 %v4274_v40, %v4278_v5  ;;  %v2181_v13 = vmax.f32 %v2149_v6, 0.0  ;;  %v4247_v14 = vadd.f32 %v7033_v19, %v4150_v2 }
 0x221   : > { %2299 = vst.msk [vmem:[%s7083_s8 + $0x8] sm:$0xf] %vm2296_vm2, %v5303_v3  ;;  %v2203_v17 = vmax.f32 %v2179_v43, %v2183_v9  ;;  %v5736_v20 = vpop.f32.mrb[24].mxu0 }
 0x222   : > { %v4325_v15 = vld [vmem:[#allocation2 + $0x30] ss:$2 sm:$0xff]  ;;  %v4333_v16 = vld [vmem:[#allocation2 + $0x31] ss:$2 sm:$0xff]  ;;  %2217 = vst.msk [vmem:[#allocation2 + $0x40] sm:$0xff] %vm2208_vm1, %v2200_v8  ;;  %v4301_v18 = vmax.f32 %v4277_v44, %v4281_v10  ;;  %v2201_v23 = vmax.f32 %v2177_v11, %v2181_v13  ;;  %v4279_v24 = vmax.f32 %v4247_v14, 0.0  ;;  %v2154_v29 = vadd.f32 %v5736_v20, %v7033_v19 }
 0x223   : > { %v4341_v21 = vmax.f32 %v4325_v15, %v4333_v16  ;;  %v5946_v25 = vpop.f32.mrb[24].mxu1  ;;  %v2059_v26 = vpop.f32.mrb[25].mxu0  ;;  %2220 = vst.msk [vmem:[#allocation2 + $0x58] sm:$0xff] %vm2208_vm1, %v2203_v17 }
 0x224   : > { %v4324_v27 = vld [vmem:[#allocation2 + $0x20] ss:$2 sm:$0xff]  ;;  %v4332_v28 = vld [vmem:[#allocation2 + $0x21] ss:$2 sm:$0xff]  ;;  %v4163_v30 = vpop.f32.mrb[25].mxu1  ;;  %v5737_v31 = vpop.f32.mrb[26].mxu0  ;;  %v4299_v34 = vmax.f32 %v4275_v22, %v4279_v24  ;;  %v4252_v35 = vadd.f32 %v5946_v25, %v7033_v19  ;;  %v2152_v38 = vadd.f32 %v7033_v19, %v2059_v26 }
 0x225   : > { %v5317_v32 = vpack.c.bf16 %v4341_v21, %v4341_v21  ;;  %v4340_v33 = vmax.f32 %v4324_v27, %v4332_v28  ;;  %2218 = vst.msk [vmem:[#allocation2 + $0x48] sm:$0xff] %vm2208_vm1, %v2201_v23  ;;  %v5947_v36 = vpop.f32.mrb[26].mxu1  ;;  %v2062_v37 = vpop.f32.mrb[27].mxu0  ;;  %v4250_v39 = vadd.f32 %v7033_v19, %v4163_v30  ;;  %v2155_v40 = vadd.f32 %v5737_v31, %v7033_v19 }
 0x226   : > { %v4166_v41 = vpop.f32.mrb[27].mxu1  ;;  %v4253_v43 = vadd.f32 %v5947_v36, %v7033_v19  ;;  %v2186_v44 = vmax.f32 %v2154_v29, 0.0  ;;  %v4284_v45 = vmax.f32 %v4252_v35, 0.0  ;;  %v2184_v46 = vmax.f32 %v2152_v38, 0.0 }
 0x227   : > { %4381 = vst.msk [vmem:[%s7083_s8 + $0x2c] sm:$0xf] %vm2296_vm2, %v5317_v32  ;;  %v5316_v42 = vpack.c.bf16 %v4340_v33, %v4340_v33  ;;  %v4282_v47 = vmax.f32 %v4250_v39, 0.0  ;;  %v2187_v48 = vmax.f32 %v2155_v40, 0.0  ;;  %v2153_v53 = vadd.f32 %v7033_v19, %v2062_v37 }
 0x228   : > { %v4285_v49 = vmax.f32 %v4253_v43, 0.0  ;;  %v4251_v60 = vadd.f32 %v7033_v19, %v4166_v41 }
 0x229   : > { %4380 = vst.msk [vmem:[%s7083_s8 + $0x28] sm:$0xf] %vm2296_vm2, %v5316_v42  ;;  %v5740_v50 = vpop.f32.mrb[28].mxu0  ;;  %v2185_v24 = vmax.f32 %v2153_v53, 0.0 }
 0x22a   : > { %v2235_v51 = vld [vmem:[#allocation2 + $0x50] ss:$2 sm:$0xff]  ;;  %v2251_v52 = vld [vmem:[#allocation2 + $0x51] ss:$2 sm:$0xff]  ;;  %v2158_v54 = vadd.f32 %v5740_v50, %v7033_v19  ;;  %v5950_v55 = vpop.f32.mrb[28].mxu1  ;;  %v2075_v56 = vpop.f32.mrb[29].mxu0 }
 0x22b   : > { %v2261_v57 = vmax.f32 %v2235_v51, %v2251_v52  ;;  %4316 = vst.msk [vmem:[#allocation2 + $0x50] sm:$0xff] %vm2208_vm1, %v4300_v7  ;;  %4317 = vst.msk [vmem:[#allocation2 + $0x58] sm:$0xff] %vm2208_vm1, %v4301_v18  ;;  %v4256_v61 = vadd.f32 %v5950_v55, %v7033_v19  ;;  %v2156_v62 = vadd.f32 %v7033_v19, %v2075_v56  ;;  %v4179_v63 = vpop.f32.mrb[29].mxu1  ;;  %v5741_v0 = vpop.f32.mrb[30].mxu0  ;;  %v4283_v29 = vmax.f32 %v4251_v60, 0.0 }
 0x22c   : > { %v2233_v58 = vld [vmem:[#allocation2 + $0x40] ss:$2 sm:$0xff]  ;;  %v2249_v59 = vld [vmem:[#allocation2 + $0x41] ss:$2 sm:$0xff]  ;;  %v2190_v2 = vmax.f32 %v2158_v54, 0.0  ;;  %v4254_v3 = vadd.f32 %v7033_v19, %v4179_v63  ;;  %v2159_v4 = vadd.f32 %v5741_v0, %v7033_v19  ;;  %v5951_v5 = vpop.f32.mrb[30].mxu1 }
 0x22d   : > { %v2260_v1 = vmax.f32 %v2233_v58, %v2249_v59  ;;  %4314 = vst.msk [vmem:[#allocation2 + $0x40] sm:$0xff] %vm2208_vm1, %v4298_v12  ;;  %4315 = vst.msk [vmem:[#allocation2 + $0x48] sm:$0xff] %vm2208_vm1, %v4299_v34  ;;  %v2078_v6 = vpop.f32.mrb[31].mxu0  ;;  %v5306_v7 = vpack.c.bf16 %v2261_v57, %v2261_v57  ;;  %v4288_v8 = vmax.f32 %v4256_v61, 0.0  ;;  %v2188_v9 = vmax.f32 %v2156_v62, 0.0  ;;  %v4182_v11 = vpop.f32.mrb[31].mxu1 }
 0x22e   : > { %v4257_v10 = vadd.f32 %v5951_v5, %v7033_v19  ;;  %v2206_v14 = vmax.f32 %v2186_v44, %v2190_v2  ;;  %v4286_v12 = vmax.f32 %v4254_v3, 0.0  ;;  %v2191_v15 = vmax.f32 %v2159_v4, 0.0 }
 0x22f   : > { %v5305_v13 = vpack.c.bf16 %v2260_v1, %v2260_v1  ;;  %2302 = vst.msk [vmem:[%s7083_s8 + $0x14] sm:$0xf] %vm2296_vm2, %v5306_v7  ;;  %v4304_v16 = vmax.f32 %v4284_v45, %v4288_v8  ;;  %v2204_v17 = vmax.f32 %v2184_v46, %v2188_v9  ;;  %v2157_v20 = vadd.f32 %v7033_v19, %v2078_v6 }
 0x230   : > { %v4289_v18 = vmax.f32 %v4257_v10, 0.0  ;;  %2223 = vst.msk [vmem:[#allocation2 + $0x70] sm:$0xff] %vm2208_vm1, %v2206_v14  ;;  %v4302_v21 = vmax.f32 %v4282_v47, %v4286_v12  ;;  %v2207_v22 = vmax.f32 %v2187_v48, %v2191_v15  ;;  %v4255_v23 = vadd.f32 %v7033_v19, %v4182_v11 }
 0x231   : > { %2301 = vst.msk [vmem:[%s7083_s8 + $0x10] sm:$0xf] %vm2296_vm2, %v5305_v13  ;;  %v2189_v26 = vmax.f32 %v2157_v20, 0.0 }
 0x232   : > { %2221 = vst.msk [vmem:[#allocation2 + $0x60] sm:$0xff] %vm2208_vm1, %v2204_v17  ;;  %v4305_v25 = vmax.f32 %v4285_v49, %v4289_v18  ;;  %v4327_v27 = vld [vmem:[#allocation2 + $0x50] ss:$2 sm:$0xff]  ;;  %v4335_v28 = vld [vmem:[#allocation2 + $0x51] ss:$2 sm:$0xff]  ;;  %2224 = vst.msk [vmem:[#allocation2 + $0x78] sm:$0xff] %vm2208_vm1, %v2207_v22 }
 0x233   : > { %v4287_v30 = vmax.f32 %v4255_v23, 0.0  ;;  %v4343_v31 = vmax.f32 %v4327_v27, %v4335_v28  ;;  %v2205_v34 = vmax.f32 %v2185_v24, %v2189_v26 }
 0x234   : > { %v4326_v32 = vld [vmem:[#allocation2 + $0x40] ss:$2 sm:$0xff]  ;;  %v4334_v33 = vld [vmem:[#allocation2 + $0x41] ss:$2 sm:$0xff] }
 0x235   : > { %v4342_v35 = vmax.f32 %v4326_v32, %v4334_v33  ;;  %v4303_v36 = vmax.f32 %v4283_v29, %v4287_v30  ;;  %v5319_v19 = vpack.c.bf16 %v4343_v31, %v4343_v31  ;;  %2222 = vst.msk [vmem:[#allocation2 + $0x68] sm:$0xff] %vm2208_vm1, %v2205_v34 }
 0x237   : > { %v5318_v37 = vpack.c.bf16 %v4342_v35, %v4342_v35  ;;  %4383 = vst.msk [vmem:[%s7083_s8 + $0x34] sm:$0xf] %vm2296_vm2, %v5319_v19 }
 0x239   : > { %4382 = vst.msk [vmem:[%s7083_s8 + $0x30] sm:$0xf] %vm2296_vm2, %v5318_v37  ;;  %v2239_v38 = vld [vmem:[#allocation2 + $0x70] ss:$2 sm:$0xff]  ;;  %v2255_v39 = vld [vmem:[#allocation2 + $0x71] ss:$2 sm:$0xff] }
 0x23a   : > { %v2263_v40 = vmax.f32 %v2239_v38, %v2255_v39  ;;  %4320 = vst.msk [vmem:[#allocation2 + $0x70] sm:$0xff] %vm2208_vm1, %v4304_v16  ;;  %4321 = vst.msk [vmem:[#allocation2 + $0x78] sm:$0xff] %vm2208_vm1, %v4305_v25 }
 0x23c   : > { %v5308_v41 = vpack.c.bf16 %v2263_v40, %v2263_v40  ;;  %v2237_v42 = vld [vmem:[#allocation2 + $0x60] ss:$2 sm:$0xff]  ;;  %v2253_v43 = vld [vmem:[#allocation2 + $0x61] ss:$2 sm:$0xff] }
 0x23d   : > { %v2262_v44 = vmax.f32 %v2237_v42, %v2253_v43  ;;  %4318 = vst.msk [vmem:[#allocation2 + $0x60] sm:$0xff] %vm2208_vm1, %v4302_v21  ;;  %4319 = vst.msk [vmem:[#allocation2 + $0x68] sm:$0xff] %vm2208_vm1, %v4303_v36 }
 0x23e   : > { %2304 = vst.msk [vmem:[%s7083_s8 + $0x1c] sm:$0xf] %vm2296_vm2, %v5308_v41 }
 0x23f   : > { %v5307_v45 = vpack.c.bf16 %v2262_v44, %v2262_v44 }
 0x241   : > { %v4329_v46 = vld [vmem:[#allocation2 + $0x70] ss:$2 sm:$0xff]  ;;  %v4337_v47 = vld [vmem:[#allocation2 + $0x71] ss:$2 sm:$0xff]  ;;  %2303 = vst.msk [vmem:[%s7083_s8 + $0x18] sm:$0xf] %vm2296_vm2, %v5307_v45 }
 0x242   : > { %v4345_v48 = vmax.f32 %v4329_v46, %v4337_v47 }
 0x244   : > { %v5321_v49 = vpack.c.bf16 %v4345_v48, %v4345_v48  ;;  %v4328_v50 = vld [vmem:[#allocation2 + $0x60] ss:$2 sm:$0xff]  ;;  %v4336_v51 = vld [vmem:[#allocation2 + $0x61] ss:$2 sm:$0xff] }
 0x245   : > { %v4344_v52 = vmax.f32 %v4328_v50, %v4336_v51 }
 0x246   : > { %4385 = vst.msk [vmem:[%s7083_s8 + $0x3c] sm:$0xf] %vm2296_vm2, %v5321_v49 }
 0x247   : > { %v5320_v53 = vpack.c.bf16 %v4344_v52, %v4344_v52 }
 0x249   : > { %4384 = vst.msk [vmem:[%s7083_s8 + $0x38] sm:$0xf] %vm2296_vm2, %v5320_v53 }
 0x24a PF: > { %s13_s16 = sadd.s32 1, %s6497_s16   ;;  %s7203_s12 = smov %s6489_s14 }
 0x24b   : > { %p10_p7 = scmp.ge.s32.totalorder %s13_s16, 6   ;;  %s7204_s13 = smov %s6493_s15 }
 0x24c   : > { %s7205_s14 = smov %s7208_s17  ;;  %s7206_s15 = smov %s7212_s18 }
 0x24d   :  { %12 = sbr.rel (!%p10_p7) target bundleno = 3 (0x3), region = 91 }

// kernel: cnn_forward.6
= control target key start
LH: loop header
LB: loop body
LE: loop exit
PB: predicated region body
PF: predicated region fallthrough
CT: control target
= control target key end

     0   :  { %s2446_s12 = smov 0   ;;  %s2448_s13 = smov 0   ;;  %s3004_s0 = inlined_call_operand.vmem [shape: bf16[2,20,16,160], index: 0, kind: input, shape index: {}]   ;;  %s3005_s1 = inlined_call_operand.vmem [shape: bf16[5,160,64], index: 1, kind: input, shape index: {}]   ;;  %s3006_s2 = inlined_call_operand.vmem [shape: f32[1,64], index: 2, kind: input, shape index: {}]   ;;  %s3007_s3 = inlined_call_operand.vmem [shape: f32[2,64,64], index: 3, kind: output, shape index: {}]  }
   0x1   :  { %s2450_s14 = smov 0   ;;  %s2452_s15 = smov 0  }
   0x2   :  { %s2454_s16 = smov 0  }
   0x3 LB: > { %s22_s17 = sadd.s32 1, %s2415_s14  ;;  %s25_s18 = sadd.s32 1, %s2419_s15  ;;  %s2423_s16 = sphi %s2454_s16, %s13_s16   ;;  %s2419_s15 = sphi %s2452_s15, %s3012_s15   ;;  %s2415_s14 = sphi %s2450_s14, %s3011_s14   ;;  %s2411_s13 = sphi %s2448_s13, %s3010_s13   ;;  %s2407_s12 = sphi %s2446_s12, %s3009_s12  }
   0x4   : > { %p23_p0 = scmp.ge.s32.totalorder %s22_s17, 2  ;;  %p1898_p1 = scmp.ge.s32.totalorder %s2423_s16, 1 }
   0x5   : > { %p151_p2 = scmp.lt.s32.totalorder %s2423_s16, 5 }
   0x6   : > { %s3014_s17 = smov (%p23_p0, %s22_s17), 0  ;;  %s3016_s18 = smov (!%p23_p0, %s25_s18), %s2419_s15 }
   0x7   : > { %p152_p3 = pnand %p1898_p1, %p151_p2  ;;  %p27_p4 = scmp.ge.s32.totalorder %s3016_s18, 2 }
   0x8   : > { %v2299_v0 = vld [vmem:[%s3005_s1 + $0x50] sm:$0xff] (!%p152_p3)   ;;  %v2425_v1 = vmov (!%p152_p3), 0   ;;  %v2300_v2 = vld [vmem:[%s3005_s1] sm:$0xff] (!%p152_p3)   ;;  %v2301_v3 = vld [vmem:[%s3005_s1 + $0x58] sm:$0xff] (!%p152_p3)   ;;  %p179_p5 = scmp.lt.s32.totalorder (!%p152_p3), %s2411_s13, 1  ;;  %s2232_s23 = sshll.u32 (!%p152_p3), %s2407_s12, 7 }
   0x9   : > { %s3018_s18 = smov (%p27_p4, %s3016_s18), 0  ;;  %155 = sbr.rel (%p152_p3) target bundleno = 436 (0x1b4), region = 32 }
   0xa   : > { %434 = vmatprep.subr.bf16.mxu0 (!%p152_p3), %v2425_v1  ;;  %687 = vmatprep.subr.bf16.mxu1 (!%p152_p3), %v2425_v1  ;;  %v2302_v4 = vld [vmem:[%s3005_s1 + $0x8] sm:$0xff] (!%p152_p3)   ;;  %v2303_v5 = vld [vmem:[%s3005_s1 + $0x60] sm:$0xff] (!%p152_p3)   ;;  %v2304_v6 = vld [vmem:[%s3005_s1 + $0x10] sm:$0xff] (!%p152_p3)   ;;  %vm409_vm0 = vcmask (!%p152_p3), 261120   ;;  %s1900_s30 = sshll.u32 (!%p152_p3), %s2407_s12, 2  ;;  %vm1760_vm1 = vcmask (!%p152_p3), 523264  }
   0xb   : > { %435 = vmatpush1.bf16.msra.mxu0 (!%p152_p3), %v2299_v0  ;;  %688 = vmatpush1.bf16.msra.mxu1 (!%p152_p3), %v2300_v2  ;;  %v2305_v7 = vld [vmem:[%s3005_s1 + $0x68] sm:$0xff] (!%p152_p3)   ;;  %v2306_v8 = vld [vmem:[%s3005_s1 + $0x18] sm:$0xff] (!%p152_p3)   ;;  %v2307_v9 = vld [vmem:[%s3005_s1 + $0x70] sm:$0xff] (!%p152_p3)   ;;  %p2943_p6 = scmp.lt.s32.totalorder (!%p152_p3), %s1900_s30, 7 }
   0xc   : > { %436 = vmatprep.subr.bf16.mxu0 (!%p152_p3), %v2425_v1  ;;  %689 = vmatprep.subr.bf16.mxu1 (!%p152_p3), %v2425_v1  ;;  %v2308_v10 = vld [vmem:[%s3005_s1 + $0x20] sm:$0xff] (!%p152_p3)   ;;  %v2309_v11 = vld [vmem:[%s3005_s1 + $0x78] sm:$0xff] (!%p152_p3)   ;;  %v2310_v12 = vld [vmem:[%s3005_s1 + $0x28] sm:$0xff] (!%p152_p3)  }
   0xd   : > { %v2311_v14 = vld [vmem:[%s3005_s1 + $0x80] sm:$0xff] (!%p152_p3)   ;;  %v2312_v16 = vld [vmem:[%s3005_s1 + $0x30] sm:$0xff] (!%p152_p3)   ;;  %v2313_v17 = vld [vmem:[%s3005_s1 + $0x88] sm:$0xff] (!%p152_p3)  }
   0xe   : > { %v2314_v18 = vld [vmem:[%s3005_s1 + $0x38] sm:$0xff] (!%p152_p3)   ;;  %v2315_v19 = vld [vmem:[%s3005_s1 + $0x90] sm:$0xff] (!%p152_p3)   ;;  %v2316_v20 = vld [vmem:[%s3005_s1 + $0x40] sm:$0xff] (!%p152_p3)  }
   0xf   : > { %437 = vmatpush1.bf16.msra.mxu0 (!%p152_p3), %v2301_v3  ;;  %690 = vmatpush1.bf16.msra.mxu1 (!%p152_p3), %v2302_v4  ;;  %v2317_v21 = vld [vmem:[%s3005_s1 + $0x98] sm:$0xff] (!%p152_p3)   ;;  %v2318_v22 = vld [vmem:[%s3005_s1 + $0x48] sm:$0xff] (!%p152_p3)   ;;  %v2325_v25 = vld [vmem:[%s3005_s1 + $0xa0] sm:$0xff] (!%p152_p3)  }
  0x10   : > { %438 = vmatprep.subr.bf16.mxu0 %v2425_v1  ;;  %s3020_s13 = smov (!%p179_p5, %s2411_s13), 1  ;;  %691 = vmatprep.subr.bf16.mxu1 %v2425_v1  ;;  %v2326_v26 = vld [vmem:[%s3005_s1 + $0xf0] sm:$0xff]   ;;  %v2330_v28 = vld [vmem:[%s3005_s1 + $0xa8] sm:$0xff]   ;;  %v2331_v29 = vld [vmem:[%s3005_s1 + $0xf8] sm:$0xff]   ;;  %s3022_s30 = smov (!%p2943_p6, %s1900_s30), 7 }
  0x11   : > { %s2257_s8 = smul.u32 320, %s3020_s13  ;;  %v2332_v31 = vld [vmem:[%s3005_s1 + $0xb0] sm:$0xff]   ;;  %v2333_v32 = vld [vmem:[%s3005_s1 + $0x100] sm:$0xff]   ;;  %v2337_v34 = vld [vmem:[%s3005_s1 + $0xb8] sm:$0xff]   ;;  %s1901_s12 = sshll.u32 %s3020_s13, 3 }
  0x12   : > { %v2338_v35 = vld [vmem:[%s3005_s1 + $0x108] sm:$0xff]   ;;  %v2342_v38 = vld [vmem:[%s3005_s1 + $0xc0] sm:$0xff]   ;;  %v2343_v39 = vld [vmem:[%s3005_s1 + $0x110] sm:$0xff]   ;;  %s190_s5 = sadd.s32 %s1901_s12, %s3022_s30 }
  0x13   : > { %439 = vmatpush1.bf16.msra.mxu0 %v2303_v5  ;;  %692 = vmatpush1.bf16.msra.mxu1 %v2304_v6  ;;  %s183_s22 = scalar_lea.vmem %s3004_s0, %s2257_s8  ;;  %v2347_v40 = vld [vmem:[%s3005_s1 + $0xc8] sm:$0xff]   ;;  %v2348_v41 = vld [vmem:[%s3005_s1 + $0x118] sm:$0xff]   ;;  %v2352_v44 = vld [vmem:[%s3005_s1 + $0xd0] sm:$0xff]   ;;  %s1902_s13 = sshll.u32 %s190_s5, 3 }
  0x14   : > { %440 = vmatprep.subr.bf16.mxu0 %v2425_v1  ;;  %693 = vmatprep.subr.bf16.mxu1 %v2425_v1  ;;  %s2532_s26 = scalar_lea.vmem %s183_s22, %s2232_s23  ;;  %v2353_v45 = vld [vmem:[%s3005_s1 + $0x120] sm:$0xff]   ;;  %v2354_v46 = vld [vmem:[%s3005_s1 + $0xd8] sm:$0xff]   ;;  %v2355_v47 = vld [vmem:[%s3005_s1 + $0x128] sm:$0xff]   ;;  %s2965_s8 = scalar_lea.vmem %s3007_s3, %s1902_s13 }
  0x15   : > { %v2321_v13 = vld [vmem:[%s2532_s26 + $0x14] ss:$8 sps:$4 sm:$0xff]   ;;  %v2324_v15 = vld [vmem:[%s2532_s26 + $0x4] ss:$8 sps:$4 sm:$0xff]   ;;  %v2319_v23 = vld [vmem:[%s2532_s26 + $0x10] ss:$8 sps:$4 sm:$0xff]  }
  0x16   : > { %1970 = vmatprep.mubr.msk.bf16.mxu0 %vm409_vm0, %v2321_v13  ;;  %2004 = vmatprep.mubr.msk.bf16.mxu1 %vm409_vm0, %v2324_v15  ;;  %v2322_v24 = vld [vmem:[%s2532_s26] ss:$8 sps:$4 sm:$0xff]   ;;  %v2585_v27 = vld [vmem:[%s2532_s26 + $0x24] ss:$8 sps:$4 sm:$0xff]   ;;  %v2610_v33 = vld [vmem:[%s2532_s26 + $0x34] ss:$8 sps:$4 sm:$0xff]  }
  0x17   : > { %441 = vmatpush1.bf16.msra.mxu0 %v2305_v7  ;;  %694 = vmatpush1.bf16.msra.mxu1 %v2306_v8  ;;  %v2600_v30 = vld [vmem:[%s2532_s26 + $0x20] ss:$8 sps:$4 sm:$0xff]   ;;  %v2626_v36 = vld [vmem:[%s2532_s26 + $0x30] ss:$8 sps:$4 sm:$0xff]   ;;  %v2630_v37 = vld [vmem:[%s2532_s26 + $0x44] ss:$8 sps:$4 sm:$0xff]  }
  0x18   : > { %442 = vmatprep.subr.bf16.mxu0 %v2425_v1  ;;  %695 = vmatprep.subr.bf16.mxu1 %v2425_v1  ;;  %v2654_v42 = vld [vmem:[%s2532_s26 + $0x40] ss:$8 sps:$4 sm:$0xff]   ;;  %v2658_v43 = vld [vmem:[%s2532_s26 + $0x54] ss:$8 sps:$4 sm:$0xff]   ;;  %v2682_v48 = vld [vmem:[%s2532_s26 + $0x50] ss:$8 sps:$4 sm:$0xff]  }
  0x19   : > { %v2686_v49 = vld [vmem:[%s2532_s26 + $0x64] ss:$8 sps:$4 sm:$0xff]   ;;  %v2360_v51 = vld [vmem:[%s3005_s1 + $0x130] sm:$0xff]   ;;  %v2365_v53 = vld [vmem:[%s3005_s1 + $0x138] sm:$0xff]  }
  0x1a   : > { %v2359_v50 = vld [vmem:[%s3005_s1 + $0xe0] sm:$0xff]   ;;  %v2364_v52 = vld [vmem:[%s3005_s1 + $0xe8] sm:$0xff]   ;;  %v2714_v55 = vld [vmem:[%s2532_s26 + $0x74] ss:$8 sps:$4 sm:$0xff]  }
  0x1b   : > { %443 = vmatpush1.bf16.msra.mxu0 %v2307_v9  ;;  %696 = vmatpush1.bf16.msra.mxu1 %v2308_v10  ;;  %v2710_v54 = vld [vmem:[%s2532_s26 + $0x60] ss:$8 sps:$4 sm:$0xff]   ;;  %v2725_v56 = vld [vmem:[%s2532_s26 + $0x70] ss:$8 sps:$4 sm:$0xff]   ;;  %v2728_v57 = vld [vmem:[%s2532_s26 + $0x84] ss:$8 sps:$4 sm:$0xff]  }
  0x1c   : > { %444 = vmatprep.subr.bf16.mxu0 %v2425_v1  ;;  %697 = vmatprep.subr.bf16.mxu1 %v2425_v1  ;;  %v2737_v58 = vld [vmem:[%s2532_s26 + $0x80] ss:$8 sps:$4 sm:$0xff]   ;;  %v2368_v61 = vld [vmem:[%s3005_s1 + $0x150] sm:$0xff]   ;;  %v2369_v62 = vld [vmem:[%s3005_s1 + $0x158] sm:$0xff]  }
  0x1d   : > { %v2366_v59 = vld [vmem:[%s3005_s1 + $0x140] sm:$0xff]   ;;  %v2367_v60 = vld [vmem:[%s3005_s1 + $0x148] sm:$0xff]   ;;  %v2372_v2 = vld [vmem:[%s3005_s1 + $0x170] sm:$0xff]  }
  0x1e   : > { %v2370_v63 = vld [vmem:[%s3005_s1 + $0x160] sm:$0xff]   ;;  %v2371_v0 = vld [vmem:[%s3005_s1 + $0x168] sm:$0xff]   ;;  %v2373_v3 = vld [vmem:[%s3005_s1 + $0x178] sm:$0xff]  }
  0x1f   : > { %445 = vmatpush1.bf16.msra.mxu0 %v2309_v11  ;;  %698 = vmatpush1.bf16.msra.mxu1 %v2310_v12  ;;  %v2377_v4 = vld [vmem:[%s3005_s1 + $0x180] sm:$0xff]   ;;  %v2381_v5 = vld [vmem:[%s3005_s1 + $0x188] sm:$0xff]   ;;  %v2374_v6 = vld [vmem:[%s2532_s26 + $0x94] ss:$8 sps:$4 sm:$0xff]  }
  0x20   : > { %446 = vmatprep.subr.bf16.mxu0 %v2425_v1  ;;  %699 = vmatprep.subr.bf16.mxu1 %v2425_v1  ;;  %v2376_v7 = vld [vmem:[%s2532_s26 + $0x90] ss:$8 sps:$4 sm:$0xff]   ;;  %v2378_v8 = vld [vmem:[%s2532_s26 + $0xa4] ss:$8 sps:$4 sm:$0xff]   ;;  %v2382_v9 = vld [vmem:[%s2532_s26 + $0xb4] ss:$8 sps:$4 sm:$0xff]  }
  0x21   : > { %v2384_v10 = vld [vmem:[%s2532_s26 + $0xb0] ss:$8 sps:$4 sm:$0xff]  }
  0x23   : > { %447 = vmatpush1.bf16.msra.mxu0 %v2311_v14  ;;  %700 = vmatpush1.bf16.msra.mxu1 %v2312_v16 }
  0x24   : > { %448 = vmatprep.subr.bf16.mxu0 %v2425_v1  ;;  %701 = vmatprep.subr.bf16.mxu1 %v2425_v1 }
  0x27   : > { %449 = vmatpush1.bf16.msra.mxu0 %v2313_v17  ;;  %702 = vmatpush1.bf16.msra.mxu1 %v2314_v18 }
  0x28   : > { %450 = vmatprep.subr.bf16.mxu0 %v2425_v1  ;;  %703 = vmatprep.subr.bf16.mxu1 %v2425_v1 }
  0x2b   : > { %451 = vmatpush1.bf16.msra.mxu0 %v2315_v19  ;;  %704 = vmatpush1.bf16.msra.mxu1 %v2316_v20 }
  0x2c   : > { %452 = vmatprep.subr.bf16.mxu0 %v2425_v1  ;;  %705 = vmatprep.subr.bf16.mxu1 %v2425_v1 }
  0x2f   : > { %453 = vmatpush1.bf16.msra.mxu0 %v2317_v21  ;;  %706 = vmatpush1.bf16.msra.mxu1 %v2318_v22 }
  0x30   : > { %981 = vmatprep.subr.bf16.mxu0 %v2425_v1  ;;  %1291 = vmatprep.subr.bf16.mxu1 %v2425_v1 }
  0x32   : > { %467 = vmatmul.mubr.bf16.vlgmr.msra.gmra.mrb[0].mxu0 %v2319_v23  ;;  %720 = vmatmul.mubr.bf16.vlgmr.msra.gmra.mrb[0].mxu1 %v2322_v24 }
  0x33   : > { %982 = vmatpush1.bf16.msra.mxu0 %v2325_v25  ;;  %1292 = vmatpush1.bf16.msra.mxu1 %v2326_v26 }
  0x34   : > { %1971 = vmatprep.mubr.msk.bf16.mxu0 %vm409_vm0, %v2585_v27  ;;  %2005 = vmatprep.mubr.msk.bf16.mxu1 %vm409_vm0, %v2321_v13 }
  0x35   : > { %983 = vmatprep.subr.bf16.mxu0 %v2425_v1  ;;  %1293 = vmatprep.subr.bf16.mxu1 %v2425_v1 }
  0x37   : > { %984 = vmatpush1.bf16.msra.mxu0 %v2330_v28  ;;  %1294 = vmatpush1.bf16.msra.mxu1 %v2331_v29 }
  0x38   : > { %985 = vmatprep.subr.bf16.mxu0 %v2425_v1  ;;  %1295 = vmatprep.subr.bf16.mxu1 %v2425_v1 }
  0x3a   : > { %475 = vmatmul.mubr.bf16.gmra.mrb[4].mxu0 %v2600_v30  ;;  %728 = vmatmul.mubr.bf16.gmra.mrb[4].mxu1 %v2319_v23 }
  0x3b   : > { %986 = vmatpush1.bf16.msra.mxu0 %v2332_v31  ;;  %1296 = vmatpush1.bf16.msra.mxu1 %v2333_v32 }
  0x3c   : > { %1972 = vmatprep.mubr.msk.bf16.mxu0 %vm409_vm0, %v2610_v33  ;;  %2006 = vmatprep.mubr.msk.bf16.mxu1 %vm409_vm0, %v2585_v27 }
  0x3d   : > { %987 = vmatprep.subr.bf16.mxu0 %v2425_v1  ;;  %1297 = vmatprep.subr.bf16.mxu1 %v2425_v1 }
  0x3f   : > { %988 = vmatpush1.bf16.msra.mxu0 %v2337_v34  ;;  %1298 = vmatpush1.bf16.msra.mxu1 %v2338_v35 }
  0x40   : > { %989 = vmatprep.subr.bf16.mxu0 %v2425_v1  ;;  %1299 = vmatprep.subr.bf16.mxu1 %v2425_v1 }
  0x42   : > { %483 = vmatmul.mubr.bf16.gmra.mrb[8].mxu0 %v2626_v36  ;;  %736 = vmatmul.mubr.bf16.gmra.mrb[8].mxu1 %v2600_v30 }
  0x43   : > { %1973 = vmatprep.mubr.msk.bf16.mxu0 %vm409_vm0, %v2630_v37  ;;  %2007 = vmatprep.mubr.msk.bf16.mxu1 %vm409_vm0, %v2610_v33 }
  0x44   : > { %990 = vmatpush1.bf16.msra.mxu0 %v2342_v38  ;;  %1300 = vmatpush1.bf16.msra.mxu1 %v2343_v39 }
  0x45   : > { %991 = vmatprep.subr.bf16.mxu0 %v2425_v1  ;;  %1301 = vmatprep.subr.bf16.mxu1 %v2425_v1 }
  0x48   : > { %992 = vmatpush1.bf16.msra.mxu0 %v2347_v40  ;;  %1302 = vmatpush1.bf16.msra.mxu1 %v2348_v41 }
  0x49   : > { %993 = vmatprep.subr.bf16.mxu0 %v2425_v1  ;;  %1303 = vmatprep.subr.bf16.mxu1 %v2425_v1 }
  0x4a   : > { %491 = vmatmul.mubr.bf16.gmra.mrb[12].mxu0 %v2654_v42  ;;  %744 = vmatmul.mubr.bf16.gmra.mrb[12].mxu1 %v2626_v36 }
  0x4b   : > { %1974 = vmatprep.mubr.msk.bf16.mxu0 %vm409_vm0, %v2658_v43  ;;  %2008 = vmatprep.mubr.msk.bf16.mxu1 %vm409_vm0, %v2630_v37 }
  0x4c   : > { %994 = vmatpush1.bf16.msra.mxu0 %v2352_v44  ;;  %1304 = vmatpush1.bf16.msra.mxu1 %v2353_v45 }
  0x4d   : > { %995 = vmatprep.subr.bf16.mxu0 %v2425_v1  ;;  %1305 = vmatprep.subr.bf16.mxu1 %v2425_v1 }
  0x50   : > { %996 = vmatpush1.bf16.msra.mxu0 %v2354_v46  ;;  %1306 = vmatpush1.bf16.msra.mxu1 %v2355_v47 }
  0x51   : > { %997 = vmatprep.subr.bf16.mxu0 %v2425_v1  ;;  %1307 = vmatprep.subr.bf16.mxu1 %v2425_v1 }
  0x52   : > { %499 = vmatmul.mubr.bf16.gmra.mrb[16].mxu0 %v2682_v48  ;;  %752 = vmatmul.mubr.bf16.gmra.mrb[16].mxu1 %v2654_v42 }
  0x53   : > { %1975 = vmatprep.mubr.msk.bf16.mxu0 %vm409_vm0, %v2686_v49  ;;  %2009 = vmatprep.mubr.msk.bf16.mxu1 %vm409_vm0, %v2658_v43 }
  0x54   : > { %998 = vmatpush1.bf16.msra.mxu0 %v2359_v50  ;;  %1308 = vmatpush1.bf16.msra.mxu1 %v2360_v51 }
  0x55   : > { %999 = vmatprep.subr.bf16.mxu0 %v2425_v1  ;;  %1309 = vmatprep.subr.bf16.mxu1 %v2425_v1 }
  0x58   : > { %1000 = vmatpush1.bf16.msra.mxu0 %v2364_v52  ;;  %1310 = vmatpush1.bf16.msra.mxu1 %v2365_v53 }
  0x59   : > { %1601 = vmatprep.subr.bf16.mxu0 %v2425_v1  ;;  %2237 = vmatprep.subr.bf16.mxu1 %v2425_v1 }
  0x5a   : > { %507 = vmatmul.mubr.bf16.gmra.mrb[20].mxu0 %v2710_v54  ;;  %760 = vmatmul.mubr.bf16.gmra.mrb[20].mxu1 %v2682_v48 }
  0x5b   : > { %1976 = vmatprep.mubr.msk.bf16.mxu0 %vm409_vm0, %v2714_v55  ;;  %2010 = vmatprep.mubr.msk.bf16.mxu1 %vm409_vm0, %v2686_v49 }
  0x62   : > { %515 = vmatmul.mubr.bf16.gmra.mrb[24].mxu0 %v2725_v56  ;;  %768 = vmatmul.mubr.bf16.gmra.mrb[24].mxu1 %v2710_v54 }
  0x63   : > { %1977 = vmatprep.mubr.msk.bf16.mxu0 %vm409_vm0, %v2728_v57  ;;  %2011 = vmatprep.mubr.msk.bf16.mxu1 %vm409_vm0, %v2714_v55 }
  0x6a   : > { %523 = vmatmul.mubr.bf16.gmra.mrb[28].mxu0 %v2737_v58  ;;  %776 = vmatmul.mubr.bf16.gmra.mrb[28].mxu1 %v2725_v56 }
  0x6b   : > { %2076 = vmatprep.mubr.msk.bf16.mxu0 %vm409_vm0, %v2585_v27  ;;  %2148 = vmatprep.mubr.msk.bf16.mxu1 %vm409_vm0, %v2610_v33 }
  0x72   : > { %1014 = vmatmul.mubr.bf16.vlgmr.msra.gmra.mrb[32].mxu0 %v2600_v30  ;;  %1324 = vmatmul.mubr.bf16.vlgmr.msra.gmra.mrb[32].mxu1 %v2626_v36 }
  0x73   : > { %1602 = vmatpush1.bf16.msra.mxu0 %v2366_v59  ;;  %2247 = vmatpush1.bf16.msra.mxu1 %v2366_v59 }
  0x74   : > { %2077 = vmatprep.mubr.msk.bf16.mxu0 %vm409_vm0, %v2610_v33  ;;  %2149 = vmatprep.mubr.msk.bf16.mxu1 %vm409_vm0, %v2630_v37 }
  0x75   : > { %1603 = vmatprep.subr.bf16.mxu0 %v2425_v1  ;;  %2238 = vmatprep.subr.bf16.mxu1 %v2425_v1 }
  0x77   : > { %1604 = vmatpush1.bf16.msra.mxu0 %v2367_v60  ;;  %2248 = vmatpush1.bf16.msra.mxu1 %v2367_v60 }
  0x78   : > { %1605 = vmatprep.subr.bf16.mxu0 %v2425_v1  ;;  %2239 = vmatprep.subr.bf16.mxu1 %v2425_v1 }
  0x7a   : > { %1022 = vmatmul.mubr.bf16.gmra.mrb[36].mxu0 %v2626_v36  ;;  %1332 = vmatmul.mubr.bf16.gmra.mrb[36].mxu1 %v2654_v42 }
  0x7b   : > { %1606 = vmatpush1.bf16.msra.mxu0 %v2368_v61  ;;  %2249 = vmatpush1.bf16.msra.mxu1 %v2368_v61 }
  0x7c   : > { %2078 = vmatprep.mubr.msk.bf16.mxu0 %vm409_vm0, %v2630_v37  ;;  %2150 = vmatprep.mubr.msk.bf16.mxu1 %vm409_vm0, %v2658_v43 }
  0x7d   : > { %1607 = vmatprep.subr.bf16.mxu0 %v2425_v1  ;;  %2240 = vmatprep.subr.bf16.mxu1 %v2425_v1 }
  0x7f   : > { %1608 = vmatpush1.bf16.msra.mxu0 %v2369_v62  ;;  %2250 = vmatpush1.bf16.msra.mxu1 %v2369_v62 }
  0x80   : > { %1609 = vmatprep.subr.bf16.mxu0 %v2425_v1  ;;  %2241 = vmatprep.subr.bf16.mxu1 %v2425_v1 }
  0x82   : > { %1030 = vmatmul.mubr.bf16.gmra.mrb[40].mxu0 %v2654_v42  ;;  %1340 = vmatmul.mubr.bf16.gmra.mrb[40].mxu1 %v2682_v48 }
  0x83   : > { %2079 = vmatprep.mubr.msk.bf16.mxu0 %vm409_vm0, %v2658_v43  ;;  %2151 = vmatprep.mubr.msk.bf16.mxu1 %vm409_vm0, %v2686_v49 }
  0x84   : > { %1610 = vmatpush1.bf16.msra.mxu0 %v2370_v63  ;;  %2251 = vmatpush1.bf16.msra.mxu1 %v2370_v63 }
  0x85   : > { %1611 = vmatprep.subr.bf16.mxu0 %v2425_v1  ;;  %2242 = vmatprep.subr.bf16.mxu1 %v2425_v1 }
  0x88   : > { %1612 = vmatpush1.bf16.msra.mxu0 %v2371_v0  ;;  %2252 = vmatpush1.bf16.msra.mxu1 %v2371_v0 }
  0x89   : > { %1613 = vmatprep.subr.bf16.mxu0 %v2425_v1  ;;  %2243 = vmatprep.subr.bf16.mxu1 %v2425_v1 }
  0x8a   : > { %1038 = vmatmul.mubr.bf16.gmra.mrb[44].mxu0 %v2682_v48  ;;  %1348 = vmatmul.mubr.bf16.gmra.mrb[44].mxu1 %v2710_v54 }
  0x8b   : > { %2080 = vmatprep.mubr.msk.bf16.mxu0 %vm409_vm0, %v2686_v49  ;;  %2152 = vmatprep.mubr.msk.bf16.mxu1 %vm409_vm0, %v2714_v55 }
  0x8c   : > { %1614 = vmatpush1.bf16.msra.mxu0 %v2372_v2  ;;  %2253 = vmatpush1.bf16.msra.mxu1 %v2372_v2 }
  0x8d   : > { %1615 = vmatprep.subr.bf16.mxu0 %v2425_v1  ;;  %2244 = vmatprep.subr.bf16.mxu1 %v2425_v1 }
  0x90   : > { %1616 = vmatpush1.bf16.msra.mxu0 %v2373_v3  ;;  %2254 = vmatpush1.bf16.msra.mxu1 %v2373_v3 }
  0x91   : > { %1617 = vmatprep.subr.bf16.mxu0 %v2425_v1  ;;  %2245 = vmatprep.subr.bf16.mxu1 %v2425_v1 }
  0x92   : > { %1046 = vmatmul.mubr.bf16.gmra.mrb[48].mxu0 %v2710_v54  ;;  %1356 = vmatmul.mubr.bf16.gmra.mrb[48].mxu1 %v2725_v56 }
  0x93   : > { %2081 = vmatprep.mubr.msk.bf16.mxu0 %vm409_vm0, %v2714_v55  ;;  %2153 = vmatprep.mubr.msk.bf16.mxu1 %vm409_vm0, %v2728_v57 }
  0x94   : > { %1618 = vmatpush1.bf16.msra.mxu0 %v2377_v4  ;;  %2255 = vmatpush1.bf16.msra.mxu1 %v2377_v4 }
  0x95   : > { %1619 = vmatprep.subr.bf16.mxu0 %v2425_v1  ;;  %2246 = vmatprep.subr.bf16.mxu1 %v2425_v1  ;;  %v2380_v1 = vld [vmem:[%s2532_s26 + $0xa0] ss:$8 sps:$4 sm:$0xff]  }
  0x98   : > { %1620 = vmatpush1.bf16.msra.mxu0 %v2381_v5  ;;  %2256 = vmatpush1.bf16.msra.mxu1 %v2381_v5 }
  0x9a   : > { %1054 = vmatmul.mubr.bf16.gmra.mrb[52].mxu0 %v2725_v56  ;;  %1364 = vmatmul.mubr.bf16.gmra.mrb[52].mxu1 %v2737_v58 }
  0x9b   : > { %2082 = vmatprep.mubr.msk.bf16.mxu0 %vm409_vm0, %v2728_v57  ;;  %2154 = vmatprep.mubr.msk.bf16.mxu1 %vm409_vm0, %v2374_v6 }
  0xa2   : > { %1062 = vmatmul.mubr.bf16.gmra.mrb[56].mxu0 %v2737_v58  ;;  %1372 = vmatmul.mubr.bf16.gmra.mrb[56].mxu1 %v2376_v7 }
  0xa3   : > { %2083 = vmatprep.mubr.msk.bf16.mxu0 %vm409_vm0, %v2374_v6  ;;  %2155 = vmatprep.mubr.msk.bf16.mxu1 %vm409_vm0, %v2378_v8 }
  0xaa   : > { %1070 = vmatmul.mubr.bf16.gmra.mrb[60].mxu0 %v2376_v7  ;;  %1380 = vmatmul.mubr.bf16.gmra.mrb[60].mxu1 %v2380_v1 }
  0xab   : > { %2220 = vmatprep.mubr.msk.bf16.mxu0 %vm409_vm0, %v2630_v37  ;;  %2224 = vmatprep.mubr.msk.bf16.mxu1 %vm409_vm0, %v2728_v57 }
  0xb2   : > { %1634 = vmatmul.mubr.bf16.vlgmr.msra.gmra.mrb[64].mxu0 %v2654_v42  ;;  %1666 = vmatmul.mubr.bf16.vlgmr.msra.gmra.mrb[64].mxu1 %v2737_v58 }
  0xb3   : > { %2221 = vmatprep.mubr.msk.bf16.mxu0 %vm409_vm0, %v2658_v43  ;;  %2225 = vmatprep.mubr.msk.bf16.mxu1 %vm409_vm0, %v2374_v6 }
  0xba   : > { %1642 = vmatmul.mubr.bf16.gmra.mrb[68].mxu0 %v2682_v48  ;;  %1674 = vmatmul.mubr.bf16.gmra.mrb[68].mxu1 %v2376_v7 }
  0xbb   : > { %2222 = vmatprep.mubr.msk.bf16.mxu0 %vm409_vm0, %v2686_v49  ;;  %2226 = vmatprep.mubr.msk.bf16.mxu1 %vm409_vm0, %v2378_v8 }
  0xc2   : > { %1650 = vmatmul.mubr.bf16.gmra.mrb[72].mxu0 %v2710_v54  ;;  %1682 = vmatmul.mubr.bf16.gmra.mrb[72].mxu1 %v2380_v1 }
  0xc3   : > { %2223 = vmatprep.mubr.msk.bf16.mxu0 %vm409_vm0, %v2714_v55  ;;  %2227 = vmatprep.mubr.msk.bf16.mxu1 %vm409_vm0, %v2382_v9 }
  0xca   : > { %1658 = vmatmul.mubr.bf16.gmra.mrb[76].mxu0 %v2725_v56  ;;  %1690 = vmatmul.mubr.bf16.gmra.mrb[76].mxu1 %v2384_v10 }
 0x105   : > { %v468_v11 = vpop.f32.mrb[0].mxu0  ;;  %v721_v12 = vpop.f32.mrb[0].mxu1 }
 0x106   : > { %v470_v13 = vpop.f32.mrb[1].mxu0  ;;  %v2855_v14 = vadd.f32 %v721_v12, %v468_v11  ;;  %v723_v15 = vpop.f32.mrb[1].mxu1 }
 0x107   : > { %v471_v16 = vpop.f32.mrb[2].mxu0  ;;  %v724_v17 = vpop.f32.mrb[2].mxu1 }
 0x108   : > { %v473_v18 = vpop.f32.mrb[3].mxu0  ;;  %v2857_v19 = vadd.f32 %v724_v17, %v471_v16  ;;  %v726_v20 = vpop.f32.mrb[3].mxu1 }
 0x10d   : > { %v476_v21 = vpop.f32.mrb[4].mxu0  ;;  %v729_v22 = vpop.f32.mrb[4].mxu1 }
 0x10e   : > { %v478_v23 = vpop.f32.mrb[5].mxu0  ;;  %v2859_v24 = vadd.f32 %v729_v22, %v476_v21  ;;  %v731_v25 = vpop.f32.mrb[5].mxu1 }
 0x10f   : > { %v479_v26 = vpop.f32.mrb[6].mxu0  ;;  %v732_v27 = vpop.f32.mrb[6].mxu1 }
 0x110   : > { %v481_v28 = vpop.f32.mrb[7].mxu0  ;;  %v2861_v29 = vadd.f32 %v732_v27, %v479_v26  ;;  %v734_v30 = vpop.f32.mrb[7].mxu1 }
 0x115   : > { %v484_v31 = vpop.f32.mrb[8].mxu0  ;;  %v737_v32 = vpop.f32.mrb[8].mxu1 }
 0x116   : > { %v486_v33 = vpop.f32.mrb[9].mxu0  ;;  %v2863_v34 = vadd.f32 %v737_v32, %v484_v31  ;;  %v739_v35 = vpop.f32.mrb[9].mxu1 }
 0x117   : > { %v487_v36 = vpop.f32.mrb[10].mxu0  ;;  %v740_v37 = vpop.f32.mrb[10].mxu1 }
 0x118   : > { %v489_v38 = vpop.f32.mrb[11].mxu0  ;;  %v2865_v39 = vadd.f32 %v740_v37, %v487_v36  ;;  %v742_v40 = vpop.f32.mrb[11].mxu1 }
 0x11d   : > { %v492_v41 = vpop.f32.mrb[12].mxu0  ;;  %v745_v42 = vpop.f32.mrb[12].mxu1 }
 0x11e   : > { %v494_v43 = vpop.f32.mrb[13].mxu0  ;;  %v2867_v44 = vadd.f32 %v745_v42, %v492_v41  ;;  %v747_v45 = vpop.f32.mrb[13].mxu1 }
 0x11f   : > { %v495_v46 = vpop.f32.mrb[14].mxu0  ;;  %v748_v47 = vpop.f32.mrb[14].mxu1 }
 0x120   : > { %v497_v48 = vpop.f32.mrb[15].mxu0  ;;  %v2869_v49 = vadd.f32 %v748_v47, %v495_v46  ;;  %v750_v50 = vpop.f32.mrb[15].mxu1 }
 0x125   : > { %v500_v51 = vpop.f32.mrb[16].mxu0  ;;  %v753_v52 = vpop.f32.mrb[16].mxu1 }
 0x126   : > { %v502_v53 = vpop.f32.mrb[17].mxu0  ;;  %v2871_v54 = vadd.f32 %v753_v52, %v500_v51  ;;  %v755_v55 = vpop.f32.mrb[17].mxu1 }
 0x127   : > { %v503_v56 = vpop.f32.mrb[18].mxu0  ;;  %v756_v57 = vpop.f32.mrb[18].mxu1 }
 0x128   : > { %v505_v58 = vpop.f32.mrb[19].mxu0  ;;  %v2873_v59 = vadd.f32 %v756_v57, %v503_v56  ;;  %v758_v60 = vpop.f32.mrb[19].mxu1 }
 0x12d   : > { %v508_v61 = vpop.f32.mrb[20].mxu0  ;;  %v761_v62 = vpop.f32.mrb[20].mxu1 }
 0x12e   : > { %v510_v63 = vpop.f32.mrb[21].mxu0  ;;  %v2875_v0 = vadd.f32 %v761_v62, %v508_v61  ;;  %v763_v2 = vpop.f32.mrb[21].mxu1 }
 0x12f   : > { %v511_v3 = vpop.f32.mrb[22].mxu0  ;;  %v764_v4 = vpop.f32.mrb[22].mxu1 }
 0x130   : > { %v513_v5 = vpop.f32.mrb[23].mxu0  ;;  %v2877_v6 = vadd.f32 %v764_v4, %v511_v3  ;;  %v766_v7 = vpop.f32.mrb[23].mxu1 }
 0x135   : > { %v516_v8 = vpop.f32.mrb[24].mxu0  ;;  %v769_v1 = vpop.f32.mrb[24].mxu1 }
 0x136   : > { %v518_v9 = vpop.f32.mrb[25].mxu0  ;;  %v2879_v10 = vadd.f32 %v769_v1, %v516_v8  ;;  %v771_v11 = vpop.f32.mrb[25].mxu1 }
 0x137   : > { %v519_v12 = vpop.f32.mrb[26].mxu0  ;;  %v772_v13 = vpop.f32.mrb[26].mxu1 }
 0x138   : > { %v521_v15 = vpop.f32.mrb[27].mxu0  ;;  %v2881_v16 = vadd.f32 %v772_v13, %v519_v12  ;;  %v774_v17 = vpop.f32.mrb[27].mxu1 }
 0x13d   : > { %v524_v18 = vpop.f32.mrb[28].mxu0  ;;  %v777_v20 = vpop.f32.mrb[28].mxu1 }
 0x13e   : > { %v526_v21 = vpop.f32.mrb[29].mxu0  ;;  %v2883_v22 = vadd.f32 %v777_v20, %v524_v18  ;;  %v779_v23 = vpop.f32.mrb[29].mxu1 }
 0x13f   : > { %v527_v25 = vpop.f32.mrb[30].mxu0  ;;  %v780_v26 = vpop.f32.mrb[30].mxu1 }
 0x140   : > { %v529_v27 = vpop.f32.mrb[31].mxu0  ;;  %v2885_v28 = vadd.f32 %v780_v26, %v527_v25  ;;  %v782_v30 = vpop.f32.mrb[31].mxu1 }
 0x145   : > { %v1015_v31 = vpop.f32.mrb[32].mxu0  ;;  %v1325_v33 = vpop.f32.mrb[32].mxu1 }
 0x146   : > { %v1078_v32 = vadd.f32 %v1015_v31, %v2855_v14  ;;  %v1017_v35 = vpop.f32.mrb[33].mxu0  ;;  %v1327_v36 = vpop.f32.mrb[33].mxu1 }
 0x147   : > { %v1018_v37 = vpop.f32.mrb[34].mxu0  ;;  %v1328_v41 = vpop.f32.mrb[34].mxu1 }
 0x148   : > { %v2888_v38 = vadd.f32 %v1325_v33, %v1078_v32  ;;  %v1079_v40 = vadd.f32 %v1018_v37, %v2857_v19  ;;  %v1020_v42 = vpop.f32.mrb[35].mxu0  ;;  %v1330_v43 = vpop.f32.mrb[35].mxu1 }
 0x14a   : > { %v2891_v45 = vadd.f32 %v1328_v41, %v1079_v40 }
 0x14d   : > { %v1023_v46 = vpop.f32.mrb[36].mxu0  ;;  %v1333_v48 = vpop.f32.mrb[36].mxu1 }
 0x14e   : > { %v1080_v47 = vadd.f32 %v1023_v46, %v2859_v24  ;;  %v1025_v50 = vpop.f32.mrb[37].mxu0  ;;  %v1335_v51 = vpop.f32.mrb[37].mxu1 }
 0x14f   : > { %v1026_v14 = vpop.f32.mrb[38].mxu0  ;;  %v1336_v55 = vpop.f32.mrb[38].mxu1 }
 0x150   : > { %v2894_v52 = vadd.f32 %v1333_v48, %v1080_v47  ;;  %v1081_v53 = vadd.f32 %v1026_v14, %v2861_v29  ;;  %v1028_v56 = vpop.f32.mrb[39].mxu0  ;;  %v1338_v57 = vpop.f32.mrb[39].mxu1 }
 0x152   : > { %v2897_v19 = vadd.f32 %v1336_v55, %v1081_v53 }
 0x155   : > { %v1031_v58 = vpop.f32.mrb[40].mxu0  ;;  %v1341_v61 = vpop.f32.mrb[40].mxu1 }
 0x156   : > { %v1082_v60 = vadd.f32 %v1031_v58, %v2863_v34  ;;  %v1033_v62 = vpop.f32.mrb[41].mxu0  ;;  %v1343_v63 = vpop.f32.mrb[41].mxu1 }
 0x157   : > { %v1034_v24 = vpop.f32.mrb[42].mxu0  ;;  %v1344_v4 = vpop.f32.mrb[42].mxu1 }
 0x158   : > { %v2900_v2 = vadd.f32 %v1341_v61, %v1082_v60  ;;  %v1083_v3 = vadd.f32 %v1034_v24, %v2865_v39  ;;  %v1036_v5 = vpop.f32.mrb[43].mxu0  ;;  %v1346_v7 = vpop.f32.mrb[43].mxu1 }
 0x15a   : > { %v2903_v29 = vadd.f32 %v1344_v4, %v1083_v3 }
 0x15d   : > { %v1039_v8 = vpop.f32.mrb[44].mxu0  ;;  %v1349_v9 = vpop.f32.mrb[44].mxu1 }
 0x15e   : > { %v1084_v1 = vadd.f32 %v1039_v8, %v2867_v44  ;;  %v1041_v11 = vpop.f32.mrb[45].mxu0  ;;  %v1351_v12 = vpop.f32.mrb[45].mxu1 }
 0x15f   : > { %v1042_v34 = vpop.f32.mrb[46].mxu0  ;;  %v1352_v17 = vpop.f32.mrb[46].mxu1 }
 0x160   : > { %v2906_v13 = vadd.f32 %v1349_v9, %v1084_v1  ;;  %v1085_v15 = vadd.f32 %v1042_v34, %v2869_v49  ;;  %v1044_v18 = vpop.f32.mrb[47].mxu0  ;;  %v1354_v20 = vpop.f32.mrb[47].mxu1 }
 0x162   : > { %v2909_v39 = vadd.f32 %v1352_v17, %v1085_v15 }
 0x165   : > { %v1047_v21 = vpop.f32.mrb[48].mxu0  ;;  %v1357_v25 = vpop.f32.mrb[48].mxu1 }
 0x166   : > { %v1086_v23 = vadd.f32 %v1047_v21, %v2871_v54  ;;  %v1049_v26 = vpop.f32.mrb[49].mxu0  ;;  %v1359_v27 = vpop.f32.mrb[49].mxu1 }
 0x167   : > { %v1050_v44 = vpop.f32.mrb[50].mxu0  ;;  %v1360_v32 = vpop.f32.mrb[50].mxu1  ;;  %v2932_v27 = vld [vmem:[%s3006_s2] ss:$0 sm:$0xff] }
 0x168   : > { %v1396_v30 = vadd.f32 %v1357_v25, %v1086_v23  ;;  %v1087_v31 = vadd.f32 %v1050_v44, %v2873_v59  ;;  %v1052_v33 = vpop.f32.mrb[51].mxu0  ;;  %v1362_v35 = vpop.f32.mrb[51].mxu1 }
 0x16a   : > { %v1397_v36 = vadd.f32 %v1360_v32, %v1087_v31 }
 0x16d   : > { %v1055_v49 = vpop.f32.mrb[52].mxu0  ;;  %v1365_v40 = vpop.f32.mrb[52].mxu1 }
 0x16e   : > { %v1088_v37 = vadd.f32 %v1055_v49, %v2875_v0  ;;  %v1057_v41 = vpop.f32.mrb[53].mxu0  ;;  %v1367_v42 = vpop.f32.mrb[53].mxu1 }
 0x16f   : > { %v1058_v43 = vpop.f32.mrb[54].mxu0  ;;  %v1368_v47 = vpop.f32.mrb[54].mxu1 }
 0x170   : > { %v1398_v46 = vadd.f32 %v1365_v40, %v1088_v37  ;;  %v1089_v54 = vadd.f32 %v1058_v43, %v2877_v6  ;;  %v1060_v48 = vpop.f32.mrb[55].mxu0  ;;  %v1370_v50 = vpop.f32.mrb[55].mxu1 }
 0x172   : > { %v1399_v51 = vadd.f32 %v1368_v47, %v1089_v54 }
 0x175   : > { %v1063_v14 = vpop.f32.mrb[56].mxu0  ;;  %v1373_v53 = vpop.f32.mrb[56].mxu1 }
 0x176   : > { %v1090_v59 = vadd.f32 %v1063_v14, %v2879_v10  ;;  %v1065_v55 = vpop.f32.mrb[57].mxu0  ;;  %v1375_v56 = vpop.f32.mrb[57].mxu1 }
 0x177   : > { %v1066_v57 = vpop.f32.mrb[58].mxu0  ;;  %v1376_v60 = vpop.f32.mrb[58].mxu1 }
 0x178   : > { %v2916_v58 = vadd.f32 %v1373_v53, %v1090_v59  ;;  %v1091_v0 = vadd.f32 %v1066_v57, %v2881_v16  ;;  %v1068_v61 = vpop.f32.mrb[59].mxu0  ;;  %v1378_v62 = vpop.f32.mrb[59].mxu1 }
 0x17a   : > { %v2919_v63 = vadd.f32 %v1376_v60, %v1091_v0 }
 0x17d   : > { %v1071_v6 = vpop.f32.mrb[60].mxu0  ;;  %v1381_v3 = vpop.f32.mrb[60].mxu1 }
 0x17e   : > { %v1092_v24 = vadd.f32 %v1071_v6, %v2883_v22  ;;  %v1073_v4 = vpop.f32.mrb[61].mxu0  ;;  %v1383_v5 = vpop.f32.mrb[61].mxu1 }
 0x17f   : > { %v1074_v10 = vpop.f32.mrb[62].mxu0  ;;  %v1384_v1 = vpop.f32.mrb[62].mxu1 }
 0x180   : > { %v2922_v7 = vadd.f32 %v1381_v3, %v1092_v24  ;;  %v1093_v8 = vadd.f32 %v1074_v10, %v2885_v28  ;;  %v1076_v9 = vpop.f32.mrb[63].mxu0  ;;  %v1386_v11 = vpop.f32.mrb[63].mxu1 }
 0x182   : > { %v2925_v16 = vadd.f32 %v1384_v1, %v1093_v8 }
 0x185   : > { %v1635_v12 = vpop.f32.mrb[64].mxu0  ;;  %v1667_v15 = vpop.f32.mrb[64].mxu1 }
 0x186   : > { %v1698_v34 = vadd.f32 %v1635_v12, %v2888_v38  ;;  %v1637_v17 = vpop.f32.mrb[65].mxu0  ;;  %v1706_v22 = vadd.f32 %v1667_v15, %v1396_v30  ;;  %v1669_v18 = vpop.f32.mrb[65].mxu1 }
 0x187   : > { %v1638_v20 = vpop.f32.mrb[66].mxu0  ;;  %v1670_v23 = vpop.f32.mrb[66].mxu1 }
 0x188   : > { %v1699_v21 = vadd.f32 %v1638_v20, %v2891_v45  ;;  %v1640_v25 = vpop.f32.mrb[67].mxu0  ;;  %v1707_v26 = vadd.f32 %v1670_v23, %v1397_v36  ;;  %v1672_v28 = vpop.f32.mrb[67].mxu1  ;;  %v1720_v38 = vadd.f32 %v2932_v27, %v1698_v34  ;;  %v1728_v33 = vadd.f32 %v2932_v27, %v1706_v22 }
 0x18a   : > { %v1721_v36 = vadd.f32 %v2932_v27, %v1699_v21  ;;  %v1729_v43 = vadd.f32 %v2932_v27, %v1707_v26  ;;  %v1736_v47 = vmax.f32 %v1720_v38, 0.0  ;;  %v1744_v14 = vmax.f32 %v1728_v33, 0.0 }
 0x18c   : > { %v1737_v53 = vmax.f32 %v1721_v36, 0.0  ;;  %v1745_v57 = vmax.f32 %v1729_v43, 0.0 }
 0x18d   : > { %v1643_v44 = vpop.f32.mrb[68].mxu0  ;;  %v1675_v32 = vpop.f32.mrb[68].mxu1 }
 0x18e   : > { %v1700_v31 = vadd.f32 %v1643_v44, %v2894_v52  ;;  %v1645_v30 = vpop.f32.mrb[69].mxu0  ;;  %v1708_v45 = vadd.f32 %v1675_v32, %v1398_v46  ;;  %v1677_v35 = vpop.f32.mrb[69].mxu1 }
 0x18f   : > { %v1646_v49 = vpop.f32.mrb[70].mxu0  ;;  %v1678_v41 = vpop.f32.mrb[70].mxu1 }
 0x190   : > { %v1722_v37 = vadd.f32 %v2932_v27, %v1700_v31  ;;  %v1701_v40 = vadd.f32 %v1646_v49, %v2897_v19  ;;  %v1648_v42 = vpop.f32.mrb[71].mxu0  ;;  %v1730_v52 = vadd.f32 %v2932_v27, %v1708_v45  ;;  %v1709_v46 = vadd.f32 %v1678_v41, %v1399_v51  ;;  %v1680_v54 = vpop.f32.mrb[71].mxu1 }
 0x192   : > { %v1738_v48 = vmax.f32 %v1722_v37, 0.0  ;;  %v1723_v50 = vadd.f32 %v2932_v27, %v1701_v40  ;;  %v1746_v19 = vmax.f32 %v1730_v52, 0.0  ;;  %v1731_v59 = vadd.f32 %v2932_v27, %v1709_v46 }
 0x194   : > { %v1752_v55 = vmax.f32 %v1736_v47, %v1738_v48  ;;  %v1739_v56 = vmax.f32 %v1723_v50, 0.0  ;;  %v1756_v0 = vmax.f32 %v1744_v14, %v1746_v19  ;;  %v1747_v60 = vmax.f32 %v1731_v59, 0.0 }
 0x195   : > { %v1651_v51 = vpop.f32.mrb[72].mxu0  ;;  %v1683_v6 = vpop.f32.mrb[72].mxu1 }
 0x196   : > { %1761 = vst.msk [vmem:[#allocation2] sm:$0xff] %vm1760_vm1, %v1752_v55  ;;  %v1753_v61 = vmax.f32 %v1737_v53, %v1739_v56  ;;  %v1702_v62 = vadd.f32 %v1651_v51, %v2900_v2  ;;  %v1653_v24 = vpop.f32.mrb[73].mxu0  ;;  %1765 = vst.msk [vmem:[#allocation2 + $0x20] sm:$0xff] %vm1760_vm1, %v1756_v0  ;;  %v1757_v3 = vmax.f32 %v1745_v57, %v1747_v60  ;;  %v1685_v5 = vpop.f32.mrb[73].mxu1 }
 0x197   : > { %v1710_v4 = vadd.f32 %v1683_v6, %v2916_v58  ;;  %v1654_v10 = vpop.f32.mrb[74].mxu0  ;;  %v1686_v1 = vpop.f32.mrb[74].mxu1 }
 0x198   : > { %1762 = vst.msk [vmem:[#allocation2 + $0x8] sm:$0xff] %vm1760_vm1, %v1753_v61  ;;  %v1703_v8 = vadd.f32 %v1654_v10, %v2903_v29  ;;  %v1656_v9 = vpop.f32.mrb[75].mxu0  ;;  %1766 = vst.msk [vmem:[#allocation2 + $0x28] sm:$0xff] %vm1760_vm1, %v1757_v3  ;;  %v1711_v2 = vadd.f32 %v1686_v1, %v2919_v63  ;;  %v1688_v11 = vpop.f32.mrb[75].mxu1  ;;  %v1724_v34 = vadd.f32 %v2932_v27, %v1702_v62 }
 0x199   : > { %v1732_v18 = vadd.f32 %v2932_v27, %v1710_v4 }
 0x19a   : > { %v1725_v26 = vadd.f32 %v2932_v27, %v1703_v8  ;;  %v1733_v30 = vadd.f32 %v2932_v27, %v1711_v2  ;;  %v1740_v35 = vmax.f32 %v1724_v34, 0.0 }
 0x19b   : > { %v1748_v37 = vmax.f32 %v1732_v18, 0.0 }
 0x19c   : > { %v1741_v41 = vmax.f32 %v1725_v26, 0.0  ;;  %v1749_v52 = vmax.f32 %v1733_v30, 0.0 }
 0x19d   : > { %v1659_v12 = vpop.f32.mrb[76].mxu0  ;;  %v1691_v15 = vpop.f32.mrb[76].mxu1 }
 0x19e   : > { %v1704_v58 = vadd.f32 %v1659_v12, %v2906_v13  ;;  %v1661_v17 = vpop.f32.mrb[77].mxu0  ;;  %v1712_v63 = vadd.f32 %v1691_v15, %v2922_v7  ;;  %v1693_v20 = vpop.f32.mrb[77].mxu1 }
 0x19f   : > { %v1769_v29 = vld [vmem:[#allocation2] ss:$2 sm:$0xff]  ;;  %v1777_v22 = vld [vmem:[#allocation2 + $0x1] ss:$2 sm:$0xff]  ;;  %v1662_v21 = vpop.f32.mrb[78].mxu0  ;;  %v1694_v38 = vpop.f32.mrb[78].mxu1 }
 0x1a0   : > { %v1784_v23 = vmax.f32 %v1769_v29, %v1777_v22  ;;  %v1773_v25 = vld [vmem:[#allocation2 + $0x20] ss:$2 sm:$0xff]  ;;  %v1781_v13 = vld [vmem:[#allocation2 + $0x21] ss:$2 sm:$0xff]  ;;  %v1726_v28 = vadd.f32 %v2932_v27, %v1704_v58  ;;  %v1705_v44 = vadd.f32 %v1662_v21, %v2909_v39  ;;  %v1664_v31 = vpop.f32.mrb[79].mxu0  ;;  %v1734_v7 = vadd.f32 %v2932_v27, %v1712_v63  ;;  %v1696_v45 = vpop.f32.mrb[79].mxu1 }
 0x1a1   : > { %v1786_v32 = vmax.f32 %v1773_v25, %v1781_v13  ;;  %v1713_v33 = vadd.f32 %v1694_v38, %v2925_v16 }
 0x1a2   : > { %1788 = vst.msk [vmem:[%s2965_s8] sm:$0xff] %vm1760_vm1, %v1784_v23  ;;  %v1742_v49 = vmax.f32 %v1726_v28, 0.0  ;;  %v1727_v36 = vadd.f32 %v2932_v27, %v1705_v44  ;;  %v1750_v39 = vmax.f32 %v1734_v7, 0.0 }
 0x1a3   : > { %1790 = vst.msk [vmem:[%s2965_s8 + $0x10] sm:$0xff] %vm1760_vm1, %v1786_v32  ;;  %v1735_v40 = vadd.f32 %v2932_v27, %v1713_v33 }
 0x1a4   : > { %v1754_v42 = vmax.f32 %v1740_v35, %v1742_v49  ;;  %v1743_v43 = vmax.f32 %v1727_v36, 0.0  ;;  %v1758_v16 = vmax.f32 %v1748_v37, %v1750_v39 }
 0x1a5   : > { %v1751_v46 = vmax.f32 %v1735_v40, 0.0 }
 0x1a6   : > { %1763 = vst.msk [vmem:[#allocation2 + $0x10] sm:$0xff] %vm1760_vm1, %v1754_v42  ;;  %v1755_v54 = vmax.f32 %v1741_v41, %v1743_v43  ;;  %1767 = vst.msk [vmem:[#allocation2 + $0x30] sm:$0xff] %vm1760_vm1, %v1758_v16 }
 0x1a7   : > { %v1759_v47 = vmax.f32 %v1749_v52, %v1751_v46 }
 0x1a8   : > { %1764 = vst.msk [vmem:[#allocation2 + $0x18] sm:$0xff] %vm1760_vm1, %v1755_v54 }
 0x1a9   : > { %1768 = vst.msk [vmem:[#allocation2 + $0x38] sm:$0xff] %vm1760_vm1, %v1759_v47 }
 0x1af   : > { %v1771_v48 = vld [vmem:[#allocation2 + $0x10] ss:$2 sm:$0xff]  ;;  %v1779_v27 = vld [vmem:[#allocation2 + $0x11] ss:$2 sm:$0xff] }
 0x1b0   : > { %v1785_v50 = vmax.f32 %v1771_v48, %v1779_v27  ;;  %v1775_v14 = vld [vmem:[#allocation2 + $0x30] ss:$2 sm:$0xff]  ;;  %v1783_v19 = vld [vmem:[#allocation2 + $0x31] ss:$2 sm:$0xff] }
 0x1b1   : > { %v1787_v59 = vmax.f32 %v1775_v14, %v1783_v19 }
 0x1b2   : > { %1789 = vst.msk [vmem:[%s2965_s8 + $0x8] sm:$0xff] %vm1760_vm1, %v1785_v50 }
 0x1b3   : > { %1791 = vst.msk [vmem:[%s2965_s8 + $0x18] sm:$0xff] %vm1760_vm1, %v1787_v59 }
 0x1b4 PF: > { %s13_s16 = sadd.s32 1, %s2423_s16   ;;  %s3009_s12 = smov %s2415_s14 }
 0x1b5   : > { %p10_p7 = scmp.ge.s32.totalorder %s13_s16, 6   ;;  %s3010_s13 = smov %s2419_s15 }
 0x1b6   : > { %s3011_s14 = smov %s3014_s17  ;;  %s3012_s15 = smov %s3018_s18 }
 0x1b7   :  { %12 = sbr.rel (!%p10_p7) target bundleno = 3 (0x3), region = 78 }

// kernel: cnn_forward.7
= control target key start
LH: loop header
LB: loop body
LE: loop exit
PB: predicated region body
PF: predicated region fallthrough
CT: control target
= control target key end

     0   :  { %s8127_s12 = smov 0   ;;  %s8129_s13 = smov 0   ;;  %s9570_s0 = inlined_call_operand.vmem [shape: f32[8,4096], index: 0, kind: input, shape index: {}]   ;;  %s9571_s1 = inlined_call_operand.vmem [shape: bf16[4096,653], index: 1, kind: input, shape index: {}]   ;;  %s9572_s2 = inlined_call_operand.vmem [shape: f32[1,653], index: 2, kind: input, shape index: {}]   ;;  %s9573_s3 = inlined_call_operand.vmem [shape: f32[8,653], index: 3, kind: output, shape index: {}]  }
   0x1   :  { %s8131_s14 = smov 0  }
   0x2 LB: > { %s7183_s15 = sadd.s32 4294967295, %s8105_s14   ;;  %s8144_s16 = sadd.s32 1, %s8105_s14   ;;  %s8105_s14 = sphi %s8131_s14, %s9576_s14   ;;  %s8101_s13 = sphi %s8129_s13, %s9575_s13   ;;  %s8097_s12 = sphi %s8127_s12, %s9574_s12  }
   0x3   : > { %s38_s17 = ssub.s32 %s8105_s14, %s8144_s16  ;;  %s41_s18 = sadd.s32 1, %s8101_s13 }
   0x4   : > { %p39_p0 = scmp.eq.s32.totalorder %s38_s17, 0  ;;  %p48_p1 = scmp.ne.s32.totalorder %s8101_s13, %s8097_s12 }
   0x5   : > { %p49_p2 = scmp.eq.s32.totalorder %s8105_s14, 0  ;;  %p7186_p4 = scmp.ge.s32.totalorder %s8105_s14, 6 }
   0x6   : > { %s8153_s19 = scalar_select %p39_p0, %s8101_s13, %s41_s18  }
   0x7   : > { %p50_p3 = por %p49_p2, %p48_p1  ;;  %129 = sbr.rel (%p7186_p4) target bundleno = 359 (0x167), region = 20 }
   0xe   : > { %132 = sbr.rel (!%p50_p3) target bundleno = 359 (0x167), region = 24  ;;  %s134_s20 = sand.u32 (%p50_p3), 1, %s8101_s13  }
   0xf   : > { %s7188_s21 = sshll.u32 (%p50_p3), %s8105_s14, 2  ;;  %s7187_s22 = sshll.u32 (%p50_p3), %s134_s20, 11 }
  0x10   : > { %s8161_s25 = scalar_lea.vmem (%p50_p3), %s9571_s1, %s7188_s21  ;;  %s8165_s26 = scalar_lea.vmem (%p50_p3), [#allocation2], %s7187_s22 }
  0x11   : > { %v154_v0 = vld [vmem:[%s8161_s25] sm:$0xf] (%p50_p3)  ;;  %v156_v1 = vld [vmem:[%s8161_s25 + $0x18] sm:$0xf] (%p50_p3)  ;;  %v158_v2 = vld [vmem:[%s8161_s25 + $0x30] sm:$0xf] (%p50_p3) }
  0x12   : > { %155 = vst [vmem:[%s8165_s26] sm:$0xf] (%p50_p3), %v154_v0  ;;  %157 = vst [vmem:[%s8165_s26 + $0x4] sm:$0xf] (%p50_p3), %v156_v1  ;;  %v160_v3 = vld [vmem:[%s8161_s25 + $0x48] sm:$0xf] (%p50_p3) }
  0x13   : > { %v162_v4 = vld [vmem:[%s8161_s25 + $0x60] sm:$0xf] (%p50_p3)  ;;  %159 = vst [vmem:[%s8165_s26 + $0x8] sm:$0xf] (%p50_p3), %v158_v2  ;;  %161 = vst [vmem:[%s8165_s26 + $0xc] sm:$0xf] (%p50_p3), %v160_v3 }
  0x14   : > { %163 = vst [vmem:[%s8165_s26 + $0x10] sm:$0xf] (%p50_p3), %v162_v4  ;;  %v164_v5 = vld [vmem:[%s8161_s25 + $0x78] sm:$0xf] (%p50_p3)  ;;  %v166_v6 = vld [vmem:[%s8161_s25 + $0x90] sm:$0xf] (%p50_p3) }
  0x15   : > { %v168_v7 = vld [vmem:[%s8161_s25 + $0xa8] sm:$0xf]  ;;  %165 = vst [vmem:[%s8165_s26 + $0x14] sm:$0xf] %v164_v5  ;;  %167 = vst [vmem:[%s8165_s26 + $0x18] sm:$0xf] %v166_v6 }
  0x16   : > { %169 = vst [vmem:[%s8165_s26 + $0x1c] sm:$0xf] %v168_v7  ;;  %v170_v8 = vld [vmem:[%s8161_s25 + $0xc0] sm:$0xf]  ;;  %v172_v9 = vld [vmem:[%s8161_s25 + $0xd8] sm:$0xf] }
  0x17   : > { %v174_v10 = vld [vmem:[%s8161_s25 + $0xf0] sm:$0xf]  ;;  %171 = vst [vmem:[%s8165_s26 + $0x20] sm:$0xf] %v170_v8  ;;  %173 = vst [vmem:[%s8165_s26 + $0x24] sm:$0xf] %v172_v9 }
  0x18   : > { %175 = vst [vmem:[%s8165_s26 + $0x28] sm:$0xf] %v174_v10  ;;  %v176_v11 = vld [vmem:[%s8161_s25 + $0x108] sm:$0xf]  ;;  %v178_v12 = vld [vmem:[%s8161_s25 + $0x120] sm:$0xf] }
  0x19   : > { %v180_v13 = vld [vmem:[%s8161_s25 + $0x138] sm:$0xf]  ;;  %177 = vst [vmem:[%s8165_s26 + $0x2c] sm:$0xf] %v176_v11  ;;  %179 = vst [vmem:[%s8165_s26 + $0x30] sm:$0xf] %v178_v12 }
  0x1a   : > { %181 = vst [vmem:[%s8165_s26 + $0x34] sm:$0xf] %v180_v13  ;;  %v182_v14 = vld [vmem:[%s8161_s25 + $0x150] sm:$0xf]  ;;  %v184_v15 = vld [vmem:[%s8161_s25 + $0x168] sm:$0xf] }
  0x1b   : > { %v186_v16 = vld [vmem:[%s8161_s25 + $0x180] sm:$0xf]  ;;  %183 = vst [vmem:[%s8165_s26 + $0x38] sm:$0xf] %v182_v14  ;;  %185 = vst [vmem:[%s8165_s26 + $0x3c] sm:$0xf] %v184_v15 }
  0x1c   : > { %187 = vst [vmem:[%s8165_s26 + $0x40] sm:$0xf] %v186_v16  ;;  %v188_v17 = vld [vmem:[%s8161_s25 + $0x198] sm:$0xf]  ;;  %v190_v18 = vld [vmem:[%s8161_s25 + $0x1b0] sm:$0xf] }
  0x1d   : > { %v192_v19 = vld [vmem:[%s8161_s25 + $0x1c8] sm:$0xf]  ;;  %189 = vst [vmem:[%s8165_s26 + $0x44] sm:$0xf] %v188_v17  ;;  %191 = vst [vmem:[%s8165_s26 + $0x48] sm:$0xf] %v190_v18 }
  0x1e   : > { %193 = vst [vmem:[%s8165_s26 + $0x4c] sm:$0xf] %v192_v19  ;;  %v194_v20 = vld [vmem:[%s8161_s25 + $0x1e0] sm:$0xf]  ;;  %v196_v21 = vld [vmem:[%s8161_s25 + $0x1f8] sm:$0xf] }
  0x1f   : > { %v198_v22 = vld [vmem:[%s8161_s25 + $0x210] sm:$0xf]  ;;  %195 = vst [vmem:[%s8165_s26 + $0x50] sm:$0xf] %v194_v20  ;;  %197 = vst [vmem:[%s8165_s26 + $0x54] sm:$0xf] %v196_v21 }
  0x20   : > { %199 = vst [vmem:[%s8165_s26 + $0x58] sm:$0xf] %v198_v22  ;;  %v200_v23 = vld [vmem:[%s8161_s25 + $0x228] sm:$0xf]  ;;  %v202_v24 = vld [vmem:[%s8161_s25 + $0x240] sm:$0xf] }
  0x21   : > { %v204_v25 = vld [vmem:[%s8161_s25 + $0x258] sm:$0xf]  ;;  %201 = vst [vmem:[%s8165_s26 + $0x5c] sm:$0xf] %v200_v23  ;;  %203 = vst [vmem:[%s8165_s26 + $0x60] sm:$0xf] %v202_v24 }
  0x22   : > { %205 = vst [vmem:[%s8165_s26 + $0x64] sm:$0xf] %v204_v25  ;;  %v206_v26 = vld [vmem:[%s8161_s25 + $0x270] sm:$0xf]  ;;  %v208_v27 = vld [vmem:[%s8161_s25 + $0x288] sm:$0xf] }
  0x23   : > { %v210_v28 = vld [vmem:[%s8161_s25 + $0x2a0] sm:$0xf]  ;;  %207 = vst [vmem:[%s8165_s26 + $0x68] sm:$0xf] %v206_v26  ;;  %209 = vst [vmem:[%s8165_s26 + $0x6c] sm:$0xf] %v208_v27 }
  0x24   : > { %211 = vst [vmem:[%s8165_s26 + $0x70] sm:$0xf] %v210_v28  ;;  %v212_v29 = vld [vmem:[%s8161_s25 + $0x2b8] sm:$0xf]  ;;  %v214_v30 = vld [vmem:[%s8161_s25 + $0x2d0] sm:$0xf] }
  0x25   : > { %v216_v31 = vld [vmem:[%s8161_s25 + $0x2e8] sm:$0xf]  ;;  %213 = vst [vmem:[%s8165_s26 + $0x74] sm:$0xf] %v212_v29  ;;  %215 = vst [vmem:[%s8165_s26 + $0x78] sm:$0xf] %v214_v30 }
  0x26   : > { %217 = vst [vmem:[%s8165_s26 + $0x7c] sm:$0xf] %v216_v31  ;;  %v218_v32 = vld [vmem:[%s8161_s25 + $0x300] sm:$0xf]  ;;  %v220_v33 = vld [vmem:[%s8161_s25 + $0x318] sm:$0xf] }
  0x27   : > { %v222_v34 = vld [vmem:[%s8161_s25 + $0x330] sm:$0xf]  ;;  %219 = vst [vmem:[%s8165_s26 + $0x80] sm:$0xf] %v218_v32  ;;  %221 = vst [vmem:[%s8165_s26 + $0x84] sm:$0xf] %v220_v33 }
  0x28   : > { %223 = vst [vmem:[%s8165_s26 + $0x88] sm:$0xf] %v222_v34  ;;  %v224_v35 = vld [vmem:[%s8161_s25 + $0x348] sm:$0xf]  ;;  %v226_v36 = vld [vmem:[%s8161_s25 + $0x360] sm:$0xf] }
  0x29   : > { %v228_v37 = vld [vmem:[%s8161_s25 + $0x378] sm:$0xf]  ;;  %225 = vst [vmem:[%s8165_s26 + $0x8c] sm:$0xf] %v224_v35  ;;  %227 = vst [vmem:[%s8165_s26 + $0x90] sm:$0xf] %v226_v36 }
  0x2a   : > { %229 = vst [vmem:[%s8165_s26 + $0x94] sm:$0xf] %v228_v37  ;;  %v230_v38 = vld [vmem:[%s8161_s25 + $0x390] sm:$0xf]  ;;  %v232_v39 = vld [vmem:[%s8161_s25 + $0x3a8] sm:$0xf] }
  0x2b   : > { %v234_v40 = vld [vmem:[%s8161_s25 + $0x3c0] sm:$0xf]  ;;  %231 = vst [vmem:[%s8165_s26 + $0x98] sm:$0xf] %v230_v38  ;;  %233 = vst [vmem:[%s8165_s26 + $0x9c] sm:$0xf] %v232_v39 }
  0x2c   : > { %235 = vst [vmem:[%s8165_s26 + $0xa0] sm:$0xf] %v234_v40  ;;  %v236_v41 = vld [vmem:[%s8161_s25 + $0x3d8] sm:$0xf]  ;;  %v238_v42 = vld [vmem:[%s8161_s25 + $0x3f0] sm:$0xf] }
  0x2d   : > { %v240_v43 = vld [vmem:[%s8161_s25 + $0x408] sm:$0xf]  ;;  %237 = vst [vmem:[%s8165_s26 + $0xa4] sm:$0xf] %v236_v41  ;;  %239 = vst [vmem:[%s8165_s26 + $0xa8] sm:$0xf] %v238_v42 }
  0x2e   : > { %241 = vst [vmem:[%s8165_s26 + $0xac] sm:$0xf] %v240_v43  ;;  %v242_v44 = vld [vmem:[%s8161_s25 + $0x420] sm:$0xf]  ;;  %v244_v45 = vld [vmem:[%s8161_s25 + $0x438] sm:$0xf] }
  0x2f   : > { %v246_v46 = vld [vmem:[%s8161_s25 + $0x450] sm:$0xf]  ;;  %243 = vst [vmem:[%s8165_s26 + $0xb0] sm:$0xf] %v242_v44  ;;  %245 = vst [vmem:[%s8165_s26 + $0xb4] sm:$0xf] %v244_v45 }
  0x30   : > { %247 = vst [vmem:[%s8165_s26 + $0xb8] sm:$0xf] %v246_v46  ;;  %v248_v47 = vld [vmem:[%s8161_s25 + $0x468] sm:$0xf]  ;;  %v250_v48 = vld [vmem:[%s8161_s25 + $0x480] sm:$0xf] }
  0x31   : > { %v252_v49 = vld [vmem:[%s8161_s25 + $0x498] sm:$0xf]  ;;  %249 = vst [vmem:[%s8165_s26 + $0xbc] sm:$0xf] %v248_v47  ;;  %251 = vst [vmem:[%s8165_s26 + $0xc0] sm:$0xf] %v250_v48 }
  0x32   : > { %253 = vst [vmem:[%s8165_s26 + $0xc4] sm:$0xf] %v252_v49  ;;  %v254_v50 = vld [vmem:[%s8161_s25 + $0x4b0] sm:$0xf]  ;;  %v256_v51 = vld [vmem:[%s8161_s25 + $0x4c8] sm:$0xf] }
  0x33   : > { %v258_v52 = vld [vmem:[%s8161_s25 + $0x4e0] sm:$0xf]  ;;  %255 = vst [vmem:[%s8165_s26 + $0xc8] sm:$0xf] %v254_v50  ;;  %257 = vst [vmem:[%s8165_s26 + $0xcc] sm:$0xf] %v256_v51 }
  0x34   : > { %259 = vst [vmem:[%s8165_s26 + $0xd0] sm:$0xf] %v258_v52  ;;  %v260_v53 = vld [vmem:[%s8161_s25 + $0x4f8] sm:$0xf]  ;;  %v262_v54 = vld [vmem:[%s8161_s25 + $0x510] sm:$0xf] }
  0x35   : > { %v264_v55 = vld [vmem:[%s8161_s25 + $0x528] sm:$0xf]  ;;  %261 = vst [vmem:[%s8165_s26 + $0xd4] sm:$0xf] %v260_v53  ;;  %263 = vst [vmem:[%s8165_s26 + $0xd8] sm:$0xf] %v262_v54 }
  0x36   : > { %265 = vst [vmem:[%s8165_s26 + $0xdc] sm:$0xf] %v264_v55  ;;  %v266_v56 = vld [vmem:[%s8161_s25 + $0x540] sm:$0xf]  ;;  %v268_v57 = vld [vmem:[%s8161_s25 + $0x558] sm:$0xf] }
  0x37   : > { %v270_v58 = vld [vmem:[%s8161_s25 + $0x570] sm:$0xf]  ;;  %267 = vst [vmem:[%s8165_s26 + $0xe0] sm:$0xf] %v266_v56  ;;  %269 = vst [vmem:[%s8165_s26 + $0xe4] sm:$0xf] %v268_v57 }
  0x38   : > { %271 = vst [vmem:[%s8165_s26 + $0xe8] sm:$0xf] %v270_v58  ;;  %v272_v59 = vld [vmem:[%s8161_s25 + $0x588] sm:$0xf]  ;;  %v274_v60 = vld [vmem:[%s8161_s25 + $0x5a0] sm:$0xf] }
  0x39   : > { %v276_v61 = vld [vmem:[%s8161_s25 + $0x5b8] sm:$0xf]  ;;  %273 = vst [vmem:[%s8165_s26 + $0xec] sm:$0xf] %v272_v59  ;;  %275 = vst [vmem:[%s8165_s26 + $0xf0] sm:$0xf] %v274_v60 }
  0x3a   : > { %277 = vst [vmem:[%s8165_s26 + $0xf4] sm:$0xf] %v276_v61  ;;  %v278_v62 = vld [vmem:[%s8161_s25 + $0x5d0] sm:$0xf]  ;;  %v280_v63 = vld [vmem:[%s8161_s25 + $0x5e8] sm:$0xf] }
  0x3b   : > { %v282_v0 = vld [vmem:[%s8161_s25 + $0x600] sm:$0xf]  ;;  %279 = vst [vmem:[%s8165_s26 + $0xf8] sm:$0xf] %v278_v62  ;;  %281 = vst [vmem:[%s8165_s26 + $0xfc] sm:$0xf] %v280_v63 }
  0x3c   : > { %283 = vst [vmem:[%s8165_s26 + $0x100] sm:$0xf] %v282_v0  ;;  %v284_v1 = vld [vmem:[%s8161_s25 + $0x618] sm:$0xf]  ;;  %v286_v2 = vld [vmem:[%s8161_s25 + $0x630] sm:$0xf] }
  0x3d   : > { %v288_v3 = vld [vmem:[%s8161_s25 + $0x648] sm:$0xf]  ;;  %285 = vst [vmem:[%s8165_s26 + $0x104] sm:$0xf] %v284_v1  ;;  %287 = vst [vmem:[%s8165_s26 + $0x108] sm:$0xf] %v286_v2 }
  0x3e   : > { %289 = vst [vmem:[%s8165_s26 + $0x10c] sm:$0xf] %v288_v3  ;;  %v290_v4 = vld [vmem:[%s8161_s25 + $0x660] sm:$0xf]  ;;  %v292_v5 = vld [vmem:[%s8161_s25 + $0x678] sm:$0xf] }
  0x3f   : > { %v294_v6 = vld [vmem:[%s8161_s25 + $0x690] sm:$0xf]  ;;  %291 = vst [vmem:[%s8165_s26 + $0x110] sm:$0xf] %v290_v4  ;;  %293 = vst [vmem:[%s8165_s26 + $0x114] sm:$0xf] %v292_v5 }
  0x40   : > { %295 = vst [vmem:[%s8165_s26 + $0x118] sm:$0xf] %v294_v6  ;;  %v296_v7 = vld [vmem:[%s8161_s25 + $0x6a8] sm:$0xf]  ;;  %v298_v8 = vld [vmem:[%s8161_s25 + $0x6c0] sm:$0xf] }
  0x41   : > { %v300_v9 = vld [vmem:[%s8161_s25 + $0x6d8] sm:$0xf]  ;;  %297 = vst [vmem:[%s8165_s26 + $0x11c] sm:$0xf] %v296_v7  ;;  %299 = vst [vmem:[%s8165_s26 + $0x120] sm:$0xf] %v298_v8 }
  0x42   : > { %301 = vst [vmem:[%s8165_s26 + $0x124] sm:$0xf] %v300_v9  ;;  %v302_v10 = vld [vmem:[%s8161_s25 + $0x6f0] sm:$0xf]  ;;  %v304_v11 = vld [vmem:[%s8161_s25 + $0x708] sm:$0xf] }
  0x43   : > { %v306_v12 = vld [vmem:[%s8161_s25 + $0x720] sm:$0xf]  ;;  %303 = vst [vmem:[%s8165_s26 + $0x128] sm:$0xf] %v302_v10  ;;  %305 = vst [vmem:[%s8165_s26 + $0x12c] sm:$0xf] %v304_v11 }
  0x44   : > { %307 = vst [vmem:[%s8165_s26 + $0x130] sm:$0xf] %v306_v12  ;;  %v308_v13 = vld [vmem:[%s8161_s25 + $0x738] sm:$0xf]  ;;  %v310_v14 = vld [vmem:[%s8161_s25 + $0x750] sm:$0xf] }
  0x45   : > { %v312_v15 = vld [vmem:[%s8161_s25 + $0x768] sm:$0xf]  ;;  %309 = vst [vmem:[%s8165_s26 + $0x134] sm:$0xf] %v308_v13  ;;  %311 = vst [vmem:[%s8165_s26 + $0x138] sm:$0xf] %v310_v14 }
  0x46   : > { %313 = vst [vmem:[%s8165_s26 + $0x13c] sm:$0xf] %v312_v15  ;;  %v314_v16 = vld [vmem:[%s8161_s25 + $0x780] sm:$0xf]  ;;  %v316_v17 = vld [vmem:[%s8161_s25 + $0x798] sm:$0xf] }
  0x47   : > { %v318_v18 = vld [vmem:[%s8161_s25 + $0x7b0] sm:$0xf]  ;;  %315 = vst [vmem:[%s8165_s26 + $0x140] sm:$0xf] %v314_v16  ;;  %317 = vst [vmem:[%s8165_s26 + $0x144] sm:$0xf] %v316_v17 }
  0x48   : > { %319 = vst [vmem:[%s8165_s26 + $0x148] sm:$0xf] %v318_v18  ;;  %v320_v19 = vld [vmem:[%s8161_s25 + $0x7c8] sm:$0xf]  ;;  %v322_v20 = vld [vmem:[%s8161_s25 + $0x7e0] sm:$0xf] }
  0x49   : > { %v324_v21 = vld [vmem:[%s8161_s25 + $0x7f8] sm:$0xf]  ;;  %321 = vst [vmem:[%s8165_s26 + $0x14c] sm:$0xf] %v320_v19  ;;  %323 = vst [vmem:[%s8165_s26 + $0x150] sm:$0xf] %v322_v20 }
  0x4a   : > { %325 = vst [vmem:[%s8165_s26 + $0x154] sm:$0xf] %v324_v21  ;;  %v326_v22 = vld [vmem:[%s8161_s25 + $0x810] sm:$0xf]  ;;  %v328_v23 = vld [vmem:[%s8161_s25 + $0x828] sm:$0xf] }
  0x4b   : > { %v330_v24 = vld [vmem:[%s8161_s25 + $0x840] sm:$0xf]  ;;  %327 = vst [vmem:[%s8165_s26 + $0x158] sm:$0xf] %v326_v22  ;;  %329 = vst [vmem:[%s8165_s26 + $0x15c] sm:$0xf] %v328_v23 }
  0x4c   : > { %331 = vst [vmem:[%s8165_s26 + $0x160] sm:$0xf] %v330_v24  ;;  %v332_v25 = vld [vmem:[%s8161_s25 + $0x858] sm:$0xf]  ;;  %v334_v26 = vld [vmem:[%s8161_s25 + $0x870] sm:$0xf] }
  0x4d   : > { %v336_v27 = vld [vmem:[%s8161_s25 + $0x888] sm:$0xf]  ;;  %333 = vst [vmem:[%s8165_s26 + $0x164] sm:$0xf] %v332_v25  ;;  %335 = vst [vmem:[%s8165_s26 + $0x168] sm:$0xf] %v334_v26 }
  0x4e   : > { %337 = vst [vmem:[%s8165_s26 + $0x16c] sm:$0xf] %v336_v27  ;;  %v338_v28 = vld [vmem:[%s8161_s25 + $0x8a0] sm:$0xf]  ;;  %v340_v29 = vld [vmem:[%s8161_s25 + $0x8b8] sm:$0xf] }
  0x4f   : > { %v342_v30 = vld [vmem:[%s8161_s25 + $0x8d0] sm:$0xf]  ;;  %339 = vst [vmem:[%s8165_s26 + $0x170] sm:$0xf] %v338_v28  ;;  %341 = vst [vmem:[%s8165_s26 + $0x174] sm:$0xf] %v340_v29 }
  0x50   : > { %343 = vst [vmem:[%s8165_s26 + $0x178] sm:$0xf] %v342_v30  ;;  %v344_v31 = vld [vmem:[%s8161_s25 + $0x8e8] sm:$0xf]  ;;  %v346_v32 = vld [vmem:[%s8161_s25 + $0x900] sm:$0xf] }
  0x51   : > { %v348_v33 = vld [vmem:[%s8161_s25 + $0x918] sm:$0xf]  ;;  %345 = vst [vmem:[%s8165_s26 + $0x17c] sm:$0xf] %v344_v31  ;;  %347 = vst [vmem:[%s8165_s26 + $0x180] sm:$0xf] %v346_v32 }
  0x52   : > { %349 = vst [vmem:[%s8165_s26 + $0x184] sm:$0xf] %v348_v33  ;;  %v350_v34 = vld [vmem:[%s8161_s25 + $0x930] sm:$0xf]  ;;  %v352_v35 = vld [vmem:[%s8161_s25 + $0x948] sm:$0xf] }
  0x53   : > { %v354_v36 = vld [vmem:[%s8161_s25 + $0x960] sm:$0xf]  ;;  %351 = vst [vmem:[%s8165_s26 + $0x188] sm:$0xf] %v350_v34  ;;  %353 = vst [vmem:[%s8165_s26 + $0x18c] sm:$0xf] %v352_v35 }
  0x54   : > { %355 = vst [vmem:[%s8165_s26 + $0x190] sm:$0xf] %v354_v36  ;;  %v356_v37 = vld [vmem:[%s8161_s25 + $0x978] sm:$0xf]  ;;  %v358_v38 = vld [vmem:[%s8161_s25 + $0x990] sm:$0xf] }
  0x55   : > { %v360_v39 = vld [vmem:[%s8161_s25 + $0x9a8] sm:$0xf]  ;;  %357 = vst [vmem:[%s8165_s26 + $0x194] sm:$0xf] %v356_v37  ;;  %359 = vst [vmem:[%s8165_s26 + $0x198] sm:$0xf] %v358_v38 }
  0x56   : > { %361 = vst [vmem:[%s8165_s26 + $0x19c] sm:$0xf] %v360_v39  ;;  %v362_v40 = vld [vmem:[%s8161_s25 + $0x9c0] sm:$0xf]  ;;  %v364_v41 = vld [vmem:[%s8161_s25 + $0x9d8] sm:$0xf] }
  0x57   : > { %v366_v42 = vld [vmem:[%s8161_s25 + $0x9f0] sm:$0xf]  ;;  %363 = vst [vmem:[%s8165_s26 + $0x1a0] sm:$0xf] %v362_v40  ;;  %365 = vst [vmem:[%s8165_s26 + $0x1a4] sm:$0xf] %v364_v41 }
  0x58   : > { %367 = vst [vmem:[%s8165_s26 + $0x1a8] sm:$0xf] %v366_v42  ;;  %v368_v43 = vld [vmem:[%s8161_s25 + $0xa08] sm:$0xf]  ;;  %v370_v44 = vld [vmem:[%s8161_s25 + $0xa20] sm:$0xf] }
  0x59   : > { %v372_v45 = vld [vmem:[%s8161_s25 + $0xa38] sm:$0xf]  ;;  %369 = vst [vmem:[%s8165_s26 + $0x1ac] sm:$0xf] %v368_v43  ;;  %371 = vst [vmem:[%s8165_s26 + $0x1b0] sm:$0xf] %v370_v44 }
  0x5a   : > { %373 = vst [vmem:[%s8165_s26 + $0x1b4] sm:$0xf] %v372_v45  ;;  %v374_v46 = vld [vmem:[%s8161_s25 + $0xa50] sm:$0xf]  ;;  %v376_v47 = vld [vmem:[%s8161_s25 + $0xa68] sm:$0xf] }
  0x5b   : > { %v378_v48 = vld [vmem:[%s8161_s25 + $0xa80] sm:$0xf]  ;;  %375 = vst [vmem:[%s8165_s26 + $0x1b8] sm:$0xf] %v374_v46  ;;  %377 = vst [vmem:[%s8165_s26 + $0x1bc] sm:$0xf] %v376_v47 }
  0x5c   : > { %379 = vst [vmem:[%s8165_s26 + $0x1c0] sm:$0xf] %v378_v48  ;;  %v380_v49 = vld [vmem:[%s8161_s25 + $0xa98] sm:$0xf]  ;;  %v382_v50 = vld [vmem:[%s8161_s25 + $0xab0] sm:$0xf] }
  0x5d   : > { %v384_v51 = vld [vmem:[%s8161_s25 + $0xac8] sm:$0xf]  ;;  %381 = vst [vmem:[%s8165_s26 + $0x1c4] sm:$0xf] %v380_v49  ;;  %383 = vst [vmem:[%s8165_s26 + $0x1c8] sm:$0xf] %v382_v50 }
  0x5e   : > { %385 = vst [vmem:[%s8165_s26 + $0x1cc] sm:$0xf] %v384_v51  ;;  %v386_v52 = vld [vmem:[%s8161_s25 + $0xae0] sm:$0xf]  ;;  %v388_v53 = vld [vmem:[%s8161_s25 + $0xaf8] sm:$0xf] }
  0x5f   : > { %v390_v54 = vld [vmem:[%s8161_s25 + $0xb10] sm:$0xf]  ;;  %387 = vst [vmem:[%s8165_s26 + $0x1d0] sm:$0xf] %v386_v52  ;;  %389 = vst [vmem:[%s8165_s26 + $0x1d4] sm:$0xf] %v388_v53 }
  0x60   : > { %391 = vst [vmem:[%s8165_s26 + $0x1d8] sm:$0xf] %v390_v54  ;;  %v392_v55 = vld [vmem:[%s8161_s25 + $0xb28] sm:$0xf]  ;;  %v394_v56 = vld [vmem:[%s8161_s25 + $0xb40] sm:$0xf] }
  0x61   : > { %v396_v57 = vld [vmem:[%s8161_s25 + $0xb58] sm:$0xf]  ;;  %393 = vst [vmem:[%s8165_s26 + $0x1dc] sm:$0xf] %v392_v55  ;;  %395 = vst [vmem:[%s8165_s26 + $0x1e0] sm:$0xf] %v394_v56 }
  0x62   : > { %397 = vst [vmem:[%s8165_s26 + $0x1e4] sm:$0xf] %v396_v57  ;;  %v398_v58 = vld [vmem:[%s8161_s25 + $0xb70] sm:$0xf]  ;;  %v400_v59 = vld [vmem:[%s8161_s25 + $0xb88] sm:$0xf] }
  0x63   : > { %v402_v60 = vld [vmem:[%s8161_s25 + $0xba0] sm:$0xf]  ;;  %399 = vst [vmem:[%s8165_s26 + $0x1e8] sm:$0xf] %v398_v58  ;;  %401 = vst [vmem:[%s8165_s26 + $0x1ec] sm:$0xf] %v400_v59 }
  0x64   : > { %403 = vst [vmem:[%s8165_s26 + $0x1f0] sm:$0xf] %v402_v60  ;;  %v404_v61 = vld [vmem:[%s8161_s25 + $0xbb8] sm:$0xf]  ;;  %v406_v62 = vld [vmem:[%s8161_s25 + $0xbd0] sm:$0xf] }
  0x65   : > { %v408_v63 = vld [vmem:[%s8161_s25 + $0xbe8] sm:$0xf]  ;;  %405 = vst [vmem:[%s8165_s26 + $0x1f4] sm:$0xf] %v404_v61  ;;  %407 = vst [vmem:[%s8165_s26 + $0x1f8] sm:$0xf] %v406_v62 }
  0x66   : > { %409 = vst [vmem:[%s8165_s26 + $0x1fc] sm:$0xf] %v408_v63  ;;  %v410_v0 = vld [vmem:[%s8161_s25 + $0xc00] sm:$0xf]  ;;  %v412_v1 = vld [vmem:[%s8161_s25 + $0xc18] sm:$0xf] }
  0x67   : > { %v414_v2 = vld [vmem:[%s8161_s25 + $0xc30] sm:$0xf]  ;;  %411 = vst [vmem:[%s8165_s26 + $0x200] sm:$0xf] %v410_v0  ;;  %413 = vst [vmem:[%s8165_s26 + $0x204] sm:$0xf] %v412_v1 }
  0x68   : > { %415 = vst [vmem:[%s8165_s26 + $0x208] sm:$0xf] %v414_v2  ;;  %v416_v3 = vld [vmem:[%s8161_s25 + $0xc48] sm:$0xf]  ;;  %v418_v4 = vld [vmem:[%s8161_s25 + $0xc60] sm:$0xf] }
  0x69   : > { %v420_v5 = vld [vmem:[%s8161_s25 + $0xc78] sm:$0xf]  ;;  %417 = vst [vmem:[%s8165_s26 + $0x20c] sm:$0xf] %v416_v3  ;;  %419 = vst [vmem:[%s8165_s26 + $0x210] sm:$0xf] %v418_v4 }
  0x6a   : > { %421 = vst [vmem:[%s8165_s26 + $0x214] sm:$0xf] %v420_v5  ;;  %v422_v6 = vld [vmem:[%s8161_s25 + $0xc90] sm:$0xf]  ;;  %v424_v7 = vld [vmem:[%s8161_s25 + $0xca8] sm:$0xf] }
  0x6b   : > { %v426_v8 = vld [vmem:[%s8161_s25 + $0xcc0] sm:$0xf]  ;;  %423 = vst [vmem:[%s8165_s26 + $0x218] sm:$0xf] %v422_v6  ;;  %425 = vst [vmem:[%s8165_s26 + $0x21c] sm:$0xf] %v424_v7 }
  0x6c   : > { %427 = vst [vmem:[%s8165_s26 + $0x220] sm:$0xf] %v426_v8  ;;  %v428_v9 = vld [vmem:[%s8161_s25 + $0xcd8] sm:$0xf]  ;;  %v430_v10 = vld [vmem:[%s8161_s25 + $0xcf0] sm:$0xf] }
  0x6d   : > { %v432_v11 = vld [vmem:[%s8161_s25 + $0xd08] sm:$0xf]  ;;  %429 = vst [vmem:[%s8165_s26 + $0x224] sm:$0xf] %v428_v9  ;;  %431 = vst [vmem:[%s8165_s26 + $0x228] sm:$0xf] %v430_v10 }
  0x6e   : > { %433 = vst [vmem:[%s8165_s26 + $0x22c] sm:$0xf] %v432_v11  ;;  %v434_v12 = vld [vmem:[%s8161_s25 + $0xd20] sm:$0xf]  ;;  %v436_v13 = vld [vmem:[%s8161_s25 + $0xd38] sm:$0xf] }
  0x6f   : > { %v438_v14 = vld [vmem:[%s8161_s25 + $0xd50] sm:$0xf]  ;;  %435 = vst [vmem:[%s8165_s26 + $0x230] sm:$0xf] %v434_v12  ;;  %437 = vst [vmem:[%s8165_s26 + $0x234] sm:$0xf] %v436_v13 }
  0x70   : > { %439 = vst [vmem:[%s8165_s26 + $0x238] sm:$0xf] %v438_v14  ;;  %v440_v15 = vld [vmem:[%s8161_s25 + $0xd68] sm:$0xf]  ;;  %v442_v16 = vld [vmem:[%s8161_s25 + $0xd80] sm:$0xf] }
  0x71   : > { %v444_v17 = vld [vmem:[%s8161_s25 + $0xd98] sm:$0xf]  ;;  %441 = vst [vmem:[%s8165_s26 + $0x23c] sm:$0xf] %v440_v15  ;;  %443 = vst [vmem:[%s8165_s26 + $0x240] sm:$0xf] %v442_v16 }
  0x72   : > { %445 = vst [vmem:[%s8165_s26 + $0x244] sm:$0xf] %v444_v17  ;;  %v446_v18 = vld [vmem:[%s8161_s25 + $0xdb0] sm:$0xf]  ;;  %v448_v19 = vld [vmem:[%s8161_s25 + $0xdc8] sm:$0xf] }
  0x73   : > { %v450_v20 = vld [vmem:[%s8161_s25 + $0xde0] sm:$0xf]  ;;  %447 = vst [vmem:[%s8165_s26 + $0x248] sm:$0xf] %v446_v18  ;;  %449 = vst [vmem:[%s8165_s26 + $0x24c] sm:$0xf] %v448_v19 }
  0x74   : > { %451 = vst [vmem:[%s8165_s26 + $0x250] sm:$0xf] %v450_v20  ;;  %v452_v21 = vld [vmem:[%s8161_s25 + $0xdf8] sm:$0xf]  ;;  %v454_v22 = vld [vmem:[%s8161_s25 + $0xe10] sm:$0xf] }
  0x75   : > { %v456_v23 = vld [vmem:[%s8161_s25 + $0xe28] sm:$0xf]  ;;  %453 = vst [vmem:[%s8165_s26 + $0x254] sm:$0xf] %v452_v21  ;;  %455 = vst [vmem:[%s8165_s26 + $0x258] sm:$0xf] %v454_v22 }
  0x76   : > { %457 = vst [vmem:[%s8165_s26 + $0x25c] sm:$0xf] %v456_v23  ;;  %v458_v24 = vld [vmem:[%s8161_s25 + $0xe40] sm:$0xf]  ;;  %v460_v25 = vld [vmem:[%s8161_s25 + $0xe58] sm:$0xf] }
  0x77   : > { %v462_v26 = vld [vmem:[%s8161_s25 + $0xe70] sm:$0xf]  ;;  %459 = vst [vmem:[%s8165_s26 + $0x260] sm:$0xf] %v458_v24  ;;  %461 = vst [vmem:[%s8165_s26 + $0x264] sm:$0xf] %v460_v25 }
  0x78   : > { %463 = vst [vmem:[%s8165_s26 + $0x268] sm:$0xf] %v462_v26  ;;  %v464_v27 = vld [vmem:[%s8161_s25 + $0xe88] sm:$0xf]  ;;  %v466_v28 = vld [vmem:[%s8161_s25 + $0xea0] sm:$0xf] }
  0x79   : > { %v468_v29 = vld [vmem:[%s8161_s25 + $0xeb8] sm:$0xf]  ;;  %465 = vst [vmem:[%s8165_s26 + $0x26c] sm:$0xf] %v464_v27  ;;  %467 = vst [vmem:[%s8165_s26 + $0x270] sm:$0xf] %v466_v28 }
  0x7a   : > { %469 = vst [vmem:[%s8165_s26 + $0x274] sm:$0xf] %v468_v29  ;;  %v470_v30 = vld [vmem:[%s8161_s25 + $0xed0] sm:$0xf]  ;;  %v472_v31 = vld [vmem:[%s8161_s25 + $0xee8] sm:$0xf] }
  0x7b   : > { %v474_v32 = vld [vmem:[%s8161_s25 + $0xf00] sm:$0xf]  ;;  %471 = vst [vmem:[%s8165_s26 + $0x278] sm:$0xf] %v470_v30  ;;  %473 = vst [vmem:[%s8165_s26 + $0x27c] sm:$0xf] %v472_v31 }
  0x7c   : > { %475 = vst [vmem:[%s8165_s26 + $0x280] sm:$0xf] %v474_v32  ;;  %v476_v33 = vld [vmem:[%s8161_s25 + $0xf18] sm:$0xf]  ;;  %v478_v34 = vld [vmem:[%s8161_s25 + $0xf30] sm:$0xf] }
  0x7d   : > { %v480_v35 = vld [vmem:[%s8161_s25 + $0xf48] sm:$0xf]  ;;  %477 = vst [vmem:[%s8165_s26 + $0x284] sm:$0xf] %v476_v33  ;;  %479 = vst [vmem:[%s8165_s26 + $0x288] sm:$0xf] %v478_v34 }
  0x7e   : > { %481 = vst [vmem:[%s8165_s26 + $0x28c] sm:$0xf] %v480_v35  ;;  %v482_v36 = vld [vmem:[%s8161_s25 + $0xf60] sm:$0xf]  ;;  %v484_v37 = vld [vmem:[%s8161_s25 + $0xf78] sm:$0xf] }
  0x7f   : > { %v486_v38 = vld [vmem:[%s8161_s25 + $0xf90] sm:$0xf]  ;;  %483 = vst [vmem:[%s8165_s26 + $0x290] sm:$0xf] %v482_v36  ;;  %485 = vst [vmem:[%s8165_s26 + $0x294] sm:$0xf] %v484_v37 }
  0x80   : > { %487 = vst [vmem:[%s8165_s26 + $0x298] sm:$0xf] %v486_v38  ;;  %v488_v39 = vld [vmem:[%s8161_s25 + $0xfa8] sm:$0xf]  ;;  %v490_v40 = vld [vmem:[%s8161_s25 + $0xfc0] sm:$0xf] }
  0x81   : > { %v492_v41 = vld [vmem:[%s8161_s25 + $0xfd8] sm:$0xf]  ;;  %489 = vst [vmem:[%s8165_s26 + $0x29c] sm:$0xf] %v488_v39  ;;  %491 = vst [vmem:[%s8165_s26 + $0x2a0] sm:$0xf] %v490_v40 }
  0x82   : > { %493 = vst [vmem:[%s8165_s26 + $0x2a4] sm:$0xf] %v492_v41  ;;  %v494_v42 = vld [vmem:[%s8161_s25 + $0xff0] sm:$0xf]  ;;  %v496_v43 = vld [vmem:[%s8161_s25 + $0x1008] sm:$0xf] }
  0x83   : > { %v498_v44 = vld [vmem:[%s8161_s25 + $0x1020] sm:$0xf]  ;;  %495 = vst [vmem:[%s8165_s26 + $0x2a8] sm:$0xf] %v494_v42  ;;  %497 = vst [vmem:[%s8165_s26 + $0x2ac] sm:$0xf] %v496_v43 }
  0x84   : > { %499 = vst [vmem:[%s8165_s26 + $0x2b0] sm:$0xf] %v498_v44  ;;  %v500_v45 = vld [vmem:[%s8161_s25 + $0x1038] sm:$0xf]  ;;  %v502_v46 = vld [vmem:[%s8161_s25 + $0x1050] sm:$0xf] }
  0x85   : > { %v504_v47 = vld [vmem:[%s8161_s25 + $0x1068] sm:$0xf]  ;;  %501 = vst [vmem:[%s8165_s26 + $0x2b4] sm:$0xf] %v500_v45  ;;  %503 = vst [vmem:[%s8165_s26 + $0x2b8] sm:$0xf] %v502_v46 }
  0x86   : > { %505 = vst [vmem:[%s8165_s26 + $0x2bc] sm:$0xf] %v504_v47  ;;  %v506_v48 = vld [vmem:[%s8161_s25 + $0x1080] sm:$0xf]  ;;  %v508_v49 = vld [vmem:[%s8161_s25 + $0x1098] sm:$0xf] }
  0x87   : > { %v510_v50 = vld [vmem:[%s8161_s25 + $0x10b0] sm:$0xf]  ;;  %507 = vst [vmem:[%s8165_s26 + $0x2c0] sm:$0xf] %v506_v48  ;;  %509 = vst [vmem:[%s8165_s26 + $0x2c4] sm:$0xf] %v508_v49 }
  0x88   : > { %511 = vst [vmem:[%s8165_s26 + $0x2c8] sm:$0xf] %v510_v50  ;;  %v512_v51 = vld [vmem:[%s8161_s25 + $0x10c8] sm:$0xf]  ;;  %v514_v52 = vld [vmem:[%s8161_s25 + $0x10e0] sm:$0xf] }
  0x89   : > { %v516_v53 = vld [vmem:[%s8161_s25 + $0x10f8] sm:$0xf]  ;;  %513 = vst [vmem:[%s8165_s26 + $0x2cc] sm:$0xf] %v512_v51  ;;  %515 = vst [vmem:[%s8165_s26 + $0x2d0] sm:$0xf] %v514_v52 }
  0x8a   : > { %517 = vst [vmem:[%s8165_s26 + $0x2d4] sm:$0xf] %v516_v53  ;;  %v518_v54 = vld [vmem:[%s8161_s25 + $0x1110] sm:$0xf]  ;;  %v520_v55 = vld [vmem:[%s8161_s25 + $0x1128] sm:$0xf] }
  0x8b   : > { %v522_v56 = vld [vmem:[%s8161_s25 + $0x1140] sm:$0xf]  ;;  %519 = vst [vmem:[%s8165_s26 + $0x2d8] sm:$0xf] %v518_v54  ;;  %521 = vst [vmem:[%s8165_s26 + $0x2dc] sm:$0xf] %v520_v55 }
  0x8c   : > { %523 = vst [vmem:[%s8165_s26 + $0x2e0] sm:$0xf] %v522_v56  ;;  %v524_v57 = vld [vmem:[%s8161_s25 + $0x1158] sm:$0xf]  ;;  %v526_v58 = vld [vmem:[%s8161_s25 + $0x1170] sm:$0xf] }
  0x8d   : > { %v528_v59 = vld [vmem:[%s8161_s25 + $0x1188] sm:$0xf]  ;;  %525 = vst [vmem:[%s8165_s26 + $0x2e4] sm:$0xf] %v524_v57  ;;  %527 = vst [vmem:[%s8165_s26 + $0x2e8] sm:$0xf] %v526_v58 }
  0x8e   : > { %529 = vst [vmem:[%s8165_s26 + $0x2ec] sm:$0xf] %v528_v59  ;;  %v530_v60 = vld [vmem:[%s8161_s25 + $0x11a0] sm:$0xf]  ;;  %v532_v61 = vld [vmem:[%s8161_s25 + $0x11b8] sm:$0xf] }
  0x8f   : > { %v534_v62 = vld [vmem:[%s8161_s25 + $0x11d0] sm:$0xf]  ;;  %531 = vst [vmem:[%s8165_s26 + $0x2f0] sm:$0xf] %v530_v60  ;;  %533 = vst [vmem:[%s8165_s26 + $0x2f4] sm:$0xf] %v532_v61 }
  0x90   : > { %535 = vst [vmem:[%s8165_s26 + $0x2f8] sm:$0xf] %v534_v62  ;;  %v536_v63 = vld [vmem:[%s8161_s25 + $0x11e8] sm:$0xf]  ;;  %v538_v0 = vld [vmem:[%s8161_s25 + $0x1200] sm:$0xf] }
  0x91   : > { %v540_v1 = vld [vmem:[%s8161_s25 + $0x1218] sm:$0xf]  ;;  %537 = vst [vmem:[%s8165_s26 + $0x2fc] sm:$0xf] %v536_v63  ;;  %539 = vst [vmem:[%s8165_s26 + $0x300] sm:$0xf] %v538_v0 }
  0x92   : > { %541 = vst [vmem:[%s8165_s26 + $0x304] sm:$0xf] %v540_v1  ;;  %v542_v2 = vld [vmem:[%s8161_s25 + $0x1230] sm:$0xf]  ;;  %v544_v3 = vld [vmem:[%s8161_s25 + $0x1248] sm:$0xf] }
  0x93   : > { %v546_v4 = vld [vmem:[%s8161_s25 + $0x1260] sm:$0xf]  ;;  %543 = vst [vmem:[%s8165_s26 + $0x308] sm:$0xf] %v542_v2  ;;  %545 = vst [vmem:[%s8165_s26 + $0x30c] sm:$0xf] %v544_v3 }
  0x94   : > { %547 = vst [vmem:[%s8165_s26 + $0x310] sm:$0xf] %v546_v4  ;;  %v548_v5 = vld [vmem:[%s8161_s25 + $0x1278] sm:$0xf]  ;;  %v550_v6 = vld [vmem:[%s8161_s25 + $0x1290] sm:$0xf] }
  0x95   : > { %v552_v7 = vld [vmem:[%s8161_s25 + $0x12a8] sm:$0xf]  ;;  %549 = vst [vmem:[%s8165_s26 + $0x314] sm:$0xf] %v548_v5  ;;  %551 = vst [vmem:[%s8165_s26 + $0x318] sm:$0xf] %v550_v6 }
  0x96   : > { %553 = vst [vmem:[%s8165_s26 + $0x31c] sm:$0xf] %v552_v7  ;;  %v554_v8 = vld [vmem:[%s8161_s25 + $0x12c0] sm:$0xf]  ;;  %v556_v9 = vld [vmem:[%s8161_s25 + $0x12d8] sm:$0xf] }
  0x97   : > { %v558_v10 = vld [vmem:[%s8161_s25 + $0x12f0] sm:$0xf]  ;;  %555 = vst [vmem:[%s8165_s26 + $0x320] sm:$0xf] %v554_v8  ;;  %557 = vst [vmem:[%s8165_s26 + $0x324] sm:$0xf] %v556_v9 }
  0x98   : > { %559 = vst [vmem:[%s8165_s26 + $0x328] sm:$0xf] %v558_v10  ;;  %v560_v11 = vld [vmem:[%s8161_s25 + $0x1308] sm:$0xf]  ;;  %v562_v12 = vld [vmem:[%s8161_s25 + $0x1320] sm:$0xf] }
  0x99   : > { %v564_v13 = vld [vmem:[%s8161_s25 + $0x1338] sm:$0xf]  ;;  %561 = vst [vmem:[%s8165_s26 + $0x32c] sm:$0xf] %v560_v11  ;;  %563 = vst [vmem:[%s8165_s26 + $0x330] sm:$0xf] %v562_v12 }
  0x9a   : > { %565 = vst [vmem:[%s8165_s26 + $0x334] sm:$0xf] %v564_v13  ;;  %v566_v14 = vld [vmem:[%s8161_s25 + $0x1350] sm:$0xf]  ;;  %v568_v15 = vld [vmem:[%s8161_s25 + $0x1368] sm:$0xf] }
  0x9b   : > { %v570_v16 = vld [vmem:[%s8161_s25 + $0x1380] sm:$0xf]  ;;  %567 = vst [vmem:[%s8165_s26 + $0x338] sm:$0xf] %v566_v14  ;;  %569 = vst [vmem:[%s8165_s26 + $0x33c] sm:$0xf] %v568_v15 }
  0x9c   : > { %571 = vst [vmem:[%s8165_s26 + $0x340] sm:$0xf] %v570_v16  ;;  %v572_v17 = vld [vmem:[%s8161_s25 + $0x1398] sm:$0xf]  ;;  %v574_v18 = vld [vmem:[%s8161_s25 + $0x13b0] sm:$0xf] }
  0x9d   : > { %v576_v19 = vld [vmem:[%s8161_s25 + $0x13c8] sm:$0xf]  ;;  %573 = vst [vmem:[%s8165_s26 + $0x344] sm:$0xf] %v572_v17  ;;  %575 = vst [vmem:[%s8165_s26 + $0x348] sm:$0xf] %v574_v18 }
  0x9e   : > { %577 = vst [vmem:[%s8165_s26 + $0x34c] sm:$0xf] %v576_v19  ;;  %v578_v20 = vld [vmem:[%s8161_s25 + $0x13e0] sm:$0xf]  ;;  %v580_v21 = vld [vmem:[%s8161_s25 + $0x13f8] sm:$0xf] }
  0x9f   : > { %v582_v22 = vld [vmem:[%s8161_s25 + $0x1410] sm:$0xf]  ;;  %579 = vst [vmem:[%s8165_s26 + $0x350] sm:$0xf] %v578_v20  ;;  %581 = vst [vmem:[%s8165_s26 + $0x354] sm:$0xf] %v580_v21 }
  0xa0   : > { %583 = vst [vmem:[%s8165_s26 + $0x358] sm:$0xf] %v582_v22  ;;  %v584_v23 = vld [vmem:[%s8161_s25 + $0x1428] sm:$0xf]  ;;  %v586_v24 = vld [vmem:[%s8161_s25 + $0x1440] sm:$0xf] }
  0xa1   : > { %v588_v25 = vld [vmem:[%s8161_s25 + $0x1458] sm:$0xf]  ;;  %585 = vst [vmem:[%s8165_s26 + $0x35c] sm:$0xf] %v584_v23  ;;  %587 = vst [vmem:[%s8165_s26 + $0x360] sm:$0xf] %v586_v24 }
  0xa2   : > { %589 = vst [vmem:[%s8165_s26 + $0x364] sm:$0xf] %v588_v25  ;;  %v590_v26 = vld [vmem:[%s8161_s25 + $0x1470] sm:$0xf]  ;;  %v592_v27 = vld [vmem:[%s8161_s25 + $0x1488] sm:$0xf] }
  0xa3   : > { %v594_v28 = vld [vmem:[%s8161_s25 + $0x14a0] sm:$0xf]  ;;  %591 = vst [vmem:[%s8165_s26 + $0x368] sm:$0xf] %v590_v26  ;;  %593 = vst [vmem:[%s8165_s26 + $0x36c] sm:$0xf] %v592_v27 }
  0xa4   : > { %595 = vst [vmem:[%s8165_s26 + $0x370] sm:$0xf] %v594_v28  ;;  %v596_v29 = vld [vmem:[%s8161_s25 + $0x14b8] sm:$0xf]  ;;  %v598_v30 = vld [vmem:[%s8161_s25 + $0x14d0] sm:$0xf] }
  0xa5   : > { %v600_v31 = vld [vmem:[%s8161_s25 + $0x14e8] sm:$0xf]  ;;  %597 = vst [vmem:[%s8165_s26 + $0x374] sm:$0xf] %v596_v29  ;;  %599 = vst [vmem:[%s8165_s26 + $0x378] sm:$0xf] %v598_v30 }
  0xa6   : > { %601 = vst [vmem:[%s8165_s26 + $0x37c] sm:$0xf] %v600_v31  ;;  %v602_v32 = vld [vmem:[%s8161_s25 + $0x1500] sm:$0xf]  ;;  %v604_v33 = vld [vmem:[%s8161_s25 + $0x1518] sm:$0xf] }
  0xa7   : > { %v606_v34 = vld [vmem:[%s8161_s25 + $0x1530] sm:$0xf]  ;;  %603 = vst [vmem:[%s8165_s26 + $0x380] sm:$0xf] %v602_v32  ;;  %605 = vst [vmem:[%s8165_s26 + $0x384] sm:$0xf] %v604_v33 }
  0xa8   : > { %607 = vst [vmem:[%s8165_s26 + $0x388] sm:$0xf] %v606_v34  ;;  %v608_v35 = vld [vmem:[%s8161_s25 + $0x1548] sm:$0xf]  ;;  %v610_v36 = vld [vmem:[%s8161_s25 + $0x1560] sm:$0xf] }
  0xa9   : > { %v612_v37 = vld [vmem:[%s8161_s25 + $0x1578] sm:$0xf]  ;;  %609 = vst [vmem:[%s8165_s26 + $0x38c] sm:$0xf] %v608_v35  ;;  %611 = vst [vmem:[%s8165_s26 + $0x390] sm:$0xf] %v610_v36 }
  0xaa   : > { %613 = vst [vmem:[%s8165_s26 + $0x394] sm:$0xf] %v612_v37  ;;  %v614_v38 = vld [vmem:[%s8161_s25 + $0x1590] sm:$0xf]  ;;  %v616_v39 = vld [vmem:[%s8161_s25 + $0x15a8] sm:$0xf] }
  0xab   : > { %v618_v40 = vld [vmem:[%s8161_s25 + $0x15c0] sm:$0xf]  ;;  %615 = vst [vmem:[%s8165_s26 + $0x398] sm:$0xf] %v614_v38  ;;  %617 = vst [vmem:[%s8165_s26 + $0x39c] sm:$0xf] %v616_v39 }
  0xac   : > { %619 = vst [vmem:[%s8165_s26 + $0x3a0] sm:$0xf] %v618_v40  ;;  %v620_v41 = vld [vmem:[%s8161_s25 + $0x15d8] sm:$0xf]  ;;  %v622_v42 = vld [vmem:[%s8161_s25 + $0x15f0] sm:$0xf] }
  0xad   : > { %v624_v43 = vld [vmem:[%s8161_s25 + $0x1608] sm:$0xf]  ;;  %621 = vst [vmem:[%s8165_s26 + $0x3a4] sm:$0xf] %v620_v41  ;;  %623 = vst [vmem:[%s8165_s26 + $0x3a8] sm:$0xf] %v622_v42 }
  0xae   : > { %625 = vst [vmem:[%s8165_s26 + $0x3ac] sm:$0xf] %v624_v43  ;;  %v626_v44 = vld [vmem:[%s8161_s25 + $0x1620] sm:$0xf]  ;;  %v628_v45 = vld [vmem:[%s8161_s25 + $0x1638] sm:$0xf] }
  0xaf   : > { %v630_v46 = vld [vmem:[%s8161_s25 + $0x1650] sm:$0xf]  ;;  %627 = vst [vmem:[%s8165_s26 + $0x3b0] sm:$0xf] %v626_v44  ;;  %629 = vst [vmem:[%s8165_s26 + $0x3b4] sm:$0xf] %v628_v45 }
  0xb0   : > { %631 = vst [vmem:[%s8165_s26 + $0x3b8] sm:$0xf] %v630_v46  ;;  %v632_v47 = vld [vmem:[%s8161_s25 + $0x1668] sm:$0xf]  ;;  %v634_v48 = vld [vmem:[%s8161_s25 + $0x1680] sm:$0xf] }
  0xb1   : > { %v636_v49 = vld [vmem:[%s8161_s25 + $0x1698] sm:$0xf]  ;;  %633 = vst [vmem:[%s8165_s26 + $0x3bc] sm:$0xf] %v632_v47  ;;  %635 = vst [vmem:[%s8165_s26 + $0x3c0] sm:$0xf] %v634_v48 }
  0xb2   : > { %637 = vst [vmem:[%s8165_s26 + $0x3c4] sm:$0xf] %v636_v49  ;;  %v638_v50 = vld [vmem:[%s8161_s25 + $0x16b0] sm:$0xf]  ;;  %v640_v51 = vld [vmem:[%s8161_s25 + $0x16c8] sm:$0xf] }
  0xb3   : > { %v642_v52 = vld [vmem:[%s8161_s25 + $0x16e0] sm:$0xf]  ;;  %639 = vst [vmem:[%s8165_s26 + $0x3c8] sm:$0xf] %v638_v50  ;;  %641 = vst [vmem:[%s8165_s26 + $0x3cc] sm:$0xf] %v640_v51 }
  0xb4   : > { %643 = vst [vmem:[%s8165_s26 + $0x3d0] sm:$0xf] %v642_v52  ;;  %v644_v53 = vld [vmem:[%s8161_s25 + $0x16f8] sm:$0xf]  ;;  %v646_v54 = vld [vmem:[%s8161_s25 + $0x1710] sm:$0xf] }
  0xb5   : > { %v648_v55 = vld [vmem:[%s8161_s25 + $0x1728] sm:$0xf]  ;;  %645 = vst [vmem:[%s8165_s26 + $0x3d4] sm:$0xf] %v644_v53  ;;  %647 = vst [vmem:[%s8165_s26 + $0x3d8] sm:$0xf] %v646_v54 }
  0xb6   : > { %649 = vst [vmem:[%s8165_s26 + $0x3dc] sm:$0xf] %v648_v55  ;;  %v650_v56 = vld [vmem:[%s8161_s25 + $0x1740] sm:$0xf]  ;;  %v652_v57 = vld [vmem:[%s8161_s25 + $0x1758] sm:$0xf] }
  0xb7   : > { %v654_v58 = vld [vmem:[%s8161_s25 + $0x1770] sm:$0xf]  ;;  %651 = vst [vmem:[%s8165_s26 + $0x3e0] sm:$0xf] %v650_v56  ;;  %653 = vst [vmem:[%s8165_s26 + $0x3e4] sm:$0xf] %v652_v57 }
  0xb8   : > { %655 = vst [vmem:[%s8165_s26 + $0x3e8] sm:$0xf] %v654_v58  ;;  %v656_v59 = vld [vmem:[%s8161_s25 + $0x1788] sm:$0xf]  ;;  %v658_v60 = vld [vmem:[%s8161_s25 + $0x17a0] sm:$0xf] }
  0xb9   : > { %v660_v61 = vld [vmem:[%s8161_s25 + $0x17b8] sm:$0xf]  ;;  %657 = vst [vmem:[%s8165_s26 + $0x3ec] sm:$0xf] %v656_v59  ;;  %659 = vst [vmem:[%s8165_s26 + $0x3f0] sm:$0xf] %v658_v60 }
  0xba   : > { %661 = vst [vmem:[%s8165_s26 + $0x3f4] sm:$0xf] %v660_v61  ;;  %v662_v62 = vld [vmem:[%s8161_s25 + $0x17d0] sm:$0xf]  ;;  %v664_v63 = vld [vmem:[%s8161_s25 + $0x17e8] sm:$0xf] }
  0xbb   : > { %v666_v0 = vld [vmem:[%s8161_s25 + $0x1800] sm:$0xf]  ;;  %663 = vst [vmem:[%s8165_s26 + $0x3f8] sm:$0xf] %v662_v62  ;;  %665 = vst [vmem:[%s8165_s26 + $0x3fc] sm:$0xf] %v664_v63 }
  0xbc   : > { %667 = vst [vmem:[%s8165_s26 + $0x400] sm:$0xf] %v666_v0  ;;  %v668_v1 = vld [vmem:[%s8161_s25 + $0x1818] sm:$0xf]  ;;  %v670_v2 = vld [vmem:[%s8161_s25 + $0x1830] sm:$0xf] }
  0xbd   : > { %v672_v3 = vld [vmem:[%s8161_s25 + $0x1848] sm:$0xf]  ;;  %669 = vst [vmem:[%s8165_s26 + $0x404] sm:$0xf] %v668_v1  ;;  %671 = vst [vmem:[%s8165_s26 + $0x408] sm:$0xf] %v670_v2 }
  0xbe   : > { %673 = vst [vmem:[%s8165_s26 + $0x40c] sm:$0xf] %v672_v3  ;;  %v674_v4 = vld [vmem:[%s8161_s25 + $0x1860] sm:$0xf]  ;;  %v676_v5 = vld [vmem:[%s8161_s25 + $0x1878] sm:$0xf] }
  0xbf   : > { %v678_v6 = vld [vmem:[%s8161_s25 + $0x1890] sm:$0xf]  ;;  %675 = vst [vmem:[%s8165_s26 + $0x410] sm:$0xf] %v674_v4  ;;  %677 = vst [vmem:[%s8165_s26 + $0x414] sm:$0xf] %v676_v5 }
  0xc0   : > { %679 = vst [vmem:[%s8165_s26 + $0x418] sm:$0xf] %v678_v6  ;;  %v680_v7 = vld [vmem:[%s8161_s25 + $0x18a8] sm:$0xf]  ;;  %v682_v8 = vld [vmem:[%s8161_s25 + $0x18c0] sm:$0xf] }
  0xc1   : > { %v684_v9 = vld [vmem:[%s8161_s25 + $0x18d8] sm:$0xf]  ;;  %681 = vst [vmem:[%s8165_s26 + $0x41c] sm:$0xf] %v680_v7  ;;  %683 = vst [vmem:[%s8165_s26 + $0x420] sm:$0xf] %v682_v8 }
  0xc2   : > { %685 = vst [vmem:[%s8165_s26 + $0x424] sm:$0xf] %v684_v9  ;;  %v686_v10 = vld [vmem:[%s8161_s25 + $0x18f0] sm:$0xf]  ;;  %v688_v11 = vld [vmem:[%s8161_s25 + $0x1908] sm:$0xf] }
  0xc3   : > { %v690_v12 = vld [vmem:[%s8161_s25 + $0x1920] sm:$0xf]  ;;  %687 = vst [vmem:[%s8165_s26 + $0x428] sm:$0xf] %v686_v10  ;;  %689 = vst [vmem:[%s8165_s26 + $0x42c] sm:$0xf] %v688_v11 }
  0xc4   : > { %691 = vst [vmem:[%s8165_s26 + $0x430] sm:$0xf] %v690_v12  ;;  %v692_v13 = vld [vmem:[%s8161_s25 + $0x1938] sm:$0xf]  ;;  %v694_v14 = vld [vmem:[%s8161_s25 + $0x1950] sm:$0xf] }
  0xc5   : > { %v696_v15 = vld [vmem:[%s8161_s25 + $0x1968] sm:$0xf]  ;;  %693 = vst [vmem:[%s8165_s26 + $0x434] sm:$0xf] %v692_v13  ;;  %695 = vst [vmem:[%s8165_s26 + $0x438] sm:$0xf] %v694_v14 }
  0xc6   : > { %697 = vst [vmem:[%s8165_s26 + $0x43c] sm:$0xf] %v696_v15  ;;  %v698_v16 = vld [vmem:[%s8161_s25 + $0x1980] sm:$0xf]  ;;  %v700_v17 = vld [vmem:[%s8161_s25 + $0x1998] sm:$0xf] }
  0xc7   : > { %v702_v18 = vld [vmem:[%s8161_s25 + $0x19b0] sm:$0xf]  ;;  %699 = vst [vmem:[%s8165_s26 + $0x440] sm:$0xf] %v698_v16  ;;  %701 = vst [vmem:[%s8165_s26 + $0x444] sm:$0xf] %v700_v17 }
  0xc8   : > { %703 = vst [vmem:[%s8165_s26 + $0x448] sm:$0xf] %v702_v18  ;;  %v704_v19 = vld [vmem:[%s8161_s25 + $0x19c8] sm:$0xf]  ;;  %v706_v20 = vld [vmem:[%s8161_s25 + $0x19e0] sm:$0xf] }
  0xc9   : > { %v708_v21 = vld [vmem:[%s8161_s25 + $0x19f8] sm:$0xf]  ;;  %705 = vst [vmem:[%s8165_s26 + $0x44c] sm:$0xf] %v704_v19  ;;  %707 = vst [vmem:[%s8165_s26 + $0x450] sm:$0xf] %v706_v20 }
  0xca   : > { %709 = vst [vmem:[%s8165_s26 + $0x454] sm:$0xf] %v708_v21  ;;  %v710_v22 = vld [vmem:[%s8161_s25 + $0x1a10] sm:$0xf]  ;;  %v712_v23 = vld [vmem:[%s8161_s25 + $0x1a28] sm:$0xf] }
  0xcb   : > { %v714_v24 = vld [vmem:[%s8161_s25 + $0x1a40] sm:$0xf]  ;;  %711 = vst [vmem:[%s8165_s26 + $0x458] sm:$0xf] %v710_v22  ;;  %713 = vst [vmem:[%s8165_s26 + $0x45c] sm:$0xf] %v712_v23 }
  0xcc   : > { %715 = vst [vmem:[%s8165_s26 + $0x460] sm:$0xf] %v714_v24  ;;  %v716_v25 = vld [vmem:[%s8161_s25 + $0x1a58] sm:$0xf]  ;;  %v718_v26 = vld [vmem:[%s8161_s25 + $0x1a70] sm:$0xf] }
  0xcd   : > { %v720_v27 = vld [vmem:[%s8161_s25 + $0x1a88] sm:$0xf]  ;;  %717 = vst [vmem:[%s8165_s26 + $0x464] sm:$0xf] %v716_v25  ;;  %719 = vst [vmem:[%s8165_s26 + $0x468] sm:$0xf] %v718_v26 }
  0xce   : > { %721 = vst [vmem:[%s8165_s26 + $0x46c] sm:$0xf] %v720_v27  ;;  %v722_v28 = vld [vmem:[%s8161_s25 + $0x1aa0] sm:$0xf]  ;;  %v724_v29 = vld [vmem:[%s8161_s25 + $0x1ab8] sm:$0xf] }
  0xcf   : > { %v726_v30 = vld [vmem:[%s8161_s25 + $0x1ad0] sm:$0xf]  ;;  %723 = vst [vmem:[%s8165_s26 + $0x470] sm:$0xf] %v722_v28  ;;  %725 = vst [vmem:[%s8165_s26 + $0x474] sm:$0xf] %v724_v29 }
  0xd0   : > { %727 = vst [vmem:[%s8165_s26 + $0x478] sm:$0xf] %v726_v30  ;;  %v728_v31 = vld [vmem:[%s8161_s25 + $0x1ae8] sm:$0xf]  ;;  %v730_v32 = vld [vmem:[%s8161_s25 + $0x1b00] sm:$0xf] }
  0xd1   : > { %v732_v33 = vld [vmem:[%s8161_s25 + $0x1b18] sm:$0xf]  ;;  %729 = vst [vmem:[%s8165_s26 + $0x47c] sm:$0xf] %v728_v31  ;;  %731 = vst [vmem:[%s8165_s26 + $0x480] sm:$0xf] %v730_v32 }
  0xd2   : > { %733 = vst [vmem:[%s8165_s26 + $0x484] sm:$0xf] %v732_v33  ;;  %v734_v34 = vld [vmem:[%s8161_s25 + $0x1b30] sm:$0xf]  ;;  %v736_v35 = vld [vmem:[%s8161_s25 + $0x1b48] sm:$0xf] }
  0xd3   : > { %v738_v36 = vld [vmem:[%s8161_s25 + $0x1b60] sm:$0xf]  ;;  %735 = vst [vmem:[%s8165_s26 + $0x488] sm:$0xf] %v734_v34  ;;  %737 = vst [vmem:[%s8165_s26 + $0x48c] sm:$0xf] %v736_v35 }
  0xd4   : > { %739 = vst [vmem:[%s8165_s26 + $0x490] sm:$0xf] %v738_v36  ;;  %v740_v37 = vld [vmem:[%s8161_s25 + $0x1b78] sm:$0xf]  ;;  %v742_v38 = vld [vmem:[%s8161_s25 + $0x1b90] sm:$0xf] }
  0xd5   : > { %v744_v39 = vld [vmem:[%s8161_s25 + $0x1ba8] sm:$0xf]  ;;  %741 = vst [vmem:[%s8165_s26 + $0x494] sm:$0xf] %v740_v37  ;;  %743 = vst [vmem:[%s8165_s26 + $0x498] sm:$0xf] %v742_v38 }
  0xd6   : > { %745 = vst [vmem:[%s8165_s26 + $0x49c] sm:$0xf] %v744_v39  ;;  %v746_v40 = vld [vmem:[%s8161_s25 + $0x1bc0] sm:$0xf]  ;;  %v748_v41 = vld [vmem:[%s8161_s25 + $0x1bd8] sm:$0xf] }
  0xd7   : > { %v750_v42 = vld [vmem:[%s8161_s25 + $0x1bf0] sm:$0xf]  ;;  %747 = vst [vmem:[%s8165_s26 + $0x4a0] sm:$0xf] %v746_v40  ;;  %749 = vst [vmem:[%s8165_s26 + $0x4a4] sm:$0xf] %v748_v41 }
  0xd8   : > { %751 = vst [vmem:[%s8165_s26 + $0x4a8] sm:$0xf] %v750_v42  ;;  %v752_v43 = vld [vmem:[%s8161_s25 + $0x1c08] sm:$0xf]  ;;  %v754_v44 = vld [vmem:[%s8161_s25 + $0x1c20] sm:$0xf] }
  0xd9   : > { %v756_v45 = vld [vmem:[%s8161_s25 + $0x1c38] sm:$0xf]  ;;  %753 = vst [vmem:[%s8165_s26 + $0x4ac] sm:$0xf] %v752_v43  ;;  %755 = vst [vmem:[%s8165_s26 + $0x4b0] sm:$0xf] %v754_v44 }
  0xda   : > { %757 = vst [vmem:[%s8165_s26 + $0x4b4] sm:$0xf] %v756_v45  ;;  %v758_v46 = vld [vmem:[%s8161_s25 + $0x1c50] sm:$0xf]  ;;  %v760_v47 = vld [vmem:[%s8161_s25 + $0x1c68] sm:$0xf] }
  0xdb   : > { %v762_v48 = vld [vmem:[%s8161_s25 + $0x1c80] sm:$0xf]  ;;  %759 = vst [vmem:[%s8165_s26 + $0x4b8] sm:$0xf] %v758_v46  ;;  %761 = vst [vmem:[%s8165_s26 + $0x4bc] sm:$0xf] %v760_v47 }
  0xdc   : > { %763 = vst [vmem:[%s8165_s26 + $0x4c0] sm:$0xf] %v762_v48  ;;  %v764_v49 = vld [vmem:[%s8161_s25 + $0x1c98] sm:$0xf]  ;;  %v766_v50 = vld [vmem:[%s8161_s25 + $0x1cb0] sm:$0xf] }
  0xdd   : > { %v768_v51 = vld [vmem:[%s8161_s25 + $0x1cc8] sm:$0xf]  ;;  %765 = vst [vmem:[%s8165_s26 + $0x4c4] sm:$0xf] %v764_v49  ;;  %767 = vst [vmem:[%s8165_s26 + $0x4c8] sm:$0xf] %v766_v50 }
  0xde   : > { %769 = vst [vmem:[%s8165_s26 + $0x4cc] sm:$0xf] %v768_v51  ;;  %v770_v52 = vld [vmem:[%s8161_s25 + $0x1ce0] sm:$0xf]  ;;  %v772_v53 = vld [vmem:[%s8161_s25 + $0x1cf8] sm:$0xf] }
  0xdf   : > { %v774_v54 = vld [vmem:[%s8161_s25 + $0x1d10] sm:$0xf]  ;;  %771 = vst [vmem:[%s8165_s26 + $0x4d0] sm:$0xf] %v770_v52  ;;  %773 = vst [vmem:[%s8165_s26 + $0x4d4] sm:$0xf] %v772_v53 }
  0xe0   : > { %775 = vst [vmem:[%s8165_s26 + $0x4d8] sm:$0xf] %v774_v54  ;;  %v776_v55 = vld [vmem:[%s8161_s25 + $0x1d28] sm:$0xf]  ;;  %v778_v56 = vld [vmem:[%s8161_s25 + $0x1d40] sm:$0xf] }
  0xe1   : > { %v780_v57 = vld [vmem:[%s8161_s25 + $0x1d58] sm:$0xf]  ;;  %777 = vst [vmem:[%s8165_s26 + $0x4dc] sm:$0xf] %v776_v55  ;;  %779 = vst [vmem:[%s8165_s26 + $0x4e0] sm:$0xf] %v778_v56 }
  0xe2   : > { %781 = vst [vmem:[%s8165_s26 + $0x4e4] sm:$0xf] %v780_v57  ;;  %v782_v58 = vld [vmem:[%s8161_s25 + $0x1d70] sm:$0xf]  ;;  %v784_v59 = vld [vmem:[%s8161_s25 + $0x1d88] sm:$0xf] }
  0xe3   : > { %v786_v60 = vld [vmem:[%s8161_s25 + $0x1da0] sm:$0xf]  ;;  %783 = vst [vmem:[%s8165_s26 + $0x4e8] sm:$0xf] %v782_v58  ;;  %785 = vst [vmem:[%s8165_s26 + $0x4ec] sm:$0xf] %v784_v59 }
  0xe4   : > { %787 = vst [vmem:[%s8165_s26 + $0x4f0] sm:$0xf] %v786_v60  ;;  %v788_v61 = vld [vmem:[%s8161_s25 + $0x1db8] sm:$0xf]  ;;  %v790_v62 = vld [vmem:[%s8161_s25 + $0x1dd0] sm:$0xf] }
  0xe5   : > { %v792_v63 = vld [vmem:[%s8161_s25 + $0x1de8] sm:$0xf]  ;;  %789 = vst [vmem:[%s8165_s26 + $0x4f4] sm:$0xf] %v788_v61  ;;  %791 = vst [vmem:[%s8165_s26 + $0x4f8] sm:$0xf] %v790_v62 }
  0xe6   : > { %793 = vst [vmem:[%s8165_s26 + $0x4fc] sm:$0xf] %v792_v63  ;;  %v794_v0 = vld [vmem:[%s8161_s25 + $0x1e00] sm:$0xf]  ;;  %v796_v1 = vld [vmem:[%s8161_s25 + $0x1e18] sm:$0xf] }
  0xe7   : > { %v798_v2 = vld [vmem:[%s8161_s25 + $0x1e30] sm:$0xf]  ;;  %795 = vst [vmem:[%s8165_s26 + $0x500] sm:$0xf] %v794_v0  ;;  %797 = vst [vmem:[%s8165_s26 + $0x504] sm:$0xf] %v796_v1 }
  0xe8   : > { %799 = vst [vmem:[%s8165_s26 + $0x508] sm:$0xf] %v798_v2  ;;  %v800_v3 = vld [vmem:[%s8161_s25 + $0x1e48] sm:$0xf]  ;;  %v802_v4 = vld [vmem:[%s8161_s25 + $0x1e60] sm:$0xf] }
  0xe9   : > { %v804_v5 = vld [vmem:[%s8161_s25 + $0x1e78] sm:$0xf]  ;;  %801 = vst [vmem:[%s8165_s26 + $0x50c] sm:$0xf] %v800_v3  ;;  %803 = vst [vmem:[%s8165_s26 + $0x510] sm:$0xf] %v802_v4 }
  0xea   : > { %805 = vst [vmem:[%s8165_s26 + $0x514] sm:$0xf] %v804_v5  ;;  %v806_v6 = vld [vmem:[%s8161_s25 + $0x1e90] sm:$0xf]  ;;  %v808_v7 = vld [vmem:[%s8161_s25 + $0x1ea8] sm:$0xf] }
  0xeb   : > { %v810_v8 = vld [vmem:[%s8161_s25 + $0x1ec0] sm:$0xf]  ;;  %807 = vst [vmem:[%s8165_s26 + $0x518] sm:$0xf] %v806_v6  ;;  %809 = vst [vmem:[%s8165_s26 + $0x51c] sm:$0xf] %v808_v7 }
  0xec   : > { %811 = vst [vmem:[%s8165_s26 + $0x520] sm:$0xf] %v810_v8  ;;  %v812_v9 = vld [vmem:[%s8161_s25 + $0x1ed8] sm:$0xf]  ;;  %v814_v10 = vld [vmem:[%s8161_s25 + $0x1ef0] sm:$0xf] }
  0xed   : > { %v816_v11 = vld [vmem:[%s8161_s25 + $0x1f08] sm:$0xf]  ;;  %813 = vst [vmem:[%s8165_s26 + $0x524] sm:$0xf] %v812_v9  ;;  %815 = vst [vmem:[%s8165_s26 + $0x528] sm:$0xf] %v814_v10 }
  0xee   : > { %817 = vst [vmem:[%s8165_s26 + $0x52c] sm:$0xf] %v816_v11  ;;  %v818_v12 = vld [vmem:[%s8161_s25 + $0x1f20] sm:$0xf]  ;;  %v820_v13 = vld [vmem:[%s8161_s25 + $0x1f38] sm:$0xf] }
  0xef   : > { %v822_v14 = vld [vmem:[%s8161_s25 + $0x1f50] sm:$0xf]  ;;  %819 = vst [vmem:[%s8165_s26 + $0x530] sm:$0xf] %v818_v12  ;;  %821 = vst [vmem:[%s8165_s26 + $0x534] sm:$0xf] %v820_v13 }
  0xf0   : > { %823 = vst [vmem:[%s8165_s26 + $0x538] sm:$0xf] %v822_v14  ;;  %v824_v15 = vld [vmem:[%s8161_s25 + $0x1f68] sm:$0xf]  ;;  %v826_v16 = vld [vmem:[%s8161_s25 + $0x1f80] sm:$0xf] }
  0xf1   : > { %v828_v17 = vld [vmem:[%s8161_s25 + $0x1f98] sm:$0xf]  ;;  %825 = vst [vmem:[%s8165_s26 + $0x53c] sm:$0xf] %v824_v15  ;;  %827 = vst [vmem:[%s8165_s26 + $0x540] sm:$0xf] %v826_v16 }
  0xf2   : > { %829 = vst [vmem:[%s8165_s26 + $0x544] sm:$0xf] %v828_v17  ;;  %v830_v18 = vld [vmem:[%s8161_s25 + $0x1fb0] sm:$0xf]  ;;  %v832_v19 = vld [vmem:[%s8161_s25 + $0x1fc8] sm:$0xf] }
  0xf3   : > { %v834_v20 = vld [vmem:[%s8161_s25 + $0x1fe0] sm:$0xf]  ;;  %831 = vst [vmem:[%s8165_s26 + $0x548] sm:$0xf] %v830_v18  ;;  %833 = vst [vmem:[%s8165_s26 + $0x54c] sm:$0xf] %v832_v19 }
  0xf4   : > { %835 = vst [vmem:[%s8165_s26 + $0x550] sm:$0xf] %v834_v20  ;;  %v836_v21 = vld [vmem:[%s8161_s25 + $0x1ff8] sm:$0xf]  ;;  %v838_v22 = vld [vmem:[%s8161_s25 + $0x2010] sm:$0xf] }
  0xf5   : > { %v840_v23 = vld [vmem:[%s8161_s25 + $0x2028] sm:$0xf]  ;;  %837 = vst [vmem:[%s8165_s26 + $0x554] sm:$0xf] %v836_v21  ;;  %839 = vst [vmem:[%s8165_s26 + $0x558] sm:$0xf] %v838_v22 }
  0xf6   : > { %841 = vst [vmem:[%s8165_s26 + $0x55c] sm:$0xf] %v840_v23  ;;  %v842_v24 = vld [vmem:[%s8161_s25 + $0x2040] sm:$0xf]  ;;  %v844_v25 = vld [vmem:[%s8161_s25 + $0x2058] sm:$0xf] }
  0xf7   : > { %v846_v26 = vld [vmem:[%s8161_s25 + $0x2070] sm:$0xf]  ;;  %843 = vst [vmem:[%s8165_s26 + $0x560] sm:$0xf] %v842_v24  ;;  %845 = vst [vmem:[%s8165_s26 + $0x564] sm:$0xf] %v844_v25 }
  0xf8   : > { %847 = vst [vmem:[%s8165_s26 + $0x568] sm:$0xf] %v846_v26  ;;  %v848_v27 = vld [vmem:[%s8161_s25 + $0x2088] sm:$0xf]  ;;  %v850_v28 = vld [vmem:[%s8161_s25 + $0x20a0] sm:$0xf] }
  0xf9   : > { %v852_v29 = vld [vmem:[%s8161_s25 + $0x20b8] sm:$0xf]  ;;  %849 = vst [vmem:[%s8165_s26 + $0x56c] sm:$0xf] %v848_v27  ;;  %851 = vst [vmem:[%s8165_s26 + $0x570] sm:$0xf] %v850_v28 }
  0xfa   : > { %853 = vst [vmem:[%s8165_s26 + $0x574] sm:$0xf] %v852_v29  ;;  %v854_v30 = vld [vmem:[%s8161_s25 + $0x20d0] sm:$0xf]  ;;  %v856_v31 = vld [vmem:[%s8161_s25 + $0x20e8] sm:$0xf] }
  0xfb   : > { %v858_v32 = vld [vmem:[%s8161_s25 + $0x2100] sm:$0xf]  ;;  %855 = vst [vmem:[%s8165_s26 + $0x578] sm:$0xf] %v854_v30  ;;  %857 = vst [vmem:[%s8165_s26 + $0x57c] sm:$0xf] %v856_v31 }
  0xfc   : > { %859 = vst [vmem:[%s8165_s26 + $0x580] sm:$0xf] %v858_v32  ;;  %v860_v33 = vld [vmem:[%s8161_s25 + $0x2118] sm:$0xf]  ;;  %v862_v34 = vld [vmem:[%s8161_s25 + $0x2130] sm:$0xf] }
  0xfd   : > { %v864_v35 = vld [vmem:[%s8161_s25 + $0x2148] sm:$0xf]  ;;  %861 = vst [vmem:[%s8165_s26 + $0x584] sm:$0xf] %v860_v33  ;;  %863 = vst [vmem:[%s8165_s26 + $0x588] sm:$0xf] %v862_v34 }
  0xfe   : > { %865 = vst [vmem:[%s8165_s26 + $0x58c] sm:$0xf] %v864_v35  ;;  %v866_v36 = vld [vmem:[%s8161_s25 + $0x2160] sm:$0xf]  ;;  %v868_v37 = vld [vmem:[%s8161_s25 + $0x2178] sm:$0xf] }
  0xff   : > { %v870_v38 = vld [vmem:[%s8161_s25 + $0x2190] sm:$0xf]  ;;  %867 = vst [vmem:[%s8165_s26 + $0x590] sm:$0xf] %v866_v36  ;;  %869 = vst [vmem:[%s8165_s26 + $0x594] sm:$0xf] %v868_v37 }
 0x100   : > { %871 = vst [vmem:[%s8165_s26 + $0x598] sm:$0xf] %v870_v38  ;;  %v872_v39 = vld [vmem:[%s8161_s25 + $0x21a8] sm:$0xf]  ;;  %v874_v40 = vld [vmem:[%s8161_s25 + $0x21c0] sm:$0xf] }
 0x101   : > { %v876_v41 = vld [vmem:[%s8161_s25 + $0x21d8] sm:$0xf]  ;;  %873 = vst [vmem:[%s8165_s26 + $0x59c] sm:$0xf] %v872_v39  ;;  %875 = vst [vmem:[%s8165_s26 + $0x5a0] sm:$0xf] %v874_v40 }
 0x102   : > { %877 = vst [vmem:[%s8165_s26 + $0x5a4] sm:$0xf] %v876_v41  ;;  %v878_v42 = vld [vmem:[%s8161_s25 + $0x21f0] sm:$0xf]  ;;  %v880_v43 = vld [vmem:[%s8161_s25 + $0x2208] sm:$0xf] }
 0x103   : > { %v882_v44 = vld [vmem:[%s8161_s25 + $0x2220] sm:$0xf]  ;;  %879 = vst [vmem:[%s8165_s26 + $0x5a8] sm:$0xf] %v878_v42  ;;  %881 = vst [vmem:[%s8165_s26 + $0x5ac] sm:$0xf] %v880_v43 }
 0x104   : > { %883 = vst [vmem:[%s8165_s26 + $0x5b0] sm:$0xf] %v882_v44  ;;  %v884_v45 = vld [vmem:[%s8161_s25 + $0x2238] sm:$0xf]  ;;  %v886_v46 = vld [vmem:[%s8161_s25 + $0x2250] sm:$0xf] }
 0x105   : > { %v888_v47 = vld [vmem:[%s8161_s25 + $0x2268] sm:$0xf]  ;;  %885 = vst [vmem:[%s8165_s26 + $0x5b4] sm:$0xf] %v884_v45  ;;  %887 = vst [vmem:[%s8165_s26 + $0x5b8] sm:$0xf] %v886_v46 }
 0x106   : > { %889 = vst [vmem:[%s8165_s26 + $0x5bc] sm:$0xf] %v888_v47  ;;  %v890_v48 = vld [vmem:[%s8161_s25 + $0x2280] sm:$0xf]  ;;  %v892_v49 = vld [vmem:[%s8161_s25 + $0x2298] sm:$0xf] }
 0x107   : > { %v894_v50 = vld [vmem:[%s8161_s25 + $0x22b0] sm:$0xf]  ;;  %891 = vst [vmem:[%s8165_s26 + $0x5c0] sm:$0xf] %v890_v48  ;;  %893 = vst [vmem:[%s8165_s26 + $0x5c4] sm:$0xf] %v892_v49 }
 0x108   : > { %895 = vst [vmem:[%s8165_s26 + $0x5c8] sm:$0xf] %v894_v50  ;;  %v896_v51 = vld [vmem:[%s8161_s25 + $0x22c8] sm:$0xf]  ;;  %v898_v52 = vld [vmem:[%s8161_s25 + $0x22e0] sm:$0xf] }
 0x109   : > { %v900_v53 = vld [vmem:[%s8161_s25 + $0x22f8] sm:$0xf]  ;;  %897 = vst [vmem:[%s8165_s26 + $0x5cc] sm:$0xf] %v896_v51  ;;  %899 = vst [vmem:[%s8165_s26 + $0x5d0] sm:$0xf] %v898_v52 }
 0x10a   : > { %901 = vst [vmem:[%s8165_s26 + $0x5d4] sm:$0xf] %v900_v53  ;;  %v902_v54 = vld [vmem:[%s8161_s25 + $0x2310] sm:$0xf]  ;;  %v904_v55 = vld [vmem:[%s8161_s25 + $0x2328] sm:$0xf] }
 0x10b   : > { %v906_v56 = vld [vmem:[%s8161_s25 + $0x2340] sm:$0xf]  ;;  %903 = vst [vmem:[%s8165_s26 + $0x5d8] sm:$0xf] %v902_v54  ;;  %905 = vst [vmem:[%s8165_s26 + $0x5dc] sm:$0xf] %v904_v55 }
 0x10c   : > { %907 = vst [vmem:[%s8165_s26 + $0x5e0] sm:$0xf] %v906_v56  ;;  %v908_v57 = vld [vmem:[%s8161_s25 + $0x2358] sm:$0xf]  ;;  %v910_v58 = vld [vmem:[%s8161_s25 + $0x2370] sm:$0xf] }
 0x10d   : > { %v912_v59 = vld [vmem:[%s8161_s25 + $0x2388] sm:$0xf]  ;;  %909 = vst [vmem:[%s8165_s26 + $0x5e4] sm:$0xf] %v908_v57  ;;  %911 = vst [vmem:[%s8165_s26 + $0x5e8] sm:$0xf] %v910_v58 }
 0x10e   : > { %913 = vst [vmem:[%s8165_s26 + $0x5ec] sm:$0xf] %v912_v59  ;;  %v914_v60 = vld [vmem:[%s8161_s25 + $0x23a0] sm:$0xf]  ;;  %v916_v61 = vld [vmem:[%s8161_s25 + $0x23b8] sm:$0xf] }
 0x10f   : > { %v918_v62 = vld [vmem:[%s8161_s25 + $0x23d0] sm:$0xf]  ;;  %915 = vst [vmem:[%s8165_s26 + $0x5f0] sm:$0xf] %v914_v60  ;;  %917 = vst [vmem:[%s8165_s26 + $0x5f4] sm:$0xf] %v916_v61 }
 0x110   : > { %919 = vst [vmem:[%s8165_s26 + $0x5f8] sm:$0xf] %v918_v62  ;;  %v920_v63 = vld [vmem:[%s8161_s25 + $0x23e8] sm:$0xf]  ;;  %v922_v0 = vld [vmem:[%s8161_s25 + $0x2400] sm:$0xf] }
 0x111   : > { %v924_v1 = vld [vmem:[%s8161_s25 + $0x2418] sm:$0xf]  ;;  %921 = vst [vmem:[%s8165_s26 + $0x5fc] sm:$0xf] %v920_v63  ;;  %923 = vst [vmem:[%s8165_s26 + $0x600] sm:$0xf] %v922_v0 }
 0x112   : > { %925 = vst [vmem:[%s8165_s26 + $0x604] sm:$0xf] %v924_v1  ;;  %v926_v2 = vld [vmem:[%s8161_s25 + $0x2430] sm:$0xf]  ;;  %v928_v3 = vld [vmem:[%s8161_s25 + $0x2448] sm:$0xf] }
 0x113   : > { %v930_v4 = vld [vmem:[%s8161_s25 + $0x2460] sm:$0xf]  ;;  %927 = vst [vmem:[%s8165_s26 + $0x608] sm:$0xf] %v926_v2  ;;  %929 = vst [vmem:[%s8165_s26 + $0x60c] sm:$0xf] %v928_v3 }
 0x114   : > { %931 = vst [vmem:[%s8165_s26 + $0x610] sm:$0xf] %v930_v4  ;;  %v932_v5 = vld [vmem:[%s8161_s25 + $0x2478] sm:$0xf]  ;;  %v934_v6 = vld [vmem:[%s8161_s25 + $0x2490] sm:$0xf] }
 0x115   : > { %v936_v7 = vld [vmem:[%s8161_s25 + $0x24a8] sm:$0xf]  ;;  %933 = vst [vmem:[%s8165_s26 + $0x614] sm:$0xf] %v932_v5  ;;  %935 = vst [vmem:[%s8165_s26 + $0x618] sm:$0xf] %v934_v6 }
 0x116   : > { %937 = vst [vmem:[%s8165_s26 + $0x61c] sm:$0xf] %v936_v7  ;;  %v938_v8 = vld [vmem:[%s8161_s25 + $0x24c0] sm:$0xf]  ;;  %v940_v9 = vld [vmem:[%s8161_s25 + $0x24d8] sm:$0xf] }
 0x117   : > { %v942_v10 = vld [vmem:[%s8161_s25 + $0x24f0] sm:$0xf]  ;;  %939 = vst [vmem:[%s8165_s26 + $0x620] sm:$0xf] %v938_v8  ;;  %941 = vst [vmem:[%s8165_s26 + $0x624] sm:$0xf] %v940_v9 }
 0x118   : > { %943 = vst [vmem:[%s8165_s26 + $0x628] sm:$0xf] %v942_v10  ;;  %v944_v11 = vld [vmem:[%s8161_s25 + $0x2508] sm:$0xf]  ;;  %v946_v12 = vld [vmem:[%s8161_s25 + $0x2520] sm:$0xf] }
 0x119   : > { %v948_v13 = vld [vmem:[%s8161_s25 + $0x2538] sm:$0xf]  ;;  %945 = vst [vmem:[%s8165_s26 + $0x62c] sm:$0xf] %v944_v11  ;;  %947 = vst [vmem:[%s8165_s26 + $0x630] sm:$0xf] %v946_v12 }
 0x11a   : > { %949 = vst [vmem:[%s8165_s26 + $0x634] sm:$0xf] %v948_v13  ;;  %v950_v14 = vld [vmem:[%s8161_s25 + $0x2550] sm:$0xf]  ;;  %v952_v15 = vld [vmem:[%s8161_s25 + $0x2568] sm:$0xf] }
 0x11b   : > { %v954_v16 = vld [vmem:[%s8161_s25 + $0x2580] sm:$0xf]  ;;  %951 = vst [vmem:[%s8165_s26 + $0x638] sm:$0xf] %v950_v14  ;;  %953 = vst [vmem:[%s8165_s26 + $0x63c] sm:$0xf] %v952_v15 }
 0x11c   : > { %955 = vst [vmem:[%s8165_s26 + $0x640] sm:$0xf] %v954_v16  ;;  %v956_v17 = vld [vmem:[%s8161_s25 + $0x2598] sm:$0xf]  ;;  %v958_v18 = vld [vmem:[%s8161_s25 + $0x25b0] sm:$0xf] }
 0x11d   : > { %v960_v19 = vld [vmem:[%s8161_s25 + $0x25c8] sm:$0xf]  ;;  %957 = vst [vmem:[%s8165_s26 + $0x644] sm:$0xf] %v956_v17  ;;  %959 = vst [vmem:[%s8165_s26 + $0x648] sm:$0xf] %v958_v18 }
 0x11e   : > { %961 = vst [vmem:[%s8165_s26 + $0x64c] sm:$0xf] %v960_v19  ;;  %v962_v20 = vld [vmem:[%s8161_s25 + $0x25e0] sm:$0xf]  ;;  %v964_v21 = vld [vmem:[%s8161_s25 + $0x25f8] sm:$0xf] }
 0x11f   : > { %v966_v22 = vld [vmem:[%s8161_s25 + $0x2610] sm:$0xf]  ;;  %963 = vst [vmem:[%s8165_s26 + $0x650] sm:$0xf] %v962_v20  ;;  %965 = vst [vmem:[%s8165_s26 + $0x654] sm:$0xf] %v964_v21 }
 0x120   : > { %967 = vst [vmem:[%s8165_s26 + $0x658] sm:$0xf] %v966_v22  ;;  %v968_v23 = vld [vmem:[%s8161_s25 + $0x2628] sm:$0xf]  ;;  %v970_v24 = vld [vmem:[%s8161_s25 + $0x2640] sm:$0xf] }
 0x121   : > { %v972_v25 = vld [vmem:[%s8161_s25 + $0x2658] sm:$0xf]  ;;  %969 = vst [vmem:[%s8165_s26 + $0x65c] sm:$0xf] %v968_v23  ;;  %971 = vst [vmem:[%s8165_s26 + $0x660] sm:$0xf] %v970_v24 }
 0x122   : > { %973 = vst [vmem:[%s8165_s26 + $0x664] sm:$0xf] %v972_v25  ;;  %v974_v26 = vld [vmem:[%s8161_s25 + $0x2670] sm:$0xf]  ;;  %v976_v27 = vld [vmem:[%s8161_s25 + $0x2688] sm:$0xf] }
 0x123   : > { %v978_v28 = vld [vmem:[%s8161_s25 + $0x26a0] sm:$0xf]  ;;  %975 = vst [vmem:[%s8165_s26 + $0x668] sm:$0xf] %v974_v26  ;;  %977 = vst [vmem:[%s8165_s26 + $0x66c] sm:$0xf] %v976_v27 }
 0x124   : > { %979 = vst [vmem:[%s8165_s26 + $0x670] sm:$0xf] %v978_v28  ;;  %v980_v29 = vld [vmem:[%s8161_s25 + $0x26b8] sm:$0xf]  ;;  %v982_v30 = vld [vmem:[%s8161_s25 + $0x26d0] sm:$0xf] }
 0x125   : > { %v984_v31 = vld [vmem:[%s8161_s25 + $0x26e8] sm:$0xf]  ;;  %981 = vst [vmem:[%s8165_s26 + $0x674] sm:$0xf] %v980_v29  ;;  %983 = vst [vmem:[%s8165_s26 + $0x678] sm:$0xf] %v982_v30 }
 0x126   : > { %985 = vst [vmem:[%s8165_s26 + $0x67c] sm:$0xf] %v984_v31  ;;  %v986_v32 = vld [vmem:[%s8161_s25 + $0x2700] sm:$0xf]  ;;  %v988_v33 = vld [vmem:[%s8161_s25 + $0x2718] sm:$0xf] }
 0x127   : > { %v990_v34 = vld [vmem:[%s8161_s25 + $0x2730] sm:$0xf]  ;;  %987 = vst [vmem:[%s8165_s26 + $0x680] sm:$0xf] %v986_v32  ;;  %989 = vst [vmem:[%s8165_s26 + $0x684] sm:$0xf] %v988_v33 }
 0x128   : > { %991 = vst [vmem:[%s8165_s26 + $0x688] sm:$0xf] %v990_v34  ;;  %v992_v35 = vld [vmem:[%s8161_s25 + $0x2748] sm:$0xf]  ;;  %v994_v36 = vld [vmem:[%s8161_s25 + $0x2760] sm:$0xf] }
 0x129   : > { %v996_v37 = vld [vmem:[%s8161_s25 + $0x2778] sm:$0xf]  ;;  %993 = vst [vmem:[%s8165_s26 + $0x68c] sm:$0xf] %v992_v35  ;;  %995 = vst [vmem:[%s8165_s26 + $0x690] sm:$0xf] %v994_v36 }
 0x12a   : > { %997 = vst [vmem:[%s8165_s26 + $0x694] sm:$0xf] %v996_v37  ;;  %v998_v38 = vld [vmem:[%s8161_s25 + $0x2790] sm:$0xf]  ;;  %v1000_v39 = vld [vmem:[%s8161_s25 + $0x27a8] sm:$0xf] }
 0x12b   : > { %v1002_v40 = vld [vmem:[%s8161_s25 + $0x27c0] sm:$0xf]  ;;  %999 = vst [vmem:[%s8165_s26 + $0x698] sm:$0xf] %v998_v38  ;;  %1001 = vst [vmem:[%s8165_s26 + $0x69c] sm:$0xf] %v1000_v39 }
 0x12c   : > { %1003 = vst [vmem:[%s8165_s26 + $0x6a0] sm:$0xf] %v1002_v40  ;;  %v1004_v41 = vld [vmem:[%s8161_s25 + $0x27d8] sm:$0xf]  ;;  %v1006_v42 = vld [vmem:[%s8161_s25 + $0x27f0] sm:$0xf] }
 0x12d   : > { %v1008_v43 = vld [vmem:[%s8161_s25 + $0x2808] sm:$0xf]  ;;  %1005 = vst [vmem:[%s8165_s26 + $0x6a4] sm:$0xf] %v1004_v41  ;;  %1007 = vst [vmem:[%s8165_s26 + $0x6a8] sm:$0xf] %v1006_v42 }
 0x12e   : > { %1009 = vst [vmem:[%s8165_s26 + $0x6ac] sm:$0xf] %v1008_v43  ;;  %v1010_v44 = vld [vmem:[%s8161_s25 + $0x2820] sm:$0xf]  ;;  %v1012_v45 = vld [vmem:[%s8161_s25 + $0x2838] sm:$0xf] }
 0x12f   : > { %v1014_v46 = vld [vmem:[%s8161_s25 + $0x2850] sm:$0xf]  ;;  %1011 = vst [vmem:[%s8165_s26 + $0x6b0] sm:$0xf] %v1010_v44  ;;  %1013 = vst [vmem:[%s8165_s26 + $0x6b4] sm:$0xf] %v1012_v45 }
 0x130   : > { %1015 = vst [vmem:[%s8165_s26 + $0x6b8] sm:$0xf] %v1014_v46  ;;  %v1016_v47 = vld [vmem:[%s8161_s25 + $0x2868] sm:$0xf]  ;;  %v1018_v48 = vld [vmem:[%s8161_s25 + $0x2880] sm:$0xf] }
 0x131   : > { %v1020_v49 = vld [vmem:[%s8161_s25 + $0x2898] sm:$0xf]  ;;  %1017 = vst [vmem:[%s8165_s26 + $0x6bc] sm:$0xf] %v1016_v47  ;;  %1019 = vst [vmem:[%s8165_s26 + $0x6c0] sm:$0xf] %v1018_v48 }
 0x132   : > { %1021 = vst [vmem:[%s8165_s26 + $0x6c4] sm:$0xf] %v1020_v49  ;;  %v1022_v50 = vld [vmem:[%s8161_s25 + $0x28b0] sm:$0xf]  ;;  %v1024_v51 = vld [vmem:[%s8161_s25 + $0x28c8] sm:$0xf] }
 0x133   : > { %v1026_v52 = vld [vmem:[%s8161_s25 + $0x28e0] sm:$0xf]  ;;  %1023 = vst [vmem:[%s8165_s26 + $0x6c8] sm:$0xf] %v1022_v50  ;;  %1025 = vst [vmem:[%s8165_s26 + $0x6cc] sm:$0xf] %v1024_v51 }
 0x134   : > { %1027 = vst [vmem:[%s8165_s26 + $0x6d0] sm:$0xf] %v1026_v52  ;;  %v1028_v53 = vld [vmem:[%s8161_s25 + $0x28f8] sm:$0xf]  ;;  %v1030_v54 = vld [vmem:[%s8161_s25 + $0x2910] sm:$0xf] }
 0x135   : > { %v1032_v55 = vld [vmem:[%s8161_s25 + $0x2928] sm:$0xf]  ;;  %1029 = vst [vmem:[%s8165_s26 + $0x6d4] sm:$0xf] %v1028_v53  ;;  %1031 = vst [vmem:[%s8165_s26 + $0x6d8] sm:$0xf] %v1030_v54 }
 0x136   : > { %1033 = vst [vmem:[%s8165_s26 + $0x6dc] sm:$0xf] %v1032_v55  ;;  %v1034_v56 = vld [vmem:[%s8161_s25 + $0x2940] sm:$0xf]  ;;  %v1036_v57 = vld [vmem:[%s8161_s25 + $0x2958] sm:$0xf] }
 0x137   : > { %v1038_v58 = vld [vmem:[%s8161_s25 + $0x2970] sm:$0xf]  ;;  %1035 = vst [vmem:[%s8165_s26 + $0x6e0] sm:$0xf] %v1034_v56  ;;  %1037 = vst [vmem:[%s8165_s26 + $0x6e4] sm:$0xf] %v1036_v57 }
 0x138   : > { %1039 = vst [vmem:[%s8165_s26 + $0x6e8] sm:$0xf] %v1038_v58  ;;  %v1040_v59 = vld [vmem:[%s8161_s25 + $0x2988] sm:$0xf]  ;;  %v1042_v60 = vld [vmem:[%s8161_s25 + $0x29a0] sm:$0xf] }
 0x139   : > { %v1044_v61 = vld [vmem:[%s8161_s25 + $0x29b8] sm:$0xf]  ;;  %1041 = vst [vmem:[%s8165_s26 + $0x6ec] sm:$0xf] %v1040_v59  ;;  %1043 = vst [vmem:[%s8165_s26 + $0x6f0] sm:$0xf] %v1042_v60 }
 0x13a   : > { %1045 = vst [vmem:[%s8165_s26 + $0x6f4] sm:$0xf] %v1044_v61  ;;  %v1046_v62 = vld [vmem:[%s8161_s25 + $0x29d0] sm:$0xf]  ;;  %v1048_v63 = vld [vmem:[%s8161_s25 + $0x29e8] sm:$0xf] }
 0x13b   : > { %v1050_v0 = vld [vmem:[%s8161_s25 + $0x2a00] sm:$0xf]  ;;  %1047 = vst [vmem:[%s8165_s26 + $0x6f8] sm:$0xf] %v1046_v62  ;;  %1049 = vst [vmem:[%s8165_s26 + $0x6fc] sm:$0xf] %v1048_v63 }
 0x13c   : > { %1051 = vst [vmem:[%s8165_s26 + $0x700] sm:$0xf] %v1050_v0  ;;  %v1052_v1 = vld [vmem:[%s8161_s25 + $0x2a18] sm:$0xf]  ;;  %v1054_v2 = vld [vmem:[%s8161_s25 + $0x2a30] sm:$0xf] }
 0x13d   : > { %v1056_v3 = vld [vmem:[%s8161_s25 + $0x2a48] sm:$0xf]  ;;  %1053 = vst [vmem:[%s8165_s26 + $0x704] sm:$0xf] %v1052_v1  ;;  %1055 = vst [vmem:[%s8165_s26 + $0x708] sm:$0xf] %v1054_v2 }
 0x13e   : > { %1057 = vst [vmem:[%s8165_s26 + $0x70c] sm:$0xf] %v1056_v3  ;;  %v1058_v4 = vld [vmem:[%s8161_s25 + $0x2a60] sm:$0xf]  ;;  %v1060_v5 = vld [vmem:[%s8161_s25 + $0x2a78] sm:$0xf] }
 0x13f   : > { %v1062_v6 = vld [vmem:[%s8161_s25 + $0x2a90] sm:$0xf]  ;;  %1059 = vst [vmem:[%s8165_s26 + $0x710] sm:$0xf] %v1058_v4  ;;  %1061 = vst [vmem:[%s8165_s26 + $0x714] sm:$0xf] %v1060_v5 }
 0x140   : > { %1063 = vst [vmem:[%s8165_s26 + $0x718] sm:$0xf] %v1062_v6  ;;  %v1064_v7 = vld [vmem:[%s8161_s25 + $0x2aa8] sm:$0xf]  ;;  %v1066_v8 = vld [vmem:[%s8161_s25 + $0x2ac0] sm:$0xf] }
 0x141   : > { %v1068_v9 = vld [vmem:[%s8161_s25 + $0x2ad8] sm:$0xf]  ;;  %1065 = vst [vmem:[%s8165_s26 + $0x71c] sm:$0xf] %v1064_v7  ;;  %1067 = vst [vmem:[%s8165_s26 + $0x720] sm:$0xf] %v1066_v8 }
 0x142   : > { %1069 = vst [vmem:[%s8165_s26 + $0x724] sm:$0xf] %v1068_v9  ;;  %v1070_v10 = vld [vmem:[%s8161_s25 + $0x2af0] sm:$0xf]  ;;  %v1072_v11 = vld [vmem:[%s8161_s25 + $0x2b08] sm:$0xf] }
 0x143   : > { %v1074_v12 = vld [vmem:[%s8161_s25 + $0x2b20] sm:$0xf]  ;;  %1071 = vst [vmem:[%s8165_s26 + $0x728] sm:$0xf] %v1070_v10  ;;  %1073 = vst [vmem:[%s8165_s26 + $0x72c] sm:$0xf] %v1072_v11 }
 0x144   : > { %1075 = vst [vmem:[%s8165_s26 + $0x730] sm:$0xf] %v1074_v12  ;;  %v1076_v13 = vld [vmem:[%s8161_s25 + $0x2b38] sm:$0xf]  ;;  %v1078_v14 = vld [vmem:[%s8161_s25 + $0x2b50] sm:$0xf] }
 0x145   : > { %v1080_v15 = vld [vmem:[%s8161_s25 + $0x2b68] sm:$0xf]  ;;  %1077 = vst [vmem:[%s8165_s26 + $0x734] sm:$0xf] %v1076_v13  ;;  %1079 = vst [vmem:[%s8165_s26 + $0x738] sm:$0xf] %v1078_v14 }
 0x146   : > { %1081 = vst [vmem:[%s8165_s26 + $0x73c] sm:$0xf] %v1080_v15  ;;  %v1082_v16 = vld [vmem:[%s8161_s25 + $0x2b80] sm:$0xf]  ;;  %v1084_v17 = vld [vmem:[%s8161_s25 + $0x2b98] sm:$0xf] }
 0x147   : > { %v1086_v18 = vld [vmem:[%s8161_s25 + $0x2bb0] sm:$0xf]  ;;  %1083 = vst [vmem:[%s8165_s26 + $0x740] sm:$0xf] %v1082_v16  ;;  %1085 = vst [vmem:[%s8165_s26 + $0x744] sm:$0xf] %v1084_v17 }
 0x148   : > { %1087 = vst [vmem:[%s8165_s26 + $0x748] sm:$0xf] %v1086_v18  ;;  %v1088_v19 = vld [vmem:[%s8161_s25 + $0x2bc8] sm:$0xf]  ;;  %v1090_v20 = vld [vmem:[%s8161_s25 + $0x2be0] sm:$0xf] }
 0x149   : > { %v1092_v21 = vld [vmem:[%s8161_s25 + $0x2bf8] sm:$0xf]  ;;  %1089 = vst [vmem:[%s8165_s26 + $0x74c] sm:$0xf] %v1088_v19  ;;  %1091 = vst [vmem:[%s8165_s26 + $0x750] sm:$0xf] %v1090_v20 }
 0x14a   : > { %1093 = vst [vmem:[%s8165_s26 + $0x754] sm:$0xf] %v1092_v21  ;;  %v1094_v22 = vld [vmem:[%s8161_s25 + $0x2c10] sm:$0xf]  ;;  %v1096_v23 = vld [vmem:[%s8161_s25 + $0x2c28] sm:$0xf] }
 0x14b   : > { %v1098_v24 = vld [vmem:[%s8161_s25 + $0x2c40] sm:$0xf]  ;;  %1095 = vst [vmem:[%s8165_s26 + $0x758] sm:$0xf] %v1094_v22  ;;  %1097 = vst [vmem:[%s8165_s26 + $0x75c] sm:$0xf] %v1096_v23 }
 0x14c   : > { %1099 = vst [vmem:[%s8165_s26 + $0x760] sm:$0xf] %v1098_v24  ;;  %v1100_v25 = vld [vmem:[%s8161_s25 + $0x2c58] sm:$0xf]  ;;  %v1102_v26 = vld [vmem:[%s8161_s25 + $0x2c70] sm:$0xf] }
 0x14d   : > { %v1104_v27 = vld [vmem:[%s8161_s25 + $0x2c88] sm:$0xf]  ;;  %1101 = vst [vmem:[%s8165_s26 + $0x764] sm:$0xf] %v1100_v25  ;;  %1103 = vst [vmem:[%s8165_s26 + $0x768] sm:$0xf] %v1102_v26 }
 0x14e   : > { %1105 = vst [vmem:[%s8165_s26 + $0x76c] sm:$0xf] %v1104_v27  ;;  %v1106_v28 = vld [vmem:[%s8161_s25 + $0x2ca0] sm:$0xf]  ;;  %v1108_v29 = vld [vmem:[%s8161_s25 + $0x2cb8] sm:$0xf] }
 0x14f   : > { %v1110_v30 = vld [vmem:[%s8161_s25 + $0x2cd0] sm:$0xf]  ;;  %1107 = vst [vmem:[%s8165_s26 + $0x770] sm:$0xf] %v1106_v28  ;;  %1109 = vst [vmem:[%s8165_s26 + $0x774] sm:$0xf] %v1108_v29 }
 0x150   : > { %1111 = vst [vmem:[%s8165_s26 + $0x778] sm:$0xf] %v1110_v30  ;;  %v1112_v31 = vld [vmem:[%s8161_s25 + $0x2ce8] sm:$0xf]  ;;  %v1114_v32 = vld [vmem:[%s8161_s25 + $0x2d00] sm:$0xf] }
 0x151   : > { %v1116_v33 = vld [vmem:[%s8161_s25 + $0x2d18] sm:$0xf]  ;;  %1113 = vst [vmem:[%s8165_s26 + $0x77c] sm:$0xf] %v1112_v31  ;;  %1115 = vst [vmem:[%s8165_s26 + $0x780] sm:$0xf] %v1114_v32 }
 0x152   : > { %1117 = vst [vmem:[%s8165_s26 + $0x784] sm:$0xf] %v1116_v33  ;;  %v1118_v34 = vld [vmem:[%s8161_s25 + $0x2d30] sm:$0xf]  ;;  %v1120_v35 = vld [vmem:[%s8161_s25 + $0x2d48] sm:$0xf] }
 0x153   : > { %v1122_v36 = vld [vmem:[%s8161_s25 + $0x2d60] sm:$0xf]  ;;  %1119 = vst [vmem:[%s8165_s26 + $0x788] sm:$0xf] %v1118_v34  ;;  %1121 = vst [vmem:[%s8165_s26 + $0x78c] sm:$0xf] %v1120_v35 }
 0x154   : > { %1123 = vst [vmem:[%s8165_s26 + $0x790] sm:$0xf] %v1122_v36  ;;  %v1124_v37 = vld [vmem:[%s8161_s25 + $0x2d78] sm:$0xf]  ;;  %v1126_v38 = vld [vmem:[%s8161_s25 + $0x2d90] sm:$0xf] }
 0x155   : > { %v1128_v39 = vld [vmem:[%s8161_s25 + $0x2da8] sm:$0xf]  ;;  %1125 = vst [vmem:[%s8165_s26 + $0x794] sm:$0xf] %v1124_v37  ;;  %1127 = vst [vmem:[%s8165_s26 + $0x798] sm:$0xf] %v1126_v38 }
 0x156   : > { %1129 = vst [vmem:[%s8165_s26 + $0x79c] sm:$0xf] %v1128_v39  ;;  %v1130_v40 = vld [vmem:[%s8161_s25 + $0x2dc0] sm:$0xf]  ;;  %v1132_v41 = vld [vmem:[%s8161_s25 + $0x2dd8] sm:$0xf] }
 0x157   : > { %v1134_v42 = vld [vmem:[%s8161_s25 + $0x2df0] sm:$0xf]  ;;  %1131 = vst [vmem:[%s8165_s26 + $0x7a0] sm:$0xf] %v1130_v40  ;;  %1133 = vst [vmem:[%s8165_s26 + $0x7a4] sm:$0xf] %v1132_v41 }
 0x158   : > { %1135 = vst [vmem:[%s8165_s26 + $0x7a8] sm:$0xf] %v1134_v42  ;;  %v1136_v43 = vld [vmem:[%s8161_s25 + $0x2e08] sm:$0xf]  ;;  %v1138_v44 = vld [vmem:[%s8161_s25 + $0x2e20] sm:$0xf] }
 0x159   : > { %v1140_v45 = vld [vmem:[%s8161_s25 + $0x2e38] sm:$0xf]  ;;  %1137 = vst [vmem:[%s8165_s26 + $0x7ac] sm:$0xf] %v1136_v43  ;;  %1139 = vst [vmem:[%s8165_s26 + $0x7b0] sm:$0xf] %v1138_v44 }
 0x15a   : > { %1141 = vst [vmem:[%s8165_s26 + $0x7b4] sm:$0xf] %v1140_v45  ;;  %v1142_v46 = vld [vmem:[%s8161_s25 + $0x2e50] sm:$0xf]  ;;  %v1144_v47 = vld [vmem:[%s8161_s25 + $0x2e68] sm:$0xf] }
 0x15b   : > { %v1146_v48 = vld [vmem:[%s8161_s25 + $0x2e80] sm:$0xf]  ;;  %1143 = vst [vmem:[%s8165_s26 + $0x7b8] sm:$0xf] %v1142_v46  ;;  %1145 = vst [vmem:[%s8165_s26 + $0x7bc] sm:$0xf] %v1144_v47 }
 0x15c   : > { %1147 = vst [vmem:[%s8165_s26 + $0x7c0] sm:$0xf] %v1146_v48  ;;  %v1148_v49 = vld [vmem:[%s8161_s25 + $0x2e98] sm:$0xf]  ;;  %v1150_v50 = vld [vmem:[%s8161_s25 + $0x2eb0] sm:$0xf] }
 0x15d   : > { %v1152_v51 = vld [vmem:[%s8161_s25 + $0x2ec8] sm:$0xf]  ;;  %1149 = vst [vmem:[%s8165_s26 + $0x7c4] sm:$0xf] %v1148_v49  ;;  %1151 = vst [vmem:[%s8165_s26 + $0x7c8] sm:$0xf] %v1150_v50 }
 0x15e   : > { %1153 = vst [vmem:[%s8165_s26 + $0x7cc] sm:$0xf] %v1152_v51  ;;  %v1154_v52 = vld [vmem:[%s8161_s25 + $0x2ee0] sm:$0xf]  ;;  %v1156_v53 = vld [vmem:[%s8161_s25 + $0x2ef8] sm:$0xf] }
 0x15f   : > { %v1158_v54 = vld [vmem:[%s8161_s25 + $0x2f10] sm:$0xf]  ;;  %1155 = vst [vmem:[%s8165_s26 + $0x7d0] sm:$0xf] %v1154_v52  ;;  %1157 = vst [vmem:[%s8165_s26 + $0x7d4] sm:$0xf] %v1156_v53 }
 0x160   : > { %1159 = vst [vmem:[%s8165_s26 + $0x7d8] sm:$0xf] %v1158_v54  ;;  %v1160_v55 = vld [vmem:[%s8161_s25 + $0x2f28] sm:$0xf]  ;;  %v1162_v56 = vld [vmem:[%s8161_s25 + $0x2f40] sm:$0xf] }
 0x161   : > { %v1164_v57 = vld [vmem:[%s8161_s25 + $0x2f58] sm:$0xf]  ;;  %1161 = vst [vmem:[%s8165_s26 + $0x7dc] sm:$0xf] %v1160_v55  ;;  %1163 = vst [vmem:[%s8165_s26 + $0x7e0] sm:$0xf] %v1162_v56 }
 0x162   : > { %1165 = vst [vmem:[%s8165_s26 + $0x7e4] sm:$0xf] %v1164_v57  ;;  %v1166_v58 = vld [vmem:[%s8161_s25 + $0x2f70] sm:$0xf]  ;;  %v1168_v59 = vld [vmem:[%s8161_s25 + $0x2f88] sm:$0xf] }
 0x163   : > { %v1170_v60 = vld [vmem:[%s8161_s25 + $0x2fa0] sm:$0xf]  ;;  %1167 = vst [vmem:[%s8165_s26 + $0x7e8] sm:$0xf] %v1166_v58  ;;  %1169 = vst [vmem:[%s8165_s26 + $0x7ec] sm:$0xf] %v1168_v59 }
 0x164   : > { %1171 = vst [vmem:[%s8165_s26 + $0x7f0] sm:$0xf] %v1170_v60  ;;  %v1172_v61 = vld [vmem:[%s8161_s25 + $0x2fb8] sm:$0xf]  ;;  %v1174_v62 = vld [vmem:[%s8161_s25 + $0x2fd0] sm:$0xf] }
 0x165   : > { %v1176_v63 = vld [vmem:[%s8161_s25 + $0x2fe8] sm:$0xf]  ;;  %1173 = vst [vmem:[%s8165_s26 + $0x7f4] sm:$0xf] %v1172_v61  ;;  %1175 = vst [vmem:[%s8165_s26 + $0x7f8] sm:$0xf] %v1174_v62 }
 0x166   : > { %1177 = vst [vmem:[%s8165_s26 + $0x7fc] sm:$0xf] %v1176_v63 }
 0x167 PF: > { %p7189_p5 = scmp.ge.s32.totalorder %s8105_s14, 1  ;;  %p4307_p6 = scmp.lt.s32.totalorder %s8105_s14, 7 }
 0x169   : > { %p4308_p7 = pnand %p7189_p5, %p4307_p6 }
 0x16a   : > { %s4314_s27 = sand.u32 (!%p4308_p7), 1, %s8097_s12   ;;  %v4348_v0 = vld [vmem:[%s9570_s0 + $0x8] sm:$0xff] (!%p4308_p7)  ;;  %v4350_v1 = vld [vmem:[%s9570_s0 + $0x18] sm:$0xff] (!%p4308_p7)  ;;  %v4347_v31 = vld [vmem:[%s9570_s0] sm:$0xff] (!%p4308_p7)  ;;  %p4339_p8 = scmp.lt.s32.totalorder (!%p4308_p7), %s7183_s15, 5 }
 0x16b   : > { %4311 = sbr.rel (%p4308_p7) target bundleno = 843 (0x34b), region = 80  ;;  %s7190_s5 = sshll.u32 (!%p4308_p7), %s4314_s27, 11  ;;  %v4380_v2 = vpack.c.bf16 (!%p4308_p7), %v4348_v0, %v4348_v0  ;;  %v4382_v3 = vpack.c.bf16 (!%p4308_p7), %v4350_v1, %v4350_v1  ;;  %v4349_v33 = vld [vmem:[%s9570_s0 + $0x10] sm:$0xff] (!%p4308_p7)  ;;  %v4352_v35 = vld [vmem:[%s9570_s0 + $0x28] sm:$0xff] (!%p4308_p7)  ;;  %v4354_v37 = vld [vmem:[%s9570_s0 + $0x38] sm:$0xff] (!%p4308_p7)  ;;  %v4379_v40 = vpack.c.bf16 (!%p4308_p7), %v4347_v31, %v4347_v31 }
 0x16c   : > { %s9198_s6 = scalar_lea.vmem (!%p4308_p7), [#allocation2], %s7190_s5  ;;  %v4381_v41 = vpack.c.bf16 (!%p4308_p7), %v4349_v33, %v4349_v33  ;;  %v4384_v44 = vpack.c.bf16 (!%p4308_p7), %v4352_v35, %v4352_v35  ;;  %v4386_v46 = vpack.c.bf16 (!%p4308_p7), %v4354_v37, %v4354_v37 }
 0x16d   : > { %v7827_v4 = vld [vmem:[%s9198_s6 + $0x40] sm:$0xff] (!%p4308_p7)   ;;  %6498 = vmatprep.mubr.bf16.mxu0 (!%p4308_p7), %v4380_v2  ;;  %6538 = vmatprep.mubr.bf16.mxu1 (!%p4308_p7), %v4382_v3  ;;  %v7831_v8 = vld [vmem:[%s9198_s6 + $0x48] sm:$0xff] (!%p4308_p7)   ;;  %v7835_v12 = vld [vmem:[%s9198_s6 + $0x50] sm:$0xff] (!%p4308_p7)  }
 0x16e   : > { %v7828_v5 = vld [vmem:[%s9198_s6 + $0xc0] sm:$0xff] (!%p4308_p7)   ;;  %7451 = vmatprep.subr.bf16.mxu0 (!%p4308_p7), %v7827_v4  ;;  %v7832_v9 = vld [vmem:[%s9198_s6 + $0xc8] sm:$0xff] (!%p4308_p7)   ;;  %v7836_v13 = vld [vmem:[%s9198_s6 + $0xd0] sm:$0xff] (!%p4308_p7)  }
 0x16f   : > { %v7829_v6 = vld [vmem:[%s9198_s6] sm:$0xff] (!%p4308_p7)   ;;  %7473 = vmatprep.subr.bf16.mxu1 (!%p4308_p7), %v7828_v5  ;;  %v7833_v10 = vld [vmem:[%s9198_s6 + $0x8] sm:$0xff] (!%p4308_p7)   ;;  %v7837_v14 = vld [vmem:[%s9198_s6 + $0x10] sm:$0xff] (!%p4308_p7)  }
 0x170   : > { %v7830_v7 = vld [vmem:[%s9198_s6 + $0x80] sm:$0xff] (!%p4308_p7)   ;;  %7452 = vmatpush3.bf16.msra.mxu0 (!%p4308_p7), %v7829_v6  ;;  %v7834_v11 = vld [vmem:[%s9198_s6 + $0x88] sm:$0xff] (!%p4308_p7)   ;;  %v7838_v15 = vld [vmem:[%s9198_s6 + $0x90] sm:$0xff] (!%p4308_p7)  }
 0x171   : > { %7474 = vmatpush3.bf16.msra.mxu1 (!%p4308_p7), %v7830_v7  ;;  %7453 = vmatprep.subr.bf16.mxu0 (!%p4308_p7), %v7831_v8  ;;  %v7839_v16 = vld [vmem:[%s9198_s6 + $0x58] sm:$0xff] (!%p4308_p7)   ;;  %v7843_v20 = vld [vmem:[%s9198_s6 + $0x60] sm:$0xff] (!%p4308_p7)   ;;  %v7847_v24 = vld [vmem:[%s9198_s6 + $0x68] sm:$0xff] (!%p4308_p7)  }
 0x172   : > { %7475 = vmatprep.subr.bf16.mxu1 %v7832_v9  ;;  %v7840_v17 = vld [vmem:[%s9198_s6 + $0xd8] sm:$0xff]   ;;  %v7844_v21 = vld [vmem:[%s9198_s6 + $0xe0] sm:$0xff]   ;;  %v7848_v25 = vld [vmem:[%s9198_s6 + $0xe8] sm:$0xff]   ;;  %s9578_s15 = smov (!%p4339_p8, %s7183_s15), 5 }
 0x173   : > { %v7841_v18 = vld [vmem:[%s9198_s6 + $0x18] sm:$0xff]   ;;  %v7845_v22 = vld [vmem:[%s9198_s6 + $0x20] sm:$0xff]   ;;  %v7849_v26 = vld [vmem:[%s9198_s6 + $0x28] sm:$0xff]   ;;  %s4341_s14 = scalar_lea.vmem %s9572_s2, %s9578_s15 }
 0x174   : > { %7454 = vmatpush3.bf16.msra.mxu0 %v7833_v10  ;;  %v7842_v19 = vld [vmem:[%s9198_s6 + $0x98] sm:$0xff]   ;;  %v7846_v23 = vld [vmem:[%s9198_s6 + $0xa0] sm:$0xff]   ;;  %v7850_v27 = vld [vmem:[%s9198_s6 + $0xa8] sm:$0xff]  }
 0x175   : > { %7476 = vmatpush3.bf16.msra.mxu1 %v7834_v11  ;;  %7455 = vmatprep.subr.bf16.mxu0 %v7835_v12  ;;  %v7851_v28 = vld [vmem:[%s9198_s6 + $0x70] sm:$0xff]   ;;  %v7855_v34 = vld [vmem:[%s9198_s6 + $0x78] sm:$0xff]   ;;  %v7859_v42 = vld [vmem:[%s9198_s6 + $0x140] sm:$0xff]  }
 0x176   : > { %7477 = vmatprep.subr.bf16.mxu1 %v7836_v13  ;;  %v7852_v29 = vld [vmem:[%s9198_s6 + $0xf0] sm:$0xff]   ;;  %v7856_v36 = vld [vmem:[%s9198_s6 + $0xf8] sm:$0xff]   ;;  %v7860_v43 = vld [vmem:[%s9198_s6 + $0x1c0] sm:$0xff]  }
 0x177   : > { %v7853_v30 = vld [vmem:[%s9198_s6 + $0x30] sm:$0xff]   ;;  %v7857_v38 = vld [vmem:[%s9198_s6 + $0x38] sm:$0xff]   ;;  %v7861_v45 = vld [vmem:[%s9198_s6 + $0x100] sm:$0xff]  }
 0x178   : > { %7456 = vmatpush3.bf16.msra.mxu0 %v7837_v14  ;;  %v7854_v32 = vld [vmem:[%s9198_s6 + $0xb0] sm:$0xff]   ;;  %v7858_v39 = vld [vmem:[%s9198_s6 + $0xb8] sm:$0xff]   ;;  %v7862_v47 = vld [vmem:[%s9198_s6 + $0x180] sm:$0xff]  }
 0x179   : > { %7478 = vmatpush3.bf16.msra.mxu1 %v7838_v15  ;;  %7457 = vmatprep.subr.bf16.mxu0 %v7839_v16  ;;  %v7863_v48 = vld [vmem:[%s9198_s6 + $0x148] sm:$0xff]   ;;  %v7867_v52 = vld [vmem:[%s9198_s6 + $0x150] sm:$0xff]   ;;  %v7871_v56 = vld [vmem:[%s9198_s6 + $0x158] sm:$0xff]  }
 0x17a   : > { %7479 = vmatprep.subr.bf16.mxu1 %v7840_v17  ;;  %v7864_v49 = vld [vmem:[%s9198_s6 + $0x1c8] sm:$0xff]   ;;  %v7868_v53 = vld [vmem:[%s9198_s6 + $0x1d0] sm:$0xff]   ;;  %v7872_v57 = vld [vmem:[%s9198_s6 + $0x1d8] sm:$0xff]  }
 0x17b   : > { %v7865_v50 = vld [vmem:[%s9198_s6 + $0x108] sm:$0xff]   ;;  %v7869_v54 = vld [vmem:[%s9198_s6 + $0x110] sm:$0xff]   ;;  %v7873_v58 = vld [vmem:[%s9198_s6 + $0x118] sm:$0xff]  }
 0x17c   : > { %7458 = vmatpush3.bf16.msra.mxu0 %v7841_v18  ;;  %v7866_v51 = vld [vmem:[%s9198_s6 + $0x188] sm:$0xff]   ;;  %v7870_v55 = vld [vmem:[%s9198_s6 + $0x190] sm:$0xff]   ;;  %v7874_v59 = vld [vmem:[%s9198_s6 + $0x198] sm:$0xff]  }
 0x17d   : > { %7480 = vmatpush3.bf16.msra.mxu1 %v7842_v19  ;;  %7459 = vmatprep.subr.bf16.mxu0 %v7843_v20  ;;  %v7875_v60 = vld [vmem:[%s9198_s6 + $0x160] sm:$0xff]   ;;  %v7879_v0 = vld [vmem:[%s9198_s6 + $0x168] sm:$0xff]   ;;  %v7883_v4 = vld [vmem:[%s9198_s6 + $0x170] sm:$0xff]  }
 0x17e   : > { %7481 = vmatprep.subr.bf16.mxu1 %v7844_v21  ;;  %v7876_v61 = vld [vmem:[%s9198_s6 + $0x1e0] sm:$0xff]   ;;  %v7880_v1 = vld [vmem:[%s9198_s6 + $0x1e8] sm:$0xff]   ;;  %v7884_v5 = vld [vmem:[%s9198_s6 + $0x1f0] sm:$0xff]  }
 0x17f   : > { %v7877_v62 = vld [vmem:[%s9198_s6 + $0x120] sm:$0xff]   ;;  %v7881_v2 = vld [vmem:[%s9198_s6 + $0x128] sm:$0xff]   ;;  %v7885_v6 = vld [vmem:[%s9198_s6 + $0x130] sm:$0xff]  }
 0x180   : > { %7460 = vmatpush3.bf16.msra.mxu0 %v7845_v22  ;;  %v7878_v63 = vld [vmem:[%s9198_s6 + $0x1a0] sm:$0xff]   ;;  %v7882_v3 = vld [vmem:[%s9198_s6 + $0x1a8] sm:$0xff]   ;;  %v7886_v8 = vld [vmem:[%s9198_s6 + $0x1b0] sm:$0xff]  }
 0x181   : > { %7482 = vmatpush3.bf16.msra.mxu1 %v7846_v23  ;;  %7461 = vmatprep.subr.bf16.mxu0 %v7847_v24  ;;  %v4351_v7 = vld [vmem:[%s9570_s0 + $0x20] sm:$0xff]  ;;  %v4353_v9 = vld [vmem:[%s9570_s0 + $0x30] sm:$0xff]  ;;  %v7887_v10 = vld [vmem:[%s9198_s6 + $0x178] sm:$0xff]  }
 0x182   : > { %7483 = vmatprep.subr.bf16.mxu1 %v7848_v25  ;;  %v4356_v11 = vld [vmem:[%s9570_s0 + $0x48] sm:$0xff]  ;;  %v7888_v12 = vld [vmem:[%s9198_s6 + $0x1f8] sm:$0xff]   ;;  %v4383_v15 = vpack.c.bf16 %v4351_v7, %v4351_v7  ;;  %v4385_v16 = vpack.c.bf16 %v4353_v9, %v4353_v9  ;;  %v7891_v17 = vld [vmem:[%s9198_s6 + $0x240] sm:$0xff]  }
 0x183   : > { %v7889_v13 = vld [vmem:[%s9198_s6 + $0x138] sm:$0xff]   ;;  %v7892_v18 = vld [vmem:[%s9198_s6 + $0x2c0] sm:$0xff]   ;;  %v4388_v19 = vpack.c.bf16 %v4356_v11, %v4356_v11  ;;  %v7895_v22 = vld [vmem:[%s9198_s6 + $0x248] sm:$0xff]  }
 0x184   : > { %7462 = vmatpush3.bf16.msra.mxu0 %v7849_v26  ;;  %v7890_v14 = vld [vmem:[%s9198_s6 + $0x1b8] sm:$0xff]   ;;  %v7893_v20 = vld [vmem:[%s9198_s6 + $0x200] sm:$0xff]   ;;  %v7896_v23 = vld [vmem:[%s9198_s6 + $0x2c8] sm:$0xff]  }
 0x185   : > { %7484 = vmatpush3.bf16.msra.mxu1 %v7850_v27  ;;  %7463 = vmatprep.subr.bf16.mxu0 %v7851_v28  ;;  %v7894_v21 = vld [vmem:[%s9198_s6 + $0x280] sm:$0xff]   ;;  %v7897_v24 = vld [vmem:[%s9198_s6 + $0x208] sm:$0xff]   ;;  %v7899_v26 = vld [vmem:[%s9198_s6 + $0x250] sm:$0xff]  }
 0x186   : > { %7485 = vmatprep.subr.bf16.mxu1 %v7852_v29  ;;  %v7898_v25 = vld [vmem:[%s9198_s6 + $0x288] sm:$0xff]   ;;  %v7900_v27 = vld [vmem:[%s9198_s6 + $0x2d0] sm:$0xff]   ;;  %v7904_v31 = vld [vmem:[%s9198_s6 + $0x2d8] sm:$0xff]  }
 0x187   : > { %v7901_v28 = vld [vmem:[%s9198_s6 + $0x210] sm:$0xff]   ;;  %v7906_v33 = vld [vmem:[%s9198_s6 + $0x298] sm:$0xff]   ;;  %v7908_v35 = vld [vmem:[%s9198_s6 + $0x2e0] sm:$0xff]  }
 0x188   : > { %7464 = vmatpush3.bf16.msra.mxu0 %v7853_v30  ;;  %v7902_v29 = vld [vmem:[%s9198_s6 + $0x290] sm:$0xff]   ;;  %v7903_v30 = vld [vmem:[%s9198_s6 + $0x258] sm:$0xff]   ;;  %v7910_v37 = vld [vmem:[%s9198_s6 + $0x2a0] sm:$0xff]  }
 0x189   : > { %7486 = vmatpush3.bf16.msra.mxu1 %v7854_v32  ;;  %7465 = vmatprep.subr.bf16.mxu0 %v7855_v34  ;;  %v7905_v32 = vld [vmem:[%s9198_s6 + $0x218] sm:$0xff]   ;;  %v7907_v34 = vld [vmem:[%s9198_s6 + $0x260] sm:$0xff]  }
 0x18a   : > { %7487 = vmatprep.subr.bf16.mxu1 %v7856_v36  ;;  %v7909_v36 = vld [vmem:[%s9198_s6 + $0x220] sm:$0xff]   ;;  %v7938_v7 = vld [vmem:[%s9198_s6 + $0x398] sm:$0xff]  }
 0x18b   : > { %v7940_v9 = vld [vmem:[%s9198_s6 + $0x3e0] sm:$0xff]  }
 0x18c   : > { %7466 = vmatpush3.bf16.msra.mxu0 %v7857_v38  ;;  %v7911_v38 = vld [vmem:[%s9198_s6 + $0x268] sm:$0xff]   ;;  %v7942_v11 = vld [vmem:[%s9198_s6 + $0x3a0] sm:$0xff]  }
 0x18d   : > { %7488 = vmatpush3.bf16.msra.mxu1 %v7858_v39  ;;  %7495 = vmatprep.subr.bf16.mxu0 %v7859_v42  ;;  %v7912_v39 = vld [vmem:[%s9198_s6 + $0x2e8] sm:$0xff]   ;;  %v7915_v42 = vld [vmem:[%s9198_s6 + $0x270] sm:$0xff]  }
 0x18e   : > { %7517 = vmatprep.subr.bf16.mxu1 %v7860_v43  ;;  %v7916_v43 = vld [vmem:[%s9198_s6 + $0x2f0] sm:$0xff]  }
 0x18f   : > { %6499 = vmatmul.mubr.bf16.vlgmr.msra.gmra.mrb[0].mxu0 %v4379_v40  ;;  %v7913_v40 = vld [vmem:[%s9198_s6 + $0x228] sm:$0xff]  }
 0x190   : > { %6539 = vmatmul.mubr.bf16.vlgmr.msra.gmra.mrb[0].mxu1 %v4381_v41  ;;  %7496 = vmatpush3.bf16.msra.mxu0 %v7861_v45  ;;  %v7914_v41 = vld [vmem:[%s9198_s6 + $0x2a8] sm:$0xff]   ;;  %v7918_v45 = vld [vmem:[%s9198_s6 + $0x2b0] sm:$0xff]  }
 0x191   : > { %7518 = vmatpush3.bf16.msra.mxu1 %v7862_v47  ;;  %6578 = vmatprep.mubr.bf16.mxu0 %v4384_v44  ;;  %v7917_v44 = vld [vmem:[%s9198_s6 + $0x230] sm:$0xff]   ;;  %v7920_v47 = vld [vmem:[%s9198_s6 + $0x2f8] sm:$0xff]  }
 0x192   : > { %7497 = vmatprep.subr.bf16.mxu0 %v7863_v48  ;;  %6618 = vmatprep.mubr.bf16.mxu1 %v4386_v46  ;;  %v7919_v46 = vld [vmem:[%s9198_s6 + $0x278] sm:$0xff]  }
 0x193   : > { %7519 = vmatprep.subr.bf16.mxu1 %v7864_v49  ;;  %v7921_v48 = vld [vmem:[%s9198_s6 + $0x238] sm:$0xff]  }
 0x194   : > { %7498 = vmatpush3.bf16.msra.mxu0 %v7865_v50  ;;  %v7922_v49 = vld [vmem:[%s9198_s6 + $0x2b8] sm:$0xff]  }
 0x195   : > { %7520 = vmatpush3.bf16.msra.mxu1 %v7866_v51  ;;  %7499 = vmatprep.subr.bf16.mxu0 %v7867_v52  ;;  %v4358_v50 = vld [vmem:[%s9570_s0 + $0x58] sm:$0xff]  ;;  %v4355_v51 = vld [vmem:[%s9570_s0 + $0x40] sm:$0xff]  ;;  %v4357_v52 = vld [vmem:[%s9570_s0 + $0x50] sm:$0xff] }
 0x196   : > { %7521 = vmatprep.subr.bf16.mxu1 %v7868_v53  ;;  %v4390_v53 = vpack.c.bf16 %v4358_v50, %v4358_v50  ;;  %v7973_v50 = vld [vmem:[%s9198_s6 + $0x420] sm:$0xff]  }
 0x198   : > { %7500 = vmatpush3.bf16.msra.mxu0 %v7869_v54  ;;  %v4387_v54 = vpack.c.bf16 %v4355_v51, %v4355_v51  ;;  %v7974_v51 = vld [vmem:[%s9198_s6 + $0x4a0] sm:$0xff]  }
 0x199   : > { %7522 = vmatpush3.bf16.msra.mxu1 %v7870_v55  ;;  %7501 = vmatprep.subr.bf16.mxu0 %v7871_v56  ;;  %v4389_v55 = vpack.c.bf16 %v4357_v52, %v4357_v52  ;;  %v7923_v56 = vld [vmem:[%s9198_s6 + $0x340] sm:$0xff]   ;;  %v7975_v52 = vld [vmem:[%s9198_s6 + $0x468] sm:$0xff]  }
 0x19a   : > { %7523 = vmatprep.subr.bf16.mxu1 %v7872_v57  ;;  %v7924_v57 = vld [vmem:[%s9198_s6 + $0x3c0] sm:$0xff]  }
 0x19c   : > { %7502 = vmatpush3.bf16.msra.mxu0 %v7873_v58  ;;  %v7925_v58 = vld [vmem:[%s9198_s6 + $0x300] sm:$0xff]  }
 0x19d   : > { %7524 = vmatpush3.bf16.msra.mxu1 %v7874_v59  ;;  %7503 = vmatprep.subr.bf16.mxu0 %v7875_v60  ;;  %v7926_v59 = vld [vmem:[%s9198_s6 + $0x380] sm:$0xff]   ;;  %v7927_v60 = vld [vmem:[%s9198_s6 + $0x348] sm:$0xff]  }
 0x19e   : > { %7525 = vmatprep.subr.bf16.mxu1 %v7876_v61  ;;  %v7928_v61 = vld [vmem:[%s9198_s6 + $0x3c8] sm:$0xff]  }
 0x1a0   : > { %7504 = vmatpush3.bf16.msra.mxu0 %v7877_v62  ;;  %v7929_v62 = vld [vmem:[%s9198_s6 + $0x308] sm:$0xff]  }
 0x1a1   : > { %7526 = vmatpush3.bf16.msra.mxu1 %v7878_v63  ;;  %7505 = vmatprep.subr.bf16.mxu0 %v7879_v0  ;;  %v7930_v63 = vld [vmem:[%s9198_s6 + $0x388] sm:$0xff]   ;;  %v7931_v0 = vld [vmem:[%s9198_s6 + $0x350] sm:$0xff]  }
 0x1a2   : > { %7527 = vmatprep.subr.bf16.mxu1 %v7880_v1  ;;  %v7932_v1 = vld [vmem:[%s9198_s6 + $0x3d0] sm:$0xff]  }
 0x1a4   : > { %7506 = vmatpush3.bf16.msra.mxu0 %v7881_v2  ;;  %v7933_v2 = vld [vmem:[%s9198_s6 + $0x310] sm:$0xff]  }
 0x1a5   : > { %7528 = vmatpush3.bf16.msra.mxu1 %v7882_v3  ;;  %7507 = vmatprep.subr.bf16.mxu0 %v7883_v4  ;;  %v7934_v3 = vld [vmem:[%s9198_s6 + $0x390] sm:$0xff]   ;;  %v7935_v4 = vld [vmem:[%s9198_s6 + $0x358] sm:$0xff]  }
 0x1a6   : > { %7529 = vmatprep.subr.bf16.mxu1 %v7884_v5  ;;  %v7936_v5 = vld [vmem:[%s9198_s6 + $0x3d8] sm:$0xff]  }
 0x1a8   : > { %7508 = vmatpush3.bf16.msra.mxu0 %v7885_v6  ;;  %v7937_v6 = vld [vmem:[%s9198_s6 + $0x318] sm:$0xff]  }
 0x1a9   : > { %7530 = vmatpush3.bf16.msra.mxu1 %v7886_v8  ;;  %7509 = vmatprep.subr.bf16.mxu0 %v7887_v10  ;;  %v7939_v8 = vld [vmem:[%s9198_s6 + $0x360] sm:$0xff]  }
 0x1aa   : > { %7531 = vmatprep.subr.bf16.mxu1 %v7888_v12  ;;  %v7941_v10 = vld [vmem:[%s9198_s6 + $0x320] sm:$0xff]   ;;  %v7943_v12 = vld [vmem:[%s9198_s6 + $0x368] sm:$0xff]  }
 0x1ac   : > { %7510 = vmatpush3.bf16.msra.mxu0 %v7889_v13  ;;  %v7944_v13 = vld [vmem:[%s9198_s6 + $0x3e8] sm:$0xff]  }
 0x1ad   : > { %7532 = vmatpush3.bf16.msra.mxu1 %v7890_v14  ;;  %7539 = vmatprep.subr.bf16.mxu0 %v7891_v17  ;;  %v7945_v14 = vld [vmem:[%s9198_s6 + $0x328] sm:$0xff]   ;;  %v7948_v17 = vld [vmem:[%s9198_s6 + $0x3f0] sm:$0xff]  }
 0x1ae   : > { %7561 = vmatprep.subr.bf16.mxu1 %v7892_v18  ;;  %v7949_v18 = vld [vmem:[%s9198_s6 + $0x330] sm:$0xff]  }
 0x1af   : > { %6579 = vmatmul.mubr.bf16.vlgmr.msra.gmra.mrb[4].mxu0 %v4383_v15  ;;  %v7946_v15 = vld [vmem:[%s9198_s6 + $0x3a8] sm:$0xff]  }
 0x1b0   : > { %6619 = vmatmul.mubr.bf16.vlgmr.msra.gmra.mrb[4].mxu1 %v4385_v16  ;;  %7540 = vmatpush3.bf16.msra.mxu0 %v7893_v20  ;;  %v7947_v16 = vld [vmem:[%s9198_s6 + $0x370] sm:$0xff]   ;;  %v7951_v20 = vld [vmem:[%s9198_s6 + $0x378] sm:$0xff]  }
 0x1b1   : > { %7562 = vmatpush3.bf16.msra.mxu1 %v7894_v21  ;;  %6658 = vmatprep.mubr.bf16.mxu0 %v4388_v19  ;;  %v7950_v19 = vld [vmem:[%s9198_s6 + $0x3b0] sm:$0xff]   ;;  %v7952_v21 = vld [vmem:[%s9198_s6 + $0x3f8] sm:$0xff]  }
 0x1b2   : > { %7541 = vmatprep.subr.bf16.mxu0 %v7895_v22  ;;  %7563 = vmatprep.subr.bf16.mxu1 %v7896_v23  ;;  %v7953_v22 = vld [vmem:[%s9198_s6 + $0x338] sm:$0xff]  }
 0x1b3   : > { %6698 = vmatprep.mubr.bf16.mxu1 %v4390_v53  ;;  %v7954_v23 = vld [vmem:[%s9198_s6 + $0x3b8] sm:$0xff]   ;;  %v7976_v53 = vld [vmem:[%s9198_s6 + $0x4e8] sm:$0xff]  }
 0x1b4   : > { %7542 = vmatpush3.bf16.msra.mxu0 %v7897_v24  ;;  %v4360_v24 = vld [vmem:[%s9570_s0 + $0x68] sm:$0xff] }
 0x1b5   : > { %7564 = vmatpush3.bf16.msra.mxu1 %v7898_v25  ;;  %7543 = vmatprep.subr.bf16.mxu0 %v7899_v26  ;;  %v4362_v25 = vld [vmem:[%s9570_s0 + $0x78] sm:$0xff]  ;;  %v4359_v26 = vld [vmem:[%s9570_s0 + $0x60] sm:$0xff] }
 0x1b6   : > { %7565 = vmatprep.subr.bf16.mxu1 %v7900_v27  ;;  %v4392_v27 = vpack.c.bf16 %v4360_v24, %v4360_v24  ;;  %v8003_v24 = vld [vmem:[%s9198_s6 + $0x560] sm:$0xff]  }
 0x1b8   : > { %7544 = vmatpush3.bf16.msra.mxu0 %v7901_v28  ;;  %v4394_v28 = vpack.c.bf16 %v4362_v25, %v4362_v25  ;;  %v8004_v25 = vld [vmem:[%s9198_s6 + $0x5e0] sm:$0xff]  }
 0x1b9   : > { %7566 = vmatpush3.bf16.msra.mxu1 %v7902_v29  ;;  %7545 = vmatprep.subr.bf16.mxu0 %v7903_v30  ;;  %v4391_v29 = vpack.c.bf16 %v4359_v26, %v4359_v26  ;;  %v4361_v30 = vld [vmem:[%s9570_s0 + $0x70] sm:$0xff]  ;;  %v8005_v26 = vld [vmem:[%s9198_s6 + $0x520] sm:$0xff]  }
 0x1ba   : > { %7567 = vmatprep.subr.bf16.mxu1 %v7904_v31  ;;  %v4393_v31 = vpack.c.bf16 %v4361_v30, %v4361_v30  ;;  %v8009_v30 = vld [vmem:[%s9198_s6 + $0x528] sm:$0xff]  }
 0x1bc   : > { %7546 = vmatpush3.bf16.msra.mxu0 %v7905_v32  ;;  %v7955_v32 = vld [vmem:[%s9198_s6 + $0x440] sm:$0xff]  }
 0x1bd   : > { %7568 = vmatpush3.bf16.msra.mxu1 %v7906_v33  ;;  %7547 = vmatprep.subr.bf16.mxu0 %v7907_v34  ;;  %v7956_v33 = vld [vmem:[%s9198_s6 + $0x4c0] sm:$0xff]  }
 0x1be   : > { %7569 = vmatprep.subr.bf16.mxu1 %v7908_v35  ;;  %v7957_v34 = vld [vmem:[%s9198_s6 + $0x400] sm:$0xff]  }
 0x1bf   : > { %v7958_v35 = vld [vmem:[%s9198_s6 + $0x480] sm:$0xff]  }
 0x1c0   : > { %7548 = vmatpush3.bf16.msra.mxu0 %v7909_v36  ;;  %v7959_v36 = vld [vmem:[%s9198_s6 + $0x448] sm:$0xff]  }
 0x1c1   : > { %7570 = vmatpush3.bf16.msra.mxu1 %v7910_v37  ;;  %7549 = vmatprep.subr.bf16.mxu0 %v7911_v38  ;;  %v7960_v37 = vld [vmem:[%s9198_s6 + $0x4c8] sm:$0xff]  }
 0x1c2   : > { %7571 = vmatprep.subr.bf16.mxu1 %v7912_v39  ;;  %v7961_v38 = vld [vmem:[%s9198_s6 + $0x408] sm:$0xff]  }
 0x1c3   : > { %v7962_v39 = vld [vmem:[%s9198_s6 + $0x488] sm:$0xff]  }
 0x1c4   : > { %7550 = vmatpush3.bf16.msra.mxu0 %v7913_v40  ;;  %v7963_v40 = vld [vmem:[%s9198_s6 + $0x450] sm:$0xff]  }
 0x1c5   : > { %7572 = vmatpush3.bf16.msra.mxu1 %v7914_v41  ;;  %7551 = vmatprep.subr.bf16.mxu0 %v7915_v42  ;;  %v7964_v41 = vld [vmem:[%s9198_s6 + $0x4d0] sm:$0xff]  }
 0x1c6   : > { %7573 = vmatprep.subr.bf16.mxu1 %v7916_v43  ;;  %v7965_v42 = vld [vmem:[%s9198_s6 + $0x410] sm:$0xff]  }
 0x1c7   : > { %v7966_v43 = vld [vmem:[%s9198_s6 + $0x490] sm:$0xff]  }
 0x1c8   : > { %7552 = vmatpush3.bf16.msra.mxu0 %v7917_v44  ;;  %v7967_v44 = vld [vmem:[%s9198_s6 + $0x458] sm:$0xff]  }
 0x1c9   : > { %7574 = vmatpush3.bf16.msra.mxu1 %v7918_v45  ;;  %7553 = vmatprep.subr.bf16.mxu0 %v7919_v46  ;;  %v7968_v45 = vld [vmem:[%s9198_s6 + $0x4d8] sm:$0xff]  }
 0x1ca   : > { %7575 = vmatprep.subr.bf16.mxu1 %v7920_v47  ;;  %v7969_v46 = vld [vmem:[%s9198_s6 + $0x418] sm:$0xff]  }
 0x1cb   : > { %v7970_v47 = vld [vmem:[%s9198_s6 + $0x498] sm:$0xff]  }
 0x1cc   : > { %7554 = vmatpush3.bf16.msra.mxu0 %v7921_v48  ;;  %v7971_v48 = vld [vmem:[%s9198_s6 + $0x460] sm:$0xff]  }
 0x1cd   : > { %7576 = vmatpush3.bf16.msra.mxu1 %v7922_v49  ;;  %7583 = vmatprep.subr.bf16.mxu0 %v7923_v56  ;;  %v7972_v49 = vld [vmem:[%s9198_s6 + $0x4e0] sm:$0xff]   ;;  %v7979_v56 = vld [vmem:[%s9198_s6 + $0x470] sm:$0xff]  }
 0x1ce   : > { %7605 = vmatprep.subr.bf16.mxu1 %v7924_v57  ;;  %v7980_v57 = vld [vmem:[%s9198_s6 + $0x4f0] sm:$0xff]  }
 0x1cf   : > { %6659 = vmatmul.mubr.bf16.vlgmr.msra.gmra.mrb[8].mxu0 %v4387_v54  ;;  %v7977_v54 = vld [vmem:[%s9198_s6 + $0x428] sm:$0xff]  }
 0x1d0   : > { %6699 = vmatmul.mubr.bf16.vlgmr.msra.gmra.mrb[8].mxu1 %v4389_v55  ;;  %7584 = vmatpush3.bf16.msra.mxu0 %v7925_v58  ;;  %v7978_v55 = vld [vmem:[%s9198_s6 + $0x4a8] sm:$0xff]   ;;  %v7981_v58 = vld [vmem:[%s9198_s6 + $0x430] sm:$0xff]  }
 0x1d1   : > { %7606 = vmatpush3.bf16.msra.mxu1 %v7926_v59  ;;  %7585 = vmatprep.subr.bf16.mxu0 %v7927_v60  ;;  %v7982_v59 = vld [vmem:[%s9198_s6 + $0x4b0] sm:$0xff]   ;;  %v7983_v60 = vld [vmem:[%s9198_s6 + $0x478] sm:$0xff]  }
 0x1d2   : > { %7607 = vmatprep.subr.bf16.mxu1 %v7928_v61  ;;  %6738 = vmatprep.mubr.bf16.mxu0 %v4392_v27  ;;  %v7984_v61 = vld [vmem:[%s9198_s6 + $0x4f8] sm:$0xff]   ;;  %v8006_v27 = vld [vmem:[%s9198_s6 + $0x5a0] sm:$0xff]  }
 0x1d3   : > { %6778 = vmatprep.mubr.bf16.mxu1 %v4394_v28  ;;  %v8007_v28 = vld [vmem:[%s9198_s6 + $0x568] sm:$0xff]  }
 0x1d4   : > { %7586 = vmatpush3.bf16.msra.mxu0 %v7929_v62  ;;  %v7985_v62 = vld [vmem:[%s9198_s6 + $0x438] sm:$0xff]  }
 0x1d5   : > { %7608 = vmatpush3.bf16.msra.mxu1 %v7930_v63  ;;  %7587 = vmatprep.subr.bf16.mxu0 %v7931_v0  ;;  %v7986_v63 = vld [vmem:[%s9198_s6 + $0x4b8] sm:$0xff]   ;;  %v4364_v0 = vld [vmem:[%s9570_s0 + $0x88] sm:$0xff] }
 0x1d6   : > { %7609 = vmatprep.subr.bf16.mxu1 %v7932_v1  ;;  %v4366_v1 = vld [vmem:[%s9570_s0 + $0x98] sm:$0xff] }
 0x1d8   : > { %7588 = vmatpush3.bf16.msra.mxu0 %v7933_v2  ;;  %v4396_v2 = vpack.c.bf16 %v4364_v0, %v4364_v0  ;;  %v8035_v0 = vld [vmem:[%s9198_s6 + $0x660] sm:$0xff]  }
 0x1d9   : > { %7610 = vmatpush3.bf16.msra.mxu1 %v7934_v3  ;;  %7589 = vmatprep.subr.bf16.mxu0 %v7935_v4  ;;  %v4398_v3 = vpack.c.bf16 %v4366_v1, %v4366_v1  ;;  %v4363_v4 = vld [vmem:[%s9570_s0 + $0x80] sm:$0xff] }
 0x1da   : > { %7611 = vmatprep.subr.bf16.mxu1 %v7936_v5  ;;  %v4365_v5 = vld [vmem:[%s9570_s0 + $0x90] sm:$0xff]  ;;  %v8036_v1 = vld [vmem:[%s9198_s6 + $0x6e0] sm:$0xff]  }
 0x1dc   : > { %7590 = vmatpush3.bf16.msra.mxu0 %v7937_v6  ;;  %v4395_v6 = vpack.c.bf16 %v4363_v4, %v4363_v4  ;;  %v8039_v4 = vld [vmem:[%s9198_s6 + $0x668] sm:$0xff]  }
 0x1dd   : > { %7612 = vmatpush3.bf16.msra.mxu1 %v7938_v7  ;;  %7591 = vmatprep.subr.bf16.mxu0 %v7939_v8  ;;  %v4397_v7 = vpack.c.bf16 %v4365_v5, %v4365_v5  ;;  %v7987_v8 = vld [vmem:[%s9198_s6 + $0x540] sm:$0xff]   ;;  %v8040_v5 = vld [vmem:[%s9198_s6 + $0x6e8] sm:$0xff]  }
 0x1de   : > { %7613 = vmatprep.subr.bf16.mxu1 %v7940_v9  ;;  %v7988_v9 = vld [vmem:[%s9198_s6 + $0x5c0] sm:$0xff]  }
 0x1e0   : > { %7592 = vmatpush3.bf16.msra.mxu0 %v7941_v10  ;;  %v7989_v10 = vld [vmem:[%s9198_s6 + $0x500] sm:$0xff]  }
 0x1e1   : > { %7614 = vmatpush3.bf16.msra.mxu1 %v7942_v11  ;;  %7593 = vmatprep.subr.bf16.mxu0 %v7943_v12  ;;  %v7990_v11 = vld [vmem:[%s9198_s6 + $0x580] sm:$0xff]   ;;  %v7991_v12 = vld [vmem:[%s9198_s6 + $0x548] sm:$0xff]  }
 0x1e2   : > { %7615 = vmatprep.subr.bf16.mxu1 %v7944_v13  ;;  %v7992_v13 = vld [vmem:[%s9198_s6 + $0x5c8] sm:$0xff]  }
 0x1e4   : > { %7594 = vmatpush3.bf16.msra.mxu0 %v7945_v14  ;;  %v7993_v14 = vld [vmem:[%s9198_s6 + $0x508] sm:$0xff]  }
 0x1e5   : > { %7616 = vmatpush3.bf16.msra.mxu1 %v7946_v15  ;;  %7595 = vmatprep.subr.bf16.mxu0 %v7947_v16  ;;  %v7994_v15 = vld [vmem:[%s9198_s6 + $0x588] sm:$0xff]   ;;  %v7995_v16 = vld [vmem:[%s9198_s6 + $0x550] sm:$0xff]  }
 0x1e6   : > { %7617 = vmatprep.subr.bf16.mxu1 %v7948_v17  ;;  %v7996_v17 = vld [vmem:[%s9198_s6 + $0x5d0] sm:$0xff]  }
 0x1e8   : > { %7596 = vmatpush3.bf16.msra.mxu0 %v7949_v18  ;;  %v7997_v18 = vld [vmem:[%s9198_s6 + $0x510] sm:$0xff]  }
 0x1e9   : > { %7618 = vmatpush3.bf16.msra.mxu1 %v7950_v19  ;;  %7597 = vmatprep.subr.bf16.mxu0 %v7951_v20  ;;  %v7998_v19 = vld [vmem:[%s9198_s6 + $0x590] sm:$0xff]   ;;  %v7999_v20 = vld [vmem:[%s9198_s6 + $0x558] sm:$0xff]  }
 0x1ea   : > { %7619 = vmatprep.subr.bf16.mxu1 %v7952_v21  ;;  %v8000_v21 = vld [vmem:[%s9198_s6 + $0x5d8] sm:$0xff]  }
 0x1ec   : > { %7598 = vmatpush3.bf16.msra.mxu0 %v7953_v22  ;;  %v8001_v22 = vld [vmem:[%s9198_s6 + $0x518] sm:$0xff]  }
 0x1ed   : > { %7620 = vmatpush3.bf16.msra.mxu1 %v7954_v23  ;;  %7627 = vmatprep.subr.bf16.mxu0 %v7955_v32  ;;  %v8002_v23 = vld [vmem:[%s9198_s6 + $0x598] sm:$0xff]   ;;  %v8011_v32 = vld [vmem:[%s9198_s6 + $0x570] sm:$0xff]  }
 0x1ee   : > { %7649 = vmatprep.subr.bf16.mxu1 %v7956_v33  ;;  %v8012_v33 = vld [vmem:[%s9198_s6 + $0x5f0] sm:$0xff]  }
 0x1ef   : > { %6739 = vmatmul.mubr.bf16.vlgmr.msra.gmra.mrb[12].mxu0 %v4391_v29  ;;  %v8008_v29 = vld [vmem:[%s9198_s6 + $0x5e8] sm:$0xff]  }
 0x1f0   : > { %6779 = vmatmul.mubr.bf16.vlgmr.msra.gmra.mrb[12].mxu1 %v4393_v31  ;;  %7628 = vmatpush3.bf16.msra.mxu0 %v7957_v34  ;;  %v8010_v31 = vld [vmem:[%s9198_s6 + $0x5a8] sm:$0xff]   ;;  %v8013_v34 = vld [vmem:[%s9198_s6 + $0x530] sm:$0xff]  }
 0x1f1   : > { %7650 = vmatpush3.bf16.msra.mxu1 %v7958_v35  ;;  %7629 = vmatprep.subr.bf16.mxu0 %v7959_v36  ;;  %v8014_v35 = vld [vmem:[%s9198_s6 + $0x5b0] sm:$0xff]   ;;  %v8015_v36 = vld [vmem:[%s9198_s6 + $0x578] sm:$0xff]  }
 0x1f2   : > { %7651 = vmatprep.subr.bf16.mxu1 %v7960_v37  ;;  %6818 = vmatprep.mubr.bf16.mxu0 %v4396_v2  ;;  %v8016_v37 = vld [vmem:[%s9198_s6 + $0x5f8] sm:$0xff]   ;;  %v8037_v2 = vld [vmem:[%s9198_s6 + $0x620] sm:$0xff]  }
 0x1f3   : > { %6858 = vmatprep.mubr.bf16.mxu1 %v4398_v3  ;;  %v8038_v3 = vld [vmem:[%s9198_s6 + $0x6a0] sm:$0xff]  }
 0x1f4   : > { %7630 = vmatpush3.bf16.msra.mxu0 %v7961_v38  ;;  %v8017_v38 = vld [vmem:[%s9198_s6 + $0x538] sm:$0xff]  }
 0x1f5   : > { %7652 = vmatpush3.bf16.msra.mxu1 %v7962_v39  ;;  %7631 = vmatprep.subr.bf16.mxu0 %v7963_v40  ;;  %v8018_v39 = vld [vmem:[%s9198_s6 + $0x5b8] sm:$0xff]   ;;  %v4368_v40 = vld [vmem:[%s9570_s0 + $0xa8] sm:$0xff] }
 0x1f6   : > { %7653 = vmatprep.subr.bf16.mxu1 %v7964_v41  ;;  %v4400_v41 = vpack.c.bf16 %v4368_v40, %v4368_v40 }
 0x1f8   : > { %7632 = vmatpush3.bf16.msra.mxu0 %v7965_v42  ;;  %v4370_v42 = vld [vmem:[%s9570_s0 + $0xb8] sm:$0xff] }
 0x1f9   : > { %7654 = vmatpush3.bf16.msra.mxu1 %v7966_v43  ;;  %7633 = vmatprep.subr.bf16.mxu0 %v7967_v44  ;;  %v4367_v43 = vld [vmem:[%s9570_s0 + $0xa0] sm:$0xff]  ;;  %v4369_v44 = vld [vmem:[%s9570_s0 + $0xb0] sm:$0xff] }
 0x1fa   : > { %7655 = vmatprep.subr.bf16.mxu1 %v7968_v45  ;;  %v4402_v45 = vpack.c.bf16 %v4370_v42, %v4370_v42 }
 0x1fc   : > { %7634 = vmatpush3.bf16.msra.mxu0 %v7969_v46  ;;  %v4399_v46 = vpack.c.bf16 %v4367_v43, %v4367_v43  ;;  %v8068_v43 = vld [vmem:[%s9198_s6 + $0x7e0] sm:$0xff]  }
 0x1fd   : > { %7656 = vmatpush3.bf16.msra.mxu1 %v7970_v47  ;;  %7635 = vmatprep.subr.bf16.mxu0 %v7971_v48  ;;  %v4401_v47 = vpack.c.bf16 %v4369_v44, %v4369_v44  ;;  %v8019_v48 = vld [vmem:[%s9198_s6 + $0x640] sm:$0xff]  }
 0x1fe   : > { %7657 = vmatprep.subr.bf16.mxu1 %v7972_v49  ;;  %v8020_v49 = vld [vmem:[%s9198_s6 + $0x6c0] sm:$0xff]  }
 0x200   : > { %7636 = vmatpush3.bf16.msra.mxu0 %v7973_v50  ;;  %v8021_v50 = vld [vmem:[%s9198_s6 + $0x600] sm:$0xff]  }
 0x201   : > { %7658 = vmatpush3.bf16.msra.mxu1 %v7974_v51  ;;  %7637 = vmatprep.subr.bf16.mxu0 %v7975_v52  ;;  %v8022_v51 = vld [vmem:[%s9198_s6 + $0x680] sm:$0xff]   ;;  %v8023_v52 = vld [vmem:[%s9198_s6 + $0x648] sm:$0xff]  }
 0x202   : > { %7659 = vmatprep.subr.bf16.mxu1 %v7976_v53  ;;  %v8024_v53 = vld [vmem:[%s9198_s6 + $0x6c8] sm:$0xff]  }
 0x204   : > { %7638 = vmatpush3.bf16.msra.mxu0 %v7977_v54  ;;  %v8025_v54 = vld [vmem:[%s9198_s6 + $0x608] sm:$0xff]  }
 0x205   : > { %7660 = vmatpush3.bf16.msra.mxu1 %v7978_v55  ;;  %7639 = vmatprep.subr.bf16.mxu0 %v7979_v56  ;;  %v8026_v55 = vld [vmem:[%s9198_s6 + $0x688] sm:$0xff]   ;;  %v8027_v56 = vld [vmem:[%s9198_s6 + $0x650] sm:$0xff]  }
 0x206   : > { %7661 = vmatprep.subr.bf16.mxu1 %v7980_v57  ;;  %v8028_v57 = vld [vmem:[%s9198_s6 + $0x6d0] sm:$0xff]  }
 0x208   : > { %7640 = vmatpush3.bf16.msra.mxu0 %v7981_v58  ;;  %v8029_v58 = vld [vmem:[%s9198_s6 + $0x610] sm:$0xff]  }
 0x209   : > { %7662 = vmatpush3.bf16.msra.mxu1 %v7982_v59  ;;  %7641 = vmatprep.subr.bf16.mxu0 %v7983_v60  ;;  %v8030_v59 = vld [vmem:[%s9198_s6 + $0x690] sm:$0xff]   ;;  %v8031_v60 = vld [vmem:[%s9198_s6 + $0x658] sm:$0xff]  }
 0x20a   : > { %7663 = vmatprep.subr.bf16.mxu1 %v7984_v61  ;;  %v8032_v61 = vld [vmem:[%s9198_s6 + $0x6d8] sm:$0xff]  }
 0x20c   : > { %7642 = vmatpush3.bf16.msra.mxu0 %v7985_v62  ;;  %v8033_v62 = vld [vmem:[%s9198_s6 + $0x618] sm:$0xff]  }
 0x20d   : > { %7664 = vmatpush3.bf16.msra.mxu1 %v7986_v63  ;;  %7671 = vmatprep.subr.bf16.mxu0 %v7987_v8  ;;  %v8034_v63 = vld [vmem:[%s9198_s6 + $0x698] sm:$0xff]   ;;  %v8043_v8 = vld [vmem:[%s9198_s6 + $0x670] sm:$0xff]  }
 0x20e   : > { %7693 = vmatprep.subr.bf16.mxu1 %v7988_v9  ;;  %v8044_v9 = vld [vmem:[%s9198_s6 + $0x6f0] sm:$0xff]  }
 0x20f   : > { %6819 = vmatmul.mubr.bf16.vlgmr.msra.gmra.mrb[16].mxu0 %v4395_v6  ;;  %v8041_v6 = vld [vmem:[%s9198_s6 + $0x628] sm:$0xff]  }
 0x210   : > { %6859 = vmatmul.mubr.bf16.vlgmr.msra.gmra.mrb[16].mxu1 %v4397_v7  ;;  %7672 = vmatpush3.bf16.msra.mxu0 %v7989_v10  ;;  %v8042_v7 = vld [vmem:[%s9198_s6 + $0x6a8] sm:$0xff]   ;;  %v8045_v10 = vld [vmem:[%s9198_s6 + $0x630] sm:$0xff]  }
 0x211   : > { %7694 = vmatpush3.bf16.msra.mxu1 %v7990_v11  ;;  %7673 = vmatprep.subr.bf16.mxu0 %v7991_v12  ;;  %v8046_v11 = vld [vmem:[%s9198_s6 + $0x6b0] sm:$0xff]   ;;  %v8047_v12 = vld [vmem:[%s9198_s6 + $0x678] sm:$0xff]  }
 0x212   : > { %7695 = vmatprep.subr.bf16.mxu1 %v7992_v13  ;;  %6898 = vmatprep.mubr.bf16.mxu0 %v4400_v41  ;;  %v8048_v13 = vld [vmem:[%s9198_s6 + $0x6f8] sm:$0xff]   ;;  %v8067_v41 = vld [vmem:[%s9198_s6 + $0x760] sm:$0xff]  }
 0x213   : > { %6938 = vmatprep.mubr.bf16.mxu1 %v4402_v45  ;;  %v8069_v45 = vld [vmem:[%s9198_s6 + $0x720] sm:$0xff]  }
 0x214   : > { %7674 = vmatpush3.bf16.msra.mxu0 %v7993_v14  ;;  %v8049_v14 = vld [vmem:[%s9198_s6 + $0x638] sm:$0xff]  }
 0x215   : > { %7696 = vmatpush3.bf16.msra.mxu1 %v7994_v15  ;;  %7675 = vmatprep.subr.bf16.mxu0 %v7995_v16  ;;  %v8050_v15 = vld [vmem:[%s9198_s6 + $0x6b8] sm:$0xff]   ;;  %v4372_v16 = vld [vmem:[%s9570_s0 + $0xc8] sm:$0xff] }
 0x216   : > { %7697 = vmatprep.subr.bf16.mxu1 %v7996_v17  ;;  %v4374_v17 = vld [vmem:[%s9570_s0 + $0xd8] sm:$0xff] }
 0x218   : > { %7676 = vmatpush3.bf16.msra.mxu0 %v7997_v18  ;;  %v4371_v18 = vld [vmem:[%s9570_s0 + $0xc0] sm:$0xff] }
 0x219   : > { %7698 = vmatpush3.bf16.msra.mxu1 %v7998_v19  ;;  %7677 = vmatprep.subr.bf16.mxu0 %v7999_v20  ;;  %v4404_v19 = vpack.c.bf16 %v4372_v16, %v4372_v16  ;;  %v4406_v20 = vpack.c.bf16 %v4374_v17, %v4374_v17 }
 0x21a   : > { %7699 = vmatprep.subr.bf16.mxu1 %v8000_v21  ;;  %v4403_v21 = vpack.c.bf16 %v4371_v18, %v4371_v18 }
 0x21c   : > { %7678 = vmatpush3.bf16.msra.mxu0 %v8001_v22  ;;  %v4373_v22 = vld [vmem:[%s9570_s0 + $0xd0] sm:$0xff] }
 0x21d   : > { %7700 = vmatpush3.bf16.msra.mxu1 %v8002_v23  ;;  %7679 = vmatprep.subr.bf16.mxu0 %v8003_v24  ;;  %v4405_v23 = vpack.c.bf16 %v4373_v22, %v4373_v22  ;;  %v8051_v24 = vld [vmem:[%s9198_s6 + $0x740] sm:$0xff]  }
 0x21e   : > { %7701 = vmatprep.subr.bf16.mxu1 %v8004_v25  ;;  %v8052_v25 = vld [vmem:[%s9198_s6 + $0x7c0] sm:$0xff]  }
 0x220   : > { %7680 = vmatpush3.bf16.msra.mxu0 %v8005_v26  ;;  %v8053_v26 = vld [vmem:[%s9198_s6 + $0x700] sm:$0xff]  }
 0x221   : > { %7702 = vmatpush3.bf16.msra.mxu1 %v8006_v27  ;;  %7681 = vmatprep.subr.bf16.mxu0 %v8007_v28  ;;  %v8054_v27 = vld [vmem:[%s9198_s6 + $0x780] sm:$0xff]   ;;  %v8055_v28 = vld [vmem:[%s9198_s6 + $0x748] sm:$0xff]  }
 0x222   : > { %7703 = vmatprep.subr.bf16.mxu1 %v8008_v29  ;;  %v8056_v29 = vld [vmem:[%s9198_s6 + $0x7c8] sm:$0xff]  }
 0x224   : > { %7682 = vmatpush3.bf16.msra.mxu0 %v8009_v30  ;;  %v8057_v30 = vld [vmem:[%s9198_s6 + $0x708] sm:$0xff]  }
 0x225   : > { %7704 = vmatpush3.bf16.msra.mxu1 %v8010_v31  ;;  %7683 = vmatprep.subr.bf16.mxu0 %v8011_v32  ;;  %v8058_v31 = vld [vmem:[%s9198_s6 + $0x788] sm:$0xff]   ;;  %v8059_v32 = vld [vmem:[%s9198_s6 + $0x750] sm:$0xff]  }
 0x226   : > { %7705 = vmatprep.subr.bf16.mxu1 %v8012_v33  ;;  %v8060_v33 = vld [vmem:[%s9198_s6 + $0x7d0] sm:$0xff]  }
 0x228   : > { %7684 = vmatpush3.bf16.msra.mxu0 %v8013_v34  ;;  %v8061_v34 = vld [vmem:[%s9198_s6 + $0x710] sm:$0xff]  }
 0x229   : > { %7706 = vmatpush3.bf16.msra.mxu1 %v8014_v35  ;;  %7685 = vmatprep.subr.bf16.mxu0 %v8015_v36  ;;  %v8062_v35 = vld [vmem:[%s9198_s6 + $0x790] sm:$0xff]   ;;  %v8063_v36 = vld [vmem:[%s9198_s6 + $0x758] sm:$0xff]  }
 0x22a   : > { %7707 = vmatprep.subr.bf16.mxu1 %v8016_v37  ;;  %v8064_v37 = vld [vmem:[%s9198_s6 + $0x7d8] sm:$0xff]  }
 0x22c   : > { %7686 = vmatpush3.bf16.msra.mxu0 %v8017_v38  ;;  %v8065_v38 = vld [vmem:[%s9198_s6 + $0x718] sm:$0xff]  }
 0x22d   : > { %7708 = vmatpush3.bf16.msra.mxu1 %v8018_v39  ;;  %7715 = vmatprep.subr.bf16.mxu0 %v8019_v48  ;;  %v8066_v39 = vld [vmem:[%s9198_s6 + $0x798] sm:$0xff]   ;;  %v8070_v48 = vld [vmem:[%s9198_s6 + $0x7a0] sm:$0xff]  }
 0x22e   : > { %7737 = vmatprep.subr.bf16.mxu1 %v8020_v49  ;;  %v7192_v49 = vld [vmem:[%s4341_s14] ss:$0 sm:$0xff] }
 0x22f   : > { %6899 = vmatmul.mubr.bf16.vlgmr.msra.gmra.mrb[20].mxu0 %v4399_v46 }
 0x230   : > { %6939 = vmatmul.mubr.bf16.vlgmr.msra.gmra.mrb[20].mxu1 %v4401_v47  ;;  %7716 = vmatpush3.bf16.msra.mxu0 %v8021_v50 }
 0x231   : > { %7738 = vmatpush3.bf16.msra.mxu1 %v8022_v51  ;;  %7717 = vmatprep.subr.bf16.mxu0 %v8023_v52 }
 0x232   : > { %7739 = vmatprep.subr.bf16.mxu1 %v8024_v53  ;;  %6978 = vmatprep.mubr.bf16.mxu0 %v4404_v19  ;;  %v8071_v53 = vld [vmem:[%s9198_s6 + $0x768] sm:$0xff]  }
 0x233   : > { %7018 = vmatprep.mubr.bf16.mxu1 %v4406_v20 }
 0x234   : > { %7718 = vmatpush3.bf16.msra.mxu0 %v8025_v54 }
 0x235   : > { %7740 = vmatpush3.bf16.msra.mxu1 %v8026_v55  ;;  %7719 = vmatprep.subr.bf16.mxu0 %v8027_v56  ;;  %v8072_v55 = vld [vmem:[%s9198_s6 + $0x7e8] sm:$0xff]  }
 0x236   : > { %7741 = vmatprep.subr.bf16.mxu1 %v8028_v57 }
 0x238   : > { %7720 = vmatpush3.bf16.msra.mxu0 %v8029_v58  ;;  %v8073_v58 = vld [vmem:[%s9198_s6 + $0x728] sm:$0xff]  }
 0x239   : > { %7742 = vmatpush3.bf16.msra.mxu1 %v8030_v59  ;;  %7721 = vmatprep.subr.bf16.mxu0 %v8031_v60  ;;  %v8074_v60 = vld [vmem:[%s9198_s6 + $0x7a8] sm:$0xff]  }
 0x23a   : > { %7743 = vmatprep.subr.bf16.mxu1 %v8032_v61  ;;  %v8075_v61 = vld [vmem:[%s9198_s6 + $0x770] sm:$0xff]  }
 0x23c   : > { %7722 = vmatpush3.bf16.msra.mxu0 %v8033_v62  ;;  %v8076_v62 = vld [vmem:[%s9198_s6 + $0x7f0] sm:$0xff]  }
 0x23d   : > { %7744 = vmatpush3.bf16.msra.mxu1 %v8034_v63  ;;  %7723 = vmatprep.subr.bf16.mxu0 %v8035_v0  ;;  %v8077_v63 = vld [vmem:[%s9198_s6 + $0x730] sm:$0xff]  }
 0x23e   : > { %7745 = vmatprep.subr.bf16.mxu1 %v8036_v1  ;;  %v8078_v0 = vld [vmem:[%s9198_s6 + $0x7b0] sm:$0xff]   ;;  %v8079_v1 = vld [vmem:[%s9198_s6 + $0x778] sm:$0xff]  }
 0x240   : > { %7724 = vmatpush3.bf16.msra.mxu0 %v8037_v2  ;;  %v8080_v2 = vld [vmem:[%s9198_s6 + $0x7f8] sm:$0xff]  }
 0x241   : > { %7746 = vmatpush3.bf16.msra.mxu1 %v8038_v3  ;;  %7725 = vmatprep.subr.bf16.mxu0 %v8039_v4  ;;  %v8081_v3 = vld [vmem:[%s9198_s6 + $0x738] sm:$0xff]  }
 0x242   : > { %7747 = vmatprep.subr.bf16.mxu1 %v8040_v5  ;;  %v8082_v4 = vld [vmem:[%s9198_s6 + $0x7b8] sm:$0xff]   ;;  %v4376_v5 = vld [vmem:[%s9570_s0 + $0xe8] sm:$0xff]  ;;  %s7191_s6 = sshll.u32 %s9578_s15, 3 }
 0x243   : > { %s4345_s8 = scalar_lea.vmem %s9573_s3, %s7191_s6 }
 0x244   : > { %7726 = vmatpush3.bf16.msra.mxu0 %v8041_v6  ;;  %v4408_v6 = vpack.c.bf16 %v4376_v5, %v4376_v5 }
 0x245   : > { %7748 = vmatpush3.bf16.msra.mxu1 %v8042_v7  ;;  %7727 = vmatprep.subr.bf16.mxu0 %v8043_v8  ;;  %v4378_v7 = vld [vmem:[%s9570_s0 + $0xf8] sm:$0xff]  ;;  %v4375_v8 = vld [vmem:[%s9570_s0 + $0xe0] sm:$0xff] }
 0x246   : > { %7749 = vmatprep.subr.bf16.mxu1 %v8044_v9  ;;  %v4377_v9 = vld [vmem:[%s9570_s0 + $0xf0] sm:$0xff] }
 0x248   : > { %7728 = vmatpush3.bf16.msra.mxu0 %v8045_v10  ;;  %v4410_v10 = vpack.c.bf16 %v4378_v7, %v4378_v7 }
 0x249   : > { %7750 = vmatpush3.bf16.msra.mxu1 %v8046_v11  ;;  %7729 = vmatprep.subr.bf16.mxu0 %v8047_v12  ;;  %v4407_v11 = vpack.c.bf16 %v4375_v8, %v4375_v8  ;;  %v4409_v12 = vpack.c.bf16 %v4377_v9, %v4377_v9 }
 0x24a   : > { %7751 = vmatprep.subr.bf16.mxu1 %v8048_v13 }
 0x24c   : > { %7730 = vmatpush3.bf16.msra.mxu0 %v8049_v14 }
 0x24d   : > { %7752 = vmatpush3.bf16.msra.mxu1 %v8050_v15  ;;  %7759 = vmatprep.subr.bf16.mxu0 %v8051_v24 }
 0x24e   : > { %7781 = vmatprep.subr.bf16.mxu1 %v8052_v25 }
 0x24f   : > { %6979 = vmatmul.mubr.bf16.vlgmr.msra.gmra.mrb[24].mxu0 %v4403_v21 }
 0x250   : > { %7019 = vmatmul.mubr.bf16.vlgmr.msra.gmra.mrb[24].mxu1 %v4405_v23  ;;  %7760 = vmatpush3.bf16.msra.mxu0 %v8053_v26 }
 0x251   : > { %7782 = vmatpush3.bf16.msra.mxu1 %v8054_v27  ;;  %7761 = vmatprep.subr.bf16.mxu0 %v8055_v28 }
 0x252   : > { %7783 = vmatprep.subr.bf16.mxu1 %v8056_v29  ;;  %7058 = vmatprep.mubr.bf16.mxu0 %v4408_v6 }
 0x253   : > { %7098 = vmatprep.mubr.bf16.mxu1 %v4410_v10 }
 0x254   : > { %7762 = vmatpush3.bf16.msra.mxu0 %v8057_v30 }
 0x255   : > { %7784 = vmatpush3.bf16.msra.mxu1 %v8058_v31  ;;  %7763 = vmatprep.subr.bf16.mxu0 %v8059_v32 }
 0x256   : > { %7785 = vmatprep.subr.bf16.mxu1 %v8060_v33 }
 0x258   : > { %7764 = vmatpush3.bf16.msra.mxu0 %v8061_v34 }
 0x259   : > { %7786 = vmatpush3.bf16.msra.mxu1 %v8062_v35  ;;  %7765 = vmatprep.subr.bf16.mxu0 %v8063_v36 }
 0x25a   : > { %7787 = vmatprep.subr.bf16.mxu1 %v8064_v37 }
 0x25c   : > { %7766 = vmatpush3.bf16.msra.mxu0 %v8065_v38 }
 0x25d   : > { %7788 = vmatpush3.bf16.msra.mxu1 %v8066_v39  ;;  %7767 = vmatprep.subr.bf16.mxu0 %v8067_v41 }
 0x25e   : > { %7789 = vmatprep.subr.bf16.mxu1 %v8068_v43 }
 0x260   : > { %7768 = vmatpush3.bf16.msra.mxu0 %v8069_v45 }
 0x261   : > { %7790 = vmatpush3.bf16.msra.mxu1 %v8070_v48  ;;  %7769 = vmatprep.subr.bf16.mxu0 %v8071_v53 }
 0x262   : > { %v7467_v40 = vpop.f32.mrb[0].mxu0  ;;  %7791 = vmatprep.subr.bf16.mxu1 %v8072_v55 }
 0x263   : > { %v7489_v42 = vpop.f32.mrb[0].mxu1  ;;  %v7468_v44 = vpop.f32.mrb[1].mxu0 }
 0x264   : > { %v7469_v46 = vadd.f32 %v7468_v44, %v7467_v40  ;;  %v7490_v47 = vpop.f32.mrb[1].mxu1  ;;  %v7470_v51 = vpop.f32.mrb[2].mxu0  ;;  %7770 = vmatpush3.bf16.msra.mxu0 %v8073_v58 }
 0x265   : > { %v7491_v50 = vadd.f32 %v7490_v47, %v7489_v42  ;;  %v7492_v54 = vpop.f32.mrb[2].mxu1  ;;  %v7471_v56 = vpop.f32.mrb[3].mxu0  ;;  %7792 = vmatpush3.bf16.msra.mxu1 %v8074_v60  ;;  %7771 = vmatprep.subr.bf16.mxu0 %v8075_v61 }
 0x266   : > { %v6501_v52 = vadd.f32 %v7469_v46, %v7192_v49  ;;  %v7493_v59 = vpop.f32.mrb[3].mxu1  ;;  %7793 = vmatprep.subr.bf16.mxu1 %v8076_v62 }
 0x268   : > { %v6541_v57 = vadd.f32 %v7491_v50, %v6501_v52  ;;  %7772 = vmatpush3.bf16.msra.mxu0 %v8077_v63 }
 0x269   : > { %7794 = vmatpush3.bf16.msra.mxu1 %v8078_v0  ;;  %7773 = vmatprep.subr.bf16.mxu0 %v8079_v1 }
 0x26a   : > { %7795 = vmatprep.subr.bf16.mxu1 %v8080_v2 }
 0x26c   : > { %7774 = vmatpush3.bf16.msra.mxu0 %v8081_v3 }
 0x26d   : > { %7796 = vmatpush3.bf16.msra.mxu1 %v8082_v4 }
 0x26f   : > { %7059 = vmatmul.mubr.bf16.vlgmr.msra.gmra.mrb[28].mxu0 %v4407_v11 }
 0x270   : > { %7099 = vmatmul.mubr.bf16.vlgmr.msra.gmra.mrb[28].mxu1 %v4409_v12 }
 0x282   : > { %v7511_v13 = vpop.f32.mrb[4].mxu0 }
 0x283   : > { %v7533_v14 = vpop.f32.mrb[4].mxu1  ;;  %v7512_v15 = vpop.f32.mrb[5].mxu0 }
 0x284   : > { %v7513_v16 = vadd.f32 %v7512_v15, %v7511_v13  ;;  %v7534_v17 = vpop.f32.mrb[5].mxu1  ;;  %v7514_v18 = vpop.f32.mrb[6].mxu0 }
 0x285   : > { %v7535_v19 = vadd.f32 %v7534_v17, %v7533_v14  ;;  %v7536_v20 = vpop.f32.mrb[6].mxu1  ;;  %v7515_v21 = vpop.f32.mrb[7].mxu0 }
 0x286   : > { %v6581_v22 = vadd.f32 %v7513_v16, %v6541_v57  ;;  %v7537_v23 = vpop.f32.mrb[7].mxu1 }
 0x288   : > { %v6621_v24 = vadd.f32 %v7535_v19, %v6581_v22 }
 0x2a2   : > { %v7555_v25 = vpop.f32.mrb[8].mxu0 }
 0x2a3   : > { %v7577_v26 = vpop.f32.mrb[8].mxu1  ;;  %v7556_v27 = vpop.f32.mrb[9].mxu0 }
 0x2a4   : > { %v7557_v28 = vadd.f32 %v7556_v27, %v7555_v25  ;;  %v7578_v29 = vpop.f32.mrb[9].mxu1  ;;  %v7558_v30 = vpop.f32.mrb[10].mxu0 }
 0x2a5   : > { %v7579_v31 = vadd.f32 %v7578_v29, %v7577_v26  ;;  %v7580_v32 = vpop.f32.mrb[10].mxu1  ;;  %v7559_v33 = vpop.f32.mrb[11].mxu0 }
 0x2a6   : > { %v6661_v34 = vadd.f32 %v7557_v28, %v6621_v24  ;;  %v7581_v35 = vpop.f32.mrb[11].mxu1 }
 0x2a8   : > { %v6701_v36 = vadd.f32 %v7579_v31, %v6661_v34 }
 0x2c2   : > { %v7599_v37 = vpop.f32.mrb[12].mxu0 }
 0x2c3   : > { %v7621_v38 = vpop.f32.mrb[12].mxu1  ;;  %v7600_v39 = vpop.f32.mrb[13].mxu0 }
 0x2c4   : > { %v7622_v40 = vpop.f32.mrb[13].mxu1  ;;  %v7601_v41 = vadd.f32 %v7600_v39, %v7599_v37  ;;  %v7602_v43 = vpop.f32.mrb[14].mxu0 }
 0x2c5   : > { %v7623_v42 = vadd.f32 %v7622_v40, %v7621_v38  ;;  %v7624_v44 = vpop.f32.mrb[14].mxu1  ;;  %v7603_v45 = vpop.f32.mrb[15].mxu0 }
 0x2c6   : > { %v7625_v46 = vpop.f32.mrb[15].mxu1  ;;  %v6741_v47 = vadd.f32 %v7601_v41, %v6701_v36 }
 0x2c8   : > { %v6781_v48 = vadd.f32 %v7623_v42, %v6741_v47 }
 0x2e2   : > { %v7643_v49 = vpop.f32.mrb[16].mxu0 }
 0x2e3   : > { %v7665_v50 = vpop.f32.mrb[16].mxu1  ;;  %v7644_v51 = vpop.f32.mrb[17].mxu0 }
 0x2e4   : > { %v7645_v52 = vadd.f32 %v7644_v51, %v7643_v49  ;;  %v7666_v53 = vpop.f32.mrb[17].mxu1  ;;  %v7646_v54 = vpop.f32.mrb[18].mxu0 }
 0x2e5   : > { %v7667_v55 = vadd.f32 %v7666_v53, %v7665_v50  ;;  %v7668_v56 = vpop.f32.mrb[18].mxu1  ;;  %v7647_v57 = vpop.f32.mrb[19].mxu0 }
 0x2e6   : > { %v6821_v58 = vadd.f32 %v7645_v52, %v6781_v48  ;;  %v7669_v59 = vpop.f32.mrb[19].mxu1 }
 0x2e8   : > { %v6861_v60 = vadd.f32 %v7667_v55, %v6821_v58 }
 0x302   : > { %v7687_v61 = vpop.f32.mrb[20].mxu0 }
 0x303   : > { %v7709_v62 = vpop.f32.mrb[20].mxu1  ;;  %v7688_v63 = vpop.f32.mrb[21].mxu0 }
 0x304   : > { %v7689_v0 = vadd.f32 %v7688_v63, %v7687_v61  ;;  %v7710_v1 = vpop.f32.mrb[21].mxu1  ;;  %v7690_v2 = vpop.f32.mrb[22].mxu0 }
 0x305   : > { %v7711_v3 = vadd.f32 %v7710_v1, %v7709_v62  ;;  %v7712_v4 = vpop.f32.mrb[22].mxu1  ;;  %v7691_v5 = vpop.f32.mrb[23].mxu0 }
 0x306   : > { %v6901_v6 = vadd.f32 %v7689_v0, %v6861_v60  ;;  %v7713_v7 = vpop.f32.mrb[23].mxu1 }
 0x308   : > { %v6941_v8 = vadd.f32 %v7711_v3, %v6901_v6 }
 0x322   : > { %v7731_v9 = vpop.f32.mrb[24].mxu0 }
 0x323   : > { %v7753_v10 = vpop.f32.mrb[24].mxu1  ;;  %v7732_v11 = vpop.f32.mrb[25].mxu0 }
 0x324   : > { %v7754_v12 = vpop.f32.mrb[25].mxu1  ;;  %v7733_v13 = vadd.f32 %v7732_v11, %v7731_v9  ;;  %v7734_v15 = vpop.f32.mrb[26].mxu0 }
 0x325   : > { %v7755_v14 = vadd.f32 %v7754_v12, %v7753_v10  ;;  %v7756_v16 = vpop.f32.mrb[26].mxu1  ;;  %v7735_v17 = vpop.f32.mrb[27].mxu0 }
 0x326   : > { %v7757_v18 = vpop.f32.mrb[27].mxu1  ;;  %v6981_v19 = vadd.f32 %v7733_v13, %v6941_v8 }
 0x328   : > { %v7021_v20 = vadd.f32 %v7755_v14, %v6981_v19 }
 0x342   : > { %v7775_v21 = vpop.f32.mrb[28].mxu0 }
 0x343   : > { %v7797_v22 = vpop.f32.mrb[28].mxu1  ;;  %v7776_v23 = vpop.f32.mrb[29].mxu0 }
 0x344   : > { %v7777_v24 = vadd.f32 %v7776_v23, %v7775_v21  ;;  %v7798_v25 = vpop.f32.mrb[29].mxu1  ;;  %v7778_v26 = vpop.f32.mrb[30].mxu0 }
 0x345   : > { %v7799_v27 = vadd.f32 %v7798_v25, %v7797_v22  ;;  %v7800_v28 = vpop.f32.mrb[30].mxu1  ;;  %v7779_v29 = vpop.f32.mrb[31].mxu0 }
 0x346   : > { %v7061_v30 = vadd.f32 %v7777_v24, %v7021_v20  ;;  %v7801_v31 = vpop.f32.mrb[31].mxu1 }
 0x348   : > { %v7101_v32 = vadd.f32 %v7799_v27, %v7061_v30 }
 0x34a   : > { %7106 = vst [vmem:[%s4345_s8] sm:$0xff] %v7101_v32 }
 0x34b PF: > { %p10_p9 = scmp.ge.s32.totalorder %s8144_s16, 8   ;;  %s9574_s12 = smov %s8101_s13 }
 0x34c   : > { %s9575_s13 = smov %s8153_s19  ;;  %s9576_s14 = smov %s8144_s16 }
 0x34d   :  { %12 = sbr.rel (!%p10_p9) target bundleno = 2 (0x2), region = 126 }

</bundles_post_ra>
